<compile_context>
chip_gen: v7x
topology: tpu7x:2x2x1
jax: 0.10.0
libtpu: 0.0.40
codegen_flags: <defaults>
</compile_context>

<pallas_src>
import functools

import jax
import jax.numpy as jnp
import numpy as np
from jax import lax
from jax.experimental import pallas as pl
from jax.experimental.pallas import tpu as pltpu


# ----------------------------------------------------------------------------
# Fused LeNet kernel (one grid step = TB samples; everything stays in VMEM)
# ----------------------------------------------------------------------------
def _lenet_fused_kernel(
    x_ref,                     # (TB, 28, 28) f32   input images
    w1_ref, b1_ref,            # (140, 144) bf16 , (1, 144) f32   conv1 Toeplitz
    ae1_ref, ao1_ref,          # (144, 72) bf16   pool1 even/odd column select
    w2_ref, b2_ref,            # (360, 128) bf16 , (1, 128) f32   conv2 Toeplitz
    ae2_ref, ao2_ref,          # (128, 64) bf16   pool2 even/odd column select
    wf1_ref, bf1_ref,          # (256, 120) bf16 , (1, 120) f32
    wf2_ref, bf2_ref,          # (120, 84)  bf16 , (1, 84)  f32
    wf3_ref, bf3_ref,          # (84, 128)  bf16 , (1, 128) f32   (lane-padded)
    out_ref,                   # (TB, 128) f32    lane-dense logits
    y1p_ref,                   # scratch (TB, 24, 72) f32  conv1 act, j-pooled
    y2p_ref,                   # scratch (TB*8, 64) f32    conv2 act, j-pooled
    *, tb: int,
):
    f32, bf16 = jnp.float32, jnp.bfloat16

    # ---- conv1 + ReLU: one K=140 Toeplitz matmul ---------------------------
    # xs[b*24+i, ki*28+c] = x[b, i+ki, c]
    xs = jnp.concatenate([x_ref[:, ki:ki + 24, :] for ki in range(5)], axis=2)
    xs = xs.reshape(tb * 24, 5 * 28).astype(bf16)          # 24 rows/sample (8-aligned)
    y1 = jnp.dot(xs, w1_ref[...], preferred_element_type=f32) + b1_ref[...]
    y1 = jnp.maximum(y1, 0.0).astype(bf16)                 # (tb*24, 144), col=j*6+o

    # ---- pool1, j-direction only (exact 0/1 bf16 selectors) ----------------
    ycp = jnp.maximum(
        jnp.dot(y1, ae1_ref[...], preferred_element_type=f32),
        jnp.dot(y1, ao1_ref[...], preferred_element_type=f32))  # (tb*24, 72)
    y1p_ref[...] = ycp.reshape(tb, 24, 72)                 # aligned split (24 = 3*8)

    # ---- conv2 + ReLU: i-direction pooling fused into window extraction ----
    # p1[b, ip, :] = max(y1p[b, 2*ip, :], y1p[b, 2*ip+1, :]); window ki needs
    # pooled rows ki..ki+7 -> strided sublane loads, then one K=360 matmul.
    wins = []
    for ki in range(5):
        ev = y1p_ref[:, pl.ds(2 * ki, 8, stride=2), :]       # rows 2*(ki+i2)
        od = y1p_ref[:, pl.ds(2 * ki + 1, 8, stride=2), :]   # rows 2*(ki+i2)+1
        wins.append(jnp.maximum(ev, od).reshape(tb * 8, 72))  # 8 rows/sample
    xs2 = jnp.concatenate(wins, axis=1).astype(bf16)          # (tb*8, 360)
    y2 = jnp.dot(xs2, w2_ref[...], preferred_element_type=f32) + b2_ref[...]
    y2 = jnp.maximum(y2, 0.0).astype(bf16)                    # (tb*8, 128), col=j2*16+o

    # ---- pool2, j-direction -------------------------------------------------
    y2cp = jnp.maximum(
        jnp.dot(y2, ae2_ref[...], preferred_element_type=f32),
        jnp.dot(y2, ao2_ref[...], preferred_element_type=f32))  # (tb*8, 64)
    y2p_ref[...] = y2cp

    # ---- pool2 i-direction + NCHW flatten folded into fc1 ------------------
    # piece[ip][b, :] = max over the conv2 row pair (2ip, 2ip+1) of sample b.
    pieces = []
    for ip in range(4):
        ev = y2p_ref[pl.ds(2 * ip, tb, stride=8), :]          # rows b*8 + 2*ip
        od = y2p_ref[pl.ds(2 * ip + 1, tb, stride=8), :]
        pieces.append(jnp.maximum(ev, od))                    # (tb, 64)
    xfc = jnp.concatenate(pieces, axis=1).astype(bf16)        # (tb, 256)

    # ---- fc1 -> fc2 -> fc3 (fc3 lane-padded to 128 for an unmasked store) --
    h1 = jnp.dot(xfc, wf1_ref[...], preferred_element_type=f32) + bf1_ref[...]
    h1 = jnp.maximum(h1, 0.0).astype(bf16)
    h2 = jnp.dot(h1, wf2_ref[...], preferred_element_type=f32) + bf2_ref[...]
    h2 = jnp.maximum(h2, 0.0).astype(bf16)
    out = jnp.dot(h2, wf3_ref[...], preferred_element_type=f32) + bf3_ref[...]
    out_ref[...] = out                                        # full (tb, 128) store


# ----------------------------------------------------------------------------
# Host-side, one-time weight preprocessing (independent of the batch tile)
# ----------------------------------------------------------------------------
def prepare_lenet_operands(params):
    f32 = np.float32
    w1 = np.asarray(params["w1"], f32)    # (6, 1, 5, 5)   OIHW
    b1 = np.asarray(params["b1"], f32)
    w2 = np.asarray(params["w2"], f32)    # (16, 6, 5, 5)
    b2 = np.asarray(params["b2"], f32)
    wf1 = np.asarray(params["wf1"], f32)  # (256, 120)     (in, out)
    bf1 = np.asarray(params["bf1"], f32)
    wf2 = np.asarray(params["wf2"], f32)
    bf2 = np.asarray(params["bf2"], f32)
    wf3 = np.asarray(params["wf3"], f32)
    bf3 = np.asarray(params["bf3"], f32)

    # conv1 fused Toeplitz: W1[ki*28 + c, j*6 + o] = w1[o, 0, ki, c - j]
    W1 = np.zeros((5 * 28, 24 * 6), f32)
    for ki in range(5):
        for j in range(24):
            for kj in range(5):
                W1[ki * 28 + j + kj, j * 6:(j + 1) * 6] = w1[:, 0, ki, kj]
    b1t = np.tile(b1, 24)[None, :]                           # (1, 144)

    # pool1 even/odd column selectors (cols j*6+o -> jp*6+o)
    AE1 = np.zeros((144, 72), f32)
    AO1 = np.zeros((144, 72), f32)
    for jp in range(12):
        for o in range(6):
            AE1[(2 * jp) * 6 + o, jp * 6 + o] = 1.0
            AO1[(2 * jp + 1) * 6 + o, jp * 6 + o] = 1.0

    # conv2 fused Toeplitz: W2[ki*72 + jp*6 + cin, j2*16 + o] = w2[o,cin,ki,jp-j2]
    W2 = np.zeros((5 * 72, 8 * 16), f32)
    for ki in range(5):
        for j2 in range(8):
            for kj in range(5):
                jp = j2 + kj
                W2[ki * 72 + jp * 6: ki * 72 + jp * 6 + 6,
                   j2 * 16:(j2 + 1) * 16] = w2[:, :, ki, kj].T
    b2t = np.tile(b2, 8)[None, :]                            # (1, 128)

    # pool2 even/odd column selectors (cols j2*16+o -> jp2*16+o)
    AE2 = np.zeros((128, 64), f32)
    AO2 = np.zeros((128, 64), f32)
    for jp in range(4):
        for o in range(16):
            AE2[(2 * jp) * 16 + o, jp * 16 + o] = 1.0
            AO2[(2 * jp + 1) * 16 + o, jp * 16 + o] = 1.0

    # fc1: fold torch's NCHW flatten (flat = o*16 + ip*4 + jp) into the weight;
    # kernel's fc1 input column order is ip*64 + jp*16 + o.
    Wf1 = wf1.reshape(16, 4, 4, 120).transpose(1, 2, 0, 3).reshape(256, 120)

    # fc3 lane-padded to 128 output columns (lane-dense store; host slices :10)
    Wf3 = np.zeros((84, 128), f32)
    Wf3[:, :10] = wf3
    bf3p = np.zeros((1, 128), f32)
    bf3p[0, :10] = bf3

    bf16 = jnp.bfloat16
    return (
        jnp.asarray(W1, bf16), jnp.asarray(b1t),
        jnp.asarray(AE1, bf16), jnp.asarray(AO1, bf16),
        jnp.asarray(W2, bf16), jnp.asarray(b2t),
        jnp.asarray(AE2, bf16), jnp.asarray(AO2, bf16),
        jnp.asarray(Wf1, bf16), jnp.asarray(bf1[None, :]),
        jnp.asarray(wf2, bf16), jnp.asarray(bf2[None, :]),
        jnp.asarray(Wf3, bf16), jnp.asarray(bf3p),
    )


# ----------------------------------------------------------------------------
# Public forward: one pallas_call, grid over the batch
# ----------------------------------------------------------------------------
def lenet_forward_pallas(x_nchw, ops, *, tb=32):
    N = x_nchw.shape[0]
    assert x_nchw.shape[1:] == (1, 28, 28), x_nchw.shape
    assert tb % 8 == 0, "batch tile must be a multiple of 8 (sublane tiling)"
    x = x_nchw.reshape(N, 28, 28).astype(jnp.float32)

    n_pad = (-N) % tb
    if n_pad:
        x = jnp.pad(x, ((0, n_pad), (0, 0), (0, 0)))
    n_total = N + n_pad

    def const_spec(a):  # weights: constant block across the grid
        zero = (0,) * a.ndim
        return pl.BlockSpec(a.shape, lambda b, _z=zero: _z)

    in_specs = [pl.BlockSpec((tb, 28, 28), lambda b: (b, 0, 0))]
    in_specs += [const_spec(a) for a in ops]

    out = pl.pallas_call(
        functools.partial(_lenet_fused_kernel, tb=tb),
        out_shape=jax.ShapeDtypeStruct((n_total, 128), jnp.float32),
        grid=(n_total // tb,),
        in_specs=in_specs,
        out_specs=pl.BlockSpec((tb, 128), lambda b: (b, 0)),
        scratch_shapes=[
            pltpu.VMEM((tb, 24, 72), jnp.float32),   # conv1 act (j-pooled)
            pltpu.VMEM((tb * 8, 64), jnp.float32),   # conv2 act (j-pooled)
        ],
        compiler_params=pltpu.CompilerParams(
            dimension_semantics=("parallel",)),      # dual-TC split on v7x
    )(x, *ops)
    return out[:N, :10]


# ----------------------------------------------------------------------------
# Pure-JAX reference (independent check of semantics)
# ----------------------------------------------------------------------------
def lenet_forward_ref(x, params):
    def conv(x, w, b):
        y = lax.conv_general_dilated(
            x, w, window_strides=(1, 1), padding="VALID",
            dimension_numbers=("NCHW", "OIHW", "NCHW"))
        return y + b[None, :, None, None]

    def pool(x):
        return lax.reduce_window(x, -jnp.inf, lax.max,
                                 (1, 1, 2, 2), (1, 1, 2, 2), "VALID")

    x = pool(jnp.maximum(conv(x, params["w1"], params["b1"]), 0.0))
    x = pool(jnp.maximum(conv(x, params["w2"], params["b2"]), 0.0))
    x = x.reshape(x.shape[0], 16 * 4 * 4)
    x = jnp.maximum(x @ params["wf1"] + params["bf1"], 0.0)
    x = jnp.maximum(x @ params["wf2"] + params["bf2"], 0.0)
    return x @ params["wf3"] + params["bf3"]


# ----------------------------------------------------------------------------
# Deterministic parameter init (PyTorch-like uniform(-1/sqrt(fan_in), ...))
# ----------------------------------------------------------------------------
def init_params(key):
    def u(key, shape, fan_in):
        s = 1.0 / np.sqrt(fan_in)
        return jax.random.uniform(key, shape, jnp.float32, minval=-s, maxval=s)

    keys = jax.random.split(key, 10)
    return {
        "w1": u(keys[0], (6, 1, 5, 5), 1 * 5 * 5),
        "b1": u(keys[1], (6,), 1 * 5 * 5),
        "w2": u(keys[2], (16, 6, 5, 5), 6 * 5 * 5),
        "b2": u(keys[3], (16,), 6 * 5 * 5),
        "wf1": u(keys[4], (256, 120), 256),
        "bf1": u(keys[5], (120,), 256),
        "wf2": u(keys[6], (120, 84), 120),
        "bf2": u(keys[7], (84,), 120),
        "wf3": u(keys[8], (84, 10), 84),
        "bf3": u(keys[9], (10,), 84),
    }


if __name__ == "__main__":
    key = jax.random.PRNGKey(0)
    pkey, xkey = jax.random.split(key)
    params = init_params(pkey)
    ops = prepare_lenet_operands(params)

    TB = 32           # samples per grid step
    N = 72            # not a multiple of TB -> exercises padding; 3 grid steps
    x = jax.random.normal(xkey, (N, 1, 28, 28), dtype=jnp.float32)

    fwd = jax.jit(functools.partial(lenet_forward_pallas, tb=TB))
    out = jax.block_until_ready(fwd(x, ops))

    ref = jax.block_until_ready(jax.jit(lenet_forward_ref)(x, params))

    assert out.shape == (N, 10), out.shape
    # Tolerance accommodates bf16 MXU operands / bf16-rounded pooled
    # activations (f32 accumulation) vs the all-f32 reference.
    np.testing.assert_allclose(np.asarray(out), np.asarray(ref),
                               rtol=2e-2, atol=3e-2)
    print("KERNEL_OK")
</pallas_src>

<mosaic_0001>
module attributes {stable_mosaic.version = 11 : i64} {
  func.func @_lenet_fused_kernel(%arg0: i32, %arg1: memref<32x28x28xf32, #tpu.memory_space<vmem>>, %arg2: memref<140x144xbf16, #tpu.memory_space<vmem>>, %arg3: memref<1x144xf32, #tpu.memory_space<vmem>>, %arg4: memref<144x72xbf16, #tpu.memory_space<vmem>>, %arg5: memref<144x72xbf16, #tpu.memory_space<vmem>>, %arg6: memref<360x128xbf16, #tpu.memory_space<vmem>>, %arg7: memref<1x128xf32, #tpu.memory_space<vmem>>, %arg8: memref<128x64xbf16, #tpu.memory_space<vmem>>, %arg9: memref<128x64xbf16, #tpu.memory_space<vmem>>, %arg10: memref<256x120xbf16, #tpu.memory_space<vmem>>, %arg11: memref<1x120xf32, #tpu.memory_space<vmem>>, %arg12: memref<120x84xbf16, #tpu.memory_space<vmem>>, %arg13: memref<1x84xf32, #tpu.memory_space<vmem>>, %arg14: memref<84x128xbf16, #tpu.memory_space<vmem>>, %arg15: memref<1x128xf32, #tpu.memory_space<vmem>>, %arg16: memref<32x128xf32, #tpu.memory_space<vmem>>, %arg17: memref<32x24x72xf32, #tpu.memory_space<vmem>>, %arg18: memref<256x64xf32, #tpu.memory_space<vmem>>) attributes {dimension_semantics = [#tpu.dimension_semantics<parallel>], iteration_bounds = array<i64: 3>, scalar_prefetch = 0 : i64, scratch_operands = 2 : i64, tpu.core_type = #tpu.core_type<tc>, window_params = [{transform_indices = @transform_0, window_bounds = array<i64: 32, 28, 28>}, {pipeline_mode = #tpu.pipeline_mode<synchronous>, transform_indices = @transform_1, window_bounds = array<i64: 140, 144>}, {pipeline_mode = #tpu.pipeline_mode<synchronous>, transform_indices = @transform_2, window_bounds = array<i64: 1, 144>}, {pipeline_mode = #tpu.pipeline_mode<synchronous>, transform_indices = @transform_3, window_bounds = array<i64: 144, 72>}, {pipeline_mode = #tpu.pipeline_mode<synchronous>, transform_indices = @transform_4, window_bounds = array<i64: 144, 72>}, {pipeline_mode = #tpu.pipeline_mode<synchronous>, transform_indices = @transform_5, window_bounds = array<i64: 360, 128>}, {pipeline_mode = #tpu.pipeline_mode<synchronous>, transform_indices = @transform_6, window_bounds = array<i64: 1, 128>}, {pipeline_mode = #tpu.pipeline_mode<synchronous>, transform_indices = @transform_7, window_bounds = array<i64: 128, 64>}, {pipeline_mode = #tpu.pipeline_mode<synchronous>, transform_indices = @transform_8, window_bounds = array<i64: 128, 64>}, {pipeline_mode = #tpu.pipeline_mode<synchronous>, transform_indices = @transform_9, window_bounds = array<i64: 256, 120>}, {pipeline_mode = #tpu.pipeline_mode<synchronous>, transform_indices = @transform_10, window_bounds = array<i64: 1, 120>}, {pipeline_mode = #tpu.pipeline_mode<synchronous>, transform_indices = @transform_11, window_bounds = array<i64: 120, 84>}, {pipeline_mode = #tpu.pipeline_mode<synchronous>, transform_indices = @transform_12, window_bounds = array<i64: 1, 84>}, {pipeline_mode = #tpu.pipeline_mode<synchronous>, transform_indices = @transform_13, window_bounds = array<i64: 84, 128>}, {pipeline_mode = #tpu.pipeline_mode<synchronous>, transform_indices = @transform_14, window_bounds = array<i64: 1, 128>}, {transform_indices = @transform_15, window_bounds = array<i64: 32, 128>}]} {
    %c0 = arith.constant 0 : index
    %c0_0 = arith.constant 0 : index
    %c0_1 = arith.constant 0 : index
    %0 = vector.load %arg1[%c0, %c0_0, %c0_1] : memref<32x28x28xf32, #tpu.memory_space<vmem>>, vector<32x24x28xf32>
    %c0_2 = arith.constant 0 : index
    %c1 = arith.constant 1 : index
    %c0_3 = arith.constant 0 : index
    %1 = vector.load %arg1[%c0_2, %c1, %c0_3] : memref<32x28x28xf32, #tpu.memory_space<vmem>>, vector<32x24x28xf32>
    %c0_4 = arith.constant 0 : index
    %c2 = arith.constant 2 : index
    %c0_5 = arith.constant 0 : index
    %2 = vector.load %arg1[%c0_4, %c2, %c0_5] : memref<32x28x28xf32, #tpu.memory_space<vmem>>, vector<32x24x28xf32>
    %c0_6 = arith.constant 0 : index
    %c3 = arith.constant 3 : index
    %c0_7 = arith.constant 0 : index
    %3 = vector.load %arg1[%c0_6, %c3, %c0_7] : memref<32x28x28xf32, #tpu.memory_space<vmem>>, vector<32x24x28xf32>
    %c0_8 = arith.constant 0 : index
    %c4 = arith.constant 4 : index
    %c0_9 = arith.constant 0 : index
    %4 = vector.load %arg1[%c0_8, %c4, %c0_9] : memref<32x28x28xf32, #tpu.memory_space<vmem>>, vector<32x24x28xf32>
    %5 = tpu.concatenate %0, %1, %2, %3, %4 in 2 : vector<32x24x28xf32>, vector<32x24x28xf32>, vector<32x24x28xf32>, vector<32x24x28xf32>, vector<32x24x28xf32> -> vector<32x24x140xf32>
    %6 = vector.shape_cast %5 : vector<32x24x140xf32> to vector<768x140xf32>
    %7 = arith.truncf %6 : vector<768x140xf32> to vector<768x140xbf16>
    %c0_10 = arith.constant 0 : index
    %c0_11 = arith.constant 0 : index
    %8 = vector.load %arg2[%c0_10, %c0_11] : memref<140x144xbf16, #tpu.memory_space<vmem>>, vector<140x144xbf16>
    %cst = arith.constant dense<0.000000e+00> : vector<768x144xf32>
    %9 = tpu.matmul %7, %8, %cst {dimension_numbers = #tpu.dot_dimension_numbers<[1], [0], [0], [1], [0, 0, 1, 1], [], []>} : vector<768x140xbf16>, vector<140x144xbf16>, vector<768x144xf32> -> vector<768x144xf32>
    %c0_12 = arith.constant 0 : index
    %c0_13 = arith.constant 0 : index
    %10 = vector.load %arg3[%c0_12, %c0_13] : memref<1x144xf32, #tpu.memory_space<vmem>>, vector<1x144xf32>
    %11 = vector.broadcast %10 : vector<1x144xf32> to vector<768x144xf32>
    %12 = arith.addf %9, %11 : vector<768x144xf32>
    %cst_14 = arith.constant 0.000000e+00 : f32
    %13 = vector.broadcast %cst_14 : f32 to vector<768x144xf32>
    %14 = arith.maximumf %12, %13 : vector<768x144xf32>
    %15 = arith.truncf %14 : vector<768x144xf32> to vector<768x144xbf16>
    %c0_15 = arith.constant 0 : index
    %c0_16 = arith.constant 0 : index
    %16 = vector.load %arg4[%c0_15, %c0_16] : memref<144x72xbf16, #tpu.memory_space<vmem>>, vector<144x72xbf16>
    %cst_17 = arith.constant dense<0.000000e+00> : vector<768x72xf32>
    %17 = tpu.matmul %15, %16, %cst_17 {dimension_numbers = #tpu.dot_dimension_numbers<[1], [0], [0], [1], [0, 0, 1, 1], [], []>} : vector<768x144xbf16>, vector<144x72xbf16>, vector<768x72xf32> -> vector<768x72xf32>
    %c0_18 = arith.constant 0 : index
    %c0_19 = arith.constant 0 : index
    %18 = vector.load %arg5[%c0_18, %c0_19] : memref<144x72xbf16, #tpu.memory_space<vmem>>, vector<144x72xbf16>
    %cst_20 = arith.constant dense<0.000000e+00> : vector<768x72xf32>
    %19 = tpu.matmul %15, %18, %cst_20 {dimension_numbers = #tpu.dot_dimension_numbers<[1], [0], [0], [1], [0, 0, 1, 1], [], []>} : vector<768x144xbf16>, vector<144x72xbf16>, vector<768x72xf32> -> vector<768x72xf32>
    %20 = arith.maximumf %17, %19 : vector<768x72xf32>
    %21 = vector.shape_cast %20 : vector<768x72xf32> to vector<32x24x72xf32>
    %c0_21 = arith.constant 0 : index
    %c0_22 = arith.constant 0 : index
    %c0_23 = arith.constant 0 : index
    %22 = vector.load %arg17[%c0_21, %c0_22, %c0_23] : memref<32x24x72xf32, #tpu.memory_space<vmem>>, vector<32x24x72xf32>
    tpu.vector_store %arg17[%c0_21, %c0_22, %c0_23], %21 {strides = array<i32>} : memref<32x24x72xf32, #tpu.memory_space<vmem>>, vector<32x24x72xf32>,
    %c0_24 = arith.constant 0 : index
    %c0_25 = arith.constant 0 : index
    %c0_26 = arith.constant 0 : index
    %23 = tpu.strided_load %arg17[%c0_24, %c0_25, %c0_26] {strides = array<i32: 1, 2, 1>} : memref<32x24x72xf32, #tpu.memory_space<vmem>>, vector<32x8x72xf32>
    %c0_27 = arith.constant 0 : index
    %c1_28 = arith.constant 1 : index
    %c0_29 = arith.constant 0 : index
    %24 = tpu.strided_load %arg17[%c0_27, %c1_28, %c0_29] {strides = array<i32: 1, 2, 1>} : memref<32x24x72xf32, #tpu.memory_space<vmem>>, vector<32x8x72xf32>
    %25 = arith.maximumf %23, %24 : vector<32x8x72xf32>
    %26 = vector.shape_cast %25 : vector<32x8x72xf32> to vector<256x72xf32>
    %c0_30 = arith.constant 0 : index
    %c2_31 = arith.constant 2 : index
    %c0_32 = arith.constant 0 : index
    %27 = tpu.strided_load %arg17[%c0_30, %c2_31, %c0_32] {strides = array<i32: 1, 2, 1>} : memref<32x24x72xf32, #tpu.memory_space<vmem>>, vector<32x8x72xf32>
    %c0_33 = arith.constant 0 : index
    %c3_34 = arith.constant 3 : index
    %c0_35 = arith.constant 0 : index
    %28 = tpu.strided_load %arg17[%c0_33, %c3_34, %c0_35] {strides = array<i32: 1, 2, 1>} : memref<32x24x72xf32, #tpu.memory_space<vmem>>, vector<32x8x72xf32>
    %29 = arith.maximumf %27, %28 : vector<32x8x72xf32>
    %30 = vector.shape_cast %29 : vector<32x8x72xf32> to vector<256x72xf32>
    %c0_36 = arith.constant 0 : index
    %c4_37 = arith.constant 4 : index
    %c0_38 = arith.constant 0 : index
    %31 = tpu.strided_load %arg17[%c0_36, %c4_37, %c0_38] {strides = array<i32: 1, 2, 1>} : memref<32x24x72xf32, #tpu.memory_space<vmem>>, vector<32x8x72xf32>
    %c0_39 = arith.constant 0 : index
    %c5 = arith.constant 5 : index
    %c0_40 = arith.constant 0 : index
    %32 = tpu.strided_load %arg17[%c0_39, %c5, %c0_40] {strides = array<i32: 1, 2, 1>} : memref<32x24x72xf32, #tpu.memory_space<vmem>>, vector<32x8x72xf32>
    %33 = arith.maximumf %31, %32 : vector<32x8x72xf32>
    %34 = vector.shape_cast %33 : vector<32x8x72xf32> to vector<256x72xf32>
    %c0_41 = arith.constant 0 : index
    %c6 = arith.constant 6 : index
    %c0_42 = arith.constant 0 : index
    %35 = tpu.strided_load %arg17[%c0_41, %c6, %c0_42] {strides = array<i32: 1, 2, 1>} : memref<32x24x72xf32, #tpu.memory_space<vmem>>, vector<32x8x72xf32>
    %c0_43 = arith.constant 0 : index
    %c7 = arith.constant 7 : index
    %c0_44 = arith.constant 0 : index
    %36 = tpu.strided_load %arg17[%c0_43, %c7, %c0_44] {strides = array<i32: 1, 2, 1>} : memref<32x24x72xf32, #tpu.memory_space<vmem>>, vector<32x8x72xf32>
    %37 = arith.maximumf %35, %36 : vector<32x8x72xf32>
    %38 = vector.shape_cast %37 : vector<32x8x72xf32> to vector<256x72xf32>
    %c0_45 = arith.constant 0 : index
    %c8 = arith.constant 8 : index
    %c0_46 = arith.constant 0 : index
    %39 = tpu.strided_load %arg17[%c0_45, %c8, %c0_46] {strides = array<i32: 1, 2, 1>} : memref<32x24x72xf32, #tpu.memory_space<vmem>>, vector<32x8x72xf32>
    %c0_47 = arith.constant 0 : index
    %c9 = arith.constant 9 : index
    %c0_48 = arith.constant 0 : index
    %40 = tpu.strided_load %arg17[%c0_47, %c9, %c0_48] {strides = array<i32: 1, 2, 1>} : memref<32x24x72xf32, #tpu.memory_space<vmem>>, vector<32x8x72xf32>
    %41 = arith.maximumf %39, %40 : vector<32x8x72xf32>
    %42 = vector.shape_cast %41 : vector<32x8x72xf32> to vector<256x72xf32>
    %43 = tpu.concatenate %26, %30, %34, %38, %42 in 1 : vector<256x72xf32>, vector<256x72xf32>, vector<256x72xf32>, vector<256x72xf32>, vector<256x72xf32> -> vector<256x360xf32>
    %44 = arith.truncf %43 : vector<256x360xf32> to vector<256x360xbf16>
    %c0_49 = arith.constant 0 : index
    %c0_50 = arith.constant 0 : index
    %45 = vector.load %arg6[%c0_49, %c0_50] : memref<360x128xbf16, #tpu.memory_space<vmem>>, vector<360x128xbf16>
    %cst_51 = arith.constant dense<0.000000e+00> : vector<256x128xf32>
    %46 = tpu.matmul %44, %45, %cst_51 {dimension_numbers = #tpu.dot_dimension_numbers<[1], [0], [0], [1], [0, 0, 1, 1], [], []>} : vector<256x360xbf16>, vector<360x128xbf16>, vector<256x128xf32> -> vector<256x128xf32>
    %c0_52 = arith.constant 0 : index
    %c0_53 = arith.constant 0 : index
    %47 = vector.load %arg7[%c0_52, %c0_53] : memref<1x128xf32, #tpu.memory_space<vmem>>, vector<1x128xf32>
    %48 = vector.broadcast %47 : vector<1x128xf32> to vector<256x128xf32>
    %49 = arith.addf %46, %48 : vector<256x128xf32>
    %cst_54 = arith.constant 0.000000e+00 : f32
    %50 = vector.broadcast %cst_54 : f32 to vector<256x128xf32>
    %51 = arith.maximumf %49, %50 : vector<256x128xf32>
    %52 = arith.truncf %51 : vector<256x128xf32> to vector<256x128xbf16>
    %c0_55 = arith.constant 0 : index
    %c0_56 = arith.constant 0 : index
    %53 = vector.load %arg8[%c0_55, %c0_56] : memref<128x64xbf16, #tpu.memory_space<vmem>>, vector<128x64xbf16>
    %cst_57 = arith.constant dense<0.000000e+00> : vector<256x64xf32>
    %54 = tpu.matmul %52, %53, %cst_57 {dimension_numbers = #tpu.dot_dimension_numbers<[1], [0], [0], [1], [0, 0, 1, 1], [], []>} : vector<256x128xbf16>, vector<128x64xbf16>, vector<256x64xf32> -> vector<256x64xf32>
    %c0_58 = arith.constant 0 : index
    %c0_59 = arith.constant 0 : index
    %55 = vector.load %arg9[%c0_58, %c0_59] : memref<128x64xbf16, #tpu.memory_space<vmem>>, vector<128x64xbf16>
    %cst_60 = arith.constant dense<0.000000e+00> : vector<256x64xf32>
    %56 = tpu.matmul %52, %55, %cst_60 {dimension_numbers = #tpu.dot_dimension_numbers<[1], [0], [0], [1], [0, 0, 1, 1], [], []>} : vector<256x128xbf16>, vector<128x64xbf16>, vector<256x64xf32> -> vector<256x64xf32>
    %57 = arith.maximumf %54, %56 : vector<256x64xf32>
    %c0_61 = arith.constant 0 : index
    %c0_62 = arith.constant 0 : index
    %58 = vector.load %arg18[%c0_61, %c0_62] : memref<256x64xf32, #tpu.memory_space<vmem>>, vector<256x64xf32>
    tpu.vector_store %arg18[%c0_61, %c0_62], %57 {strides = array<i32>} : memref<256x64xf32, #tpu.memory_space<vmem>>, vector<256x64xf32>,
    %c0_63 = arith.constant 0 : index
    %c0_64 = arith.constant 0 : index
    %59 = tpu.strided_load %arg18[%c0_63, %c0_64] {strides = array<i32: 8, 1>} : memref<256x64xf32, #tpu.memory_space<vmem>>, vector<32x64xf32>
    %c1_65 = arith.constant 1 : index
    %c0_66 = arith.constant 0 : index
    %60 = tpu.strided_load %arg18[%c1_65, %c0_66] {strides = array<i32: 8, 1>} : memref<256x64xf32, #tpu.memory_space<vmem>>, vector<32x64xf32>
    %61 = arith.maximumf %59, %60 : vector<32x64xf32>
    %c2_67 = arith.constant 2 : index
    %c0_68 = arith.constant 0 : index
    %62 = tpu.strided_load %arg18[%c2_67, %c0_68] {strides = array<i32: 8, 1>} : memref<256x64xf32, #tpu.memory_space<vmem>>, vector<32x64xf32>
    %c3_69 = arith.constant 3 : index
    %c0_70 = arith.constant 0 : index
    %63 = tpu.strided_load %arg18[%c3_69, %c0_70] {strides = array<i32: 8, 1>} : memref<256x64xf32, #tpu.memory_space<vmem>>, vector<32x64xf32>
    %64 = arith.maximumf %62, %63 : vector<32x64xf32>
    %c4_71 = arith.constant 4 : index
    %c0_72 = arith.constant 0 : index
    %65 = tpu.strided_load %arg18[%c4_71, %c0_72] {strides = array<i32: 8, 1>} : memref<256x64xf32, #tpu.memory_space<vmem>>, vector<32x64xf32>
    %c5_73 = arith.constant 5 : index
    %c0_74 = arith.constant 0 : index
    %66 = tpu.strided_load %arg18[%c5_73, %c0_74] {strides = array<i32: 8, 1>} : memref<256x64xf32, #tpu.memory_space<vmem>>, vector<32x64xf32>
    %67 = arith.maximumf %65, %66 : vector<32x64xf32>
    %c6_75 = arith.constant 6 : index
    %c0_76 = arith.constant 0 : index
    %68 = tpu.strided_load %arg18[%c6_75, %c0_76] {strides = array<i32: 8, 1>} : memref<256x64xf32, #tpu.memory_space<vmem>>, vector<32x64xf32>
    %c7_77 = arith.constant 7 : index
    %c0_78 = arith.constant 0 : index
    %69 = tpu.strided_load %arg18[%c7_77, %c0_78] {strides = array<i32: 8, 1>} : memref<256x64xf32, #tpu.memory_space<vmem>>, vector<32x64xf32>
    %70 = arith.maximumf %68, %69 : vector<32x64xf32>
    %71 = tpu.concatenate %61, %64, %67, %70 in 1 : vector<32x64xf32>, vector<32x64xf32>, vector<32x64xf32>, vector<32x64xf32> -> vector<32x256xf32>
    %72 = arith.truncf %71 : vector<32x256xf32> to vector<32x256xbf16>
    %c0_79 = arith.constant 0 : index
    %c0_80 = arith.constant 0 : index
    %73 = vector.load %arg10[%c0_79, %c0_80] : memref<256x120xbf16, #tpu.memory_space<vmem>>, vector<256x120xbf16>
    %cst_81 = arith.constant dense<0.000000e+00> : vector<32x120xf32>
    %74 = tpu.matmul %72, %73, %cst_81 {dimension_numbers = #tpu.dot_dimension_numbers<[1], [0], [0], [1], [0, 0, 1, 1], [], []>} : vector<32x256xbf16>, vector<256x120xbf16>, vector<32x120xf32> -> vector<32x120xf32>
    %c0_82 = arith.constant 0 : index
    %c0_83 = arith.constant 0 : index
    %75 = vector.load %arg11[%c0_82, %c0_83] : memref<1x120xf32, #tpu.memory_space<vmem>>, vector<1x120xf32>
    %76 = vector.broadcast %75 : vector<1x120xf32> to vector<32x120xf32>
    %77 = arith.addf %74, %76 : vector<32x120xf32>
    %cst_84 = arith.constant 0.000000e+00 : f32
    %78 = vector.broadcast %cst_84 : f32 to vector<32x120xf32>
    %79 = arith.maximumf %77, %78 : vector<32x120xf32>
    %80 = arith.truncf %79 : vector<32x120xf32> to vector<32x120xbf16>
    %c0_85 = arith.constant 0 : index
    %c0_86 = arith.constant 0 : index
    %81 = vector.load %arg12[%c0_85, %c0_86] : memref<120x84xbf16, #tpu.memory_space<vmem>>, vector<120x84xbf16>
    %cst_87 = arith.constant dense<0.000000e+00> : vector<32x84xf32>
    %82 = tpu.matmul %80, %81, %cst_87 {dimension_numbers = #tpu.dot_dimension_numbers<[1], [0], [0], [1], [0, 0, 1, 1], [], []>} : vector<32x120xbf16>, vector<120x84xbf16>, vector<32x84xf32> -> vector<32x84xf32>
    %c0_88 = arith.constant 0 : index
    %c0_89 = arith.constant 0 : index
    %83 = vector.load %arg13[%c0_88, %c0_89] : memref<1x84xf32, #tpu.memory_space<vmem>>, vector<1x84xf32>
    %84 = vector.broadcast %83 : vector<1x84xf32> to vector<32x84xf32>
    %85 = arith.addf %82, %84 : vector<32x84xf32>
    %cst_90 = arith.constant 0.000000e+00 : f32
    %86 = vector.broadcast %cst_90 : f32 to vector<32x84xf32>
    %87 = arith.maximumf %85, %86 : vector<32x84xf32>
    %88 = arith.truncf %87 : vector<32x84xf32> to vector<32x84xbf16>
    %c0_91 = arith.constant 0 : index
    %c0_92 = arith.constant 0 : index
    %89 = vector.load %arg14[%c0_91, %c0_92] : memref<84x128xbf16, #tpu.memory_space<vmem>>, vector<84x128xbf16>
    %cst_93 = arith.constant dense<0.000000e+00> : vector<32x128xf32>
    %90 = tpu.matmul %88, %89, %cst_93 {dimension_numbers = #tpu.dot_dimension_numbers<[1], [0], [0], [1], [0, 0, 1, 1], [], []>} : vector<32x84xbf16>, vector<84x128xbf16>, vector<32x128xf32> -> vector<32x128xf32>
    %c0_94 = arith.constant 0 : index
    %c0_95 = arith.constant 0 : index
    %91 = vector.load %arg15[%c0_94, %c0_95] : memref<1x128xf32, #tpu.memory_space<vmem>>, vector<1x128xf32>
    %92 = vector.broadcast %91 : vector<1x128xf32> to vector<32x128xf32>
    %93 = arith.addf %90, %92 : vector<32x128xf32>
    %c0_96 = arith.constant 0 : index
    %c0_97 = arith.constant 0 : index
    %94 = vector.load %arg16[%c0_96, %c0_97] : memref<32x128xf32, #tpu.memory_space<vmem>>, vector<32x128xf32>
    tpu.vector_store %arg16[%c0_96, %c0_97], %93 {strides = array<i32>} : memref<32x128xf32, #tpu.memory_space<vmem>>, vector<32x128xf32>,
    return
  }
  func.func @transform_0(%arg0: i32) -> (i32, i32, i32) {
    %c0_i32 = arith.constant 0 : i32
    %c0_i32_0 = arith.constant 0 : i32
    %c0_i32_1 = arith.constant 0 : i32
    return %arg0, %c0_i32, %c0_i32_0 : i32, i32, i32
  }
  func.func @transform_1(%arg0: i32) -> (i32, i32) {
    %c0_i32 = arith.constant 0 : i32
    %c0_i32_0 = arith.constant 0 : i32
    %c0_i32_1 = arith.constant 0 : i32
    return %c0_i32, %c0_i32_0 : i32, i32
  }
  func.func @transform_2(%arg0: i32) -> (i32, i32) {
    %c0_i32 = arith.constant 0 : i32
    %c0_i32_0 = arith.constant 0 : i32
    %c0_i32_1 = arith.constant 0 : i32
    return %c0_i32, %c0_i32_0 : i32, i32
  }
  func.func @transform_3(%arg0: i32) -> (i32, i32) {
    %c0_i32 = arith.constant 0 : i32
    %c0_i32_0 = arith.constant 0 : i32
    %c0_i32_1 = arith.constant 0 : i32
    return %c0_i32, %c0_i32_0 : i32, i32
  }
  func.func @transform_4(%arg0: i32) -> (i32, i32) {
    %c0_i32 = arith.constant 0 : i32
    %c0_i32_0 = arith.constant 0 : i32
    %c0_i32_1 = arith.constant 0 : i32
    return %c0_i32, %c0_i32_0 : i32, i32
  }
  func.func @transform_5(%arg0: i32) -> (i32, i32) {
    %c0_i32 = arith.constant 0 : i32
    %c0_i32_0 = arith.constant 0 : i32
    %c0_i32_1 = arith.constant 0 : i32
    return %c0_i32, %c0_i32_0 : i32, i32
  }
  func.func @transform_6(%arg0: i32) -> (i32, i32) {
    %c0_i32 = arith.constant 0 : i32
    %c0_i32_0 = arith.constant 0 : i32
    %c0_i32_1 = arith.constant 0 : i32
    return %c0_i32, %c0_i32_0 : i32, i32
  }
  func.func @transform_7(%arg0: i32) -> (i32, i32) {
    %c0_i32 = arith.constant 0 : i32
    %c0_i32_0 = arith.constant 0 : i32
    %c0_i32_1 = arith.constant 0 : i32
    return %c0_i32, %c0_i32_0 : i32, i32
  }
  func.func @transform_8(%arg0: i32) -> (i32, i32) {
    %c0_i32 = arith.constant 0 : i32
    %c0_i32_0 = arith.constant 0 : i32
    %c0_i32_1 = arith.constant 0 : i32
    return %c0_i32, %c0_i32_0 : i32, i32
  }
  func.func @transform_9(%arg0: i32) -> (i32, i32) {
    %c0_i32 = arith.constant 0 : i32
    %c0_i32_0 = arith.constant 0 : i32
    %c0_i32_1 = arith.constant 0 : i32
    return %c0_i32, %c0_i32_0 : i32, i32
  }
  func.func @transform_10(%arg0: i32) -> (i32, i32) {
    %c0_i32 = arith.constant 0 : i32
    %c0_i32_0 = arith.constant 0 : i32
    %c0_i32_1 = arith.constant 0 : i32
    return %c0_i32, %c0_i32_0 : i32, i32
  }
  func.func @transform_11(%arg0: i32) -> (i32, i32) {
    %c0_i32 = arith.constant 0 : i32
    %c0_i32_0 = arith.constant 0 : i32
    %c0_i32_1 = arith.constant 0 : i32
    return %c0_i32, %c0_i32_0 : i32, i32
  }
  func.func @transform_12(%arg0: i32) -> (i32, i32) {
    %c0_i32 = arith.constant 0 : i32
    %c0_i32_0 = arith.constant 0 : i32
    %c0_i32_1 = arith.constant 0 : i32
    return %c0_i32, %c0_i32_0 : i32, i32
  }
  func.func @transform_13(%arg0: i32) -> (i32, i32) {
    %c0_i32 = arith.constant 0 : i32
    %c0_i32_0 = arith.constant 0 : i32
    %c0_i32_1 = arith.constant 0 : i32
    return %c0_i32, %c0_i32_0 : i32, i32
  }
  func.func @transform_14(%arg0: i32) -> (i32, i32) {
    %c0_i32 = arith.constant 0 : i32
    %c0_i32_0 = arith.constant 0 : i32
    %c0_i32_1 = arith.constant 0 : i32
    return %c0_i32, %c0_i32_0 : i32, i32
  }
  func.func @transform_15(%arg0: i32) -> (i32, i32) {
    %c0_i32 = arith.constant 0 : i32
    %c0_i32_0 = arith.constant 0 : i32
    return %arg0, %c0_i32 : i32, i32
  }
}

</mosaic_0001>

<bundles_post_ra>
// kernel: lenet_forward_pallas.1
= control target key start
LH: loop header
LB: loop body
LE: loop exit
PB: predicated region body
PF: predicated region fallthrough
CT: control target
= control target key end

     0   :  { %s10909_s18 = smov 0   ;;  %s14314_s0 = inlined_call_operand.vmem [shape: f32[96,28,28], index: 0, kind: input, shape index: {}]   ;;  %s14315_s1 = inlined_call_operand.vmem [shape: bf16[140,144], index: 1, kind: input, shape index: {}]   ;;  %s14316_s2 = inlined_call_operand.vmem [shape: f32[1,144], index: 2, kind: input, shape index: {}]   ;;  %s14317_s3 = inlined_call_operand.vmem [shape: bf16[144,72], index: 3, kind: input, shape index: {}]   ;;  %s14318_s4 = inlined_call_operand.vmem [shape: bf16[144,72], index: 4, kind: input, shape index: {}]   ;;  %s14319_s5 = inlined_call_operand.vmem [shape: bf16[360,128], index: 5, kind: input, shape index: {}]   ;;  %s14320_s6 = inlined_call_operand.vmem [shape: f32[1,128], index: 6, kind: input, shape index: {}]   ;;  %s14321_s7 = inlined_call_operand.vmem [shape: bf16[128,64], index: 7, kind: input, shape index: {}]   ;;  %s14322_s8 = inlined_call_operand.vmem [shape: bf16[128,64], index: 8, kind: input, shape index: {}]   ;;  %s14323_s9 = inlined_call_operand.vmem [shape: bf16[256,120], index: 9, kind: input, shape index: {}]   ;;  %s14324_s10 = inlined_call_operand.vmem [shape: f32[1,120], index: 10, kind: input, shape index: {}]   ;;  %s14325_s11 = inlined_call_operand.vmem [shape: bf16[120,84], index: 11, kind: input, shape index: {}]   ;;  %s14326_s12 = inlined_call_operand.vmem [shape: f32[1,84], index: 12, kind: input, shape index: {}]   ;;  %s14327_s13 = inlined_call_operand.vmem [shape: bf16[84,128], index: 13, kind: input, shape index: {}]   ;;  %s14328_s14 = inlined_call_operand.vmem [shape: f32[1,128], index: 14, kind: input, shape index: {}]   ;;  %s14329_s15 = inlined_call_operand.vmem [shape: f32[96,128], index: 15, kind: output, shape index: {}]  }
   0x1 LB: > { %s8682_s19 = sadd.s32 4294967295, %s10817_s18   ;;  %p8686_p0 = scmp.ge.s32.totalorder %s10817_s18, 1  ;;  %s10817_s18 = sphi %s10909_s18, %s25_s18  }
   0x2   : > { %p439_p1 = scmp.lt.s32.totalorder %s10817_s18, 4 }
   0x4   : > { %p440_p2 = pnand %p8686_p0, %p439_p1 }
   0x6   : > { %443 = sbr.rel (%p440_p2) target bundleno = 2627 (0xa43), region = 80 }
   0xd   : > { %s8687_s20 = sshll.u32 %s8682_s19, 5  ;;  %v10697_v0 = vld [vmem:[%s14315_s1 + $0x4] ss:$8 sps:$4 sm:$0xff]   ;;  %v10699_v1 = vld [vmem:[%s14315_s1] ss:$8 sps:$4 sm:$0xff]   ;;  %v10819_v17 = vmov 0  }
   0xe   : > { %p489_p3 = scmp.lt.s32.totalorder %s8687_s20, 95  ;;  %3272 = vmatprep.subr.bf16.mxu0 %v10697_v0  ;;  %v10700_v2 = vld [vmem:[%s14315_s1 + $0x14] ss:$8 sps:$4 sm:$0xff]   ;;  %v10702_v3 = vld [vmem:[%s14315_s1 + $0x10] ss:$8 sps:$4 sm:$0xff]   ;;  %4290 = vmatprep.subr.bf16.mxu1 %v10819_v17  ;;  %s10821_s27 = smov 84  }
   0xf   : > { %3273 = vmatpush1.bf16.msra.mxu0 %v10699_v1  ;;  %v10703_v4 = vld [vmem:[%s14315_s1 + $0x24] ss:$8 sps:$4 sm:$0xff]   ;;  %v10705_v5 = vld [vmem:[%s14315_s1 + $0x20] ss:$8 sps:$4 sm:$0xff]   ;;  %v10706_v6 = vld [vmem:[%s14315_s1 + $0x34] ss:$8 sps:$4 sm:$0xff]  }
  0x10   : > { %s14481_s20 = smov (!%p489_p3, %s8687_s20), 95  ;;  %3274 = vmatprep.subr.bf16.mxu0 %v10700_v2  ;;  %v10708_v22 = vld [vmem:[%s14315_s1 + $0x30] ss:$8 sps:$4 sm:$0xff]   ;;  %v10709_v25 = vld [vmem:[%s14315_s1 + $0x44] ss:$8 sps:$4 sm:$0xff]   ;;  %s10822_s17 = smov 56  }
  0x11   : > { %s8968_s16 = sshll.u32 %s14481_s20, 5  ;;  %s10820_s20 = smov 28   ;;  %v10711_v30 = vld [vmem:[%s14315_s1 + $0x40] ss:$8 sps:$4 sm:$0xff]   ;;  %vm3265_vm0 = vcmask 1045504   ;;  %vm2518_vm1 = vcmask 228352  }
  0x12   : > { %s10937_s22 = scalar_lea.vmem %s14314_s0, %s8968_s16  ;;  %s10823_s21 = smov 112   ;;  %vm2615_vm2 = vcmask 457728   ;;  %vm2712_vm3 = vcmask 687104   ;;  %vm2809_vm4 = vcmask 916480   ;;  %vm3120_vm5 = vcmask 97280  }
  0x13   : > { %v598_v7 = vld [vmem:[%s10937_s22 + $0x1] sm:$0xff]  ;;  %v599_v8 = vld [vmem:[%s10937_s22 + $0x9] sm:$0xff]  ;;  %3275 = vmatpush1.bf16.msra.mxu0 %v10702_v3  ;;  %v600_v20 = vld [vmem:[%s10937_s22 + $0x11] sm:$0xff]  ;;  %vm4145_vm6 = vcmask 130048   ;;  %vm5292_vm7 = vcmask 588800   ;;  %s10824_s24 = smov 16  }
  0x14   : > { %v790_v9 = vld [vmem:[%s10937_s22 + $0x3] sm:$0xff]  ;;  %v9397_v10 = vpack.i.bf16 %v599_v8, %v598_v7  ;;  %v791_v11 = vld [vmem:[%s10937_s22 + $0xb] sm:$0xff]  ;;  %3276 = vmatprep.subr.bf16.mxu0 %v10703_v4  ;;  %v792_v28 = vld [vmem:[%s10937_s22 + $0x13] sm:$0xff]  ;;  %s10825_s25 = smov 72   ;;  %s10826_s26 = smov 88   ;;  %vm6764_vm8 = vcmask 719872  }
  0x15   : > { %v694_v12 = vld [vmem:[%s10937_s22 + $0x2] sm:$0xff]  ;;  %v695_v13 = vld [vmem:[%s10937_s22 + $0xa] sm:$0xff]  ;;  %v9407_v14 = vpack.i.bf16 %v791_v11, %v790_v9  ;;  %v696_v23 = vld [vmem:[%s10937_s22 + $0x12] sm:$0xff]  ;;  %vm7114_vm9 = vcmask 1043456   ;;  %vm6797_vm10 = vcmask 261120   ;;  %vm7065_vm11 = vcmask 850944  }
  0x16   : > { %v886_v15 = vld [vmem:[%s10937_s22 + $0x4] sm:$0xff]  ;;  %v887_v16 = vld [vmem:[%s10937_s22 + $0xc] sm:$0xff]  ;;  %9398 = vrot.lane.b32.xlu0 %v9397_v10, %s10820_s20  ;;  %v9402_v18 = vpack.i.bf16 %v695_v13, %v694_v12  ;;  %v888_v31 = vld [vmem:[%s10937_s22 + $0x14] sm:$0xff]  ;;  %vm7970_vm12 = vcmask 523264   ;;  %vm8447_vm13 = vcmask 982016   ;;  %vm8569_vm14 = vcmask 1041408  }
  0x17   : > { %9408 = vrot.lane.b32.xlu1 %v9407_v14, %s10821_s27  ;;  %v9412_v19 = vpack.i.bf16 %v887_v16, %v886_v15  ;;  %v601_v21 = vld [vmem:[%s10937_s22 + $0x21] sm:$0xff]  ;;  %3277 = vmatpush1.bf16.msra.mxu0 %v10705_v5  ;;  %v602_v35 = vld [vmem:[%s10937_s22 + $0x29] sm:$0xff]  ;;  %v603_v36 = vld [vmem:[%s10937_s22 + $0x31] sm:$0xff]  ;;  %s8690_s28 = sshll.u32 %s8682_s19, 2 }
  0x18   : > { %v697_v24 = vld [vmem:[%s10937_s22 + $0x22] sm:$0xff]  ;;  %3278 = vmatprep.subr.bf16.mxu0 %v10706_v6  ;;  %v9417_v26 = vpack.i.bf16 %v601_v21, %v600_v20  ;;  %v698_v37 = vld [vmem:[%s10937_s22 + $0x2a] sm:$0xff]  ;;  %v699_v38 = vld [vmem:[%s10937_s22 + $0x32] sm:$0xff]  ;;  %v9437_v39 = vpack.i.bf16 %v603_v36, %v602_v35  ;;  %p496_p4 = scmp.lt.s32.totalorder %s8690_s28, 11 }
  0x19   : > { %v9422_v27 = vpack.i.bf16 %v697_v24, %v696_v23  ;;  %v793_v29 = vld [vmem:[%s10937_s22 + $0x23] sm:$0xff]  ;;  %v9442_v40 = vpack.i.bf16 %v699_v38, %v698_v37  ;;  %v794_v41 = vld [vmem:[%s10937_s22 + $0x2b] sm:$0xff]  ;;  %v795_v42 = vld [vmem:[%s10937_s22 + $0x33] sm:$0xff] }
  0x1a   : > { %9403 = vrot.lane.b32.xlu0 %v9402_v18, %s10822_s17  ;;  %v889_v32 = vld [vmem:[%s10937_s22 + $0x24] sm:$0xff]  ;;  %v9427_v33 = vpack.i.bf16 %v793_v29, %v792_v28  ;;  %v890_v43 = vld [vmem:[%s10937_s22 + $0x2c] sm:$0xff]  ;;  %v891_v44 = vld [vmem:[%s10937_s22 + $0x34] sm:$0xff]  ;;  %v9447_v45 = vpack.i.bf16 %v795_v42, %v794_v41  ;;  %s14483_s28 = smov (!%p496_p4, %s8690_s28), 11 }
  0x1b   : > { %9413 = vrot.lane.b32.xlu1 %v9412_v19, %s10823_s21  ;;  %3279 = vmatpush1.bf16.msra.mxu0 %v10708_v22  ;;  %v9432_v34 = vpack.i.bf16 %v889_v32, %v888_v31  ;;  %v9452_v46 = vpack.i.bf16 %v891_v44, %v890_v43  ;;  %v604_v47 = vld [vmem:[%s10937_s22 + $0x41] sm:$0xff]  ;;  %v605_v48 = vld [vmem:[%s10937_s22 + $0x49] sm:$0xff]  ;;  %v606_v59 = vld [vmem:[%s10937_s22 + $0x51] sm:$0xff]  ;;  %s8691_s29 = sshll.u32 %s14483_s28, 3 }
  0x1c   : > { %3280 = vmatprep.subr.bf16.mxu0 %v10709_v25  ;;  %v700_v49 = vld [vmem:[%s10937_s22 + $0x42] sm:$0xff]  ;;  %v701_v50 = vld [vmem:[%s10937_s22 + $0x4a] sm:$0xff]  ;;  %v9457_v51 = vpack.i.bf16 %v605_v48, %v604_v47  ;;  %v702_v61 = vld [vmem:[%s10937_s22 + $0x52] sm:$0xff] }
  0x1d   : > { %v9462_v52 = vpack.i.bf16 %v701_v50, %v700_v49  ;;  %v796_v53 = vld [vmem:[%s10937_s22 + $0x43] sm:$0xff]  ;;  %v797_v54 = vld [vmem:[%s10937_s22 + $0x4b] sm:$0xff]  ;;  %v798_v1 = vld [vmem:[%s10937_s22 + $0x53] sm:$0xff] }
  0x1e   : > { %9418 = vrot.lane.b32.xlu0 %v9417_v26, %s10820_s20  ;;  %v892_v55 = vld [vmem:[%s10937_s22 + $0x44] sm:$0xff]  ;;  %v893_v56 = vld [vmem:[%s10937_s22 + $0x4c] sm:$0xff]  ;;  %v9467_v57 = vpack.i.bf16 %v797_v54, %v796_v53  ;;  %v894_v3 = vld [vmem:[%s10937_s22 + $0x54] sm:$0xff] }
  0x1f   : > { %9423 = vrot.lane.b32.xlu1 %v9422_v27, %s10822_s17  ;;  %3281 = vmatpush1.bf16.msra.mxu0 %v10711_v30  ;;  %v9472_v58 = vpack.i.bf16 %v893_v56, %v892_v55  ;;  %v607_v60 = vld [vmem:[%s10937_s22 + $0x61] sm:$0xff]  ;;  %v608_v6 = vld [vmem:[%s10937_s22 + $0x69] sm:$0xff]  ;;  %v609_v8 = vld [vmem:[%s10937_s22 + $0x71] sm:$0xff] }
  0x20   : > { %v703_v62 = vld [vmem:[%s10937_s22 + $0x62] sm:$0xff]  ;;  %v9477_v63 = vpack.i.bf16 %v607_v60, %v606_v59  ;;  %v704_v9 = vld [vmem:[%s10937_s22 + $0x6a] sm:$0xff]  ;;  %v705_v10 = vld [vmem:[%s10937_s22 + $0x72] sm:$0xff]  ;;  %v9497_v13 = vpack.i.bf16 %v609_v8, %v608_v6 }
  0x21   : > { %v9482_v0 = vpack.i.bf16 %v703_v62, %v702_v61  ;;  %v799_v2 = vld [vmem:[%s10937_s22 + $0x63] sm:$0xff]  ;;  %v10712_v11 = vld [vmem:[%s14315_s1 + $0x54] ss:$8 sps:$4 sm:$0xff]   ;;  %v10714_v12 = vld [vmem:[%s14315_s1 + $0x50] ss:$8 sps:$4 sm:$0xff]   ;;  %v9502_v14 = vpack.i.bf16 %v705_v10, %v704_v9 }
  0x22   : > { %9428 = vrot.lane.b32.xlu0 %v9427_v33, %s10821_s27  ;;  %v895_v4 = vld [vmem:[%s10937_s22 + $0x64] sm:$0xff]  ;;  %v9487_v5 = vpack.i.bf16 %v799_v2, %v798_v1  ;;  %3282 = vmatprep.subr.bf16.mxu0 %v10712_v11  ;;  %v801_v16 = vld [vmem:[%s10937_s22 + $0x73] sm:$0xff] }
  0x23   : > { %9433 = vrot.lane.b32.xlu1 %v9432_v34, %s10823_s21  ;;  %v9492_v7 = vpack.i.bf16 %v895_v4, %v894_v3  ;;  %v800_v15 = vld [vmem:[%s10937_s22 + $0x6b] sm:$0xff]  ;;  %3283 = vmatpush1.bf16.msra.mxu0 %v10714_v12  ;;  %v897_v20 = vld [vmem:[%s10937_s22 + $0x74] sm:$0xff]  ;;  %v610_v23 = vld [vmem:[%s10937_s22 + $0x81] sm:$0xff] }
  0x24   : > { %v10715_v18 = vld [vmem:[%s14315_s1 + $0x64] ss:$8 sps:$4 sm:$0xff]   ;;  %v10717_v21 = vld [vmem:[%s14315_s1 + $0x60] ss:$8 sps:$4 sm:$0xff]   ;;  %v9507_v22 = vpack.i.bf16 %v801_v16, %v800_v15  ;;  %v10718_v24 = vld [vmem:[%s14315_s1 + $0x74] ss:$8 sps:$4 sm:$0xff]  }
  0x25   : > { %v896_v19 = vld [vmem:[%s10937_s22 + $0x6c] sm:$0xff]  ;;  %3284 = vmatprep.subr.bf16.mxu0 %v10715_v18  ;;  %v706_v27 = vld [vmem:[%s10937_s22 + $0x82] sm:$0xff]  ;;  %v900_v49 = vld [vmem:[%s10937_s22 + $0x94] sm:$0xff] }
  0x26   : > { %9438 = vrot.lane.b32.xlu0 %v9437_v39, %s10820_s20  ;;  %v9512_v25 = vpack.i.bf16 %v897_v20, %v896_v19  ;;  %v611_v26 = vld [vmem:[%s10937_s22 + $0x89] sm:$0xff]  ;;  %v612_v41 = vld [vmem:[%s10937_s22 + $0x91] sm:$0xff]  ;;  %v613_v42 = vld [vmem:[%s10937_s22 + $0xa1] sm:$0xff] }
  0x27   : > { %9443 = vrot.lane.b32.xlu1 %v9442_v40, %s10822_s17  ;;  %3285 = vmatpush1.bf16.msra.mxu0 %v10717_v21  ;;  %v10720_v28 = vld [vmem:[%s14315_s1 + $0x70] ss:$8 sps:$4 sm:$0xff]   ;;  %v10721_v30 = vld [vmem:[%s14315_s1 + $0x84] ss:$8 sps:$4 sm:$0x3f]   ;;  %v9517_v31 = vpack.i.bf16 %v611_v26, %v610_v23 }
  0x28   : > { %v707_v29 = vld [vmem:[%s10937_s22 + $0x8a] sm:$0xff]  ;;  %3286 = vmatprep.subr.bf16.mxu0 %v10718_v24  ;;  %v10723_v32 = vld [vmem:[%s14315_s1 + $0x80] ss:$8 sps:$4 sm:$0x3f]   ;;  %v708_v43 = vld [vmem:[%s10937_s22 + $0x92] sm:$0xff] }
  0x29   : > { %v9522_v33 = vpack.i.bf16 %v707_v29, %v706_v27  ;;  %v802_v34 = vld [vmem:[%s10937_s22 + $0x83] sm:$0xff]  ;;  %v803_v35 = vld [vmem:[%s10937_s22 + $0x8b] sm:$0xff]  ;;  %v3267_v38 = vsel %vm3265_vm0, %v10723_v32, 0  ;;  %v804_v47 = vld [vmem:[%s10937_s22 + $0x93] sm:$0xff] }
  0x2a   : > { %9448 = vrot.lane.b32.xlu0 %v9447_v45, %s10821_s27  ;;  %v898_v36 = vld [vmem:[%s10937_s22 + $0x84] sm:$0xff]  ;;  %v899_v37 = vld [vmem:[%s10937_s22 + $0x8c] sm:$0xff]  ;;  %v9527_v39 = vpack.i.bf16 %v803_v35, %v802_v34  ;;  %v9537_v45 = vpack.i.bf16 %v613_v42, %v612_v41  ;;  %v903_v62 = vld [vmem:[%s10937_s22 + $0xb4] sm:$0xff] }
  0x2b   : > { %9453 = vrot.lane.b32.xlu1 %v9452_v46, %s10823_s21  ;;  %3287 = vmatpush1.bf16.msra.mxu0 %v10720_v28  ;;  %v9532_v40 = vpack.i.bf16 %v899_v37, %v898_v36  ;;  %v709_v44 = vld [vmem:[%s10937_s22 + $0xa2] sm:$0xff]  ;;  %v615_v54 = vld [vmem:[%s10937_s22 + $0xb1] sm:$0xff] }
  0x2c   : > { %8710 = vmatprep.subr.msk.bf16.mxu0 %vm3265_vm0, %v10721_v30  ;;  %v9542_v46 = vpack.i.bf16 %v709_v44, %v708_v43  ;;  %v805_v48 = vld [vmem:[%s10937_s22 + $0xa3] sm:$0xff]  ;;  %v711_v56 = vld [vmem:[%s10937_s22 + $0xb2] sm:$0xff] }
  0x2d   : > { %v901_v50 = vld [vmem:[%s10937_s22 + $0xa4] sm:$0xff]  ;;  %v807_v60 = vld [vmem:[%s10937_s22 + $0xb3] sm:$0xff] }
  0x2e   : > { %9458 = vrot.lane.b32.xlu0 %v9457_v51, %s10820_s20  ;;  %v9547_v51 = vpack.i.bf16 %v805_v48, %v804_v47  ;;  %v614_v53 = vld [vmem:[%s10937_s22 + $0xa9] sm:$0xff]  ;;  %v714_v15 = vld [vmem:[%s10937_s22 + $0xd2] sm:$0xff] }
  0x2f   : > { %9463 = vrot.lane.b32.xlu1 %v9462_v52, %s10822_s17  ;;  %3289 = vmatpush1.bf16.msra.mxu0 %v3267_v38  ;;  %v9552_v52 = vpack.i.bf16 %v901_v50, %v900_v49  ;;  %v710_v55 = vld [vmem:[%s10937_s22 + $0xaa] sm:$0xff]  ;;  %v712_v3 = vld [vmem:[%s10937_s22 + $0xc2] sm:$0xff]  ;;  %v810_v20 = vld [vmem:[%s10937_s22 + $0xd3] sm:$0xff] }
  0x30   : > { %4779 = vmatprep.subr.bf16.mxu0 %v10819_v17  ;;  %v806_v59 = vld [vmem:[%s10937_s22 + $0xab] sm:$0xff]  ;;  %v715_v16 = vld [vmem:[%s10937_s22 + $0xe2] sm:$0xff]  ;;  %v909_v35 = vld [vmem:[%s10937_s22 + $0xf4] sm:$0xff] }
  0x31   : > { %v902_v61 = vld [vmem:[%s10937_s22 + $0xac] sm:$0xff]  ;;  %v904_v9 = vld [vmem:[%s10937_s22 + $0xc4] sm:$0xff]  ;;  %v9602_v19 = vpack.i.bf16 %v715_v16, %v714_v15 }
  0x32   : > { %9468 = vrot.lane.b32.xlu0 %v9467_v57, %s10821_s27  ;;  %v9557_v57 = vpack.i.bf16 %v615_v54, %v614_v53  ;;  %v9572_v1 = vpack.i.bf16 %v903_v62, %v902_v61  ;;  %v617_v2 = vld [vmem:[%s10937_s22 + $0xc9] sm:$0xff]  ;;  %v621_v27 = vld [vmem:[%s10937_s22 + $0xf1] sm:$0xff]  ;;  %v622_v38 = vld [vmem:[%s10937_s22 + $0x101] sm:$0xff] }
  0x33   : > { %9473 = vrot.lane.b32.xlu1 %v9472_v58, %s10823_s21  ;;  %v9562_v58 = vpack.i.bf16 %v711_v56, %v710_v55  ;;  %v713_v4 = vld [vmem:[%s10937_s22 + $0xca] sm:$0xff]  ;;  %v717_v29 = vld [vmem:[%s10937_s22 + $0xf2] sm:$0xff]  ;;  %v721_v53 = vld [vmem:[%s10937_s22 + $0x122] sm:$0xff] }
  0x34   : > { %v9582_v6 = vpack.i.bf16 %v713_v4, %v712_v3  ;;  %v809_v8 = vld [vmem:[%s10937_s22 + $0xcb] sm:$0xff]  ;;  %v811_v21 = vld [vmem:[%s10937_s22 + $0xe3] sm:$0xff]  ;;  %v816_v56 = vld [vmem:[%s10937_s22 + $0x113] sm:$0xff] }
  0x35   : > { %v905_v10 = vld [vmem:[%s10937_s22 + $0xcc] sm:$0xff]  ;;  %v907_v23 = vld [vmem:[%s10937_s22 + $0xe4] sm:$0xff]  ;;  %v9607_v24 = vpack.i.bf16 %v811_v21, %v810_v20 }
  0x36   : > { %9478 = vrot.lane.b32.xlu0 %v9477_v63, %s10820_s20  ;;  %v9567_v63 = vpack.i.bf16 %v807_v60, %v806_v59  ;;  %v9592_v12 = vpack.i.bf16 %v905_v10, %v904_v9  ;;  %v620_v26 = vld [vmem:[%s10937_s22 + $0xe9] sm:$0xff]  ;;  %v624_v50 = vld [vmem:[%s10937_s22 + $0x111] sm:$0xff]  ;;  %v628_v10 = vld [vmem:[%s10937_s22 + $0x141] sm:$0xff] }
  0x37   : > { %9483 = vrot.lane.b32.xlu1 %v9482_v0, %s10822_s17  ;;  %v616_v0 = vld [vmem:[%s10937_s22 + $0xc1] sm:$0xff]  ;;  %v716_v28 = vld [vmem:[%s10937_s22 + $0xea] sm:$0xff]  ;;  %v9617_v30 = vpack.i.bf16 %v621_v27, %v620_v26 }
  0x38   : > { %v812_v32 = vld [vmem:[%s10937_s22 + $0xeb] sm:$0xff]  ;;  %v814_v44 = vld [vmem:[%s10937_s22 + $0x103] sm:$0xff] }
  0x39   : > { %v908_v34 = vld [vmem:[%s10937_s22 + $0xec] sm:$0xff]  ;;  %v913_v59 = vld [vmem:[%s10937_s22 + $0x124] sm:$0xff] }
  0x3a   : > { %9488 = vrot.lane.b32.xlu0 %v9487_v5, %s10821_s27  ;;  %v9577_v5 = vpack.i.bf16 %v617_v2, %v616_v0  ;;  %v9632_v37 = vpack.i.bf16 %v909_v35, %v908_v34  ;;  %v719_v41 = vld [vmem:[%s10937_s22 + $0x10a] sm:$0xff] }
  0x3b   : > { %9493 = vrot.lane.b32.xlu1 %v9492_v7, %s10823_s21  ;;  %v808_v7 = vld [vmem:[%s10937_s22 + $0xc3] sm:$0xff]  ;;  %v911_v47 = vld [vmem:[%s10937_s22 + $0x10c] sm:$0xff] }
  0x3c   : > { %v9587_v11 = vpack.i.bf16 %v809_v8, %v808_v7  ;;  %v626_v62 = vld [vmem:[%s10937_s22 + $0x129] sm:$0xff]  ;;  %v915_v7 = vld [vmem:[%s10937_s22 + $0x134] sm:$0xff] }
  0x3d   : > { %v722_v0 = vld [vmem:[%s10937_s22 + $0x12a] sm:$0xff] }
  0x3e   : > { %9498 = vrot.lane.b32.xlu0 %v9497_v13, %s10820_s20  ;;  %v618_v13 = vld [vmem:[%s10937_s22 + $0xd1] sm:$0xff]  ;;  %v820_v16 = vld [vmem:[%s10937_s22 + $0x143] sm:$0xff] }
  0x3f   : > { %9503 = vrot.lane.b32.xlu1 %v9502_v14, %s10822_s17  ;;  %v619_v14 = vld [vmem:[%s10937_s22 + $0xe1] sm:$0xff]  ;;  %v818_v4 = vld [vmem:[%s10937_s22 + $0x12b] sm:$0xff] }
  0x40   : > { %v9597_v18 = vpack.i.bf16 %v619_v14, %v618_v13  ;;  %v724_v13 = vld [vmem:[%s10937_s22 + $0x142] sm:$0xff]  ;;  %v725_v14 = vld [vmem:[%s10937_s22 + $0x14a] sm:$0xff] }
  0x41   : > { %v916_v27 = vld [vmem:[%s10937_s22 + $0x144] sm:$0xff] }
  0x42   : > { %9508 = vrot.lane.b32.xlu0 %v9507_v22, %s10821_s27  ;;  %v906_v22 = vld [vmem:[%s10937_s22 + $0xd4] sm:$0xff] }
  0x43   : > { %9513 = vrot.lane.b32.xlu1 %v9512_v25, %s10823_s21  ;;  %v9612_v25 = vpack.i.bf16 %v907_v23, %v906_v22  ;;  %v502_v22 = vld [vmem:[%s10937_s22] sm:$0xff]  ;;  %v503_v23 = vld [vmem:[%s10937_s22 + $0x8] sm:$0xff] }
  0x46   : > { %9518 = vrot.lane.b32.xlu0 %v9517_v31, %s10820_s20  ;;  %v9622_v31 = vpack.i.bf16 %v717_v29, %v716_v28  ;;  %v917_v28 = vld [vmem:[%s10937_s22 + $0x14c] sm:$0xff] }
  0x47   : > { %9523 = vrot.lane.b32.xlu1 %v9522_v33, %s10822_s17  ;;  %v813_v33 = vld [vmem:[%s10937_s22 + $0xf3] sm:$0xff] }
  0x48   : > { %v9627_v36 = vpack.i.bf16 %v813_v33, %v812_v32 }
  0x4a   : > { %9528 = vrot.lane.b32.xlu0 %v9527_v39, %s10821_s27  ;;  %v623_v39 = vld [vmem:[%s10937_s22 + $0x109] sm:$0xff] }
  0x4b   : > { %9533 = vrot.lane.b32.xlu1 %v9532_v40, %s10823_s21  ;;  %v718_v40 = vld [vmem:[%s10937_s22 + $0x102] sm:$0xff]  ;;  %v9637_v42 = vpack.i.bf16 %v623_v39, %v622_v38 }
  0x4c   : > { %v9642_v43 = vpack.i.bf16 %v719_v41, %v718_v40 }
  0x4e   : > { %9538 = vrot.lane.b32.xlu0 %v9537_v45, %s10820_s20  ;;  %v815_v45 = vld [vmem:[%s10937_s22 + $0x10b] sm:$0xff] }
  0x4f   : > { %9543 = vrot.lane.b32.xlu1 %v9542_v46, %s10822_s17  ;;  %v910_v46 = vld [vmem:[%s10937_s22 + $0x104] sm:$0xff]  ;;  %v9647_v48 = vpack.i.bf16 %v815_v45, %v814_v44 }
  0x50   : > { %v9652_v49 = vpack.i.bf16 %v911_v47, %v910_v46  ;;  %v631_v44 = vld [vmem:[%s10937_s22 + $0x161] sm:$0xff] }
  0x52   : > { %9548 = vrot.lane.b32.xlu0 %v9547_v51, %s10821_s27  ;;  %v625_v51 = vld [vmem:[%s10937_s22 + $0x121] sm:$0xff] }
  0x53   : > { %9553 = vrot.lane.b32.xlu1 %v9552_v52, %s10823_s21  ;;  %v720_v52 = vld [vmem:[%s10937_s22 + $0x112] sm:$0xff]  ;;  %v9657_v54 = vpack.i.bf16 %v625_v51, %v624_v50  ;;  %v727_v50 = vld [vmem:[%s10937_s22 + $0x162] sm:$0xff] }
  0x54   : > { %v9662_v55 = vpack.i.bf16 %v721_v53, %v720_v52 }
  0x56   : > { %9558 = vrot.lane.b32.xlu0 %v9557_v57, %s10820_s20  ;;  %v817_v57 = vld [vmem:[%s10937_s22 + $0x123] sm:$0xff] }
  0x57   : > { %9563 = vrot.lane.b32.xlu1 %v9562_v58, %s10822_s17  ;;  %v912_v58 = vld [vmem:[%s10937_s22 + $0x114] sm:$0xff]  ;;  %v9667_v60 = vpack.i.bf16 %v817_v57, %v816_v56  ;;  %v10724_v56 = vld [vmem:[%s14318_s4] sm:$0xff]  }
  0x58   : > { %v9672_v61 = vpack.i.bf16 %v913_v59, %v912_v58 }
  0x5a   : > { %9568 = vrot.lane.b32.xlu0 %v9567_v63, %s10821_s27  ;;  %v627_v63 = vld [vmem:[%s10937_s22 + $0x131] sm:$0xff] }
  0x5b   : > { %9573 = vrot.lane.b32.xlu1 %v9572_v1, %s10823_s21  ;;  %v723_v1 = vld [vmem:[%s10937_s22 + $0x132] sm:$0xff]  ;;  %v9677_v2 = vpack.i.bf16 %v627_v63, %v626_v62 }
  0x5c   : > { %v9682_v3 = vpack.i.bf16 %v723_v1, %v722_v0  ;;  %v822_v0 = vld [vmem:[%s10937_s22 + $0x153] sm:$0xff]  ;;  %v823_v1 = vld [vmem:[%s10937_s22 + $0x163] sm:$0xff] }
  0x5e   : > { %9578 = vrot.lane.b32.xlu0 %v9577_v5, %s10820_s20  ;;  %v819_v5 = vld [vmem:[%s10937_s22 + $0x133] sm:$0xff] }
  0x5f   : > { %9583 = vrot.lane.b32.xlu1 %v9582_v6, %s10822_s17  ;;  %v914_v6 = vld [vmem:[%s10937_s22 + $0x12c] sm:$0xff]  ;;  %v9687_v8 = vpack.i.bf16 %v819_v5, %v818_v4  ;;  %v918_v5 = vld [vmem:[%s10937_s22 + $0x154] sm:$0xff] }
  0x60   : > { %v9692_v9 = vpack.i.bf16 %v915_v7, %v914_v6  ;;  %v919_v6 = vld [vmem:[%s10937_s22 + $0x164] sm:$0xff] }
  0x62   : > { %9588 = vrot.lane.b32.xlu0 %v9587_v11, %s10821_s27  ;;  %v629_v11 = vld [vmem:[%s10937_s22 + $0x149] sm:$0xff] }
  0x63   : > { %9593 = vrot.lane.b32.xlu1 %v9592_v12, %s10823_s21  ;;  %v9697_v21 = vpack.i.bf16 %v629_v11, %v628_v10  ;;  %v10725_v10 = vld [vmem:[%s14318_s4 + $0x8] sm:$0xff]  }
  0x66   : > { %9598 = vrot.lane.b32.xlu0 %v9597_v18, %s10820_s20  ;;  %v821_v18 = vld [vmem:[%s10937_s22 + $0x14b] sm:$0xff] }
  0x67   : > { %9603 = vrot.lane.b32.xlu1 %v9602_v19, %s10822_s17  ;;  %v9707_v26 = vpack.i.bf16 %v821_v18, %v820_v16  ;;  %v9732_v16 = vpack.i.bf16 %v919_v6, %v918_v5 }
  0x6a   : > { %9608 = vrot.lane.b32.xlu0 %v9607_v24, %s10821_s27  ;;  %v9702_v24 = vpack.i.bf16 %v725_v14, %v724_v13  ;;  %v506_v13 = vld [vmem:[%s10937_s22 + $0x28] sm:$0xff]  ;;  %v507_v14 = vld [vmem:[%s10937_s22 + $0x30] sm:$0xff] }
  0x6b   : > { %9613 = vrot.lane.b32.xlu1 %v9612_v25, %s10823_s21 }
  0x6e   : > { %9618 = vrot.lane.b32.xlu0 %v9617_v30, %s10820_s20 }
  0x6f   : > { %9623 = vrot.lane.b32.xlu1 %v9622_v31, %s10822_s17 }
  0x72   : > { %9628 = vrot.lane.b32.xlu0 %v9627_v36, %s10821_s27  ;;  %v504_v36 = vld [vmem:[%s10937_s22 + $0x10] sm:$0xff] }
  0x73   : > { %9633 = vrot.lane.b32.xlu1 %v9632_v37, %s10823_s21  ;;  %v505_v37 = vld [vmem:[%s10937_s22 + $0x20] sm:$0xff] }
  0x76   : > { %9638 = vrot.lane.b32.xlu0 %v9637_v42, %s10820_s20  ;;  %v9712_v42 = vpack.i.bf16 %v917_v28, %v916_v27  ;;  %v729_v27 = vld [vmem:[%s10937_s22 + $0x172] sm:$0xff] }
  0x77   : > { %9643 = vrot.lane.b32.xlu1 %v9642_v43, %s10822_s17  ;;  %v630_v43 = vld [vmem:[%s10937_s22 + $0x151] sm:$0xff] }
  0x7a   : > { %9648 = vrot.lane.b32.xlu0 %v9647_v48, %s10821_s27 }
  0x7b   : > { %9653 = vrot.lane.b32.xlu1 %v9652_v49, %s10823_s21  ;;  %v726_v49 = vld [vmem:[%s10937_s22 + $0x152] sm:$0xff] }
  0x7c   : > { %v9722_v63 = vpack.i.bf16 %v727_v50, %v726_v49 }
  0x7e   : > { %9658 = vrot.lane.b32.xlu0 %v9657_v54, %s10820_s20 }
  0x7f   : > { %9663 = vrot.lane.b32.xlu1 %v9662_v55, %s10822_s17 }
  0x82   : > { %9668 = vrot.lane.b32.xlu0 %v9667_v60, %s10821_s27  ;;  %v9717_v60 = vpack.i.bf16 %v631_v44, %v630_v43 }
  0x83   : > { %9673 = vrot.lane.b32.xlu1 %v9672_v61, %s10823_s21 }
  0x86   : > { %9678 = vrot.lane.b32.xlu0 %v9677_v2, %s10820_s20 }
  0x87   : > { %9683 = vrot.lane.b32.xlu1 %v9682_v3, %s10822_s17 }
  0x88   : > { %v9399_v12 = vpop.permute.xlu0 %9398 }
  0x89   : > { %v9409_v15 = vpop.permute.xlu1 %9408  ;;  %v9401_v19 = vunpack.i.h.bf16 %v9399_v12  ;;  %v9400_v20 = vunpack.i.l.bf16 %v9399_v12 }
  0x8a   : > { %9688 = vrot.lane.b32.xlu0 %v9687_v8, %s10821_s27  ;;  %v9411_v29 = vunpack.i.h.bf16 %v9409_v15  ;;  %v9410_v30 = vunpack.i.l.bf16 %v9409_v15  ;;  %v9727_v15 = vpack.i.bf16 %v823_v1, %v822_v0  ;;  %v730_v0 = vld [vmem:[%s10937_s22 + $0x182] sm:$0xff]  ;;  %v731_v1 = vld [vmem:[%s10937_s22 + $0x18a] sm:$0xff] }
  0x8b   : > { %9693 = vrot.lane.b32.xlu1 %v9692_v9, %s10823_s21  ;;  %v2519_v34 = vsel %vm2518_vm1, %v502_v22, %v9400_v20  ;;  %v2520_v35 = vsel %vm2518_vm1, %v503_v23, %v9401_v19  ;;  %v632_v20 = vld [vmem:[%s10937_s22 + $0x169] sm:$0xff] }
  0x8c   : > { %v9404_v25 = vpop.permute.xlu0 %9403 }
  0x8d   : > { %v9406_v31 = vunpack.i.h.bf16 %v9404_v25  ;;  %v9405_v32 = vunpack.i.l.bf16 %v9404_v25  ;;  %v9414_v33 = vpop.permute.xlu1 %9413 }
  0x8e   : > { %9698 = vrot.lane.b32.xlu0 %v9697_v21, %s10820_s20  ;;  %v9416_v38 = vunpack.i.h.bf16 %v9414_v33  ;;  %v9415_v39 = vunpack.i.l.bf16 %v9414_v33  ;;  %v633_v21 = vld [vmem:[%s10937_s22 + $0x171] sm:$0xff] }
  0x8f   : > { %v2616_v40 = vsel %vm2615_vm2, %v2519_v34, %v9405_v32  ;;  %v2617_v41 = vsel %vm2615_vm2, %v2520_v35, %v9406_v31  ;;  %9703 = vrot.lane.b32.xlu1 %v9702_v24, %s10822_s17  ;;  %v824_v32 = vld [vmem:[%s10937_s22 + $0x16b] sm:$0xff] }
  0x90   : > { %v9419_v45 = vpop.permute.xlu0 %9418  ;;  %v2907_v46 = vpack.c.bf16 %v9416_v38, %v9415_v39  ;;  %v2713_v47 = vsel %vm2712_vm3, %v2616_v40, %v9410_v30  ;;  %v2714_v48 = vsel %vm2712_vm3, %v2617_v41, %v9411_v29  ;;  %v10726_v33 = vld [vmem:[%s14318_s4 + $0x10] sm:$0xff]  }
  0x91   : > { %v9421_v51 = vunpack.i.h.bf16 %v9419_v45  ;;  %v9420_v52 = vunpack.i.l.bf16 %v9419_v45  ;;  %v9424_v53 = vpop.permute.xlu1 %9423  ;;  %v2810_v54 = vsel %vm2809_vm4, %v2713_v47, %v9415_v39  ;;  %v2811_v55 = vsel %vm2809_vm4, %v2714_v48, %v9416_v38  ;;  %v825_v40 = vld [vmem:[%s10937_s22 + $0x173] sm:$0xff] }
  0x92   : > { %v9426_v57 = vunpack.i.h.bf16 %v9424_v53  ;;  %v9425_v58 = vunpack.i.l.bf16 %v9424_v53  ;;  %9708 = vrot.lane.b32.xlu0 %v9707_v26, %s10821_s27  ;;  %8711 = vmatprep.mubr.msk.bf16.mxu0 %vm3120_vm5, %v2907_v46  ;;  %v2906_v59 = vpack.c.bf16 %v2811_v55, %v2810_v54  ;;  %v728_v26 = vld [vmem:[%s10937_s22 + $0x16a] sm:$0xff]  ;;  %v921_v45 = vld [vmem:[%s10937_s22 + $0x174] sm:$0xff]  ;;  %v9747_v54 = vpack.i.bf16 %v825_v40, %v824_v32  ;;  %v637_v32 = vld [vmem:[%s10937_s22 + $0x1a1] sm:$0xff] }
  0x93   : > { %v2521_v61 = vsel %vm2518_vm1, %v504_v36, %v9420_v52  ;;  %v2522_v62 = vsel %vm2518_vm1, %v505_v37, %v9421_v51  ;;  %9713 = vrot.lane.b32.xlu1 %v9712_v42, %s10823_s21  ;;  %v9737_v36 = vpack.i.bf16 %v633_v21, %v632_v20  ;;  %v9742_v39 = vpack.i.bf16 %v729_v27, %v728_v26  ;;  %v920_v41 = vld [vmem:[%s10937_s22 + $0x16c] sm:$0xff]  ;;  %v10727_v46 = vld [vmem:[%s14318_s4 + $0x18] sm:$0xff]   ;;  %v508_v52 = vld [vmem:[%s10937_s22 + $0x40] sm:$0xff] }
  0x94   : > { %v2618_v2 = vsel %vm2615_vm2, %v2521_v61, %v9425_v58  ;;  %v2619_v3 = vsel %vm2615_vm2, %v2522_v62, %v9426_v57  ;;  %v9429_v4 = vpop.permute.xlu0 %9428  ;;  %3305 = vmatmul.mubr.bf16.vlgmr.msra.gmra.mrb[0].mxu0 %v2906_v59  ;;  %v509_v53 = vld [vmem:[%s10937_s22 + $0x48] sm:$0xff]  ;;  %v9752_v55 = vpack.i.bf16 %v921_v45, %v920_v41  ;;  %v511_v26 = vld [vmem:[%s10937_s22 + $0x60] sm:$0xff] }
  0x95   : > { %v9431_v7 = vunpack.i.h.bf16 %v9429_v4  ;;  %v9430_v8 = vunpack.i.l.bf16 %v9429_v4  ;;  %4780 = vmatpush1.bf16.msra.mxu0 %v10724_v56  ;;  %v9434_v9 = vpop.permute.xlu1 %9433  ;;  %v634_v58 = vld [vmem:[%s10937_s22 + $0x181] sm:$0xff]  ;;  %v635_v59 = vld [vmem:[%s10937_s22 + $0x189] sm:$0xff] }
  0x96   : > { %v9436_v11 = vunpack.i.h.bf16 %v9434_v9  ;;  %v9435_v12 = vunpack.i.l.bf16 %v9434_v9  ;;  %9718 = vrot.lane.b32.xlu0 %v9717_v60, %s10820_s20  ;;  %4781 = vmatprep.subr.bf16.mxu0 %v10819_v17 }
  0x97   : > { %9723 = vrot.lane.b32.xlu1 %v9722_v63, %s10822_s17  ;;  %v2715_v18 = vsel %vm2712_vm3, %v2618_v2, %v9430_v8  ;;  %v2716_v19 = vsel %vm2712_vm3, %v2619_v3, %v9431_v7  ;;  %v9757_v8 = vpack.i.bf16 %v635_v59, %v634_v58 }
  0x98   : > { %v2909_v22 = vpack.c.bf16 %v9436_v11, %v9435_v12  ;;  %v9439_v23 = vpop.permute.xlu0 %9438  ;;  %v2812_v24 = vsel %vm2809_vm4, %v2715_v18, %v9435_v12  ;;  %v2813_v25 = vsel %vm2809_vm4, %v2716_v19, %v9436_v11  ;;  %v9762_v11 = vpack.i.bf16 %v731_v1, %v730_v0  ;;  %v826_v12 = vld [vmem:[%s10937_s22 + $0x183] sm:$0xff]  ;;  %v923_v19 = vld [vmem:[%s10937_s22 + $0x18c] sm:$0xff] }
  0x99   : > { %v9441_v28 = vunpack.i.h.bf16 %v9439_v23  ;;  %v9440_v29 = vunpack.i.l.bf16 %v9439_v23  ;;  %v9444_v30 = vpop.permute.xlu1 %9443  ;;  %v2908_v31 = vpack.c.bf16 %v2813_v25, %v2812_v24  ;;  %4782 = vmatpush1.bf16.msra.mxu0 %v10725_v10  ;;  %v922_v18 = vld [vmem:[%s10937_s22 + $0x184] sm:$0xff]  ;;  %v510_v25 = vld [vmem:[%s10937_s22 + $0x50] sm:$0xff] }
  0x9a   : > { %v9446_v34 = vunpack.i.h.bf16 %v9444_v30  ;;  %v9445_v35 = vunpack.i.l.bf16 %v9444_v30  ;;  %9728 = vrot.lane.b32.xlu0 %v9727_v15, %s10821_s27  ;;  %8712 = vmatprep.mubr.msk.bf16.mxu0 %vm3120_vm5, %v2909_v22 }
  0x9b   : > { %v2523_v37 = vsel %vm2518_vm1, %v506_v13, %v9440_v29  ;;  %v2524_v38 = vsel %vm2518_vm1, %v507_v14, %v9441_v28  ;;  %9733 = vrot.lane.b32.xlu1 %v9732_v16, %s10823_s21  ;;  %4783 = vmatprep.subr.bf16.mxu0 %v10819_v17  ;;  %v827_v13 = vld [vmem:[%s10937_s22 + $0x18b] sm:$0xff]  ;;  %v9772_v28 = vpack.i.bf16 %v923_v19, %v922_v18 }
  0x9c   : > { %v2620_v42 = vsel %vm2615_vm2, %v2523_v37, %v9445_v35  ;;  %v2621_v43 = vsel %vm2615_vm2, %v2524_v38, %v9446_v34  ;;  %v9449_v44 = vpop.permute.xlu0 %9448  ;;  %3315 = vmatmul.mubr.bf16.gmra.mrb[4].mxu0 %v2908_v31  ;;  %v9767_v27 = vpack.i.bf16 %v827_v13, %v826_v12  ;;  %v636_v31 = vld [vmem:[%s10937_s22 + $0x191] sm:$0xff]  ;;  %v733_v38 = vld [vmem:[%s10937_s22 + $0x1a2] sm:$0xff] }
  0x9d   : > { %v9451_v47 = vunpack.i.h.bf16 %v9449_v44  ;;  %v9450_v48 = vunpack.i.l.bf16 %v9449_v44  ;;  %v9454_v49 = vpop.permute.xlu1 %9453  ;;  %4784 = vmatpush1.bf16.msra.mxu0 %v10726_v33  ;;  %v732_v37 = vld [vmem:[%s10937_s22 + $0x192] sm:$0xff]  ;;  %v9777_v45 = vpack.i.bf16 %v637_v32, %v636_v31 }
  0x9e   : > { %v9456_v50 = vunpack.i.h.bf16 %v9454_v49  ;;  %v9455_v51 = vunpack.i.l.bf16 %v9454_v49  ;;  %9738 = vrot.lane.b32.xlu0 %v9737_v36, %s10820_s20  ;;  %4785 = vmatprep.subr.bf16.mxu0 %v10819_v17  ;;  %v828_v49 = vld [vmem:[%s10937_s22 + $0x193] sm:$0xff] }
  0x9f   : > { %9743 = vrot.lane.b32.xlu1 %v9742_v39, %s10822_s17  ;;  %v2717_v56 = vsel %vm2712_vm3, %v2620_v42, %v9450_v48  ;;  %v2718_v57 = vsel %vm2712_vm3, %v2621_v43, %v9451_v47  ;;  %v9782_v48 = vpack.i.bf16 %v733_v38, %v732_v37 }
  0xa0   : > { %v2911_v60 = vpack.c.bf16 %v9456_v50, %v9455_v51  ;;  %v9459_v61 = vpop.permute.xlu0 %9458  ;;  %v2814_v62 = vsel %vm2809_vm4, %v2717_v56, %v9455_v51  ;;  %v2815_v63 = vsel %vm2809_vm4, %v2718_v57, %v9456_v50  ;;  %v829_v50 = vld [vmem:[%s10937_s22 + $0x1a3] sm:$0xff] }
  0xa1   : > { %v9461_v2 = vunpack.i.h.bf16 %v9459_v61  ;;  %v9460_v3 = vunpack.i.l.bf16 %v9459_v61  ;;  %v9464_v4 = vpop.permute.xlu1 %9463  ;;  %v2910_v5 = vpack.c.bf16 %v2815_v63, %v2814_v62  ;;  %4786 = vmatpush1.bf16.msra.mxu0 %v10727_v46  ;;  %v512_v61 = vld [vmem:[%s10937_s22 + $0x68] sm:$0xff]  ;;  %v513_v62 = vld [vmem:[%s10937_s22 + $0x70] sm:$0xff]  ;;  %v9787_v63 = vpack.i.bf16 %v829_v50, %v828_v49 }
  0xa2   : > { %v9466_v6 = vunpack.i.h.bf16 %v9464_v4  ;;  %v9465_v7 = vunpack.i.l.bf16 %v9464_v4  ;;  %9748 = vrot.lane.b32.xlu0 %v9747_v54, %s10821_s27  ;;  %8713 = vmatprep.mubr.msk.bf16.mxu0 %vm3120_vm5, %v2911_v60  ;;  %v924_v54 = vld [vmem:[%s10937_s22 + $0x194] sm:$0xff] }
  0xa3   : > { %v2525_v9 = vsel %vm2518_vm1, %v508_v52, %v9460_v3  ;;  %v2526_v10 = vsel %vm2518_vm1, %v509_v53, %v9461_v2  ;;  %9753 = vrot.lane.b32.xlu1 %v9752_v55, %s10823_s21  ;;  %4787 = vmatprep.subr.bf16.mxu0 %v10819_v17  ;;  %v925_v55 = vld [vmem:[%s10937_s22 + $0x1a4] sm:$0xff]  ;;  %v639_v4 = vld [vmem:[%s10937_s22 + $0x1b1] sm:$0xff] }
  0xa4   : > { %v2622_v14 = vsel %vm2615_vm2, %v2525_v9, %v9465_v7  ;;  %v2623_v15 = vsel %vm2615_vm2, %v2526_v10, %v9466_v6  ;;  %v9469_v16 = vpop.permute.xlu0 %9468  ;;  %3325 = vmatmul.mubr.bf16.gmra.mrb[8].mxu0 %v2910_v5  ;;  %v9792_v0 = vpack.i.bf16 %v925_v55, %v924_v54  ;;  %v638_v3 = vld [vmem:[%s10937_s22 + $0x1a9] sm:$0xff]  ;;  %v735_v10 = vld [vmem:[%s10937_s22 + $0x1b2] sm:$0xff] }
  0xa5   : > { %v9471_v20 = vunpack.i.h.bf16 %v9469_v16  ;;  %v9470_v21 = vunpack.i.l.bf16 %v9469_v16  ;;  %v9474_v22 = vpop.permute.xlu1 %9473  ;;  %v734_v9 = vld [vmem:[%s10937_s22 + $0x1aa] sm:$0xff]  ;;  %v9797_v18 = vpack.i.bf16 %v639_v4, %v638_v3 }
  0xa6   : > { %v9476_v23 = vunpack.i.h.bf16 %v9474_v22  ;;  %v9475_v24 = vunpack.i.l.bf16 %v9474_v22  ;;  %9758 = vrot.lane.b32.xlu0 %v9757_v8, %s10820_s20  ;;  %v830_v22 = vld [vmem:[%s10937_s22 + $0x1ab] sm:$0xff] }
  0xa7   : > { %9763 = vrot.lane.b32.xlu1 %v9762_v11, %s10822_s17  ;;  %v2719_v29 = vsel %vm2712_vm3, %v2622_v14, %v9470_v21  ;;  %v2720_v30 = vsel %vm2712_vm3, %v2623_v15, %v9471_v20  ;;  %v9802_v21 = vpack.i.bf16 %v735_v10, %v734_v9 }
  0xa8   : > { %v2913_v33 = vpack.c.bf16 %v9476_v23, %v9475_v24  ;;  %v9479_v34 = vpop.permute.xlu0 %9478  ;;  %v2816_v35 = vsel %vm2809_vm4, %v2719_v29, %v9475_v24  ;;  %v2817_v36 = vsel %vm2809_vm4, %v2720_v30, %v9476_v23  ;;  %v831_v23 = vld [vmem:[%s10937_s22 + $0x1b3] sm:$0xff] }
  0xa9   : > { %v9481_v39 = vunpack.i.h.bf16 %v9479_v34  ;;  %v9480_v40 = vunpack.i.l.bf16 %v9479_v34  ;;  %v9484_v41 = vpop.permute.xlu1 %9483  ;;  %v2912_v42 = vpack.c.bf16 %v2817_v36, %v2816_v35  ;;  %v514_v34 = vld [vmem:[%s10937_s22 + $0x80] sm:$0xff]  ;;  %v515_v35 = vld [vmem:[%s10937_s22 + $0x88] sm:$0xff]  ;;  %v9807_v36 = vpack.i.bf16 %v831_v23, %v830_v22 }
  0xaa   : > { %v9486_v43 = vunpack.i.h.bf16 %v9484_v41  ;;  %v9485_v44 = vunpack.i.l.bf16 %v9484_v41  ;;  %9768 = vrot.lane.b32.xlu0 %v9767_v27, %s10821_s27  ;;  %8714 = vmatprep.mubr.msk.bf16.mxu0 %vm3120_vm5, %v2913_v33  ;;  %v926_v27 = vld [vmem:[%s10937_s22 + $0x1ac] sm:$0xff] }
  0xab   : > { %v2527_v46 = vsel %vm2518_vm1, %v510_v25, %v9480_v40  ;;  %v2528_v47 = vsel %vm2518_vm1, %v511_v26, %v9481_v39  ;;  %9773 = vrot.lane.b32.xlu1 %v9772_v28, %s10823_s21  ;;  %v927_v28 = vld [vmem:[%s10937_s22 + $0x1b4] sm:$0xff]  ;;  %v640_v40 = vld [vmem:[%s10937_s22 + $0x1c1] sm:$0xff]  ;;  %v641_v41 = vld [vmem:[%s10937_s22 + $0x1c9] sm:$0xff] }
  0xac   : > { %v2624_v51 = vsel %vm2615_vm2, %v2527_v46, %v9485_v44  ;;  %v2625_v52 = vsel %vm2615_vm2, %v2528_v47, %v9486_v43  ;;  %v9489_v53 = vpop.permute.xlu0 %9488  ;;  %3335 = vmatmul.mubr.bf16.gmra.mrb[12].mxu0 %v2912_v42  ;;  %v9812_v37 = vpack.i.bf16 %v927_v28, %v926_v27  ;;  %v736_v46 = vld [vmem:[%s10937_s22 + $0x1c2] sm:$0xff]  ;;  %v737_v47 = vld [vmem:[%s10937_s22 + $0x1ca] sm:$0xff]  ;;  %v9817_v54 = vpack.i.bf16 %v641_v41, %v640_v40 }
  0xad   : > { %v9491_v56 = vunpack.i.h.bf16 %v9489_v53  ;;  %v9490_v57 = vunpack.i.l.bf16 %v9489_v53  ;;  %v9494_v58 = vpop.permute.xlu1 %9493 }
  0xae   : > { %v9496_v59 = vunpack.i.h.bf16 %v9494_v58  ;;  %v9495_v60 = vunpack.i.l.bf16 %v9494_v58  ;;  %9778 = vrot.lane.b32.xlu0 %v9777_v45, %s10820_s20  ;;  %v832_v58 = vld [vmem:[%s10937_s22 + $0x1c3] sm:$0xff] }
  0xaf   : > { %9783 = vrot.lane.b32.xlu1 %v9782_v48, %s10822_s17  ;;  %v2721_v1 = vsel %vm2712_vm3, %v2624_v51, %v9490_v57  ;;  %v2722_v2 = vsel %vm2712_vm3, %v2625_v52, %v9491_v56  ;;  %v9822_v57 = vpack.i.bf16 %v737_v47, %v736_v46 }
  0xb0   : > { %v2915_v5 = vpack.c.bf16 %v9496_v59, %v9495_v60  ;;  %v9499_v6 = vpop.permute.xlu0 %9498  ;;  %v2818_v7 = vsel %vm2809_vm4, %v2721_v1, %v9495_v60  ;;  %v2819_v8 = vsel %vm2809_vm4, %v2722_v2, %v9496_v59  ;;  %v833_v59 = vld [vmem:[%s10937_s22 + $0x1cb] sm:$0xff] }
  0xb1   : > { %v9501_v11 = vunpack.i.h.bf16 %v9499_v6  ;;  %v9500_v12 = vunpack.i.l.bf16 %v9499_v6  ;;  %v9504_v13 = vpop.permute.xlu1 %9503  ;;  %v2914_v14 = vpack.c.bf16 %v2819_v8, %v2818_v7  ;;  %v516_v6 = vld [vmem:[%s10937_s22 + $0x90] sm:$0xff]  ;;  %v517_v7 = vld [vmem:[%s10937_s22 + $0xa0] sm:$0xff]  ;;  %v9827_v8 = vpack.i.bf16 %v833_v59, %v832_v58 }
  0xb2   : > { %v9506_v15 = vunpack.i.h.bf16 %v9504_v13  ;;  %v9505_v16 = vunpack.i.l.bf16 %v9504_v13  ;;  %9788 = vrot.lane.b32.xlu0 %v9787_v63, %s10821_s27  ;;  %8715 = vmatprep.mubr.msk.bf16.mxu0 %vm3120_vm5, %v2915_v5  ;;  %v928_v63 = vld [vmem:[%s10937_s22 + $0x1c4] sm:$0xff] }
  0xb3   : > { %v2529_v19 = vsel %vm2518_vm1, %v512_v61, %v9500_v12  ;;  %v2530_v20 = vsel %vm2518_vm1, %v513_v62, %v9501_v11  ;;  %9793 = vrot.lane.b32.xlu1 %v9792_v0, %s10823_s21  ;;  %v929_v0 = vld [vmem:[%s10937_s22 + $0x1cc] sm:$0xff]  ;;  %v643_v13 = vld [vmem:[%s10937_s22 + $0x1e1] sm:$0xff] }
  0xb4   : > { %v2626_v24 = vsel %vm2615_vm2, %v2529_v19, %v9505_v16  ;;  %v2627_v25 = vsel %vm2615_vm2, %v2530_v20, %v9506_v15  ;;  %v9509_v26 = vpop.permute.xlu0 %9508  ;;  %3345 = vmatmul.mubr.bf16.gmra.mrb[16].mxu0 %v2914_v14  ;;  %v9832_v9 = vpack.i.bf16 %v929_v0, %v928_v63  ;;  %v642_v12 = vld [vmem:[%s10937_s22 + $0x1d1] sm:$0xff]  ;;  %v739_v20 = vld [vmem:[%s10937_s22 + $0x1e2] sm:$0xff] }
  0xb5   : > { %v9511_v29 = vunpack.i.h.bf16 %v9509_v26  ;;  %v9510_v30 = vunpack.i.l.bf16 %v9509_v26  ;;  %v9514_v31 = vpop.permute.xlu1 %9513  ;;  %v738_v19 = vld [vmem:[%s10937_s22 + $0x1d2] sm:$0xff]  ;;  %v9837_v28 = vpack.i.bf16 %v643_v13, %v642_v12 }
  0xb6   : > { %v9516_v32 = vunpack.i.h.bf16 %v9514_v31  ;;  %v9515_v33 = vunpack.i.l.bf16 %v9514_v31  ;;  %9798 = vrot.lane.b32.xlu0 %v9797_v18, %s10820_s20  ;;  %v9842_v31 = vpack.i.bf16 %v739_v20, %v738_v19  ;;  %v520_v19 = vld [vmem:[%s10937_s22 + $0xc0] sm:$0xff] }
  0xb7   : > { %9803 = vrot.lane.b32.xlu1 %v9802_v21, %s10822_s17  ;;  %v2723_v38 = vsel %vm2712_vm3, %v2626_v24, %v9510_v30  ;;  %v2724_v39 = vsel %vm2712_vm3, %v2627_v25, %v9511_v29  ;;  %v10728_v21 = vld [vmem:[%s14318_s4 + $0x20] sm:$0xff]  }
  0xb8   : > { %v2917_v42 = vpack.c.bf16 %v9516_v32, %v9515_v33  ;;  %v9519_v43 = vpop.permute.xlu0 %9518  ;;  %v2820_v44 = vsel %vm2809_vm4, %v2723_v38, %v9515_v33  ;;  %v2821_v45 = vsel %vm2809_vm4, %v2724_v39, %v9516_v32  ;;  %v834_v32 = vld [vmem:[%s10937_s22 + $0x1d3] sm:$0xff]  ;;  %v835_v33 = vld [vmem:[%s10937_s22 + $0x1e3] sm:$0xff]  ;;  %4788 = vmatpush1.bf16.msra.mxu0 %v10728_v21 }
  0xb9   : > { %v9521_v48 = vunpack.i.h.bf16 %v9519_v43  ;;  %v9520_v49 = vunpack.i.l.bf16 %v9519_v43  ;;  %v9524_v50 = vpop.permute.xlu1 %9523  ;;  %v2916_v51 = vpack.c.bf16 %v2821_v45, %v2820_v44  ;;  %v931_v38 = vld [vmem:[%s10937_s22 + $0x1e4] sm:$0xff]  ;;  %4789 = vmatprep.subr.bf16.mxu0 %v10819_v17  ;;  %v519_v45 = vld [vmem:[%s10937_s22 + $0xb0] sm:$0xff]  ;;  %v9847_v46 = vpack.i.bf16 %v835_v33, %v834_v32 }
  0xba   : > { %v9526_v52 = vunpack.i.h.bf16 %v9524_v50  ;;  %v9525_v53 = vunpack.i.l.bf16 %v9524_v50  ;;  %9808 = vrot.lane.b32.xlu0 %v9807_v36, %s10821_s27  ;;  %8716 = vmatprep.mubr.msk.bf16.mxu0 %vm3120_vm5, %v2917_v42  ;;  %v518_v44 = vld [vmem:[%s10937_s22 + $0xa8] sm:$0xff] }
  0xbb   : > { %v2531_v55 = vsel %vm2518_vm1, %v514_v34, %v9520_v49  ;;  %v2532_v56 = vsel %vm2518_vm1, %v515_v35, %v9521_v48  ;;  %9813 = vrot.lane.b32.xlu1 %v9812_v37, %s10823_s21  ;;  %v930_v37 = vld [vmem:[%s10937_s22 + $0x1d4] sm:$0xff]  ;;  %v644_v50 = vld [vmem:[%s10937_s22 + $0x1e9] sm:$0xff] }
  0xbc   : > { %v2628_v60 = vsel %vm2615_vm2, %v2531_v55, %v9525_v53  ;;  %v2629_v61 = vsel %vm2615_vm2, %v2532_v56, %v9526_v52  ;;  %v9529_v62 = vpop.permute.xlu0 %9528  ;;  %3355 = vmatmul.mubr.bf16.gmra.mrb[20].mxu0 %v2916_v51  ;;  %v9852_v47 = vpack.i.bf16 %v931_v38, %v930_v37  ;;  %v645_v51 = vld [vmem:[%s10937_s22 + $0x1f1] sm:$0xff] }
  0xbd   : > { %v9531_v1 = vunpack.i.h.bf16 %v9529_v62  ;;  %v9530_v2 = vunpack.i.l.bf16 %v9529_v62  ;;  %v9534_v3 = vpop.permute.xlu1 %9533  ;;  %v740_v56 = vld [vmem:[%s10937_s22 + $0x1ea] sm:$0xff]  ;;  %v9857_v0 = vpack.i.bf16 %v645_v51, %v644_v50 }
  0xbe   : > { %v9536_v4 = vunpack.i.h.bf16 %v9534_v3  ;;  %v9535_v5 = vunpack.i.l.bf16 %v9534_v3  ;;  %9818 = vrot.lane.b32.xlu0 %v9817_v54, %s10820_s20 }
  0xbf   : > { %9823 = vrot.lane.b32.xlu1 %v9822_v57, %s10822_s17  ;;  %v2725_v10 = vsel %vm2712_vm3, %v2628_v60, %v9530_v2  ;;  %v2726_v11 = vsel %vm2712_vm3, %v2629_v61, %v9531_v1  ;;  %v741_v57 = vld [vmem:[%s10937_s22 + $0x1f2] sm:$0xff] }
  0xc0   : > { %v2919_v14 = vpack.c.bf16 %v9536_v4, %v9535_v5  ;;  %v9539_v15 = vpop.permute.xlu0 %9538  ;;  %v2822_v16 = vsel %vm2809_vm4, %v2725_v10, %v9535_v5  ;;  %v2823_v18 = vsel %vm2809_vm4, %v2726_v11, %v9536_v4  ;;  %v9862_v3 = vpack.i.bf16 %v741_v57, %v740_v56  ;;  %v836_v4 = vld [vmem:[%s10937_s22 + $0x1eb] sm:$0xff]  ;;  %v837_v5 = vld [vmem:[%s10937_s22 + $0x1f3] sm:$0xff] }
  0xc1   : > { %v9541_v22 = vunpack.i.h.bf16 %v9539_v15  ;;  %v9540_v23 = vunpack.i.l.bf16 %v9539_v15  ;;  %v9544_v24 = vpop.permute.xlu1 %9543  ;;  %v2918_v25 = vpack.c.bf16 %v2823_v18, %v2822_v16  ;;  %v933_v10 = vld [vmem:[%s10937_s22 + $0x1f4] sm:$0xff]  ;;  %v9867_v18 = vpack.i.bf16 %v837_v5, %v836_v4  ;;  %v745_v5 = vld [vmem:[%s10937_s22 + $0x222] sm:$0xff] }
  0xc2   : > { %v9546_v26 = vunpack.i.h.bf16 %v9544_v24  ;;  %v9545_v27 = vunpack.i.l.bf16 %v9544_v24  ;;  %9828 = vrot.lane.b32.xlu0 %v9827_v8, %s10821_s27  ;;  %8717 = vmatprep.mubr.msk.bf16.mxu0 %vm3120_vm5, %v2919_v14  ;;  %v10729_v14 = vld [vmem:[%s14317_s3] sm:$0xff]   ;;  %v647_v24 = vld [vmem:[%s10937_s22 + $0x209] sm:$0xff]  ;;  %v744_v4 = vld [vmem:[%s10937_s22 + $0x212] sm:$0xff] }
  0xc3   : > { %v2533_v29 = vsel %vm2518_vm1, %v516_v6, %v9540_v23  ;;  %v2534_v30 = vsel %vm2518_vm1, %v517_v7, %v9541_v22  ;;  %9833 = vrot.lane.b32.xlu1 %v9832_v9, %s10823_s21  ;;  %v932_v9 = vld [vmem:[%s10937_s22 + $0x1ec] sm:$0xff]  ;;  %v646_v23 = vld [vmem:[%s10937_s22 + $0x201] sm:$0xff]  ;;  %4291 = vmatpush1.bf16.msra.mxu1 %v10729_v14 }
  0xc4   : > { %v2630_v34 = vsel %vm2615_vm2, %v2533_v29, %v9545_v27  ;;  %v2631_v35 = vsel %vm2615_vm2, %v2534_v30, %v9546_v26  ;;  %v9549_v36 = vpop.permute.xlu0 %9548  ;;  %3365 = vmatmul.mubr.bf16.gmra.mrb[24].mxu0 %v2918_v25  ;;  %v9872_v20 = vpack.i.bf16 %v933_v10, %v932_v9  ;;  %v521_v27 = vld [vmem:[%s10937_s22 + $0xc8] sm:$0xff]  ;;  %4292 = vmatprep.subr.bf16.mxu1 %v10819_v17  ;;  %v522_v57 = vld [vmem:[%s10937_s22 + $0xd0] sm:$0xff]  ;;  %v10732_v10 = vld [vmem:[%s14317_s3 + $0x18] sm:$0xff]  }
  0xc5   : > { %v9551_v39 = vunpack.i.h.bf16 %v9549_v36  ;;  %v9550_v40 = vunpack.i.l.bf16 %v9549_v36  ;;  %v9554_v41 = vpop.permute.xlu1 %9553  ;;  %v742_v30 = vld [vmem:[%s10937_s22 + $0x202] sm:$0xff] }
  0xc6   : > { %v9556_v42 = vunpack.i.h.bf16 %v9554_v41  ;;  %v9555_v43 = vunpack.i.l.bf16 %v9554_v41  ;;  %9838 = vrot.lane.b32.xlu0 %v9837_v28, %s10820_s20  ;;  %v10730_v36 = vld [vmem:[%s14317_s3 + $0x8] sm:$0xff]  }
  0xc7   : > { %9843 = vrot.lane.b32.xlu1 %v9842_v31, %s10822_s17  ;;  %v2727_v48 = vsel %vm2712_vm3, %v2630_v34, %v9550_v40  ;;  %v2728_v49 = vsel %vm2712_vm3, %v2631_v35, %v9551_v39  ;;  %v743_v31 = vld [vmem:[%s10937_s22 + $0x20a] sm:$0xff]  ;;  %v9877_v39 = vpack.i.bf16 %v647_v24, %v646_v23  ;;  %4293 = vmatpush1.bf16.msra.mxu1 %v10730_v36  ;;  %v936_v23 = vld [vmem:[%s10937_s22 + $0x214] sm:$0xff] }
  0xc8   : > { %v2921_v52 = vpack.c.bf16 %v9556_v42, %v9555_v43  ;;  %v9559_v53 = vpop.permute.xlu0 %9558  ;;  %v2824_v54 = vsel %vm2809_vm4, %v2727_v48, %v9555_v43  ;;  %v2825_v55 = vsel %vm2809_vm4, %v2728_v49, %v9556_v42  ;;  %v9882_v42 = vpack.i.bf16 %v743_v31, %v742_v30  ;;  %v838_v43 = vld [vmem:[%s10937_s22 + $0x203] sm:$0xff]  ;;  %v935_v49 = vld [vmem:[%s10937_s22 + $0x20c] sm:$0xff]  ;;  %4294 = vmatprep.subr.bf16.mxu1 %v10819_v17 }
  0xc9   : > { %v9561_v58 = vunpack.i.h.bf16 %v9559_v53  ;;  %v9560_v59 = vunpack.i.l.bf16 %v9559_v53  ;;  %v9564_v60 = vpop.permute.xlu1 %9563  ;;  %v2920_v61 = vpack.c.bf16 %v2825_v55, %v2824_v54  ;;  %v934_v48 = vld [vmem:[%s10937_s22 + $0x204] sm:$0xff]  ;;  %v10731_v53 = vld [vmem:[%s14317_s3 + $0x10] sm:$0xff]  }
  0xca   : > { %v9566_v62 = vunpack.i.h.bf16 %v9564_v60  ;;  %v9565_v63 = vunpack.i.l.bf16 %v9564_v60  ;;  %9848 = vrot.lane.b32.xlu0 %v9847_v46, %s10821_s27  ;;  %8718 = vmatprep.mubr.msk.bf16.mxu0 %vm3120_vm5, %v2921_v52  ;;  %v937_v24 = vld [vmem:[%s10937_s22 + $0x224] sm:$0xff] }
  0xcb   : > { %v2535_v1 = vsel %vm2518_vm1, %v518_v44, %v9560_v59  ;;  %v2536_v2 = vsel %vm2518_vm1, %v519_v45, %v9561_v58  ;;  %9853 = vrot.lane.b32.xlu1 %v9852_v47, %s10823_s21  ;;  %v839_v44 = vld [vmem:[%s10937_s22 + $0x20b] sm:$0xff]  ;;  %v9892_v58 = vpack.i.bf16 %v935_v49, %v934_v48  ;;  %4295 = vmatpush1.bf16.msra.mxu1 %v10731_v53 }
  0xcc   : > { %v2632_v6 = vsel %vm2615_vm2, %v2535_v1, %v9565_v63  ;;  %v2633_v7 = vsel %vm2615_vm2, %v2536_v2, %v9566_v62  ;;  %v9569_v8 = vpop.permute.xlu0 %9568  ;;  %3375 = vmatmul.mubr.bf16.gmra.mrb[28].mxu0 %v2920_v61  ;;  %v9887_v56 = vpack.i.bf16 %v839_v44, %v838_v43  ;;  %v648_v61 = vld [vmem:[%s10937_s22 + $0x211] sm:$0xff]  ;;  %v649_v62 = vld [vmem:[%s10937_s22 + $0x221] sm:$0xff]  ;;  %4296 = vmatprep.subr.bf16.mxu1 %v10819_v17  ;;  %v650_v36 = vld [vmem:[%s10937_s22 + $0x229] sm:$0xff] }
  0xcd   : > { %v9571_v11 = vunpack.i.h.bf16 %v9569_v8  ;;  %v9570_v12 = vunpack.i.l.bf16 %v9569_v8  ;;  %v9574_v13 = vpop.permute.xlu1 %9573  ;;  %v523_v1 = vld [vmem:[%s10937_s22 + $0xe0] sm:$0xff]  ;;  %v746_v43 = vld [vmem:[%s10937_s22 + $0x22a] sm:$0xff]  ;;  %v747_v44 = vld [vmem:[%s10937_s22 + $0x232] sm:$0xff] }
  0xce   : > { %v9576_v15 = vunpack.i.h.bf16 %v9574_v13  ;;  %v9575_v16 = vunpack.i.l.bf16 %v9574_v13  ;;  %9858 = vrot.lane.b32.xlu0 %v9857_v0, %s10820_s20  ;;  %v9897_v13 = vpack.i.bf16 %v649_v62, %v648_v61  ;;  %v10734_v49 = vld [vmem:[%s14317_s3 + $0x28] sm:$0xff]   ;;  %v939_v62 = vld [vmem:[%s10937_s22 + $0x234] sm:$0xff] }
  0xcf   : > { %9863 = vrot.lane.b32.xlu1 %v9862_v3, %s10822_s17  ;;  %v2729_v21 = vsel %vm2712_vm3, %v2632_v6, %v9570_v12  ;;  %v2730_v22 = vsel %vm2712_vm3, %v2633_v7, %v9571_v11  ;;  %4297 = vmatpush1.bf16.msra.mxu1 %v10732_v10  ;;  %v938_v61 = vld [vmem:[%s10937_s22 + $0x22c] sm:$0xff]  ;;  %v652_v10 = vld [vmem:[%s10937_s22 + $0x241] sm:$0xff] }
  0xd0   : > { %v2923_v25 = vpack.c.bf16 %v9576_v15, %v9575_v16  ;;  %v9579_v26 = vpop.permute.xlu0 %9578  ;;  %v2826_v28 = vsel %vm2809_vm4, %v2729_v21, %v9575_v16  ;;  %v2827_v29 = vsel %vm2809_vm4, %v2730_v22, %v9576_v15  ;;  %v9902_v16 = vpack.i.bf16 %v745_v5, %v744_v4  ;;  %4298 = vmatprep.subr.bf16.mxu1 %v10819_v17 }
  0xd1   : > { %v9581_v32 = vunpack.i.h.bf16 %v9579_v26  ;;  %v9580_v33 = vunpack.i.l.bf16 %v9579_v26  ;;  %v9584_v34 = vpop.permute.xlu1 %9583  ;;  %v2922_v35 = vpack.c.bf16 %v2827_v29, %v2826_v28  ;;  %v10733_v28 = vld [vmem:[%s14317_s3 + $0x20] sm:$0xff]  }
  0xd2   : > { %v9586_v37 = vunpack.i.h.bf16 %v9584_v34  ;;  %v9585_v38 = vunpack.i.l.bf16 %v9584_v34  ;;  %9868 = vrot.lane.b32.xlu0 %v9867_v18, %s10821_s27  ;;  %8719 = vmatprep.mubr.msk.bf16.mxu0 %vm3120_vm5, %v2923_v25  ;;  %v840_v18 = vld [vmem:[%s10937_s22 + $0x213] sm:$0xff] }
  0xd3   : > { %v2537_v40 = vsel %vm2518_vm1, %v520_v19, %v9580_v33  ;;  %v2538_v41 = vsel %vm2518_vm1, %v521_v27, %v9581_v32  ;;  %9873 = vrot.lane.b32.xlu1 %v9872_v20, %s10823_s21  ;;  %v841_v19 = vld [vmem:[%s10937_s22 + $0x223] sm:$0xff]  ;;  %v9912_v33 = vpack.i.bf16 %v937_v24, %v936_v23  ;;  %4299 = vmatpush1.bf16.msra.mxu1 %v10733_v28  ;;  %v10737_v24 = vld [vmem:[%s14317_s3 + $0x38] sm:$0xff]  }
  0xd4   : > { %v2634_v45 = vsel %vm2615_vm2, %v2537_v40, %v9585_v38  ;;  %v2635_v46 = vsel %vm2615_vm2, %v2538_v41, %v9586_v37  ;;  %v9589_v47 = vpop.permute.xlu0 %9588  ;;  %3385 = vmatmul.mubr.bf16.gmra.mrb[32].mxu0 %v2922_v35  ;;  %v9907_v31 = vpack.i.bf16 %v841_v19, %v840_v18  ;;  %v524_v32 = vld [vmem:[%s10937_s22 + $0xe8] sm:$0xff]  ;;  %v651_v37 = vld [vmem:[%s10937_s22 + $0x231] sm:$0xff]  ;;  %4300 = vmatprep.subr.bf16.mxu1 %v10819_v17 }
  0xd5   : > { %v9591_v50 = vunpack.i.h.bf16 %v9589_v47  ;;  %v9590_v51 = vunpack.i.l.bf16 %v9589_v47  ;;  %v9594_v52 = vpop.permute.xlu1 %9593  ;;  %v525_v40 = vld [vmem:[%s10937_s22 + $0xf0] sm:$0xff]  ;;  %v748_v18 = vld [vmem:[%s10937_s22 + $0x242] sm:$0xff] }
  0xd6   : > { %v9596_v54 = vunpack.i.h.bf16 %v9594_v52  ;;  %v9595_v55 = vunpack.i.l.bf16 %v9594_v52  ;;  %9878 = vrot.lane.b32.xlu0 %v9877_v39, %s10820_s20  ;;  %v9917_v52 = vpack.i.bf16 %v651_v37, %v650_v36  ;;  %v749_v19 = vld [vmem:[%s10937_s22 + $0x24a] sm:$0xff] }
  0xd7   : > { %9883 = vrot.lane.b32.xlu1 %v9882_v42, %s10822_s17  ;;  %v2731_v59 = vsel %vm2712_vm3, %v2634_v45, %v9590_v51  ;;  %v2732_v60 = vsel %vm2712_vm3, %v2635_v46, %v9591_v50  ;;  %4301 = vmatpush1.bf16.msra.mxu1 %v10734_v49  ;;  %v940_v36 = vld [vmem:[%s10937_s22 + $0x244] sm:$0xff]  ;;  %v941_v37 = vld [vmem:[%s10937_s22 + $0x24c] sm:$0xff] }
  0xd8   : > { %v2925_v63 = vpack.c.bf16 %v9596_v54, %v9595_v55  ;;  %v9599_v0 = vpop.permute.xlu0 %9598  ;;  %v2828_v2 = vsel %vm2809_vm4, %v2731_v59, %v9595_v55  ;;  %v2829_v3 = vsel %vm2809_vm4, %v2732_v60, %v9596_v54  ;;  %v9922_v55 = vpack.i.bf16 %v747_v44, %v746_v43  ;;  %4302 = vmatprep.subr.bf16.mxu1 %v10819_v17 }
  0xd9   : > { %v9601_v6 = vunpack.i.h.bf16 %v9599_v0  ;;  %v9600_v7 = vunpack.i.l.bf16 %v9599_v0  ;;  %v9604_v8 = vpop.permute.xlu1 %9603  ;;  %v2924_v9 = vpack.c.bf16 %v2829_v3, %v2828_v2  ;;  %v10735_v2 = vld [vmem:[%s14317_s3 + $0x30] sm:$0xff]  }
  0xda   : > { %v9606_v11 = vunpack.i.h.bf16 %v9604_v8  ;;  %v9605_v12 = vunpack.i.l.bf16 %v9604_v8  ;;  %9888 = vrot.lane.b32.xlu0 %v9887_v56, %s10821_s27  ;;  %8720 = vmatprep.mubr.msk.bf16.mxu0 %vm3120_vm5, %v2925_v63  ;;  %v842_v56 = vld [vmem:[%s10937_s22 + $0x22b] sm:$0xff] }
  0xdb   : > { %v2539_v14 = vsel %vm2518_vm1, %v522_v57, %v9600_v7  ;;  %v2540_v15 = vsel %vm2518_vm1, %v523_v1, %v9601_v6  ;;  %9893 = vrot.lane.b32.xlu1 %v9892_v58, %s10823_s21  ;;  %v843_v57 = vld [vmem:[%s10937_s22 + $0x233] sm:$0xff]  ;;  %v526_v6 = vld [vmem:[%s10937_s22 + $0x100] sm:$0xff]  ;;  %v9932_v7 = vpack.i.bf16 %v939_v62, %v938_v61  ;;  %4303 = vmatpush1.bf16.msra.mxu1 %v10735_v2 }
  0xdc   : > { %v2636_v20 = vsel %vm2615_vm2, %v2539_v14, %v9605_v12  ;;  %v2637_v21 = vsel %vm2615_vm2, %v2540_v15, %v9606_v11  ;;  %v9609_v22 = vpop.permute.xlu0 %9608  ;;  %3395 = vmatmul.mubr.bf16.gmra.mrb[36].mxu0 %v2924_v9  ;;  %v9927_v5 = vpack.i.bf16 %v843_v57, %v842_v56  ;;  %v653_v11 = vld [vmem:[%s10937_s22 + $0x249] sm:$0xff]  ;;  %4304 = vmatprep.subr.bf16.mxu1 %v10819_v17  ;;  %v750_v57 = vld [vmem:[%s10937_s22 + $0x252] sm:$0xff] }
  0xdd   : > { %v9611_v25 = vunpack.i.h.bf16 %v9609_v22  ;;  %v9610_v26 = vunpack.i.l.bf16 %v9609_v22  ;;  %v9614_v27 = vpop.permute.xlu1 %9613  ;;  %v527_v14 = vld [vmem:[%s10937_s22 + $0x108] sm:$0xff] }
  0xde   : > { %v9616_v29 = vunpack.i.h.bf16 %v9614_v27  ;;  %v9615_v30 = vunpack.i.l.bf16 %v9614_v27  ;;  %9898 = vrot.lane.b32.xlu0 %v9897_v13, %s10820_s20  ;;  %v9937_v27 = vpack.i.bf16 %v653_v11, %v652_v10  ;;  %v942_v10 = vld [vmem:[%s10937_s22 + $0x254] sm:$0xff]  ;;  %v943_v11 = vld [vmem:[%s10937_s22 + $0x264] sm:$0xff] }
  0xdf   : > { %9903 = vrot.lane.b32.xlu1 %v9902_v16, %s10822_s17  ;;  %v2733_v34 = vsel %vm2712_vm3, %v2636_v20, %v9610_v26  ;;  %v2734_v35 = vsel %vm2712_vm3, %v2637_v21, %v9611_v25  ;;  %4305 = vmatpush1.bf16.msra.mxu1 %v10737_v24  ;;  %v657_v24 = vld [vmem:[%s10937_s22 + $0x271] sm:$0xff] }
  0xe0   : > { %v2927_v38 = vpack.c.bf16 %v9616_v29, %v9615_v30  ;;  %v9619_v39 = vpop.permute.xlu0 %9618  ;;  %v2830_v41 = vsel %vm2809_vm4, %v2733_v34, %v9615_v30  ;;  %v2831_v42 = vsel %vm2809_vm4, %v2734_v35, %v9616_v29  ;;  %v9942_v30 = vpack.i.bf16 %v749_v19, %v748_v18  ;;  %4306 = vmatprep.subr.bf16.mxu1 %v10819_v17  ;;  %v530_v19 = vld [vmem:[%s10937_s22 + $0x128] sm:$0xff] }
  0xe1   : > { %v9621_v45 = vunpack.i.h.bf16 %v9619_v39  ;;  %v9620_v46 = vunpack.i.l.bf16 %v9619_v39  ;;  %v9624_v47 = vpop.permute.xlu1 %9623  ;;  %v2926_v48 = vpack.c.bf16 %v2831_v42, %v2830_v41  ;;  %v10738_v42 = vld [vmem:[%s14317_s3 + $0x40] sm:$0xff]  }
  0xe2   : > { %v9626_v50 = vunpack.i.h.bf16 %v9624_v47  ;;  %v9625_v51 = vunpack.i.l.bf16 %v9624_v47  ;;  %9908 = vrot.lane.b32.xlu0 %v9907_v31, %s10821_s27  ;;  %8721 = vmatprep.mubr.msk.bf16.mxu0 %vm3120_vm5, %v2927_v38  ;;  %v844_v31 = vld [vmem:[%s10937_s22 + $0x243] sm:$0xff]  ;;  %v9952_v47 = vpack.i.bf16 %v941_v37, %v940_v36 }
  0xe3   : > { %v2541_v53 = vsel %vm2518_vm1, %v524_v32, %v9620_v46  ;;  %v2542_v54 = vsel %vm2518_vm1, %v525_v40, %v9621_v45  ;;  %9913 = vrot.lane.b32.xlu1 %v9912_v33, %s10823_s21  ;;  %v845_v32 = vld [vmem:[%s10937_s22 + $0x24b] sm:$0xff]  ;;  %4307 = vmatpush1.bf16.msra.mxu1 %v10738_v42 }
  0xe4   : > { %v2638_v58 = vsel %vm2615_vm2, %v2541_v53, %v9625_v51  ;;  %v2639_v59 = vsel %vm2615_vm2, %v2542_v54, %v9626_v50  ;;  %v9629_v60 = vpop.permute.xlu0 %9628  ;;  %3405 = vmatmul.mubr.bf16.gmra.mrb[40].mxu0 %v2926_v48  ;;  %v10736_v38 = vld [vmem:[%s14318_s4 + $0x28] sm:$0xff]   ;;  %v9947_v45 = vpack.i.bf16 %v845_v32, %v844_v31  ;;  %v528_v46 = vld [vmem:[%s10937_s22 + $0x110] sm:$0xff]  ;;  %v529_v54 = vld [vmem:[%s10937_s22 + $0x120] sm:$0xff] }
  0xe5   : > { %v9631_v63 = vunpack.i.h.bf16 %v9629_v60  ;;  %v9630_v0 = vunpack.i.l.bf16 %v9629_v60  ;;  %v9634_v1 = vpop.permute.xlu1 %9633  ;;  %4790 = vmatpush1.bf16.msra.mxu0 %v10736_v38  ;;  %v654_v50 = vld [vmem:[%s10937_s22 + $0x251] sm:$0xff]  ;;  %v655_v51 = vld [vmem:[%s10937_s22 + $0x261] sm:$0xff] }
  0xe6   : > { %v9636_v3 = vunpack.i.h.bf16 %v9634_v1  ;;  %v9635_v4 = vunpack.i.l.bf16 %v9634_v1  ;;  %9918 = vrot.lane.b32.xlu0 %v9917_v52, %s10820_s20  ;;  %4791 = vmatprep.subr.bf16.mxu0 %v10819_v17  ;;  %v9957_v1 = vpack.i.bf16 %v655_v51, %v654_v50  ;;  %v753_v31 = vld [vmem:[%s10937_s22 + $0x272] sm:$0xff] }
  0xe7   : > { %9923 = vrot.lane.b32.xlu1 %v9922_v55, %s10822_s17  ;;  %v2735_v8 = vsel %vm2712_vm3, %v2638_v58, %v9630_v0  ;;  %v2736_v9 = vsel %vm2712_vm3, %v2639_v59, %v9631_v63  ;;  %v751_v58 = vld [vmem:[%s10937_s22 + $0x262] sm:$0xff]  ;;  %v848_v42 = vld [vmem:[%s10937_s22 + $0x26b] sm:$0xff] }
  0xe8   : > { %v2929_v12 = vpack.c.bf16 %v9636_v3, %v9635_v4  ;;  %v9639_v13 = vpop.permute.xlu0 %9638  ;;  %v2832_v15 = vsel %vm2809_vm4, %v2735_v8, %v9635_v4  ;;  %v2833_v16 = vsel %vm2809_vm4, %v2736_v9, %v9636_v3  ;;  %v9962_v4 = vpack.i.bf16 %v751_v58, %v750_v57 }
  0xe9   : > { %v9641_v20 = vunpack.i.h.bf16 %v9639_v13  ;;  %v9640_v21 = vunpack.i.l.bf16 %v9639_v13  ;;  %v9644_v22 = vpop.permute.xlu1 %9643  ;;  %v2928_v23 = vpack.c.bf16 %v2833_v16, %v2832_v15 }
  0xea   : > { %v9646_v25 = vunpack.i.h.bf16 %v9644_v22  ;;  %v9645_v26 = vunpack.i.l.bf16 %v9644_v22  ;;  %9928 = vrot.lane.b32.xlu0 %v9927_v5, %s10821_s27  ;;  %8722 = vmatprep.mubr.msk.bf16.mxu0 %vm3120_vm5, %v2929_v12  ;;  %v846_v5 = vld [vmem:[%s10937_s22 + $0x253] sm:$0xff] }
  0xeb   : > { %v2543_v28 = vsel %vm2518_vm1, %v526_v6, %v9640_v21  ;;  %v2544_v29 = vsel %vm2518_vm1, %v527_v14, %v9641_v20  ;;  %9933 = vrot.lane.b32.xlu1 %v9932_v7, %s10823_s21  ;;  %v847_v6 = vld [vmem:[%s10937_s22 + $0x263] sm:$0xff]  ;;  %v9972_v20 = vpack.i.bf16 %v943_v11, %v942_v10 }
  0xec   : > { %v2640_v33 = vsel %vm2615_vm2, %v2543_v28, %v9645_v26  ;;  %v2641_v34 = vsel %vm2615_vm2, %v2544_v29, %v9646_v25  ;;  %v9649_v35 = vpop.permute.xlu0 %9648  ;;  %3415 = vmatmul.mubr.bf16.gmra.mrb[44].mxu0 %v2928_v23  ;;  %v9967_v18 = vpack.i.bf16 %v847_v6, %v846_v5  ;;  %v656_v23 = vld [vmem:[%s10937_s22 + $0x269] sm:$0xff] }
  0xed   : > { %v9651_v39 = vunpack.i.h.bf16 %v9649_v35  ;;  %v9650_v40 = vunpack.i.l.bf16 %v9649_v35  ;;  %v9654_v41 = vpop.permute.xlu1 %9653  ;;  %v9977_v38 = vpack.i.bf16 %v657_v24, %v656_v23 }
  0xee   : > { %v9656_v43 = vunpack.i.h.bf16 %v9654_v41  ;;  %v9655_v44 = vunpack.i.l.bf16 %v9654_v41  ;;  %9938 = vrot.lane.b32.xlu0 %v9937_v27, %s10820_s20  ;;  %v531_v27 = vld [vmem:[%s10937_s22 + $0x130] sm:$0xff] }
  0xef   : > { %9943 = vrot.lane.b32.xlu1 %v9942_v30, %s10822_s17  ;;  %v2737_v48 = vsel %vm2712_vm3, %v2640_v33, %v9650_v40  ;;  %v2738_v49 = vsel %vm2712_vm3, %v2641_v34, %v9651_v39  ;;  %v752_v30 = vld [vmem:[%s10937_s22 + $0x26a] sm:$0xff] }
  0xf0   : > { %v2931_v52 = vpack.c.bf16 %v9656_v43, %v9655_v44  ;;  %v9659_v53 = vpop.permute.xlu0 %9658  ;;  %v2834_v55 = vsel %vm2809_vm4, %v2737_v48, %v9655_v44  ;;  %v2835_v56 = vsel %vm2809_vm4, %v2738_v49, %v9656_v43  ;;  %v9982_v41 = vpack.i.bf16 %v753_v31, %v752_v30  ;;  %v849_v43 = vld [vmem:[%s10937_s22 + $0x273] sm:$0xff] }
  0xf1   : > { %v9661_v59 = vunpack.i.h.bf16 %v9659_v53  ;;  %v9660_v60 = vunpack.i.l.bf16 %v9659_v53  ;;  %v9664_v61 = vpop.permute.xlu1 %9663  ;;  %v2930_v62 = vpack.c.bf16 %v2835_v56, %v2834_v55  ;;  %v945_v48 = vld [vmem:[%s10937_s22 + $0x274] sm:$0xff]  ;;  %v532_v55 = vld [vmem:[%s10937_s22 + $0x140] sm:$0xff] }
  0xf2   : > { %v9666_v63 = vunpack.i.h.bf16 %v9664_v61  ;;  %v9665_v0 = vunpack.i.l.bf16 %v9664_v61  ;;  %9948 = vrot.lane.b32.xlu0 %v9947_v45, %s10821_s27  ;;  %8723 = vmatprep.mubr.msk.bf16.mxu0 %vm3120_vm5, %v2931_v52 }
  0xf3   : > { %v2545_v2 = vsel %vm2518_vm1, %v528_v46, %v9660_v60  ;;  %v2546_v3 = vsel %vm2518_vm1, %v529_v54, %v9661_v59  ;;  %9953 = vrot.lane.b32.xlu1 %v9952_v47, %s10823_s21  ;;  %v944_v47 = vld [vmem:[%s10937_s22 + $0x26c] sm:$0xff]  ;;  %v9987_v54 = vpack.i.bf16 %v849_v43, %v848_v42  ;;  %v658_v59 = vld [vmem:[%s10937_s22 + $0x281] sm:$0xff] }
  0xf4   : > { %v2642_v7 = vsel %vm2615_vm2, %v2545_v2, %v9665_v0  ;;  %v2643_v8 = vsel %vm2615_vm2, %v2546_v3, %v9666_v63  ;;  %v9669_v9 = vpop.permute.xlu0 %9668  ;;  %3425 = vmatmul.mubr.bf16.gmra.mrb[48].mxu0 %v2930_v62  ;;  %v9992_v56 = vpack.i.bf16 %v945_v48, %v944_v47  ;;  %v659_v60 = vld [vmem:[%s10937_s22 + $0x289] sm:$0xff] }
  0xf5   : > { %v9671_v12 = vunpack.i.h.bf16 %v9669_v9  ;;  %v9670_v13 = vunpack.i.l.bf16 %v9669_v9  ;;  %v9674_v14 = vpop.permute.xlu1 %9673  ;;  %v533_v63 = vld [vmem:[%s10937_s22 + $0x148] sm:$0xff]  ;;  %v9997_v10 = vpack.i.bf16 %v659_v60, %v658_v59 }
  0xf6   : > { %v9676_v15 = vunpack.i.h.bf16 %v9674_v14  ;;  %v9675_v16 = vunpack.i.l.bf16 %v9674_v14  ;;  %9958 = vrot.lane.b32.xlu0 %v9957_v1, %s10820_s20  ;;  %v754_v2 = vld [vmem:[%s10937_s22 + $0x282] sm:$0xff]  ;;  %v755_v3 = vld [vmem:[%s10937_s22 + $0x28a] sm:$0xff] }
  0xf7   : > { %9963 = vrot.lane.b32.xlu1 %v9962_v4, %s10822_s17  ;;  %v2739_v21 = vsel %vm2712_vm3, %v2642_v7, %v9670_v13  ;;  %v2740_v22 = vsel %vm2712_vm3, %v2643_v8, %v9671_v12  ;;  %v10002_v13 = vpack.i.bf16 %v755_v3, %v754_v2  ;;  %v850_v14 = vld [vmem:[%s10937_s22 + $0x283] sm:$0xff] }
  0xf8   : > { %v2933_v25 = vpack.c.bf16 %v9676_v15, %v9675_v16  ;;  %v9679_v26 = vpop.permute.xlu0 %9678  ;;  %v2836_v28 = vsel %vm2809_vm4, %v2739_v21, %v9675_v16  ;;  %v2837_v29 = vsel %vm2809_vm4, %v2740_v22, %v9676_v15  ;;  %v851_v15 = vld [vmem:[%s10937_s22 + $0x28b] sm:$0xff] }
  0xf9   : > { %v9681_v32 = vunpack.i.h.bf16 %v9679_v26  ;;  %v9680_v33 = vunpack.i.l.bf16 %v9679_v26  ;;  %v9684_v34 = vpop.permute.xlu1 %9683  ;;  %v2932_v35 = vpack.c.bf16 %v2837_v29, %v2836_v28  ;;  %v947_v21 = vld [vmem:[%s10937_s22 + $0x28c] sm:$0xff] }
  0xfa   : > { %v9686_v36 = vunpack.i.h.bf16 %v9684_v34  ;;  %v9685_v37 = vunpack.i.l.bf16 %v9684_v34  ;;  %9968 = vrot.lane.b32.xlu0 %v9967_v18, %s10821_s27  ;;  %8724 = vmatprep.mubr.msk.bf16.mxu0 %vm3120_vm5, %v2933_v25  ;;  %v534_v28 = vld [vmem:[%s10937_s22 + $0x150] sm:$0xff] }
  0xfb   : > { %v2547_v39 = vsel %vm2518_vm1, %v530_v19, %v9680_v33  ;;  %v2548_v40 = vsel %vm2518_vm1, %v531_v27, %v9681_v32  ;;  %9973 = vrot.lane.b32.xlu1 %v9972_v20, %s10823_s21  ;;  %v946_v20 = vld [vmem:[%s10937_s22 + $0x284] sm:$0xff]  ;;  %v10007_v27 = vpack.i.bf16 %v851_v15, %v850_v14  ;;  %v660_v32 = vld [vmem:[%s10937_s22 + $0x291] sm:$0xff] }
  0xfc   : > { %v2644_v44 = vsel %vm2615_vm2, %v2547_v39, %v9685_v37  ;;  %v2645_v45 = vsel %vm2615_vm2, %v2548_v40, %v9686_v36  ;;  %v9689_v46 = vpop.permute.xlu0 %9688  ;;  %3435 = vmatmul.mubr.bf16.gmra.mrb[52].mxu0 %v2932_v35  ;;  %v10012_v29 = vpack.i.bf16 %v947_v21, %v946_v20  ;;  %v661_v33 = vld [vmem:[%s10937_s22 + $0x2a1] sm:$0xff]  ;;  %v756_v39 = vld [vmem:[%s10937_s22 + $0x292] sm:$0xff] }
  0xfd   : > { %v9691_v49 = vunpack.i.h.bf16 %v9689_v46  ;;  %v9690_v50 = vunpack.i.l.bf16 %v9689_v46  ;;  %v9694_v51 = vpop.permute.xlu1 %9693  ;;  %v535_v36 = vld [vmem:[%s10937_s22 + $0x160] sm:$0xff]  ;;  %v10017_v47 = vpack.i.bf16 %v661_v33, %v660_v32 }
  0xfe   : > { %v9696_v52 = vunpack.i.h.bf16 %v9694_v51  ;;  %v9695_v53 = vunpack.i.l.bf16 %v9694_v51  ;;  %9978 = vrot.lane.b32.xlu0 %v9977_v38, %s10820_s20  ;;  %v757_v40 = vld [vmem:[%s10937_s22 + $0x2a2] sm:$0xff]  ;;  %v852_v51 = vld [vmem:[%s10937_s22 + $0x293] sm:$0xff] }
  0xff   : > { %9983 = vrot.lane.b32.xlu1 %v9982_v41, %s10822_s17  ;;  %v2741_v57 = vsel %vm2712_vm3, %v2644_v44, %v9690_v50  ;;  %v2742_v58 = vsel %vm2712_vm3, %v2645_v45, %v9691_v49  ;;  %v10022_v50 = vpack.i.bf16 %v757_v40, %v756_v39 }
 0x100   : > { %v2935_v61 = vpack.c.bf16 %v9696_v52, %v9695_v53  ;;  %v9699_v62 = vpop.permute.xlu0 %9698  ;;  %v2838_v0 = vsel %vm2809_vm4, %v2741_v57, %v9695_v53  ;;  %v2839_v1 = vsel %vm2809_vm4, %v2742_v58, %v9696_v52  ;;  %v853_v52 = vld [vmem:[%s10937_s22 + $0x2a3] sm:$0xff] }
 0x101   : > { %v9701_v4 = vunpack.i.h.bf16 %v9699_v62  ;;  %v9700_v5 = vunpack.i.l.bf16 %v9699_v62  ;;  %v9704_v6 = vpop.permute.xlu1 %9703  ;;  %v2934_v7 = vpack.c.bf16 %v2839_v1, %v2838_v0  ;;  %v949_v57 = vld [vmem:[%s10937_s22 + $0x2a4] sm:$0xff] }
 0x102   : > { %v9706_v8 = vunpack.i.h.bf16 %v9704_v6  ;;  %v9705_v9 = vunpack.i.l.bf16 %v9704_v6  ;;  %9988 = vrot.lane.b32.xlu0 %v9987_v54, %s10821_s27  ;;  %8725 = vmatprep.mubr.msk.bf16.mxu0 %vm3120_vm5, %v2935_v61  ;;  %v536_v0 = vld [vmem:[%s10937_s22 + $0x168] sm:$0xff] }
 0x103   : > { %v2549_v11 = vsel %vm2518_vm1, %v532_v55, %v9700_v5  ;;  %v2550_v12 = vsel %vm2518_vm1, %v533_v63, %v9701_v4  ;;  %9993 = vrot.lane.b32.xlu1 %v9992_v56, %s10823_s21  ;;  %v948_v56 = vld [vmem:[%s10937_s22 + $0x294] sm:$0xff]  ;;  %v10027_v63 = vpack.i.bf16 %v853_v52, %v852_v51  ;;  %v662_v4 = vld [vmem:[%s10937_s22 + $0x2a9] sm:$0xff] }
 0x104   : > { %v2646_v16 = vsel %vm2615_vm2, %v2549_v11, %v9705_v9  ;;  %v2647_v18 = vsel %vm2615_vm2, %v2550_v12, %v9706_v8  ;;  %v9709_v19 = vpop.permute.xlu0 %9708  ;;  %3445 = vmatmul.mubr.bf16.gmra.mrb[56].mxu0 %v2934_v7  ;;  %v10032_v1 = vpack.i.bf16 %v949_v57, %v948_v56  ;;  %v663_v5 = vld [vmem:[%s10937_s22 + $0x2b1] sm:$0xff] }
 0x105   : > { %v9711_v22 = vunpack.i.h.bf16 %v9709_v19  ;;  %v9710_v23 = vunpack.i.l.bf16 %v9709_v19  ;;  %v9714_v24 = vpop.permute.xlu1 %9713  ;;  %v537_v8 = vld [vmem:[%s10937_s22 + $0x170] sm:$0xff]  ;;  %v10037_v20 = vpack.i.bf16 %v663_v5, %v662_v4 }
 0x106   : > { %v9716_v25 = vunpack.i.h.bf16 %v9714_v24  ;;  %v9715_v26 = vunpack.i.l.bf16 %v9714_v24  ;;  %9998 = vrot.lane.b32.xlu0 %v9997_v10, %s10820_s20  ;;  %v758_v11 = vld [vmem:[%s10937_s22 + $0x2aa] sm:$0xff]  ;;  %v759_v12 = vld [vmem:[%s10937_s22 + $0x2b2] sm:$0xff] }
 0x107   : > { %10003 = vrot.lane.b32.xlu1 %v10002_v13, %s10822_s17  ;;  %v2743_v30 = vsel %vm2712_vm3, %v2646_v16, %v9710_v23  ;;  %v2744_v31 = vsel %vm2712_vm3, %v2647_v18, %v9711_v22  ;;  %v10042_v23 = vpack.i.bf16 %v759_v12, %v758_v11  ;;  %v854_v24 = vld [vmem:[%s10937_s22 + $0x2ab] sm:$0xff] }
 0x108   : > { %v2937_v34 = vpack.c.bf16 %v9716_v25, %v9715_v26  ;;  %v9719_v35 = vpop.permute.xlu0 %9718  ;;  %v2840_v37 = vsel %vm2809_vm4, %v2743_v30, %v9715_v26  ;;  %v2841_v38 = vsel %vm2809_vm4, %v2744_v31, %v9716_v25  ;;  %v855_v25 = vld [vmem:[%s10937_s22 + $0x2b3] sm:$0xff] }
 0x109   : > { %v9721_v41 = vunpack.i.h.bf16 %v9719_v35  ;;  %v9720_v42 = vunpack.i.l.bf16 %v9719_v35  ;;  %v9724_v43 = vpop.permute.xlu1 %9723  ;;  %v2936_v44 = vpack.c.bf16 %v2841_v38, %v2840_v37  ;;  %v951_v30 = vld [vmem:[%s10937_s22 + $0x2b4] sm:$0xff]  ;;  %v10047_v37 = vpack.i.bf16 %v855_v25, %v854_v24 }
 0x10a   : > { %v9726_v45 = vunpack.i.h.bf16 %v9724_v43  ;;  %v9725_v46 = vunpack.i.l.bf16 %v9724_v43  ;;  %10008 = vrot.lane.b32.xlu0 %v10007_v27, %s10821_s27  ;;  %8726 = vmatprep.mubr.msk.bf16.mxu0 %vm3120_vm5, %v2937_v34  ;;  %v10739_v43 = vld [vmem:[%s14318_s4 + $0x30] sm:$0xff]  }
 0x10b   : > { %v2551_v48 = vsel %vm2518_vm1, %v534_v28, %v9720_v42  ;;  %v2552_v49 = vsel %vm2518_vm1, %v535_v36, %v9721_v41  ;;  %10013 = vrot.lane.b32.xlu1 %v10012_v29, %s10823_s21  ;;  %v950_v29 = vld [vmem:[%s10937_s22 + $0x2ac] sm:$0xff]  ;;  %v538_v36 = vld [vmem:[%s10937_s22 + $0x180] sm:$0xff]  ;;  %4792 = vmatpush1.bf16.msra.mxu0 %v10739_v43 }
 0x10c   : > { %v2648_v53 = vsel %vm2615_vm2, %v2551_v48, %v9725_v46  ;;  %v2649_v54 = vsel %vm2615_vm2, %v2552_v49, %v9726_v45  ;;  %v9729_v55 = vpop.permute.xlu0 %9728  ;;  %3455 = vmatmul.mubr.bf16.gmra.mrb[60].mxu0 %v2936_v44  ;;  %v10052_v38 = vpack.i.bf16 %v951_v30, %v950_v29  ;;  %v664_v41 = vld [vmem:[%s10937_s22 + $0x2c1] sm:$0xff]  ;;  %v665_v42 = vld [vmem:[%s10937_s22 + $0x2c9] sm:$0xff]  ;;  %4793 = vmatprep.subr.bf16.mxu0 %v10819_v17 }
 0x10d   : > { %v9731_v58 = vunpack.i.h.bf16 %v9729_v55  ;;  %v9730_v59 = vunpack.i.l.bf16 %v9729_v55  ;;  %v9734_v60 = vpop.permute.xlu1 %9733  ;;  %v539_v46 = vld [vmem:[%s10937_s22 + $0x188] sm:$0xff]  ;;  %v10057_v57 = vpack.i.bf16 %v665_v42, %v664_v41 }
 0x10e   : > { %v9736_v61 = vunpack.i.h.bf16 %v9734_v60  ;;  %v9735_v62 = vunpack.i.l.bf16 %v9734_v60  ;;  %10018 = vrot.lane.b32.xlu0 %v10017_v47, %s10820_s20  ;;  %v760_v49 = vld [vmem:[%s10937_s22 + $0x2c2] sm:$0xff] }
 0x10f   : > { %10023 = vrot.lane.b32.xlu1 %v10022_v50, %s10822_s17  ;;  %v2745_v2 = vsel %vm2712_vm3, %v2648_v53, %v9730_v59  ;;  %v2746_v3 = vsel %vm2712_vm3, %v2649_v54, %v9731_v58  ;;  %v761_v50 = vld [vmem:[%s10937_s22 + $0x2ca] sm:$0xff] }
 0x110   : > { %v2939_v6 = vpack.c.bf16 %v9736_v61, %v9735_v62  ;;  %v9739_v7 = vpop.permute.xlu0 %9738  ;;  %v2842_v9 = vsel %vm2809_vm4, %v2745_v2, %v9735_v62  ;;  %v2843_v10 = vsel %vm2809_vm4, %v2746_v3, %v9736_v61  ;;  %v10062_v60 = vpack.i.bf16 %v761_v50, %v760_v49  ;;  %v856_v61 = vld [vmem:[%s10937_s22 + $0x2c3] sm:$0xff]  ;;  %v857_v62 = vld [vmem:[%s10937_s22 + $0x2cb] sm:$0xff] }
 0x111   : > { %v9741_v13 = vunpack.i.h.bf16 %v9739_v7  ;;  %v9740_v14 = vunpack.i.l.bf16 %v9739_v7  ;;  %v9744_v15 = vpop.permute.xlu1 %9743  ;;  %v2938_v16 = vpack.c.bf16 %v2843_v10, %v2842_v9  ;;  %v952_v2 = vld [vmem:[%s10937_s22 + $0x2c4] sm:$0xff]  ;;  %v953_v3 = vld [vmem:[%s10937_s22 + $0x2cc] sm:$0xff]  ;;  %v10067_v9 = vpack.i.bf16 %v857_v62, %v856_v61 }
 0x112   : > { %v9746_v18 = vunpack.i.h.bf16 %v9744_v15  ;;  %v9745_v19 = vunpack.i.l.bf16 %v9744_v15  ;;  %10028 = vrot.lane.b32.xlu0 %v10027_v63, %s10821_s27  ;;  %8727 = vmatprep.mubr.msk.bf16.mxu0 %vm3120_vm5, %v2939_v6  ;;  %v540_v10 = vld [vmem:[%s10937_s22 + $0x190] sm:$0xff]  ;;  %v10072_v11 = vpack.i.bf16 %v953_v3, %v952_v2  ;;  %v667_v15 = vld [vmem:[%s10937_s22 + $0x2e1] sm:$0xff] }
 0x113   : > { %v2553_v21 = vsel %vm2518_vm1, %v536_v0, %v9740_v14  ;;  %v2554_v22 = vsel %vm2518_vm1, %v537_v8, %v9741_v13  ;;  %10033 = vrot.lane.b32.xlu1 %v10032_v1, %s10823_s21  ;;  %v666_v14 = vld [vmem:[%s10937_s22 + $0x2d1] sm:$0xff] }
 0x114   : > { %v2650_v26 = vsel %vm2615_vm2, %v2553_v21, %v9745_v19  ;;  %v2651_v27 = vsel %vm2615_vm2, %v2554_v22, %v9746_v18  ;;  %v9749_v28 = vpop.permute.xlu0 %9748  ;;  %3465 = vmatmul.mubr.bf16.gmra.mrb[64].mxu0 %v2938_v16  ;;  %v541_v19 = vld [vmem:[%s10937_s22 + $0x1a0] sm:$0xff]  ;;  %v762_v22 = vld [vmem:[%s10937_s22 + $0x2d2] sm:$0xff]  ;;  %v10077_v30 = vpack.i.bf16 %v667_v15, %v666_v14 }
 0x115   : > { %v9751_v31 = vunpack.i.h.bf16 %v9749_v28  ;;  %v9750_v32 = vunpack.i.l.bf16 %v9749_v28  ;;  %v9754_v33 = vpop.permute.xlu1 %9753 }
 0x116   : > { %v9756_v34 = vunpack.i.h.bf16 %v9754_v33  ;;  %v9755_v35 = vunpack.i.l.bf16 %v9754_v33  ;;  %10038 = vrot.lane.b32.xlu0 %v10037_v20, %s10820_s20 }
 0x117   : > { %10043 = vrot.lane.b32.xlu1 %v10042_v23, %s10822_s17  ;;  %v2747_v39 = vsel %vm2712_vm3, %v2650_v26, %v9750_v32  ;;  %v2748_v40 = vsel %vm2712_vm3, %v2651_v27, %v9751_v31  ;;  %v763_v23 = vld [vmem:[%s10937_s22 + $0x2e2] sm:$0xff] }
 0x118   : > { %v2941_v44 = vpack.c.bf16 %v9756_v34, %v9755_v35  ;;  %v9759_v45 = vpop.permute.xlu0 %9758  ;;  %v2844_v47 = vsel %vm2809_vm4, %v2747_v39, %v9755_v35  ;;  %v2845_v48 = vsel %vm2809_vm4, %v2748_v40, %v9756_v34  ;;  %v10082_v33 = vpack.i.bf16 %v763_v23, %v762_v22  ;;  %v858_v34 = vld [vmem:[%s10937_s22 + $0x2d3] sm:$0xff]  ;;  %v859_v35 = vld [vmem:[%s10937_s22 + $0x2e3] sm:$0xff] }
 0x119   : > { %v9761_v51 = vunpack.i.h.bf16 %v9759_v45  ;;  %v9760_v52 = vunpack.i.l.bf16 %v9759_v45  ;;  %v9764_v53 = vpop.permute.xlu1 %9763  ;;  %v2940_v54 = vpack.c.bf16 %v2845_v48, %v2844_v47  ;;  %v954_v39 = vld [vmem:[%s10937_s22 + $0x2d4] sm:$0xff]  ;;  %v955_v40 = vld [vmem:[%s10937_s22 + $0x2e4] sm:$0xff] }
 0x11a   : > { %v9766_v55 = vunpack.i.h.bf16 %v9764_v53  ;;  %v9765_v56 = vunpack.i.l.bf16 %v9764_v53  ;;  %10048 = vrot.lane.b32.xlu0 %v10047_v37, %s10821_s27  ;;  %8728 = vmatprep.mubr.msk.bf16.mxu0 %vm3120_vm5, %v2941_v44  ;;  %v542_v47 = vld [vmem:[%s10937_s22 + $0x1a8] sm:$0xff]  ;;  %v10092_v48 = vpack.i.bf16 %v955_v40, %v954_v39 }
 0x11b   : > { %v2555_v58 = vsel %vm2518_vm1, %v538_v36, %v9760_v52  ;;  %v2556_v59 = vsel %vm2518_vm1, %v539_v46, %v9761_v51  ;;  %10053 = vrot.lane.b32.xlu1 %v10052_v38, %s10823_s21  ;;  %v10087_v46 = vpack.i.bf16 %v859_v35, %v858_v34  ;;  %v668_v51 = vld [vmem:[%s10937_s22 + $0x2e9] sm:$0xff]  ;;  %v669_v52 = vld [vmem:[%s10937_s22 + $0x2f1] sm:$0xff] }
 0x11c   : > { %v2652_v63 = vsel %vm2615_vm2, %v2555_v58, %v9765_v56  ;;  %v2653_v0 = vsel %vm2615_vm2, %v2556_v59, %v9766_v55  ;;  %v9769_v1 = vpop.permute.xlu0 %9768  ;;  %3475 = vmatmul.mubr.bf16.gmra.mrb[68].mxu0 %v2940_v54  ;;  %v543_v55 = vld [vmem:[%s10937_s22 + $0x1b0] sm:$0xff]  ;;  %v10097_v2 = vpack.i.bf16 %v669_v52, %v668_v51 }
 0x11d   : > { %v9771_v4 = vunpack.i.h.bf16 %v9769_v1  ;;  %v9770_v5 = vunpack.i.l.bf16 %v9769_v1  ;;  %v9774_v6 = vpop.permute.xlu1 %9773  ;;  %v764_v58 = vld [vmem:[%s10937_s22 + $0x2ea] sm:$0xff]  ;;  %v765_v59 = vld [vmem:[%s10937_s22 + $0x2f2] sm:$0xff] }
 0x11e   : > { %v9776_v7 = vunpack.i.h.bf16 %v9774_v6  ;;  %v9775_v8 = vunpack.i.l.bf16 %v9774_v6  ;;  %10058 = vrot.lane.b32.xlu0 %v10057_v57, %s10820_s20  ;;  %v860_v6 = vld [vmem:[%s10937_s22 + $0x2eb] sm:$0xff] }
 0x11f   : > { %10063 = vrot.lane.b32.xlu1 %v10062_v60, %s10822_s17  ;;  %v2749_v12 = vsel %vm2712_vm3, %v2652_v63, %v9770_v5  ;;  %v2750_v13 = vsel %vm2712_vm3, %v2653_v0, %v9771_v4  ;;  %v10102_v5 = vpack.i.bf16 %v765_v59, %v764_v58 }
 0x120   : > { %v2943_v16 = vpack.c.bf16 %v9776_v7, %v9775_v8  ;;  %v9779_v18 = vpop.permute.xlu0 %9778  ;;  %v2846_v20 = vsel %vm2809_vm4, %v2749_v12, %v9775_v8  ;;  %v2847_v21 = vsel %vm2809_vm4, %v2750_v13, %v9776_v7  ;;  %v861_v7 = vld [vmem:[%s10937_s22 + $0x2f3] sm:$0xff] }
 0x121   : > { %v9781_v24 = vunpack.i.h.bf16 %v9779_v18  ;;  %v9780_v25 = vunpack.i.l.bf16 %v9779_v18  ;;  %v9784_v26 = vpop.permute.xlu1 %9783  ;;  %v2942_v27 = vpack.c.bf16 %v2847_v21, %v2846_v20  ;;  %v957_v12 = vld [vmem:[%s10937_s22 + $0x2f4] sm:$0xff]  ;;  %v544_v20 = vld [vmem:[%s10937_s22 + $0x1c0] sm:$0xff] }
 0x122   : > { %v9786_v28 = vunpack.i.h.bf16 %v9784_v26  ;;  %v9785_v29 = vunpack.i.l.bf16 %v9784_v26  ;;  %10068 = vrot.lane.b32.xlu0 %v10067_v9, %s10821_s27  ;;  %8729 = vmatprep.mubr.msk.bf16.mxu0 %vm3120_vm5, %v2943_v16 }
 0x123   : > { %v2557_v31 = vsel %vm2518_vm1, %v540_v10, %v9780_v25  ;;  %v2558_v32 = vsel %vm2518_vm1, %v541_v19, %v9781_v24  ;;  %10073 = vrot.lane.b32.xlu1 %v10072_v11, %s10823_s21  ;;  %v956_v11 = vld [vmem:[%s10937_s22 + $0x2ec] sm:$0xff]  ;;  %v10107_v19 = vpack.i.bf16 %v861_v7, %v860_v6  ;;  %v670_v24 = vld [vmem:[%s10937_s22 + $0x301] sm:$0xff] }
 0x124   : > { %v2654_v36 = vsel %vm2615_vm2, %v2557_v31, %v9785_v29  ;;  %v2655_v37 = vsel %vm2615_vm2, %v2558_v32, %v9786_v28  ;;  %v9789_v38 = vpop.permute.xlu0 %9788  ;;  %3485 = vmatmul.mubr.bf16.gmra.mrb[72].mxu0 %v2942_v27  ;;  %v10112_v21 = vpack.i.bf16 %v957_v12, %v956_v11  ;;  %v671_v25 = vld [vmem:[%s10937_s22 + $0x309] sm:$0xff] }
 0x125   : > { %v9791_v41 = vunpack.i.h.bf16 %v9789_v38  ;;  %v9790_v42 = vunpack.i.l.bf16 %v9789_v38  ;;  %v9794_v43 = vpop.permute.xlu1 %9793  ;;  %v545_v28 = vld [vmem:[%s10937_s22 + $0x1c8] sm:$0xff]  ;;  %v10117_v39 = vpack.i.bf16 %v671_v25, %v670_v24 }
 0x126   : > { %v9796_v44 = vunpack.i.h.bf16 %v9794_v43  ;;  %v9795_v45 = vunpack.i.l.bf16 %v9794_v43  ;;  %10078 = vrot.lane.b32.xlu0 %v10077_v30, %s10820_s20  ;;  %v766_v31 = vld [vmem:[%s10937_s22 + $0x302] sm:$0xff]  ;;  %v767_v32 = vld [vmem:[%s10937_s22 + $0x30a] sm:$0xff] }
 0x127   : > { %10083 = vrot.lane.b32.xlu1 %v10082_v33, %s10822_s17  ;;  %v2751_v49 = vsel %vm2712_vm3, %v2654_v36, %v9790_v42  ;;  %v2752_v50 = vsel %vm2712_vm3, %v2655_v37, %v9791_v41  ;;  %v10122_v42 = vpack.i.bf16 %v767_v32, %v766_v31  ;;  %v862_v43 = vld [vmem:[%s10937_s22 + $0x303] sm:$0xff] }
 0x128   : > { %v2945_v53 = vpack.c.bf16 %v9796_v44, %v9795_v45  ;;  %v9799_v54 = vpop.permute.xlu0 %9798  ;;  %v2848_v56 = vsel %vm2809_vm4, %v2751_v49, %v9795_v45  ;;  %v2849_v57 = vsel %vm2809_vm4, %v2752_v50, %v9796_v44  ;;  %v863_v44 = vld [vmem:[%s10937_s22 + $0x30b] sm:$0xff] }
 0x129   : > { %v9801_v60 = vunpack.i.h.bf16 %v9799_v54  ;;  %v9800_v61 = vunpack.i.l.bf16 %v9799_v54  ;;  %v9804_v62 = vpop.permute.xlu1 %9803  ;;  %v2944_v63 = vpack.c.bf16 %v2849_v57, %v2848_v56  ;;  %v959_v49 = vld [vmem:[%s10937_s22 + $0x30c] sm:$0xff] }
 0x12a   : > { %v9806_v0 = vunpack.i.h.bf16 %v9804_v62  ;;  %v9805_v1 = vunpack.i.l.bf16 %v9804_v62  ;;  %10088 = vrot.lane.b32.xlu0 %v10087_v46, %s10821_s27  ;;  %8730 = vmatprep.mubr.msk.bf16.mxu0 %vm3120_vm5, %v2945_v53  ;;  %v546_v56 = vld [vmem:[%s10937_s22 + $0x1d0] sm:$0xff] }
 0x12b   : > { %v2559_v3 = vsel %vm2518_vm1, %v542_v47, %v9800_v61  ;;  %v2560_v4 = vsel %vm2518_vm1, %v543_v55, %v9801_v60  ;;  %10093 = vrot.lane.b32.xlu1 %v10092_v48, %s10823_s21  ;;  %v958_v48 = vld [vmem:[%s10937_s22 + $0x304] sm:$0xff]  ;;  %v10127_v55 = vpack.i.bf16 %v863_v44, %v862_v43  ;;  %v672_v60 = vld [vmem:[%s10937_s22 + $0x311] sm:$0xff] }
 0x12c   : > { %v2656_v8 = vsel %vm2615_vm2, %v2559_v3, %v9805_v1  ;;  %v2657_v9 = vsel %vm2615_vm2, %v2560_v4, %v9806_v0  ;;  %v9809_v10 = vpop.permute.xlu0 %9808  ;;  %3495 = vmatmul.mubr.bf16.gmra.mrb[76].mxu0 %v2944_v63  ;;  %v10132_v57 = vpack.i.bf16 %v959_v49, %v958_v48  ;;  %v673_v61 = vld [vmem:[%s10937_s22 + $0x321] sm:$0xff]  ;;  %v768_v3 = vld [vmem:[%s10937_s22 + $0x312] sm:$0xff] }
 0x12d   : > { %v9811_v13 = vunpack.i.h.bf16 %v9809_v10  ;;  %v9810_v14 = vunpack.i.l.bf16 %v9809_v10  ;;  %v9814_v15 = vpop.permute.xlu1 %9813  ;;  %v547_v0 = vld [vmem:[%s10937_s22 + $0x1e0] sm:$0xff]  ;;  %v10137_v11 = vpack.i.bf16 %v673_v61, %v672_v60  ;;  %v10740_v49 = vld [vmem:[%s14318_s4 + $0x38] sm:$0xff]  }
 0x12e   : > { %v9816_v16 = vunpack.i.h.bf16 %v9814_v15  ;;  %v9815_v18 = vunpack.i.l.bf16 %v9814_v15  ;;  %10098 = vrot.lane.b32.xlu0 %v10097_v2, %s10820_s20  ;;  %v769_v4 = vld [vmem:[%s10937_s22 + $0x322] sm:$0xff]  ;;  %v864_v15 = vld [vmem:[%s10937_s22 + $0x313] sm:$0xff]  ;;  %4794 = vmatpush1.bf16.msra.mxu0 %v10740_v49 }
 0x12f   : > { %10103 = vrot.lane.b32.xlu1 %v10102_v5, %s10822_s17  ;;  %v2753_v22 = vsel %vm2712_vm3, %v2656_v8, %v9810_v14  ;;  %v2754_v23 = vsel %vm2712_vm3, %v2657_v9, %v9811_v13  ;;  %v10142_v14 = vpack.i.bf16 %v769_v4, %v768_v3  ;;  %4795 = vmatprep.subr.bf16.mxu0 %v10819_v17  ;;  %v773_v17 = vld [vmem:[%s10937_s22 + $0x34a] sm:$0xff]  ;;  %v774_v49 = vld [vmem:[%s10937_s22 + $0x352] sm:$0xff] }
 0x130   : > { %v2947_v26 = vpack.c.bf16 %v9816_v16, %v9815_v18  ;;  %v9819_v27 = vpop.permute.xlu0 %9818  ;;  %v2850_v29 = vsel %vm2809_vm4, %v2753_v22, %v9815_v18  ;;  %v2851_v30 = vsel %vm2809_vm4, %v2754_v23, %v9816_v16  ;;  %v865_v16 = vld [vmem:[%s10937_s22 + $0x323] sm:$0xff] }
 0x131   : > { %v9821_v33 = vunpack.i.h.bf16 %v9819_v27  ;;  %v9820_v34 = vunpack.i.l.bf16 %v9819_v27  ;;  %v9824_v35 = vpop.permute.xlu1 %9823  ;;  %v2946_v36 = vpack.c.bf16 %v2851_v30, %v2850_v29  ;;  %v961_v22 = vld [vmem:[%s10937_s22 + $0x324] sm:$0xff] }
 0x132   : > { %v9826_v37 = vunpack.i.h.bf16 %v9824_v35  ;;  %v9825_v38 = vunpack.i.l.bf16 %v9824_v35  ;;  %10108 = vrot.lane.b32.xlu0 %v10107_v19, %s10821_s27  ;;  %8731 = vmatprep.mubr.msk.bf16.mxu0 %vm3120_vm5, %v2947_v26  ;;  %v548_v29 = vld [vmem:[%s10937_s22 + $0x1e8] sm:$0xff] }
 0x133   : > { %v2561_v40 = vsel %vm2518_vm1, %v544_v20, %v9820_v34  ;;  %v2562_v41 = vsel %vm2518_vm1, %v545_v28, %v9821_v33  ;;  %10113 = vrot.lane.b32.xlu1 %v10112_v21, %s10823_s21  ;;  %v960_v21 = vld [vmem:[%s10937_s22 + $0x314] sm:$0xff]  ;;  %v10147_v28 = vpack.i.bf16 %v865_v16, %v864_v15  ;;  %v674_v33 = vld [vmem:[%s10937_s22 + $0x329] sm:$0xff] }
 0x134   : > { %v2658_v45 = vsel %vm2615_vm2, %v2561_v40, %v9825_v38  ;;  %v2659_v46 = vsel %vm2615_vm2, %v2562_v41, %v9826_v37  ;;  %v9829_v47 = vpop.permute.xlu0 %9828  ;;  %3505 = vmatmul.mubr.bf16.gmra.mrb[80].mxu0 %v2946_v36  ;;  %v10152_v30 = vpack.i.bf16 %v961_v22, %v960_v21  ;;  %v675_v34 = vld [vmem:[%s10937_s22 + $0x331] sm:$0xff] }
 0x135   : > { %v9831_v50 = vunpack.i.h.bf16 %v9829_v47  ;;  %v9830_v51 = vunpack.i.l.bf16 %v9829_v47  ;;  %v9834_v52 = vpop.permute.xlu1 %9833  ;;  %v549_v37 = vld [vmem:[%s10937_s22 + $0x1f0] sm:$0xff]  ;;  %v10157_v48 = vpack.i.bf16 %v675_v34, %v674_v33 }
 0x136   : > { %v9836_v53 = vunpack.i.h.bf16 %v9834_v52  ;;  %v9835_v54 = vunpack.i.l.bf16 %v9834_v52  ;;  %10118 = vrot.lane.b32.xlu0 %v10117_v39, %s10820_s20  ;;  %v770_v40 = vld [vmem:[%s10937_s22 + $0x32a] sm:$0xff]  ;;  %v771_v41 = vld [vmem:[%s10937_s22 + $0x332] sm:$0xff] }
 0x137   : > { %10123 = vrot.lane.b32.xlu1 %v10122_v42, %s10822_s17  ;;  %v2755_v58 = vsel %vm2712_vm3, %v2658_v45, %v9830_v51  ;;  %v2756_v59 = vsel %vm2712_vm3, %v2659_v46, %v9831_v50  ;;  %v10162_v52 = vpack.i.bf16 %v771_v41, %v770_v40 }
 0x138   : > { %v2949_v62 = vpack.c.bf16 %v9836_v53, %v9835_v54  ;;  %v9839_v63 = vpop.permute.xlu0 %9838  ;;  %v2852_v1 = vsel %vm2809_vm4, %v2755_v58, %v9835_v54  ;;  %v2853_v2 = vsel %vm2809_vm4, %v2756_v59, %v9836_v53  ;;  %v866_v53 = vld [vmem:[%s10937_s22 + $0x32b] sm:$0xff]  ;;  %v867_v54 = vld [vmem:[%s10937_s22 + $0x333] sm:$0xff] }
 0x139   : > { %v9841_v5 = vunpack.i.h.bf16 %v9839_v63  ;;  %v9840_v6 = vunpack.i.l.bf16 %v9839_v63  ;;  %v9844_v7 = vpop.permute.xlu1 %9843  ;;  %v2948_v8 = vpack.c.bf16 %v2853_v2, %v2852_v1  ;;  %v962_v58 = vld [vmem:[%s10937_s22 + $0x32c] sm:$0xff]  ;;  %v963_v59 = vld [vmem:[%s10937_s22 + $0x334] sm:$0xff]  ;;  %v10167_v1 = vpack.i.bf16 %v867_v54, %v866_v53  ;;  %v550_v2 = vld [vmem:[%s10937_s22 + $0x200] sm:$0xff] }
 0x13a   : > { %v9846_v9 = vunpack.i.h.bf16 %v9844_v7  ;;  %v9845_v10 = vunpack.i.l.bf16 %v9844_v7  ;;  %10128 = vrot.lane.b32.xlu0 %v10127_v55, %s10821_s27  ;;  %8732 = vmatprep.mubr.msk.bf16.mxu0 %vm3120_vm5, %v2949_v62  ;;  %v10172_v3 = vpack.i.bf16 %v963_v59, %v962_v58  ;;  %v677_v7 = vld [vmem:[%s10937_s22 + $0x349] sm:$0xff] }
 0x13b   : > { %v2563_v12 = vsel %vm2518_vm1, %v546_v56, %v9840_v6  ;;  %v2564_v13 = vsel %vm2518_vm1, %v547_v0, %v9841_v5  ;;  %10133 = vrot.lane.b32.xlu1 %v10132_v57, %s10823_s21  ;;  %v676_v6 = vld [vmem:[%s10937_s22 + $0x341] sm:$0xff] }
 0x13c   : > { %v2660_v18 = vsel %vm2615_vm2, %v2563_v12, %v9845_v10  ;;  %v2661_v19 = vsel %vm2615_vm2, %v2564_v13, %v9846_v9  ;;  %v9849_v20 = vpop.permute.xlu0 %9848  ;;  %3515 = vmatmul.mubr.bf16.gmra.mrb[84].mxu0 %v2948_v8  ;;  %v551_v10 = vld [vmem:[%s10937_s22 + $0x208] sm:$0xff]  ;;  %v10177_v21 = vpack.i.bf16 %v677_v7, %v676_v6 }
 0x13d   : > { %v9851_v23 = vunpack.i.h.bf16 %v9849_v20  ;;  %v9850_v24 = vunpack.i.l.bf16 %v9849_v20  ;;  %v9854_v25 = vpop.permute.xlu1 %9853  ;;  %v772_v13 = vld [vmem:[%s10937_s22 + $0x342] sm:$0xff] }
 0x13e   : > { %v9856_v26 = vunpack.i.h.bf16 %v9854_v25  ;;  %v9855_v27 = vunpack.i.l.bf16 %v9854_v25  ;;  %10138 = vrot.lane.b32.xlu0 %v10137_v11, %s10820_s20  ;;  %v868_v25 = vld [vmem:[%s10937_s22 + $0x343] sm:$0xff] }
 0x13f   : > { %10143 = vrot.lane.b32.xlu1 %v10142_v14, %s10822_s17  ;;  %v2757_v31 = vsel %vm2712_vm3, %v2660_v18, %v9850_v24  ;;  %v2758_v32 = vsel %vm2712_vm3, %v2661_v19, %v9851_v23  ;;  %v10182_v24 = vpack.i.bf16 %v773_v17, %v772_v13  ;;  %v680_v17 = vld [vmem:[%s10937_s22 + $0x369] sm:$0xff] }
 0x140   : > { %v2951_v35 = vpack.c.bf16 %v9856_v26, %v9855_v27  ;;  %v9859_v36 = vpop.permute.xlu0 %9858  ;;  %v2854_v38 = vsel %vm2809_vm4, %v2757_v31, %v9855_v27  ;;  %v2855_v39 = vsel %vm2809_vm4, %v2758_v32, %v9856_v26  ;;  %v869_v26 = vld [vmem:[%s10937_s22 + $0x34b] sm:$0xff] }
 0x141   : > { %v9861_v42 = vunpack.i.h.bf16 %v9859_v36  ;;  %v9860_v43 = vunpack.i.l.bf16 %v9859_v36  ;;  %v9864_v44 = vpop.permute.xlu1 %9863  ;;  %v2950_v45 = vpack.c.bf16 %v2855_v39, %v2854_v38  ;;  %v965_v31 = vld [vmem:[%s10937_s22 + $0x34c] sm:$0xff] }
 0x142   : > { %v9866_v46 = vunpack.i.h.bf16 %v9864_v44  ;;  %v9865_v47 = vunpack.i.l.bf16 %v9864_v44  ;;  %10148 = vrot.lane.b32.xlu0 %v10147_v28, %s10821_s27  ;;  %8733 = vmatprep.mubr.msk.bf16.mxu0 %vm3120_vm5, %v2951_v35  ;;  %v552_v38 = vld [vmem:[%s10937_s22 + $0x210] sm:$0xff] }
 0x143   : > { %v2565_v50 = vsel %vm2518_vm1, %v548_v29, %v9860_v43  ;;  %v2566_v51 = vsel %vm2518_vm1, %v549_v37, %v9861_v42  ;;  %10153 = vrot.lane.b32.xlu1 %v10152_v30, %s10823_s21  ;;  %v964_v30 = vld [vmem:[%s10937_s22 + $0x344] sm:$0xff]  ;;  %v10187_v37 = vpack.i.bf16 %v869_v26, %v868_v25  ;;  %v678_v42 = vld [vmem:[%s10937_s22 + $0x351] sm:$0xff] }
 0x144   : > { %v2662_v55 = vsel %vm2615_vm2, %v2565_v50, %v9865_v47  ;;  %v2663_v56 = vsel %vm2615_vm2, %v2566_v51, %v9866_v46  ;;  %v9869_v57 = vpop.permute.xlu0 %9868  ;;  %3525 = vmatmul.mubr.bf16.gmra.mrb[88].mxu0 %v2950_v45  ;;  %v10192_v39 = vpack.i.bf16 %v965_v31, %v964_v30  ;;  %v679_v43 = vld [vmem:[%s10937_s22 + $0x361] sm:$0xff] }
 0x145   : > { %v9871_v60 = vunpack.i.h.bf16 %v9869_v57  ;;  %v9870_v61 = vunpack.i.l.bf16 %v9869_v57  ;;  %v9874_v62 = vpop.permute.xlu1 %9873  ;;  %v553_v46 = vld [vmem:[%s10937_s22 + $0x220] sm:$0xff]  ;;  %v10197_v57 = vpack.i.bf16 %v679_v43, %v678_v42 }
 0x146   : > { %v9876_v63 = vunpack.i.h.bf16 %v9874_v62  ;;  %v9875_v0 = vunpack.i.l.bf16 %v9874_v62  ;;  %10158 = vrot.lane.b32.xlu0 %v10157_v48, %s10820_s20  ;;  %v775_v50 = vld [vmem:[%s10937_s22 + $0x362] sm:$0xff] }
 0x147   : > { %10163 = vrot.lane.b32.xlu1 %v10162_v52, %s10822_s17  ;;  %v2759_v4 = vsel %vm2712_vm3, %v2662_v55, %v9870_v61  ;;  %v2760_v5 = vsel %vm2712_vm3, %v2663_v56, %v9871_v60  ;;  %v10202_v60 = vpack.i.bf16 %v775_v50, %v774_v49  ;;  %v870_v61 = vld [vmem:[%s10937_s22 + $0x353] sm:$0xff]  ;;  %v871_v62 = vld [vmem:[%s10937_s22 + $0x363] sm:$0xff] }
 0x148   : > { %v2953_v8 = vpack.c.bf16 %v9876_v63, %v9875_v0  ;;  %v9879_v9 = vpop.permute.xlu0 %9878  ;;  %v2856_v11 = vsel %vm2809_vm4, %v2759_v4, %v9875_v0  ;;  %v2857_v12 = vsel %vm2809_vm4, %v2760_v5, %v9876_v63  ;;  %v557_v49 = vld [vmem:[%s10937_s22 + $0x248] sm:$0xff] }
 0x149   : > { %v9881_v14 = vunpack.i.h.bf16 %v9879_v9  ;;  %v9880_v15 = vunpack.i.l.bf16 %v9879_v9  ;;  %v9884_v16 = vpop.permute.xlu1 %9883  ;;  %v2952_v18 = vpack.c.bf16 %v2857_v12, %v2856_v11  ;;  %v10207_v9 = vpack.i.bf16 %v871_v62, %v870_v61  ;;  %v779_v61 = vld [vmem:[%s10937_s22 + $0x38a] sm:$0xff]  ;;  %v3020_v62 = vld [vmem:[%s14316_s2] sm:$0x3] }
 0x14a   : > { %v9886_v19 = vunpack.i.h.bf16 %v9884_v16  ;;  %v9885_v20 = vunpack.i.l.bf16 %v9884_v16  ;;  %10168 = vrot.lane.b32.xlu0 %v10167_v1, %s10821_s27  ;;  %8734 = vmatprep.mubr.msk.bf16.mxu0 %vm3120_vm5, %v2953_v8 }
 0x14b   : > { %v2567_v22 = vsel %vm2518_vm1, %v550_v2, %v9880_v15  ;;  %v2568_v23 = vsel %vm2518_vm1, %v551_v10, %v9881_v14  ;;  %10173 = vrot.lane.b32.xlu1 %v10172_v3, %s10823_s21  ;;  %v966_v2 = vld [vmem:[%s10937_s22 + $0x354] sm:$0xff]  ;;  %v967_v3 = vld [vmem:[%s10937_s22 + $0x364] sm:$0xff]  ;;  %v3022_v15 = vlaneseq }
 0x14c   : > { %v2664_v27 = vsel %vm2615_vm2, %v2567_v22, %v9885_v20  ;;  %v2665_v28 = vsel %vm2615_vm2, %v2568_v23, %v9886_v19  ;;  %v9889_v29 = vpop.permute.xlu0 %9888  ;;  %3535 = vmatmul.mubr.bf16.gmra.mrb[92].mxu0 %v2952_v18  ;;  %v554_v10 = vld [vmem:[%s10937_s22 + $0x228] sm:$0xff]  ;;  %v10212_v11 = vpack.i.bf16 %v967_v3, %v966_v2  ;;  %v681_v14 = vld [vmem:[%s10937_s22 + $0x371] sm:$0xff] }
 0x14d   : > { %v9891_v32 = vunpack.i.h.bf16 %v9889_v29  ;;  %v9890_v33 = vunpack.i.l.bf16 %v9889_v29  ;;  %v9894_v34 = vpop.permute.xlu1 %9893  ;;  %v555_v19 = vld [vmem:[%s10937_s22 + $0x230] sm:$0xff]  ;;  %v10217_v30 = vpack.i.bf16 %v681_v14, %v680_v17 }
 0x14e   : > { %v9896_v35 = vunpack.i.h.bf16 %v9894_v34  ;;  %v9895_v36 = vunpack.i.l.bf16 %v9894_v34  ;;  %10178 = vrot.lane.b32.xlu0 %v10177_v21, %s10820_s20  ;;  %v776_v22 = vld [vmem:[%s10937_s22 + $0x36a] sm:$0xff]  ;;  %v777_v23 = vld [vmem:[%s10937_s22 + $0x372] sm:$0xff] }
 0x14f   : > { %10183 = vrot.lane.b32.xlu1 %v10182_v24, %s10822_s17  ;;  %v2761_v40 = vsel %vm2712_vm3, %v2664_v27, %v9890_v33  ;;  %v2762_v41 = vsel %vm2712_vm3, %v2665_v28, %v9891_v32  ;;  %v10222_v33 = vpack.i.bf16 %v777_v23, %v776_v22  ;;  %v872_v34 = vld [vmem:[%s10937_s22 + $0x36b] sm:$0xff] }
 0x150   : > { %v2955_v44 = vpack.c.bf16 %v9896_v35, %v9895_v36  ;;  %v9899_v45 = vpop.permute.xlu0 %9898  ;;  %v2858_v47 = vsel %vm2809_vm4, %v2761_v40, %v9895_v36  ;;  %v2859_v48 = vsel %vm2809_vm4, %v2762_v41, %v9896_v35  ;;  %v873_v35 = vld [vmem:[%s10937_s22 + $0x373] sm:$0xff]  ;;  %v3023_v36 = vshrl.u32 %v3022_v15, 7 }
 0x151   : > { %v9901_v51 = vunpack.i.h.bf16 %v9899_v45  ;;  %v9900_v52 = vunpack.i.l.bf16 %v9899_v45  ;;  %v9904_v53 = vpop.permute.xlu1 %9903  ;;  %v2954_v54 = vpack.c.bf16 %v2859_v48, %v2858_v47  ;;  %v968_v40 = vld [vmem:[%s10937_s22 + $0x36c] sm:$0xff]  ;;  %v969_v41 = vld [vmem:[%s10937_s22 + $0x374] sm:$0xff]  ;;  %v556_v47 = vld [vmem:[%s10937_s22 + $0x240] sm:$0xff]  ;;  %v10227_v48 = vpack.i.bf16 %v873_v35, %v872_v34 }
 0x152   : > { %v9906_v55 = vunpack.i.h.bf16 %v9904_v53  ;;  %v9905_v56 = vunpack.i.l.bf16 %v9904_v53  ;;  %10188 = vrot.lane.b32.xlu0 %v10187_v37, %s10821_s27  ;;  %8735 = vmatprep.mubr.msk.bf16.mxu0 %vm3120_vm5, %v2955_v44  ;;  %v10232_v50 = vpack.i.bf16 %v969_v41, %v968_v40  ;;  %v682_v53 = vld [vmem:[%s10937_s22 + $0x381] sm:$0xff] }
 0x153   : > { %v2569_v58 = vsel %vm2518_vm1, %v552_v38, %v9900_v52  ;;  %v2570_v59 = vsel %vm2518_vm1, %v553_v46, %v9901_v51  ;;  %10193 = vrot.lane.b32.xlu1 %v10192_v39, %s10823_s21 }
 0x154   : > { %v2666_v63 = vsel %vm2615_vm2, %v2569_v58, %v9905_v56  ;;  %v2667_v0 = vsel %vm2615_vm2, %v2570_v59, %v9906_v55  ;;  %v9909_v1 = vpop.permute.xlu0 %9908  ;;  %3545 = vmatmul.mubr.bf16.gmra.mrb[96].mxu0 %v2954_v54  ;;  %v683_v54 = vld [vmem:[%s10937_s22 + $0x389] sm:$0xff]  ;;  %v3024_v55 = vsub.s32 0, %v3023_v36 }
 0x155   : > { %v9911_v4 = vunpack.i.h.bf16 %v9909_v1  ;;  %v9910_v5 = vunpack.i.l.bf16 %v9909_v1  ;;  %v9914_v6 = vpop.permute.xlu1 %9913 }
 0x156   : > { %v9916_v7 = vunpack.i.h.bf16 %v9914_v6  ;;  %v9915_v8 = vunpack.i.l.bf16 %v9914_v6  ;;  %10198 = vrot.lane.b32.xlu0 %v10197_v57, %s10820_s20  ;;  %v11861_v6 = vld [vmem:[%s10937_s22 + $0x384] sm:$0xff]  ;;  %v11877_v15 = vrot.slane %v3020_v62, %v3024_v55 }
 0x157   : > { %10203 = vrot.lane.b32.xlu1 %v10202_v60, %s10822_s17  ;;  %v2763_v12 = vsel %vm2712_vm3, %v2666_v63, %v9910_v5  ;;  %v2764_v13 = vsel %vm2712_vm3, %v2667_v0, %v9911_v4  ;;  %v778_v60 = vld [vmem:[%s10937_s22 + $0x382] sm:$0xff]  ;;  %v3028_v63 = vsub.s32 1, %v3023_v36  ;;  %v11858_v5 = vld [vmem:[%s10937_s22 + $0x38b] sm:$0xff] }
 0x158   : > { %v2957_v16 = vpack.c.bf16 %v9916_v7, %v9915_v8  ;;  %v9919_v18 = vpop.permute.xlu0 %9918  ;;  %v2860_v20 = vsel %vm2809_vm4, %v2763_v12, %v9915_v8  ;;  %v2861_v21 = vsel %vm2809_vm4, %v2764_v13, %v9916_v7  ;;  %v11855_v4 = vld [vmem:[%s10937_s22 + $0x383] sm:$0xff]  ;;  %v10242_v14 = vpack.i.bf16 %v779_v61, %v778_v60 }
 0x159   : > { %v9921_v24 = vunpack.i.h.bf16 %v9919_v18  ;;  %v9920_v25 = vunpack.i.l.bf16 %v9919_v18  ;;  %v9924_v26 = vpop.permute.xlu1 %9923  ;;  %v2956_v27 = vpack.c.bf16 %v2861_v21, %v2860_v20  ;;  %v11872_v12 = vld [vmem:[%s10937_s22 + $0x3a1] sm:$0xff]  ;;  %v11890_v23 = vrot.slane %v3020_v62, %v3028_v63 }
 0x15a   : > { %v9926_v28 = vunpack.i.h.bf16 %v9924_v26  ;;  %v9925_v29 = vunpack.i.l.bf16 %v9924_v26  ;;  %10208 = vrot.lane.b32.xlu0 %v10207_v9, %s10821_s27  ;;  %8736 = vmatprep.mubr.msk.bf16.mxu0 %vm3120_vm5, %v2957_v16  ;;  %v10237_v9 = vpack.i.bf16 %v683_v54, %v682_v53  ;;  %v11880_v16 = vld [vmem:[%s10937_s22 + $0x392] sm:$0xff]  ;;  %v11883_v18 = vld [vmem:[%s10937_s22 + $0x3a2] sm:$0xff] }
 0x15b   : > { %v2571_v31 = vsel %vm2518_vm1, %v554_v10, %v9920_v25  ;;  %v2572_v32 = vsel %vm2518_vm1, %v555_v19, %v9921_v24  ;;  %10213 = vrot.lane.b32.xlu1 %v10212_v11, %s10823_s21  ;;  %v11866_v10 = vld [vmem:[%s10937_s22 + $0x38c] sm:$0xff]  ;;  %v10247_v24 = vpack.i.bf16 %v11858_v5, %v11855_v4  ;;  %v11895_v25 = vld [vmem:[%s10937_s22 + $0x3a3] sm:$0xff]  ;;  %v11898_v26 = vld [vmem:[%s10937_s22 + $0x394] sm:$0xff]  ;;  %v10262_v35 = vpack.i.bf16 %v11883_v18, %v11880_v16 }
 0x15c   : > { %v2668_v37 = vsel %vm2615_vm2, %v2571_v31, %v9925_v29  ;;  %v2669_v38 = vsel %vm2615_vm2, %v2572_v32, %v9926_v28  ;;  %v9929_v39 = vpop.permute.xlu0 %9928  ;;  %3555 = vmatmul.mubr.bf16.gmra.mrb[100].mxu0 %v2956_v27  ;;  %v11869_v11 = vld [vmem:[%s10937_s22 + $0x391] sm:$0xff]  ;;  %v11901_v27 = vld [vmem:[%s10937_s22 + $0x3a4] sm:$0xff]  ;;  %v10252_v31 = vpack.i.bf16 %v11866_v10, %v11861_v6 }
 0x15d   : > { %v9931_v42 = vunpack.i.h.bf16 %v9929_v39  ;;  %v9930_v43 = vunpack.i.l.bf16 %v9929_v39  ;;  %v9934_v44 = vpop.permute.xlu1 %9933  ;;  %v11886_v19 = vld [vmem:[%s10937_s22 + $0x393] sm:$0xff]  ;;  %v10257_v32 = vpack.i.bf16 %v11872_v12, %v11869_v11  ;;  %v10272_v41 = vpack.i.bf16 %v11901_v27, %v11898_v26  ;;  %v11947_v4 = vld [vmem:[%s10937_s22 + $0x3ab] sm:$0xff] }
 0x15e   : > { %v9936_v45 = vunpack.i.h.bf16 %v9934_v44  ;;  %v9935_v46 = vunpack.i.l.bf16 %v9934_v44  ;;  %10218 = vrot.lane.b32.xlu0 %v10217_v30, %s10820_s20  ;;  %v10267_v40 = vpack.i.bf16 %v11895_v25, %v11886_v19  ;;  %v11950_v5 = vld [vmem:[%s10937_s22 + $0x3b3] sm:$0xff]  ;;  %v12006_v19 = vld [vmem:[%s10937_s22 + $0x3c2] sm:$0xff]  ;;  %v12009_v25 = vld [vmem:[%s10937_s22 + $0x3ca] sm:$0xff] }
 0x15f   : > { %10223 = vrot.lane.b32.xlu1 %v10222_v33, %s10822_s17  ;;  %v2765_v51 = vsel %vm2712_vm3, %v2668_v37, %v9930_v43  ;;  %v2766_v52 = vsel %vm2712_vm3, %v2669_v38, %v9931_v42  ;;  %v558_v37 = vld [vmem:[%s10937_s22 + $0x250] sm:$0xff] }
 0x160   : > { %v2959_v56 = vpack.c.bf16 %v9936_v45, %v9935_v46  ;;  %v9939_v57 = vpop.permute.xlu0 %9938  ;;  %v2862_v58 = vsel %vm2809_vm4, %v2765_v51, %v9935_v46  ;;  %v2863_v59 = vsel %vm2809_vm4, %v2766_v52, %v9936_v45  ;;  %v11919_v42 = vld [vmem:[%s10937_s22 + $0x3a9] sm:$0xff]  ;;  %v11922_v43 = vld [vmem:[%s10937_s22 + $0x3b1] sm:$0xff] }
 0x161   : > { %v9941_v0 = vunpack.i.h.bf16 %v9939_v57  ;;  %v9940_v1 = vunpack.i.l.bf16 %v9939_v57  ;;  %v9944_v2 = vpop.permute.xlu1 %9943  ;;  %v2958_v3 = vpack.c.bf16 %v2863_v59, %v2862_v58  ;;  %v11929_v51 = vld [vmem:[%s10937_s22 + $0x3aa] sm:$0xff]  ;;  %v11932_v52 = vld [vmem:[%s10937_s22 + $0x3b2] sm:$0xff]  ;;  %v10277_v63 = vpack.i.bf16 %v11922_v43, %v11919_v42 }
 0x162   : > { %v9946_v7 = vunpack.i.h.bf16 %v9944_v2  ;;  %v9945_v8 = vunpack.i.l.bf16 %v9944_v2  ;;  %10228 = vrot.lane.b32.xlu0 %v10227_v48, %s10821_s27  ;;  %8737 = vmatprep.mubr.msk.bf16.mxu0 %vm3120_vm5, %v2959_v56  ;;  %v11955_v11 = vld [vmem:[%s10937_s22 + $0x3ac] sm:$0xff]  ;;  %v11958_v12 = vld [vmem:[%s10937_s22 + $0x3b4] sm:$0xff]  ;;  %v12038_v43 = vld [vmem:[%s10937_s22 + $0x3c4] sm:$0xff] }
 0x163   : > { %v2573_v13 = vsel %vm2518_vm1, %v556_v47, %v9940_v1  ;;  %v2574_v17 = vsel %vm2518_vm1, %v557_v49, %v9941_v0  ;;  %10233 = vrot.lane.b32.xlu1 %v10232_v50, %s10823_s21  ;;  %v559_v47 = vld [vmem:[%s10937_s22 + $0x260] sm:$0xff] }
 0x164   : > { %v2670_v20 = vsel %vm2615_vm2, %v2573_v13, %v9945_v8  ;;  %v2671_v21 = vsel %vm2615_vm2, %v2574_v17, %v9946_v7  ;;  %v9949_v22 = vpop.permute.xlu0 %9948  ;;  %3565 = vmatmul.mubr.bf16.gmra.mrb[104].mxu0 %v2958_v3  ;;  %v10282_v3 = vpack.i.bf16 %v11932_v52, %v11929_v51 }
 0x165   : > { %v9951_v28 = vunpack.i.h.bf16 %v9949_v22  ;;  %v9950_v29 = vunpack.i.l.bf16 %v9949_v22  ;;  %v9954_v30 = vpop.permute.xlu1 %9953 }
 0x166   : > { %v9956_v33 = vunpack.i.h.bf16 %v9954_v30  ;;  %v9955_v34 = vunpack.i.l.bf16 %v9954_v30  ;;  %10238 = vrot.lane.b32.xlu0 %v10237_v9, %s10820_s20 }
 0x167   : > { %10243 = vrot.lane.b32.xlu1 %v10242_v14, %s10822_s17  ;;  %v3306_v36 = vpop.f32.mrb[0].mxu0  ;;  %v2767_v38 = vsel %vm2712_vm3, %v2670_v20, %v9950_v29  ;;  %v2768_v39 = vsel %vm2712_vm3, %v2671_v21, %v9951_v28 }
 0x168   : > { %v2961_v44 = vpack.c.bf16 %v9956_v33, %v9955_v34  ;;  %v3307_v45 = vadd.f32 %v3306_v36, %v11877_v15  ;;  %v9959_v46 = vpop.permute.xlu0 %9958  ;;  %v3308_v48 = vpop.f32.mrb[1].mxu0  ;;  %v2864_v49 = vsel %vm2809_vm4, %v2767_v38, %v9955_v34  ;;  %v2865_v50 = vsel %vm2809_vm4, %v2768_v39, %v9956_v33  ;;  %v11973_v34 = vld [vmem:[%s10937_s22 + $0x3c1] sm:$0xff] }
 0x169   : > { %v9961_v53 = vunpack.i.h.bf16 %v9959_v46  ;;  %v9960_v54 = vunpack.i.l.bf16 %v9959_v46  ;;  %v3309_v55 = vadd.f32 %v3308_v48, %v11890_v23  ;;  %v9964_v56 = vpop.permute.xlu1 %9963  ;;  %v3310_v57 = vpop.f32.mrb[2].mxu0  ;;  %v2960_v58 = vpack.c.bf16 %v2865_v50, %v2864_v49  ;;  %v10741_v36 = vld [vmem:[%s14318_s4 + $0x40] sm:$0xff]   ;;  %v560_v39 = vld [vmem:[%s10937_s22 + $0x268] sm:$0xff] }
 0x16a   : > { %v9966_v59 = vunpack.i.h.bf16 %v9964_v56  ;;  %v9965_v60 = vunpack.i.l.bf16 %v9964_v56  ;;  %v3311_v61 = vadd.f32 %v3310_v57, %v11877_v15  ;;  %10248 = vrot.lane.b32.xlu0 %v10247_v24, %s10821_s27  ;;  %v3312_v62 = vpop.f32.mrb[3].mxu0  ;;  %8738 = vmatprep.mubr.msk.bf16.mxu0 %vm3120_vm5, %v2961_v44  ;;  %v3785_v6 = vmax.f32 %v3307_v45, 0.0  ;;  %v561_v44 = vld [vmem:[%s10937_s22 + $0x270] sm:$0xff] }
 0x16b   : > { %v2575_v0 = vsel %vm2518_vm1, %v558_v37, %v9960_v54  ;;  %v2576_v1 = vsel %vm2518_vm1, %v559_v47, %v9961_v53  ;;  %v3313_v2 = vadd.f32 %v3312_v62, %v11890_v23  ;;  %10253 = vrot.lane.b32.xlu1 %v10252_v31, %s10823_s21  ;;  %v3786_v16 = vmax.f32 %v3309_v55, 0.0  ;;  %4796 = vmatpush1.bf16.msra.mxu0 %v10741_v36 }
 0x16c   : > { %v2672_v7 = vsel %vm2615_vm2, %v2575_v0, %v9965_v60  ;;  %v2673_v8 = vsel %vm2615_vm2, %v2576_v1, %v9966_v59  ;;  %v3787_v9 = vmax.f32 %v3311_v61, 0.0  ;;  %v9969_v10 = vpop.permute.xlu0 %9968  ;;  %3575 = vmatmul.mubr.bf16.gmra.mrb[108].mxu0 %v2960_v58  ;;  %v10287_v24 = vpack.i.bf16 %v11950_v5, %v11947_v4  ;;  %v12068_v4 = vld [vmem:[%s10937_s22 + $0x3d1] sm:$0xff]  ;;  %v12071_v5 = vld [vmem:[%s10937_s22 + $0x3e1] sm:$0xff] }
 0x16d   : > { %v9971_v13 = vunpack.i.h.bf16 %v9969_v10  ;;  %v9970_v17 = vunpack.i.l.bf16 %v9969_v10  ;;  %v9974_v14 = vpop.permute.xlu1 %9973  ;;  %v3788_v18 = vmax.f32 %v3313_v2, 0.0  ;;  %v10292_v33 = vpack.i.bf16 %v11958_v12, %v11955_v11 }
 0x16e   : > { %v9976_v20 = vunpack.i.h.bf16 %v9974_v14  ;;  %v9975_v21 = vunpack.i.l.bf16 %v9974_v14  ;;  %10258 = vrot.lane.b32.xlu0 %v10257_v32, %s10820_s20  ;;  %v11961_v22 = vpack.c.bf16 %v3787_v9, %v3785_v6  ;;  %v11976_v32 = vld [vmem:[%s10937_s22 + $0x3c9] sm:$0xff] }
 0x16f   : > { %10263 = vrot.lane.b32.xlu1 %v10262_v35, %s10822_s17  ;;  %v3316_v28 = vpop.f32.mrb[4].mxu0  ;;  %v11966_v29 = vpack.c.bf16 %v3788_v18, %v3786_v16  ;;  %v2769_v30 = vsel %vm2712_vm3, %v2672_v7, %v9970_v17  ;;  %v2770_v31 = vsel %vm2712_vm3, %v2673_v8, %v9971_v13  ;;  %v10297_v60 = vpack.i.bf16 %v11976_v32, %v11973_v34  ;;  %v12014_v8 = vld [vmem:[%s10937_s22 + $0x3c3] sm:$0xff]  ;;  %v12017_v9 = vld [vmem:[%s10937_s22 + $0x3cb] sm:$0xff]  ;;  %v12097_v34 = vld [vmem:[%s10937_s22 + $0x3d3] sm:$0xff] }
 0x170   : > { %v2963_v37 = vpack.c.bf16 %v9976_v20, %v9975_v21  ;;  %v3317_v35 = vadd.f32 %v3316_v28, %v11877_v15  ;;  %v9979_v38 = vpop.permute.xlu0 %9978  ;;  %v3318_v45 = vpop.f32.mrb[5].mxu0  ;;  %v2866_v46 = vsel %vm2809_vm4, %v2769_v30, %v9975_v21  ;;  %v2867_v47 = vsel %vm2809_vm4, %v2770_v31, %v9976_v20  ;;  %v12100_v32 = vld [vmem:[%s10937_s22 + $0x3e3] sm:$0xff] }
 0x171   : > { %v9981_v48 = vunpack.i.h.bf16 %v9979_v38  ;;  %v9980_v49 = vunpack.i.l.bf16 %v9979_v38  ;;  %v3319_v50 = vadd.f32 %v3318_v45, %v11890_v23  ;;  %v9984_v53 = vpop.permute.xlu1 %9983  ;;  %v3320_v54 = vpop.f32.mrb[6].mxu0  ;;  %8768 = vmatprep.mubr.msk.bf16.mxu1 %vm4145_vm6, %v11966_v29  ;;  %v2962_v55 = vpack.c.bf16 %v2867_v47, %v2866_v46  ;;  %v563_v38 = vld [vmem:[%s10937_s22 + $0x288] sm:$0xff] }
 0x172   : > { %v9986_v56 = vunpack.i.h.bf16 %v9984_v53  ;;  %v9985_v57 = vunpack.i.l.bf16 %v9984_v53  ;;  %v3321_v58 = vadd.f32 %v3320_v54, %v11877_v15  ;;  %10268 = vrot.lane.b32.xlu0 %v10267_v40, %s10821_s27  ;;  %v3322_v59 = vpop.f32.mrb[7].mxu0  ;;  %4323 = vmatmul.mubr.bf16.vlgmr.msra.gmra.mrb[0].mxu1 %v11961_v22  ;;  %v3789_v40 = vmax.f32 %v3317_v35, 0.0  ;;  %v562_v35 = vld [vmem:[%s10937_s22 + $0x280] sm:$0xff] }
 0x173   : > { %v2577_v61 = vsel %vm2518_vm1, %v560_v39, %v9980_v49  ;;  %v2578_v62 = vsel %vm2518_vm1, %v561_v44, %v9981_v48  ;;  %v3323_v0 = vadd.f32 %v3322_v59, %v11890_v23  ;;  %10273 = vrot.lane.b32.xlu1 %v10272_v41, %s10823_s21  ;;  %8739 = vmatprep.mubr.msk.bf16.mxu0 %vm3120_vm5, %v2963_v37  ;;  %v3790_v26 = vmax.f32 %v3319_v50, 0.0 }
 0x174   : > { %v2674_v1 = vsel %vm2615_vm2, %v2577_v61, %v9985_v57  ;;  %v2675_v2 = vsel %vm2615_vm2, %v2578_v62, %v9986_v56  ;;  %v3791_v6 = vmax.f32 %v3321_v58, 0.0  ;;  %v9989_v7 = vpop.permute.xlu0 %9988  ;;  %3585 = vmatmul.mubr.bf16.gmra.mrb[112].mxu0 %v2962_v55  ;;  %v10302_v18 = vpack.i.bf16 %v12009_v25, %v12006_v19  ;;  %v12076_v19 = vld [vmem:[%s10937_s22 + $0x3d2] sm:$0xff]  ;;  %v12079_v25 = vld [vmem:[%s10937_s22 + $0x3e2] sm:$0xff] }
 0x175   : > { %v3792_v27 = vmax.f32 %v3323_v0, 0.0  ;;  %v9991_v41 = vunpack.i.h.bf16 %v9989_v7  ;;  %v9990_v10 = vunpack.i.l.bf16 %v9989_v7  ;;  %v9994_v13 = vpop.permute.xlu1 %9993  ;;  %v10307_v42 = vpack.i.bf16 %v12017_v9, %v12014_v8  ;;  %v978_v8 = vld [vmem:[%s10937_s22 + $0x3d4] sm:$0xff]  ;;  %v979_v9 = vld [vmem:[%s10937_s22 + $0x3e4] sm:$0xff] }
 0x176   : > { %v9996_v17 = vunpack.i.h.bf16 %v9994_v13  ;;  %v9995_v14 = vunpack.i.l.bf16 %v9994_v13  ;;  %10278 = vrot.lane.b32.xlu0 %v10277_v63, %s10820_s20  ;;  %v12023_v16 = vpack.c.bf16 %v3791_v6, %v3789_v40  ;;  %v12041_v63 = vld [vmem:[%s10937_s22 + $0x3cc] sm:$0xff] }
 0x177   : > { %v12027_v20 = vpack.c.bf16 %v3792_v27, %v3790_v26  ;;  %10283 = vrot.lane.b32.xlu1 %v10282_v3, %s10822_s17  ;;  %v3326_v21 = vpop.f32.mrb[8].mxu0  ;;  %v2771_v28 = vsel %vm2712_vm3, %v2674_v1, %v9990_v10  ;;  %v2772_v30 = vsel %vm2712_vm3, %v2675_v2, %v9991_v41  ;;  %v10312_v55 = vpack.i.bf16 %v12041_v63, %v12038_v43 }
 0x178   : > { %v2965_v31 = vpack.c.bf16 %v9996_v17, %v9995_v14  ;;  %v3327_v36 = vadd.f32 %v3326_v21, %v11877_v15  ;;  %v9999_v37 = vpop.permute.xlu0 %9998  ;;  %v3328_v51 = vpop.f32.mrb[9].mxu0  ;;  %v2868_v52 = vsel %vm2809_vm4, %v2771_v28, %v9995_v14  ;;  %v2869_v3 = vsel %vm2809_vm4, %v2772_v30, %v9996_v17  ;;  %v564_v28 = vld [vmem:[%s10937_s22 + $0x290] sm:$0xff]  ;;  %v565_v30 = vld [vmem:[%s10937_s22 + $0x2a0] sm:$0xff] }
 0x179   : > { %v10001_v39 = vunpack.i.h.bf16 %v9999_v37  ;;  %v10000_v44 = vunpack.i.l.bf16 %v9999_v37  ;;  %v3329_v45 = vadd.f32 %v3328_v51, %v11890_v23  ;;  %v10004_v46 = vpop.permute.xlu1 %10003  ;;  %v3330_v47 = vpop.f32.mrb[10].mxu0  ;;  %8769 = vmatprep.mubr.msk.bf16.mxu1 %vm4145_vm6, %v12027_v20  ;;  %v2964_v48 = vpack.c.bf16 %v2869_v3, %v2868_v52 }
 0x17a   : > { %v10006_v49 = vunpack.i.h.bf16 %v10004_v46  ;;  %v10005_v50 = vunpack.i.l.bf16 %v10004_v46  ;;  %v3331_v53 = vadd.f32 %v3330_v47, %v11877_v15  ;;  %10288 = vrot.lane.b32.xlu0 %v10287_v24, %s10821_s27  ;;  %v3332_v54 = vpop.f32.mrb[11].mxu0  ;;  %4331 = vmatmul.mubr.bf16.gmra.mrb[4].mxu1 %v12023_v16  ;;  %v3793_v24 = vmax.f32 %v3327_v36, 0.0 }
 0x17b   : > { %v2579_v56 = vsel %vm2518_vm1, %v562_v35, %v10000_v44  ;;  %v2580_v57 = vsel %vm2518_vm1, %v563_v38, %v10001_v39  ;;  %v3333_v58 = vadd.f32 %v3332_v54, %v11890_v23  ;;  %10293 = vrot.lane.b32.xlu1 %v10292_v33, %s10823_s21  ;;  %8740 = vmatprep.mubr.msk.bf16.mxu0 %vm3120_vm5, %v2965_v31  ;;  %v3794_v11 = vmax.f32 %v3329_v45, 0.0 }
 0x17c   : > { %v2676_v59 = vsel %vm2615_vm2, %v2579_v56, %v10005_v50  ;;  %v2677_v61 = vsel %vm2615_vm2, %v2580_v57, %v10006_v49  ;;  %v3795_v62 = vmax.f32 %v3331_v53, 0.0  ;;  %v10009_v0 = vpop.permute.xlu0 %10008  ;;  %3595 = vmatmul.mubr.bf16.gmra.mrb[116].mxu0 %v2964_v48  ;;  %v10317_v26 = vpack.i.bf16 %v12071_v5, %v12068_v4  ;;  %v12128_v56 = vld [vmem:[%s10937_s22 + $0x3e9] sm:$0xff]  ;;  %v12131_v57 = vld [vmem:[%s10937_s22 + $0x3f1] sm:$0xff] }
 0x17d   : > { %v3796_v12 = vmax.f32 %v3333_v58, 0.0  ;;  %v10011_v33 = vunpack.i.h.bf16 %v10009_v0  ;;  %v10010_v40 = vunpack.i.l.bf16 %v10009_v0  ;;  %v10014_v1 = vpop.permute.xlu1 %10013  ;;  %v10322_v17 = vpack.i.bf16 %v12079_v25, %v12076_v19 }
 0x17e   : > { %v10016_v2 = vunpack.i.h.bf16 %v10014_v1  ;;  %v10015_v6 = vunpack.i.l.bf16 %v10014_v1  ;;  %10298 = vrot.lane.b32.xlu0 %v10297_v60, %s10820_s20  ;;  %v12085_v7 = vpack.c.bf16 %v3795_v62, %v3793_v24  ;;  %v10327_v45 = vpack.i.bf16 %v12100_v32, %v12097_v34  ;;  %v789_v1 = vld [vmem:[%s10937_s22 + $0x3f2] sm:$0xff] }
 0x17f   : > { %v12089_v27 = vpack.c.bf16 %v3796_v12, %v3794_v11  ;;  %10303 = vrot.lane.b32.xlu1 %v10302_v18, %s10822_s17  ;;  %v3336_v41 = vpop.f32.mrb[12].mxu0  ;;  %v2773_v10 = vsel %vm2712_vm3, %v2676_v59, %v10010_v40  ;;  %v2774_v13 = vsel %vm2712_vm3, %v2677_v61, %v10011_v33  ;;  %v10332_v0 = vpack.i.bf16 %v979_v9, %v978_v8  ;;  %v788_v40 = vld [vmem:[%s10937_s22 + $0x3ea] sm:$0xff] }
 0x180   : > { %v2967_v60 = vpack.c.bf16 %v10016_v2, %v10015_v6  ;;  %v3337_v14 = vadd.f32 %v3336_v41, %v11877_v15  ;;  %v10019_v21 = vpop.permute.xlu0 %10018  ;;  %v3338_v43 = vpop.f32.mrb[13].mxu0  ;;  %v2870_v18 = vsel %vm2809_vm4, %v2773_v10, %v10015_v6  ;;  %v2871_v63 = vsel %vm2809_vm4, %v2774_v13, %v10016_v2  ;;  %v566_v41 = vld [vmem:[%s10937_s22 + $0x2a8] sm:$0xff]  ;;  %v567_v10 = vld [vmem:[%s10937_s22 + $0x2b0] sm:$0xff] }
 0x181   : > { %v10021_v31 = vunpack.i.h.bf16 %v10019_v21  ;;  %v10020_v36 = vunpack.i.l.bf16 %v10019_v21  ;;  %v3339_v37 = vadd.f32 %v3338_v43, %v11890_v23  ;;  %v10024_v35 = vpop.permute.xlu1 %10023  ;;  %v3340_v38 = vpop.f32.mrb[14].mxu0  ;;  %8770 = vmatprep.mubr.msk.bf16.mxu1 %vm4145_vm6, %v12089_v27  ;;  %v2966_v51 = vpack.c.bf16 %v2871_v63, %v2870_v18 }
 0x182   : > { %v10026_v52 = vunpack.i.h.bf16 %v10024_v35  ;;  %v10025_v3 = vunpack.i.l.bf16 %v10024_v35  ;;  %v3341_v39 = vadd.f32 %v3340_v38, %v11877_v15  ;;  %10308 = vrot.lane.b32.xlu0 %v10307_v42, %s10821_s27  ;;  %v3342_v44 = vpop.f32.mrb[15].mxu0  ;;  %4339 = vmatmul.mubr.bf16.gmra.mrb[8].mxu1 %v12085_v7  ;;  %v3797_v42 = vmax.f32 %v3337_v14, 0.0 }
 0x183   : > { %v2581_v46 = vsel %vm2518_vm1, %v564_v28, %v10020_v36  ;;  %v2582_v47 = vsel %vm2518_vm1, %v565_v30, %v10021_v31  ;;  %v3343_v48 = vadd.f32 %v3342_v44, %v11890_v23  ;;  %10313 = vrot.lane.b32.xlu1 %v10312_v55, %s10823_s21  ;;  %8741 = vmatprep.mubr.msk.bf16.mxu0 %vm3120_vm5, %v2967_v60  ;;  %v3798_v58 = vmax.f32 %v3339_v37, 0.0 }
 0x184   : > { %v2678_v49 = vsel %vm2615_vm2, %v2581_v46, %v10025_v3  ;;  %v2679_v50 = vsel %vm2615_vm2, %v2582_v47, %v10026_v52  ;;  %v3799_v53 = vmax.f32 %v3341_v39, 0.0  ;;  %v10029_v54 = vpop.permute.xlu0 %10028  ;;  %3605 = vmatmul.mubr.bf16.gmra.mrb[120].mxu0 %v2966_v51  ;;  %v10337_v33 = vpack.i.bf16 %v12131_v57, %v12128_v56  ;;  %v884_v51 = vld [vmem:[%s10937_s22 + $0x3eb] sm:$0xff]  ;;  %v885_v52 = vld [vmem:[%s10937_s22 + $0x3f3] sm:$0xff] }
 0x185   : > { %v3800_v4 = vmax.f32 %v3343_v48, 0.0  ;;  %v10031_v55 = vunpack.i.h.bf16 %v10029_v54  ;;  %v10030_v5 = vunpack.i.l.bf16 %v10029_v54  ;;  %v10034_v24 = vpop.permute.xlu1 %10033  ;;  %v10342_v36 = vpack.i.bf16 %v789_v1, %v788_v40  ;;  %v980_v47 = vld [vmem:[%s10937_s22 + $0x3ec] sm:$0xff]  ;;  %v981_v48 = vld [vmem:[%s10937_s22 + $0x3f4] sm:$0xff] }
 0x186   : > { %v10036_v59 = vunpack.i.h.bf16 %v10034_v24  ;;  %v10035_v61 = vunpack.i.l.bf16 %v10034_v24  ;;  %10318 = vrot.lane.b32.xlu0 %v10317_v26, %s10820_s20  ;;  %v12134_v62 = vpack.c.bf16 %v3799_v53, %v3797_v42  ;;  %v10347_v56 = vpack.i.bf16 %v885_v52, %v884_v51 }
 0x187   : > { %v12136_v19 = vpack.c.bf16 %v3800_v4, %v3798_v58  ;;  %10323 = vrot.lane.b32.xlu1 %v10322_v17, %s10822_s17  ;;  %v3346_v25 = vpop.f32.mrb[16].mxu0  ;;  %v2775_v11 = vsel %vm2712_vm3, %v2678_v49, %v10030_v5  ;;  %v2776_v12 = vsel %vm2712_vm3, %v2679_v50, %v10031_v55  ;;  %v10352_v55 = vpack.i.bf16 %v981_v48, %v980_v47 }
 0x188   : > { %v2969_v2 = vpack.c.bf16 %v10036_v59, %v10035_v61  ;;  %v3347_v6 = vadd.f32 %v3346_v25, %v11877_v15  ;;  %v10039_v26 = vpop.permute.xlu0 %10038  ;;  %v3348_v13 = vpop.f32.mrb[17].mxu0  ;;  %v2872_v34 = vsel %vm2809_vm4, %v2775_v11, %v10035_v61  ;;  %v2873_v17 = vsel %vm2809_vm4, %v2776_v12, %v10036_v59  ;;  %v568_v25 = vld [vmem:[%s10937_s22 + $0x2c0] sm:$0xff]  ;;  %v569_v11 = vld [vmem:[%s10937_s22 + $0x2c8] sm:$0xff] }
 0x189   : > { %v10041_v32 = vunpack.i.h.bf16 %v10039_v26  ;;  %v10040_v60 = vunpack.i.l.bf16 %v10039_v26  ;;  %v3349_v14 = vadd.f32 %v3348_v13, %v11890_v23  ;;  %v10044_v21 = vpop.permute.xlu1 %10043  ;;  %v3350_v28 = vpop.f32.mrb[18].mxu0  ;;  %8771 = vmatprep.mubr.msk.bf16.mxu1 %vm4145_vm6, %v12136_v19  ;;  %v2968_v30 = vpack.c.bf16 %v2873_v17, %v2872_v34 }
 0x18a   : > { %v10046_v43 = vunpack.i.h.bf16 %v10044_v21  ;;  %v10045_v18 = vunpack.i.l.bf16 %v10044_v21  ;;  %v3351_v63 = vadd.f32 %v3350_v28, %v11877_v15  ;;  %10328 = vrot.lane.b32.xlu0 %v10327_v45, %s10821_s27  ;;  %v3352_v31 = vpop.f32.mrb[19].mxu0  ;;  %4347 = vmatmul.mubr.bf16.gmra.mrb[12].mxu1 %v12134_v62  ;;  %v3801_v3 = vmax.f32 %v3347_v6, 0.0 }
 0x18b   : > { %v2583_v37 = vsel %vm2518_vm1, %v566_v41, %v10040_v60  ;;  %v2584_v35 = vsel %vm2518_vm1, %v567_v10, %v10041_v32  ;;  %v3353_v38 = vadd.f32 %v3352_v31, %v11890_v23  ;;  %10333 = vrot.lane.b32.xlu1 %v10332_v0, %s10823_s21  ;;  %8742 = vmatprep.mubr.msk.bf16.mxu0 %vm3120_vm5, %v2969_v2  ;;  %v3802_v8 = vmax.f32 %v3349_v14, 0.0 }
 0x18c   : > { %v2680_v39 = vsel %vm2615_vm2, %v2583_v37, %v10045_v18  ;;  %v2681_v44 = vsel %vm2615_vm2, %v2584_v35, %v10046_v43  ;;  %v3803_v45 = vmax.f32 %v3351_v63, 0.0  ;;  %v10049_v46 = vpop.permute.xlu0 %10048  ;;  %3615 = vmatmul.mubr.bf16.gmra.mrb[124].mxu0 %v2968_v30 }
 0x18d   : > { %v3804_v9 = vmax.f32 %v3353_v38, 0.0  ;;  %v10051_v42 = vunpack.i.h.bf16 %v10049_v46  ;;  %v10050_v49 = vunpack.i.l.bf16 %v10049_v46  ;;  %v10054_v50 = vpop.permute.xlu1 %10053 }
 0x18e   : > { %v10056_v53 = vunpack.i.h.bf16 %v10054_v50  ;;  %v10055_v54 = vunpack.i.l.bf16 %v10054_v50  ;;  %10338 = vrot.lane.b32.xlu0 %v10337_v33, %s10820_s20  ;;  %v12168_v57 = vpack.c.bf16 %v3803_v45, %v3801_v3 }
 0x18f   : > { %v12170_v58 = vpack.c.bf16 %v3804_v9, %v3802_v8  ;;  %10343 = vrot.lane.b32.xlu1 %v10342_v36, %s10822_s17  ;;  %v3356_v4 = vpop.f32.mrb[20].mxu0  ;;  %v2777_v5 = vsel %vm2712_vm3, %v2680_v39, %v10050_v49  ;;  %v2778_v24 = vsel %vm2712_vm3, %v2681_v44, %v10051_v42  ;;  %v570_v9 = vld [vmem:[%s10937_s22 + $0x2d0] sm:$0xff]  ;;  %v571_v42 = vld [vmem:[%s10937_s22 + $0x2e0] sm:$0xff] }
 0x190   : > { %v2971_v59 = vpack.c.bf16 %v10056_v53, %v10055_v54  ;;  %v3357_v61 = vadd.f32 %v3356_v4, %v11877_v15  ;;  %v10059_v0 = vpop.permute.xlu0 %10058  ;;  %v3358_v12 = vpop.f32.mrb[21].mxu0  ;;  %v2874_v33 = vsel %vm2809_vm4, %v2777_v5, %v10055_v54  ;;  %v2875_v40 = vsel %vm2809_vm4, %v2778_v24, %v10056_v53 }
 0x191   : > { %v10061_v1 = vunpack.i.h.bf16 %v10059_v0  ;;  %v10060_v2 = vunpack.i.l.bf16 %v10059_v0  ;;  %v3359_v6 = vadd.f32 %v3358_v12, %v11890_v23  ;;  %v10064_v26 = vpop.permute.xlu1 %10063  ;;  %v3360_v41 = vpop.f32.mrb[22].mxu0  ;;  %8772 = vmatprep.mubr.msk.bf16.mxu1 %vm4145_vm6, %v12170_v58  ;;  %v2970_v10 = vpack.c.bf16 %v2875_v40, %v2874_v33 }
 0x192   : > { %v10066_v13 = vunpack.i.h.bf16 %v10064_v26  ;;  %v10065_v34 = vunpack.i.l.bf16 %v10064_v26  ;;  %v3361_v17 = vadd.f32 %v3360_v41, %v11877_v15  ;;  %10348 = vrot.lane.b32.xlu0 %v10347_v56, %s10821_s27  ;;  %v3362_v32 = vpop.f32.mrb[23].mxu0  ;;  %4355 = vmatmul.mubr.bf16.gmra.mrb[16].mxu1 %v12168_v57  ;;  %v3805_v28 = vmax.f32 %v3357_v61, 0.0 }
 0x193   : > { %v2585_v60 = vsel %vm2518_vm1, %v568_v25, %v10060_v2  ;;  %v2586_v14 = vsel %vm2518_vm1, %v569_v11, %v10061_v1  ;;  %v3363_v21 = vadd.f32 %v3362_v32, %v11890_v23  ;;  %10353 = vrot.lane.b32.xlu1 %v10352_v55, %s10823_s21  ;;  %8743 = vmatprep.mubr.msk.bf16.mxu0 %vm3120_vm5, %v2971_v59  ;;  %v3806_v31 = vmax.f32 %v3359_v6, 0.0 }
 0x194   : > { %v2682_v30 = vsel %vm2615_vm2, %v2585_v60, %v10065_v34  ;;  %v2683_v43 = vsel %vm2615_vm2, %v2586_v14, %v10066_v13  ;;  %v3807_v18 = vmax.f32 %v3361_v17, 0.0  ;;  %v10069_v63 = vpop.permute.xlu0 %10068  ;;  %3625 = vmatmul.mubr.bf16.gmra.mrb[128].mxu0 %v2970_v10 }
 0x195   : > { %v3808_v36 = vmax.f32 %v3363_v21, 0.0  ;;  %v10071_v37 = vunpack.i.h.bf16 %v10069_v63  ;;  %v10070_v35 = vunpack.i.l.bf16 %v10069_v63  ;;  %v10074_v38 = vpop.permute.xlu1 %10073 }
 0x196   : > { %v10076_v51 = vunpack.i.h.bf16 %v10074_v38  ;;  %v10075_v52 = vunpack.i.l.bf16 %v10074_v38  ;;  %v12193_v3 = vpack.c.bf16 %v3807_v18, %v3805_v28 }
 0x197   : > { %v12195_v39 = vpack.c.bf16 %v3808_v36, %v3806_v31  ;;  %v3366_v44 = vpop.f32.mrb[24].mxu0  ;;  %v2779_v45 = vsel %vm2712_vm3, %v2682_v30, %v10070_v35  ;;  %v2780_v46 = vsel %vm2712_vm3, %v2683_v43, %v10071_v37  ;;  %v572_v36 = vld [vmem:[%s10937_s22 + $0x2e8] sm:$0xff]  ;;  %v573_v37 = vld [vmem:[%s10937_s22 + $0x2f0] sm:$0xff] }
 0x198   : > { %v2973_v47 = vpack.c.bf16 %v10076_v51, %v10075_v52  ;;  %v3367_v48 = vadd.f32 %v3366_v44, %v11877_v15  ;;  %v10079_v8 = vpop.permute.xlu0 %10078  ;;  %v3368_v49 = vpop.f32.mrb[25].mxu0  ;;  %v2876_v50 = vsel %vm2809_vm4, %v2779_v45, %v10075_v52  ;;  %v2877_v53 = vsel %vm2809_vm4, %v2780_v46, %v10076_v51 }
 0x199   : > { %v10081_v54 = vunpack.i.h.bf16 %v10079_v8  ;;  %v10080_v56 = vunpack.i.l.bf16 %v10079_v8  ;;  %v3369_v4 = vadd.f32 %v3368_v49, %v11890_v23  ;;  %v10084_v55 = vpop.permute.xlu1 %10083  ;;  %v3370_v5 = vpop.f32.mrb[26].mxu0  ;;  %8773 = vmatprep.mubr.msk.bf16.mxu1 %vm4145_vm6, %v12195_v39  ;;  %v2972_v24 = vpack.c.bf16 %v2877_v53, %v2876_v50 }
 0x19a   : > { %v10086_v59 = vunpack.i.h.bf16 %v10084_v55  ;;  %v10085_v61 = vunpack.i.l.bf16 %v10084_v55  ;;  %v3371_v0 = vadd.f32 %v3370_v5, %v11877_v15  ;;  %v3372_v25 = vpop.f32.mrb[27].mxu0  ;;  %4363 = vmatmul.mubr.bf16.gmra.mrb[20].mxu1 %v12193_v3  ;;  %8744 = vmatprep.mubr.msk.bf16.mxu0 %vm3120_vm5, %v2973_v47  ;;  %v3809_v40 = vmax.f32 %v3367_v48, 0.0 }
 0x19b   : > { %v2587_v11 = vsel %vm2518_vm1, %v570_v9, %v10080_v56  ;;  %v2588_v12 = vsel %vm2518_vm1, %v571_v42, %v10081_v54  ;;  %v3373_v33 = vadd.f32 %v3372_v25, %v11890_v23  ;;  %v3810_v41 = vmax.f32 %v3369_v4, 0.0 }
 0x19c   : > { %v2684_v1 = vsel %vm2615_vm2, %v2587_v11, %v10085_v61  ;;  %v2685_v2 = vsel %vm2615_vm2, %v2588_v12, %v10086_v59  ;;  %v3811_v6 = vmax.f32 %v3371_v0, 0.0  ;;  %v10089_v26 = vpop.permute.xlu0 %10088  ;;  %3635 = vmatmul.mubr.bf16.gmra.mrb[132].mxu0 %v2972_v24 }
 0x19d   : > { %v3812_v10 = vmax.f32 %v3373_v33, 0.0  ;;  %v10091_v13 = vunpack.i.h.bf16 %v10089_v26  ;;  %v10090_v34 = vunpack.i.l.bf16 %v10089_v26  ;;  %v10094_v17 = vpop.permute.xlu1 %10093 }
 0x19e   : > { %v10096_v32 = vunpack.i.h.bf16 %v10094_v17  ;;  %v10095_v60 = vunpack.i.l.bf16 %v10094_v17  ;;  %v12215_v14 = vpack.c.bf16 %v3811_v6, %v3809_v40  ;;  %v575_v17 = vld [vmem:[%s10937_s22 + $0x308] sm:$0xff] }
 0x19f   : > { %v12217_v21 = vpack.c.bf16 %v3812_v10, %v3810_v41  ;;  %v3376_v28 = vpop.f32.mrb[28].mxu0  ;;  %v2781_v30 = vsel %vm2712_vm3, %v2684_v1, %v10090_v34  ;;  %v2782_v43 = vsel %vm2712_vm3, %v2685_v2, %v10091_v13  ;;  %v574_v34 = vld [vmem:[%s10937_s22 + $0x300] sm:$0xff] }
 0x1a0   : > { %v2975_v18 = vpack.c.bf16 %v10096_v32, %v10095_v60  ;;  %v3377_v63 = vadd.f32 %v3376_v28, %v11877_v15  ;;  %v10099_v31 = vpop.permute.xlu0 %10098  ;;  %v3378_v35 = vpop.f32.mrb[29].mxu0  ;;  %v2878_v38 = vsel %vm2809_vm4, %v2781_v30, %v10095_v60  ;;  %v2879_v51 = vsel %vm2809_vm4, %v2782_v43, %v10096_v32 }
 0x1a1   : > { %v10101_v52 = vunpack.i.h.bf16 %v10099_v31  ;;  %v10100_v44 = vunpack.i.l.bf16 %v10099_v31  ;;  %v3379_v45 = vadd.f32 %v3378_v35, %v11890_v23  ;;  %v10104_v46 = vpop.permute.xlu1 %10103  ;;  %v3380_v47 = vpop.f32.mrb[30].mxu0  ;;  %8774 = vmatprep.mubr.msk.bf16.mxu1 %vm4145_vm6, %v12217_v21  ;;  %v2974_v48 = vpack.c.bf16 %v2879_v51, %v2878_v38 }
 0x1a2   : > { %v10106_v8 = vunpack.i.h.bf16 %v10104_v46  ;;  %v10105_v9 = vunpack.i.l.bf16 %v10104_v46  ;;  %v3381_v42 = vadd.f32 %v3380_v47, %v11877_v15  ;;  %v3382_v49 = vpop.f32.mrb[31].mxu0  ;;  %4371 = vmatmul.mubr.bf16.gmra.mrb[24].mxu1 %v12215_v14  ;;  %8745 = vmatprep.mubr.msk.bf16.mxu0 %vm3120_vm5, %v2975_v18  ;;  %v3813_v56 = vmax.f32 %v3377_v63, 0.0 }
 0x1a3   : > { %v2589_v50 = vsel %vm2518_vm1, %v572_v36, %v10100_v44  ;;  %v2590_v53 = vsel %vm2518_vm1, %v573_v37, %v10101_v52  ;;  %v3383_v54 = vadd.f32 %v3382_v49, %v11890_v23  ;;  %v3814_v59 = vmax.f32 %v3379_v45, 0.0 }
 0x1a4   : > { %v2686_v4 = vsel %vm2615_vm2, %v2589_v50, %v10105_v9  ;;  %v2687_v55 = vsel %vm2615_vm2, %v2590_v53, %v10106_v8  ;;  %v3815_v5 = vmax.f32 %v3381_v42, 0.0  ;;  %v10109_v24 = vpop.permute.xlu0 %10108  ;;  %3645 = vmatmul.mubr.bf16.gmra.mrb[136].mxu0 %v2974_v48 }
 0x1a5   : > { %v3816_v61 = vmax.f32 %v3383_v54, 0.0  ;;  %v10111_v0 = vunpack.i.h.bf16 %v10109_v24  ;;  %v10110_v25 = vunpack.i.l.bf16 %v10109_v24  ;;  %v10114_v11 = vpop.permute.xlu1 %10113 }
 0x1a6   : > { %v10116_v12 = vunpack.i.h.bf16 %v10114_v11  ;;  %v10115_v33 = vunpack.i.l.bf16 %v10114_v11  ;;  %v12237_v40 = vpack.c.bf16 %v3815_v5, %v3813_v56 }
 0x1a7   : > { %v12239_v1 = vpack.c.bf16 %v3816_v61, %v3814_v59  ;;  %v3386_v2 = vpop.f32.mrb[32].mxu0  ;;  %v2783_v6 = vsel %vm2712_vm3, %v2686_v4, %v10110_v25  ;;  %v2784_v26 = vsel %vm2712_vm3, %v2687_v55, %v10111_v0 }
 0x1a8   : > { %v2977_v41 = vpack.c.bf16 %v10116_v12, %v10115_v33  ;;  %v3387_v10 = vadd.f32 %v3386_v2, %v11877_v15  ;;  %v10119_v13 = vpop.permute.xlu0 %10118  ;;  %v3388_v32 = vpop.f32.mrb[33].mxu0  ;;  %v2880_v60 = vsel %vm2809_vm4, %v2783_v6, %v10115_v33  ;;  %v2881_v28 = vsel %vm2809_vm4, %v2784_v26, %v10116_v12  ;;  %v576_v12 = vld [vmem:[%s10937_s22 + $0x310] sm:$0xff]  ;;  %v577_v33 = vld [vmem:[%s10937_s22 + $0x320] sm:$0xff] }
 0x1a9   : > { %v10121_v30 = vunpack.i.h.bf16 %v10119_v13  ;;  %v10120_v43 = vunpack.i.l.bf16 %v10119_v13  ;;  %v3389_v18 = vadd.f32 %v3388_v32, %v11890_v23  ;;  %v10124_v63 = vpop.permute.xlu1 %10123  ;;  %v3390_v31 = vpop.f32.mrb[34].mxu0  ;;  %8775 = vmatprep.mubr.msk.bf16.mxu1 %vm4145_vm6, %v12239_v1  ;;  %v2976_v36 = vpack.c.bf16 %v2881_v28, %v2880_v60 }
 0x1aa   : > { %v10126_v37 = vunpack.i.h.bf16 %v10124_v63  ;;  %v10125_v35 = vunpack.i.l.bf16 %v10124_v63  ;;  %v3391_v38 = vadd.f32 %v3390_v31, %v11877_v15  ;;  %v3392_v51 = vpop.f32.mrb[35].mxu0  ;;  %4379 = vmatmul.mubr.bf16.gmra.mrb[28].mxu1 %v12237_v40  ;;  %8746 = vmatprep.mubr.msk.bf16.mxu0 %vm3120_vm5, %v2977_v41  ;;  %v3817_v46 = vmax.f32 %v3387_v10, 0.0 }
 0x1ab   : > { %v2591_v52 = vsel %vm2518_vm1, %v574_v34, %v10120_v43  ;;  %v2592_v44 = vsel %vm2518_vm1, %v575_v17, %v10121_v30  ;;  %v3393_v45 = vadd.f32 %v3392_v51, %v11890_v23  ;;  %v3818_v42 = vmax.f32 %v3389_v18, 0.0 }
 0x1ac   : > { %v2688_v47 = vsel %vm2615_vm2, %v2591_v52, %v10125_v35  ;;  %v2689_v48 = vsel %vm2615_vm2, %v2592_v44, %v10126_v37  ;;  %v3819_v8 = vmax.f32 %v3391_v38, 0.0  ;;  %v10129_v9 = vpop.permute.xlu0 %10128  ;;  %3655 = vmatmul.mubr.bf16.gmra.mrb[140].mxu0 %v2976_v36 }
 0x1ad   : > { %v3820_v49 = vmax.f32 %v3393_v45, 0.0  ;;  %v10131_v50 = vunpack.i.h.bf16 %v10129_v9  ;;  %v10130_v53 = vunpack.i.l.bf16 %v10129_v9  ;;  %v10134_v54 = vpop.permute.xlu1 %10133 }
 0x1ae   : > { %v10136_v56 = vunpack.i.h.bf16 %v10134_v54  ;;  %v10135_v4 = vunpack.i.l.bf16 %v10134_v54  ;;  %v12259_v55 = vpack.c.bf16 %v3819_v8, %v3817_v46 }
 0x1af   : > { %v12261_v5 = vpack.c.bf16 %v3820_v49, %v3818_v42  ;;  %v3396_v24 = vpop.f32.mrb[36].mxu0  ;;  %v2785_v59 = vsel %vm2712_vm3, %v2688_v47, %v10130_v53  ;;  %v2786_v61 = vsel %vm2712_vm3, %v2689_v48, %v10131_v50 }
 0x1b0   : > { %v2979_v0 = vpack.c.bf16 %v10136_v56, %v10135_v4  ;;  %v3397_v25 = vadd.f32 %v3396_v24, %v11877_v15  ;;  %v10139_v11 = vpop.permute.xlu0 %10138  ;;  %v3398_v2 = vpop.f32.mrb[37].mxu0  ;;  %v2882_v6 = vsel %vm2809_vm4, %v2785_v59, %v10135_v4  ;;  %v2883_v26 = vsel %vm2809_vm4, %v2786_v61, %v10136_v56  ;;  %v578_v24 = vld [vmem:[%s10937_s22 + $0x328] sm:$0xff]  ;;  %v579_v59 = vld [vmem:[%s10937_s22 + $0x330] sm:$0xff] }
 0x1b1   : > { %v10141_v41 = vunpack.i.h.bf16 %v10139_v11  ;;  %v10140_v10 = vunpack.i.l.bf16 %v10139_v11  ;;  %v3399_v13 = vadd.f32 %v3398_v2, %v11890_v23  ;;  %v10144_v34 = vpop.permute.xlu1 %10143  ;;  %v3400_v17 = vpop.f32.mrb[38].mxu0  ;;  %8776 = vmatprep.mubr.msk.bf16.mxu1 %vm4145_vm6, %v12261_v5  ;;  %v2978_v32 = vpack.c.bf16 %v2883_v26, %v2882_v6 }
 0x1b2   : > { %v10146_v60 = vunpack.i.h.bf16 %v10144_v34  ;;  %v10145_v28 = vunpack.i.l.bf16 %v10144_v34  ;;  %v3401_v30 = vadd.f32 %v3400_v17, %v11877_v15  ;;  %v3402_v43 = vpop.f32.mrb[39].mxu0  ;;  %4387 = vmatmul.mubr.bf16.gmra.mrb[32].mxu1 %v12259_v55  ;;  %8747 = vmatprep.mubr.msk.bf16.mxu0 %vm3120_vm5, %v2979_v0  ;;  %v3821_v36 = vmax.f32 %v3397_v25, 0.0 }
 0x1b3   : > { %v2593_v18 = vsel %vm2518_vm1, %v576_v12, %v10140_v10  ;;  %v2594_v63 = vsel %vm2518_vm1, %v577_v33, %v10141_v41  ;;  %v3403_v31 = vadd.f32 %v3402_v43, %v11890_v23  ;;  %v3822_v52 = vmax.f32 %v3399_v13, 0.0 }
 0x1b4   : > { %v2690_v37 = vsel %vm2615_vm2, %v2593_v18, %v10145_v28  ;;  %v2691_v35 = vsel %vm2615_vm2, %v2594_v63, %v10146_v60  ;;  %v3823_v38 = vmax.f32 %v3401_v30, 0.0  ;;  %v10149_v51 = vpop.permute.xlu0 %10148  ;;  %3665 = vmatmul.mubr.bf16.gmra.mrb[144].mxu0 %v2978_v32 }
 0x1b5   : > { %v3824_v44 = vmax.f32 %v3403_v31, 0.0  ;;  %v10151_v45 = vunpack.i.h.bf16 %v10149_v51  ;;  %v10150_v46 = vunpack.i.l.bf16 %v10149_v51  ;;  %v10154_v47 = vpop.permute.xlu1 %10153 }
 0x1b6   : > { %v10156_v48 = vunpack.i.h.bf16 %v10154_v47  ;;  %v10155_v8 = vunpack.i.l.bf16 %v10154_v47  ;;  %v12281_v9 = vpack.c.bf16 %v3823_v38, %v3821_v36 }
 0x1b7   : > { %v12283_v42 = vpack.c.bf16 %v3824_v44, %v3822_v52  ;;  %v3406_v49 = vpop.f32.mrb[40].mxu0  ;;  %v2787_v50 = vsel %vm2712_vm3, %v2690_v37, %v10150_v46  ;;  %v2788_v53 = vsel %vm2712_vm3, %v2691_v35, %v10151_v45 }
 0x1b8   : > { %v2981_v54 = vpack.c.bf16 %v10156_v48, %v10155_v8  ;;  %v3407_v56 = vadd.f32 %v3406_v49, %v11877_v15  ;;  %v10159_v4 = vpop.permute.xlu0 %10158  ;;  %v3408_v61 = vpop.f32.mrb[41].mxu0  ;;  %v2884_v0 = vsel %vm2809_vm4, %v2787_v50, %v10155_v8  ;;  %v2885_v25 = vsel %vm2809_vm4, %v2788_v53, %v10156_v48  ;;  %v580_v53 = vld [vmem:[%s10937_s22 + $0x340] sm:$0xff] }
 0x1b9   : > { %v10161_v11 = vunpack.i.h.bf16 %v10159_v4  ;;  %v10160_v12 = vunpack.i.l.bf16 %v10159_v4  ;;  %v3409_v33 = vadd.f32 %v3408_v61, %v11890_v23  ;;  %v10164_v2 = vpop.permute.xlu1 %10163  ;;  %v3410_v6 = vpop.f32.mrb[42].mxu0  ;;  %8777 = vmatprep.mubr.msk.bf16.mxu1 %vm4145_vm6, %v12283_v42  ;;  %v2980_v26 = vpack.c.bf16 %v2885_v25, %v2884_v0 }
 0x1ba   : > { %v10166_v41 = vunpack.i.h.bf16 %v10164_v2  ;;  %v10165_v10 = vunpack.i.l.bf16 %v10164_v2  ;;  %v3411_v13 = vadd.f32 %v3410_v6, %v11877_v15  ;;  %v3412_v34 = vpop.f32.mrb[43].mxu0  ;;  %4395 = vmatmul.mubr.bf16.gmra.mrb[36].mxu1 %v12281_v9  ;;  %8748 = vmatprep.mubr.msk.bf16.mxu0 %vm3120_vm5, %v2981_v54  ;;  %v3825_v28 = vmax.f32 %v3407_v56, 0.0  ;;  %v581_v54 = vld [vmem:[%s10937_s22 + $0x348] sm:$0xff] }
 0x1bb   : > { %v2595_v17 = vsel %vm2518_vm1, %v578_v24, %v10160_v12  ;;  %v2596_v32 = vsel %vm2518_vm1, %v579_v59, %v10161_v11  ;;  %v3413_v60 = vadd.f32 %v3412_v34, %v11890_v23  ;;  %v3826_v31 = vmax.f32 %v3409_v33, 0.0 }
 0x1bc   : > { %v2692_v30 = vsel %vm2615_vm2, %v2595_v17, %v10165_v10  ;;  %v2693_v43 = vsel %vm2615_vm2, %v2596_v32, %v10166_v41  ;;  %v3827_v18 = vmax.f32 %v3411_v13, 0.0  ;;  %v10169_v63 = vpop.permute.xlu0 %10168  ;;  %3675 = vmatmul.mubr.bf16.gmra.mrb[148].mxu0 %v2980_v26 }
 0x1bd   : > { %v3828_v36 = vmax.f32 %v3413_v60, 0.0  ;;  %v10171_v37 = vunpack.i.h.bf16 %v10169_v63  ;;  %v10170_v35 = vunpack.i.l.bf16 %v10169_v63  ;;  %v10174_v38 = vpop.permute.xlu1 %10173 }
 0x1be   : > { %v10176_v51 = vunpack.i.h.bf16 %v10174_v38  ;;  %v10175_v52 = vunpack.i.l.bf16 %v10174_v38  ;;  %v12303_v44 = vpack.c.bf16 %v3827_v18, %v3825_v28 }
 0x1bf   : > { %v12305_v45 = vpack.c.bf16 %v3828_v36, %v3826_v31  ;;  %v3416_v46 = vpop.f32.mrb[44].mxu0  ;;  %v2789_v47 = vsel %vm2712_vm3, %v2692_v30, %v10170_v35  ;;  %v2790_v48 = vsel %vm2712_vm3, %v2693_v43, %v10171_v37 }
 0x1c0   : > { %v2983_v8 = vpack.c.bf16 %v10176_v51, %v10175_v52  ;;  %v3417_v49 = vadd.f32 %v3416_v46, %v11877_v15  ;;  %v10179_v50 = vpop.permute.xlu0 %10178  ;;  %v3418_v56 = vpop.f32.mrb[45].mxu0  ;;  %v2886_v4 = vsel %vm2809_vm4, %v2789_v47, %v10175_v52  ;;  %v2887_v24 = vsel %vm2809_vm4, %v2790_v48, %v10176_v51 }
 0x1c1   : > { %v10181_v59 = vunpack.i.h.bf16 %v10179_v50  ;;  %v10180_v61 = vunpack.i.l.bf16 %v10179_v50  ;;  %v3419_v0 = vadd.f32 %v3418_v56, %v11890_v23  ;;  %v10184_v25 = vpop.permute.xlu1 %10183  ;;  %v3420_v11 = vpop.f32.mrb[46].mxu0  ;;  %8778 = vmatprep.mubr.msk.bf16.mxu1 %vm4145_vm6, %v12305_v45  ;;  %v2982_v12 = vpack.c.bf16 %v2887_v24, %v2886_v4  ;;  %v583_v50 = vld [vmem:[%s10937_s22 + $0x360] sm:$0xff] }
 0x1c2   : > { %v10186_v33 = vunpack.i.h.bf16 %v10184_v25  ;;  %v10185_v2 = vunpack.i.l.bf16 %v10184_v25  ;;  %v3421_v6 = vadd.f32 %v3420_v11, %v11877_v15  ;;  %v3422_v26 = vpop.f32.mrb[47].mxu0  ;;  %4403 = vmatmul.mubr.bf16.gmra.mrb[40].mxu1 %v12303_v44  ;;  %8749 = vmatprep.mubr.msk.bf16.mxu0 %vm3120_vm5, %v2983_v8  ;;  %v3829_v34 = vmax.f32 %v3417_v49, 0.0  ;;  %v582_v49 = vld [vmem:[%s10937_s22 + $0x350] sm:$0xff] }
 0x1c3   : > { %v2597_v41 = vsel %vm2518_vm1, %v580_v53, %v10180_v61  ;;  %v2598_v10 = vsel %vm2518_vm1, %v581_v54, %v10181_v59  ;;  %v3423_v13 = vadd.f32 %v3422_v26, %v11890_v23  ;;  %v3830_v30 = vmax.f32 %v3419_v0, 0.0 }
 0x1c4   : > { %v2694_v17 = vsel %vm2615_vm2, %v2597_v41, %v10185_v2  ;;  %v2695_v32 = vsel %vm2615_vm2, %v2598_v10, %v10186_v33  ;;  %v3831_v60 = vmax.f32 %v3421_v6, 0.0  ;;  %v10189_v28 = vpop.permute.xlu0 %10188  ;;  %3685 = vmatmul.mubr.bf16.gmra.mrb[152].mxu0 %v2982_v12 }
 0x1c5   : > { %v3832_v43 = vmax.f32 %v3423_v13, 0.0  ;;  %v10191_v18 = vunpack.i.h.bf16 %v10189_v28  ;;  %v10190_v63 = vunpack.i.l.bf16 %v10189_v28  ;;  %v10194_v31 = vpop.permute.xlu1 %10193 }
 0x1c6   : > { %v10196_v36 = vunpack.i.h.bf16 %v10194_v31  ;;  %v10195_v37 = vunpack.i.l.bf16 %v10194_v31  ;;  %v12325_v35 = vpack.c.bf16 %v3831_v60, %v3829_v34 }
 0x1c7   : > { %v12327_v38 = vpack.c.bf16 %v3832_v43, %v3830_v30  ;;  %v3426_v51 = vpop.f32.mrb[48].mxu0  ;;  %v2791_v52 = vsel %vm2712_vm3, %v2694_v17, %v10190_v63  ;;  %v2792_v46 = vsel %vm2712_vm3, %v2695_v32, %v10191_v18 }
 0x1c8   : > { %v2985_v47 = vpack.c.bf16 %v10196_v36, %v10195_v37  ;;  %v3427_v48 = vadd.f32 %v3426_v51, %v11877_v15  ;;  %v10199_v8 = vpop.permute.xlu0 %10198  ;;  %v3428_v53 = vpop.f32.mrb[49].mxu0  ;;  %v2888_v54 = vsel %vm2809_vm4, %v2791_v52, %v10195_v37  ;;  %v2889_v56 = vsel %vm2809_vm4, %v2792_v46, %v10196_v36 }
 0x1c9   : > { %v10201_v4 = vunpack.i.h.bf16 %v10199_v8  ;;  %v10200_v24 = vunpack.i.l.bf16 %v10199_v8  ;;  %v3429_v59 = vadd.f32 %v3428_v53, %v11890_v23  ;;  %v10204_v61 = vpop.permute.xlu1 %10203  ;;  %v3430_v0 = vpop.f32.mrb[50].mxu0  ;;  %8779 = vmatprep.mubr.msk.bf16.mxu1 %vm4145_vm6, %v12327_v38  ;;  %v2984_v25 = vpack.c.bf16 %v2889_v56, %v2888_v54 }
 0x1ca   : > { %v10206_v11 = vunpack.i.h.bf16 %v10204_v61  ;;  %v10205_v12 = vunpack.i.l.bf16 %v10204_v61  ;;  %v3431_v33 = vadd.f32 %v3430_v0, %v11877_v15  ;;  %v3432_v2 = vpop.f32.mrb[51].mxu0  ;;  %4411 = vmatmul.mubr.bf16.gmra.mrb[44].mxu1 %v12325_v35  ;;  %8750 = vmatprep.mubr.msk.bf16.mxu0 %vm3120_vm5, %v2985_v47  ;;  %v3833_v10 = vmax.f32 %v3427_v48, 0.0 }
 0x1cb   : > { %v2599_v6 = vsel %vm2518_vm1, %v582_v49, %v10200_v24  ;;  %v2600_v26 = vsel %vm2518_vm1, %v583_v50, %v10201_v4  ;;  %v3433_v41 = vadd.f32 %v3432_v2, %v11890_v23  ;;  %v3834_v60 = vmax.f32 %v3429_v59, 0.0  ;;  %v584_v49 = vld [vmem:[%s10937_s22 + $0x368] sm:$0xff]  ;;  %v585_v50 = vld [vmem:[%s10937_s22 + $0x370] sm:$0xff] }
 0x1cc   : > { %v2696_v13 = vsel %vm2615_vm2, %v2599_v6, %v10205_v12  ;;  %v2697_v34 = vsel %vm2615_vm2, %v2600_v26, %v10206_v11  ;;  %v3835_v17 = vmax.f32 %v3431_v33, 0.0  ;;  %v10209_v32 = vpop.permute.xlu0 %10208  ;;  %3695 = vmatmul.mubr.bf16.gmra.mrb[156].mxu0 %v2984_v25 }
 0x1cd   : > { %v3836_v28 = vmax.f32 %v3433_v41, 0.0  ;;  %v10211_v30 = vunpack.i.h.bf16 %v10209_v32  ;;  %v10210_v43 = vunpack.i.l.bf16 %v10209_v32  ;;  %v10214_v18 = vpop.permute.xlu1 %10213 }
 0x1ce   : > { %v10216_v63 = vunpack.i.h.bf16 %v10214_v18  ;;  %v10215_v31 = vunpack.i.l.bf16 %v10214_v18  ;;  %v12347_v36 = vpack.c.bf16 %v3835_v17, %v3833_v10 }
 0x1cf   : > { %v12349_v37 = vpack.c.bf16 %v3836_v28, %v3834_v60  ;;  %v2793_v51 = vsel %vm2712_vm3, %v2696_v13, %v10210_v43  ;;  %v2794_v52 = vsel %vm2712_vm3, %v2697_v34, %v10211_v30  ;;  %v3436_v46 = vpop.f32.mrb[52].mxu0 }
 0x1d0   : > { %v2987_v47 = vpack.c.bf16 %v10216_v63, %v10215_v31  ;;  %v3437_v48 = vadd.f32 %v3436_v46, %v11877_v15  ;;  %v10219_v8 = vpop.permute.xlu0 %10218  ;;  %v3438_v53 = vpop.f32.mrb[53].mxu0  ;;  %v2890_v54 = vsel %vm2809_vm4, %v2793_v51, %v10215_v31  ;;  %v2891_v56 = vsel %vm2809_vm4, %v2794_v52, %v10216_v63 }
 0x1d1   : > { %v10221_v4 = vunpack.i.h.bf16 %v10219_v8  ;;  %v10220_v24 = vunpack.i.l.bf16 %v10219_v8  ;;  %v3439_v59 = vadd.f32 %v3438_v53, %v11890_v23  ;;  %v10224_v61 = vpop.permute.xlu1 %10223  ;;  %v3440_v0 = vpop.f32.mrb[54].mxu0  ;;  %8780 = vmatprep.mubr.msk.bf16.mxu1 %vm4145_vm6, %v12349_v37  ;;  %v2986_v25 = vpack.c.bf16 %v2891_v56, %v2890_v54  ;;  %v586_v53 = vld [vmem:[%s10937_s22 + $0x380] sm:$0xff]  ;;  %v587_v54 = vld [vmem:[%s10937_s22 + $0x388] sm:$0xff] }
 0x1d2   : > { %v10226_v11 = vunpack.i.h.bf16 %v10224_v61  ;;  %v10225_v12 = vunpack.i.l.bf16 %v10224_v61  ;;  %v3441_v33 = vadd.f32 %v3440_v0, %v11877_v15  ;;  %v3442_v2 = vpop.f32.mrb[55].mxu0  ;;  %4419 = vmatmul.mubr.bf16.gmra.mrb[48].mxu1 %v12347_v36  ;;  %8751 = vmatprep.mubr.msk.bf16.mxu0 %vm3120_vm5, %v2987_v47  ;;  %v3837_v10 = vmax.f32 %v3437_v48, 0.0 }
 0x1d3   : > { %v2601_v6 = vsel %vm2518_vm1, %v584_v49, %v10220_v24  ;;  %v2602_v26 = vsel %vm2518_vm1, %v585_v50, %v10221_v4  ;;  %v3443_v41 = vadd.f32 %v3442_v2, %v11890_v23  ;;  %v3838_v60 = vmax.f32 %v3439_v59, 0.0 }
 0x1d4   : > { %v2698_v13 = vsel %vm2615_vm2, %v2601_v6, %v10225_v12  ;;  %v2699_v34 = vsel %vm2615_vm2, %v2602_v26, %v10226_v11  ;;  %v3839_v17 = vmax.f32 %v3441_v33, 0.0  ;;  %v10229_v32 = vpop.permute.xlu0 %10228  ;;  %3705 = vmatmul.mubr.bf16.gmra.mrb[160].mxu0 %v2986_v25 }
 0x1d5   : > { %v3840_v28 = vmax.f32 %v3443_v41, 0.0  ;;  %v10231_v30 = vunpack.i.h.bf16 %v10229_v32  ;;  %v10230_v43 = vunpack.i.l.bf16 %v10229_v32  ;;  %v10234_v18 = vpop.permute.xlu1 %10233 }
 0x1d6   : > { %v10236_v63 = vunpack.i.h.bf16 %v10234_v18  ;;  %v10235_v31 = vunpack.i.l.bf16 %v10234_v18  ;;  %v12369_v51 = vpack.c.bf16 %v3839_v17, %v3837_v10 }
 0x1d7   : > { %v12371_v52 = vpack.c.bf16 %v3840_v28, %v3838_v60  ;;  %v2795_v46 = vsel %vm2712_vm3, %v2698_v13, %v10230_v43  ;;  %v2796_v47 = vsel %vm2712_vm3, %v2699_v34, %v10231_v30  ;;  %v3446_v48 = vpop.f32.mrb[56].mxu0 }
 0x1d8   : > { %v2989_v8 = vpack.c.bf16 %v10236_v63, %v10235_v31  ;;  %v3447_v49 = vadd.f32 %v3446_v48, %v11877_v15  ;;  %v10239_v50 = vpop.permute.xlu0 %10238  ;;  %v3448_v56 = vpop.f32.mrb[57].mxu0  ;;  %v2892_v4 = vsel %vm2809_vm4, %v2795_v46, %v10235_v31  ;;  %v2893_v24 = vsel %vm2809_vm4, %v2796_v47, %v10236_v63 }
 0x1d9   : > { %v10241_v59 = vunpack.i.h.bf16 %v10239_v50  ;;  %v10240_v61 = vunpack.i.l.bf16 %v10239_v50  ;;  %v3449_v0 = vadd.f32 %v3448_v56, %v11890_v23  ;;  %v10244_v25 = vpop.permute.xlu1 %10243  ;;  %v3450_v11 = vpop.f32.mrb[58].mxu0  ;;  %8781 = vmatprep.mubr.msk.bf16.mxu1 %vm4145_vm6, %v12371_v52  ;;  %v2988_v12 = vpack.c.bf16 %v2893_v24, %v2892_v4  ;;  %v588_v24 = vld [vmem:[%s10937_s22 + $0x390] sm:$0xff] }
 0x1da   : > { %v10246_v33 = vunpack.i.h.bf16 %v10244_v25  ;;  %v10245_v2 = vunpack.i.l.bf16 %v10244_v25  ;;  %v3451_v6 = vadd.f32 %v3450_v11, %v11877_v15  ;;  %v3452_v26 = vpop.f32.mrb[59].mxu0  ;;  %4427 = vmatmul.mubr.bf16.gmra.mrb[52].mxu1 %v12369_v51  ;;  %8752 = vmatprep.mubr.msk.bf16.mxu0 %vm3120_vm5, %v2989_v8  ;;  %v3841_v34 = vmax.f32 %v3447_v49, 0.0 }
 0x1db   : > { %v2603_v41 = vsel %vm2518_vm1, %v586_v53, %v10240_v61  ;;  %v2604_v10 = vsel %vm2518_vm1, %v587_v54, %v10241_v59  ;;  %v3453_v13 = vadd.f32 %v3452_v26, %v11890_v23  ;;  %v3842_v30 = vmax.f32 %v3449_v0, 0.0  ;;  %v589_v59 = vld [vmem:[%s10937_s22 + $0x3a0] sm:$0xff] }
 0x1dc   : > { %v2700_v17 = vsel %vm2615_vm2, %v2603_v41, %v10245_v2  ;;  %v2701_v32 = vsel %vm2615_vm2, %v2604_v10, %v10246_v33  ;;  %v3843_v60 = vmax.f32 %v3451_v6, 0.0  ;;  %v10249_v28 = vpop.permute.xlu0 %10248  ;;  %3715 = vmatmul.mubr.bf16.gmra.mrb[164].mxu0 %v2988_v12 }
 0x1dd   : > { %v3844_v43 = vmax.f32 %v3453_v13, 0.0  ;;  %v10251_v18 = vunpack.i.h.bf16 %v10249_v28  ;;  %v10250_v63 = vunpack.i.l.bf16 %v10249_v28  ;;  %v10254_v31 = vpop.permute.xlu1 %10253 }
 0x1de   : > { %v10256_v46 = vunpack.i.h.bf16 %v10254_v31  ;;  %v10255_v47 = vunpack.i.l.bf16 %v10254_v31  ;;  %v12391_v48 = vpack.c.bf16 %v3843_v60, %v3841_v34 }
 0x1df   : > { %v12393_v8 = vpack.c.bf16 %v3844_v43, %v3842_v30  ;;  %v2797_v49 = vsel %vm2712_vm3, %v2700_v17, %v10250_v63  ;;  %v2798_v50 = vsel %vm2712_vm3, %v2701_v32, %v10251_v18  ;;  %v3456_v53 = vpop.f32.mrb[60].mxu0 }
 0x1e0   : > { %v2991_v54 = vpack.c.bf16 %v10256_v46, %v10255_v47  ;;  %v3457_v56 = vadd.f32 %v3456_v53, %v11877_v15  ;;  %v10259_v4 = vpop.permute.xlu0 %10258  ;;  %v3458_v61 = vpop.f32.mrb[61].mxu0  ;;  %v2894_v0 = vsel %vm2809_vm4, %v2797_v49, %v10255_v47  ;;  %v2895_v25 = vsel %vm2809_vm4, %v2798_v50, %v10256_v46 }
 0x1e1   : > { %v10261_v11 = vunpack.i.h.bf16 %v10259_v4  ;;  %v10260_v12 = vunpack.i.l.bf16 %v10259_v4  ;;  %v3459_v33 = vadd.f32 %v3458_v61, %v11890_v23  ;;  %v10264_v2 = vpop.permute.xlu1 %10263  ;;  %v3460_v6 = vpop.f32.mrb[62].mxu0  ;;  %8782 = vmatprep.mubr.msk.bf16.mxu1 %vm4145_vm6, %v12393_v8  ;;  %v2990_v26 = vpack.c.bf16 %v2895_v25, %v2894_v0 }
 0x1e2   : > { %v10266_v41 = vunpack.i.h.bf16 %v10264_v2  ;;  %v10265_v10 = vunpack.i.l.bf16 %v10264_v2  ;;  %v3461_v13 = vadd.f32 %v3460_v6, %v11877_v15  ;;  %v3462_v34 = vpop.f32.mrb[63].mxu0  ;;  %4435 = vmatmul.mubr.bf16.gmra.mrb[56].mxu1 %v12391_v48  ;;  %8753 = vmatprep.mubr.msk.bf16.mxu0 %vm3120_vm5, %v2991_v54  ;;  %v3845_v28 = vmax.f32 %v3457_v56, 0.0 }
 0x1e3   : > { %v2605_v17 = vsel %vm2518_vm1, %v588_v24, %v10260_v12  ;;  %v2606_v32 = vsel %vm2518_vm1, %v589_v59, %v10261_v11  ;;  %v3463_v60 = vadd.f32 %v3462_v34, %v11890_v23  ;;  %v3846_v31 = vmax.f32 %v3459_v33, 0.0  ;;  %v590_v12 = vld [vmem:[%s10937_s22 + $0x3a8] sm:$0xff]  ;;  %v591_v33 = vld [vmem:[%s10937_s22 + $0x3b0] sm:$0xff] }
 0x1e4   : > { %v2702_v30 = vsel %vm2615_vm2, %v2605_v17, %v10265_v10  ;;  %v2703_v43 = vsel %vm2615_vm2, %v2606_v32, %v10266_v41  ;;  %v3847_v18 = vmax.f32 %v3461_v13, 0.0  ;;  %v10269_v63 = vpop.permute.xlu0 %10268  ;;  %3725 = vmatmul.mubr.bf16.gmra.mrb[168].mxu0 %v2990_v26 }
 0x1e5   : > { %v3848_v46 = vmax.f32 %v3463_v60, 0.0  ;;  %v10271_v47 = vunpack.i.h.bf16 %v10269_v63  ;;  %v10270_v49 = vunpack.i.l.bf16 %v10269_v63  ;;  %v10274_v50 = vpop.permute.xlu1 %10273 }
 0x1e6   : > { %v10276_v53 = vunpack.i.h.bf16 %v10274_v50  ;;  %v10275_v54 = vunpack.i.l.bf16 %v10274_v50  ;;  %v12413_v4 = vpack.c.bf16 %v3847_v18, %v3845_v28 }
 0x1e7   : > { %v12415_v24 = vpack.c.bf16 %v3848_v46, %v3846_v31  ;;  %v2799_v56 = vsel %vm2712_vm3, %v2702_v30, %v10270_v49  ;;  %v2800_v59 = vsel %vm2712_vm3, %v2703_v43, %v10271_v47  ;;  %v3466_v61 = vpop.f32.mrb[64].mxu0 }
 0x1e8   : > { %v2993_v0 = vpack.c.bf16 %v10276_v53, %v10275_v54  ;;  %v3467_v25 = vadd.f32 %v3466_v61, %v11877_v15  ;;  %v10279_v11 = vpop.permute.xlu0 %10278  ;;  %v3468_v2 = vpop.f32.mrb[65].mxu0  ;;  %v2896_v6 = vsel %vm2809_vm4, %v2799_v56, %v10275_v54  ;;  %v2897_v26 = vsel %vm2809_vm4, %v2800_v59, %v10276_v53 }
 0x1e9   : > { %v10281_v41 = vunpack.i.h.bf16 %v10279_v11  ;;  %v10280_v10 = vunpack.i.l.bf16 %v10279_v11  ;;  %v3469_v13 = vadd.f32 %v3468_v2, %v11890_v23  ;;  %v10284_v34 = vpop.permute.xlu1 %10283  ;;  %v3470_v17 = vpop.f32.mrb[66].mxu0  ;;  %8783 = vmatprep.mubr.msk.bf16.mxu1 %vm4145_vm6, %v12415_v24  ;;  %v2992_v32 = vpack.c.bf16 %v2897_v26, %v2896_v6 }
 0x1ea   : > { %v10286_v60 = vunpack.i.h.bf16 %v10284_v34  ;;  %v10285_v28 = vunpack.i.l.bf16 %v10284_v34  ;;  %v3471_v30 = vadd.f32 %v3470_v17, %v11877_v15  ;;  %v3472_v43 = vpop.f32.mrb[67].mxu0  ;;  %4443 = vmatmul.mubr.bf16.gmra.mrb[60].mxu1 %v12413_v4  ;;  %8754 = vmatprep.mubr.msk.bf16.mxu0 %vm3120_vm5, %v2993_v0  ;;  %v3849_v46 = vmax.f32 %v3467_v25, 0.0  ;;  %v592_v34 = vld [vmem:[%s10937_s22 + $0x3c0] sm:$0xff]  ;;  %v593_v17 = vld [vmem:[%s10937_s22 + $0x3c8] sm:$0xff] }
 0x1eb   : > { %v2607_v18 = vsel %vm2518_vm1, %v590_v12, %v10280_v10  ;;  %v2608_v63 = vsel %vm2518_vm1, %v591_v33, %v10281_v41  ;;  %v3473_v31 = vadd.f32 %v3472_v43, %v11890_v23  ;;  %v3850_v54 = vmax.f32 %v3469_v13, 0.0 }
 0x1ec   : > { %v2704_v47 = vsel %vm2615_vm2, %v2607_v18, %v10285_v28  ;;  %v2705_v49 = vsel %vm2615_vm2, %v2608_v63, %v10286_v60  ;;  %v3851_v50 = vmax.f32 %v3471_v30, 0.0  ;;  %v10289_v53 = vpop.permute.xlu0 %10288  ;;  %3735 = vmatmul.mubr.bf16.gmra.mrb[172].mxu0 %v2992_v32 }
 0x1ed   : > { %v3852_v56 = vmax.f32 %v3473_v31, 0.0  ;;  %v10291_v59 = vunpack.i.h.bf16 %v10289_v53  ;;  %v10290_v61 = vunpack.i.l.bf16 %v10289_v53  ;;  %v10294_v0 = vpop.permute.xlu1 %10293 }
 0x1ee   : > { %v10296_v11 = vunpack.i.h.bf16 %v10294_v0  ;;  %v10295_v12 = vunpack.i.l.bf16 %v10294_v0  ;;  %v12435_v33 = vpack.c.bf16 %v3851_v50, %v3849_v46 }
 0x1ef   : > { %v12437_v2 = vpack.c.bf16 %v3852_v56, %v3850_v54  ;;  %v2801_v25 = vsel %vm2712_vm3, %v2704_v47, %v10290_v61  ;;  %v2802_v6 = vsel %vm2712_vm3, %v2705_v49, %v10291_v59  ;;  %v3476_v26 = vpop.f32.mrb[68].mxu0 }
 0x1f0   : > { %v2995_v41 = vpack.c.bf16 %v10296_v11, %v10295_v12  ;;  %v3477_v10 = vadd.f32 %v3476_v26, %v11877_v15  ;;  %v10299_v13 = vpop.permute.xlu0 %10298  ;;  %v3478_v32 = vpop.f32.mrb[69].mxu0  ;;  %v2898_v60 = vsel %vm2809_vm4, %v2801_v25, %v10295_v12  ;;  %v2899_v28 = vsel %vm2809_vm4, %v2802_v6, %v10296_v11 }
 0x1f1   : > { %v10301_v30 = vunpack.i.h.bf16 %v10299_v13  ;;  %v10300_v43 = vunpack.i.l.bf16 %v10299_v13  ;;  %v3479_v18 = vadd.f32 %v3478_v32, %v11890_v23  ;;  %v10304_v63 = vpop.permute.xlu1 %10303  ;;  %v3480_v31 = vpop.f32.mrb[70].mxu0  ;;  %8784 = vmatprep.mubr.msk.bf16.mxu1 %vm4145_vm6, %v12437_v2  ;;  %v2994_v46 = vpack.c.bf16 %v2899_v28, %v2898_v60 }
 0x1f2   : > { %v10306_v47 = vunpack.i.h.bf16 %v10304_v63  ;;  %v10305_v49 = vunpack.i.l.bf16 %v10304_v63  ;;  %v3481_v50 = vadd.f32 %v3480_v31, %v11877_v15  ;;  %v3482_v53 = vpop.f32.mrb[71].mxu0  ;;  %4451 = vmatmul.mubr.bf16.gmra.mrb[64].mxu1 %v12435_v33  ;;  %8755 = vmatprep.mubr.msk.bf16.mxu0 %vm3120_vm5, %v2995_v41  ;;  %v3853_v61 = vmax.f32 %v3477_v10, 0.0 }
 0x1f3   : > { %v2609_v54 = vsel %vm2518_vm1, %v592_v34, %v10300_v43  ;;  %v2610_v56 = vsel %vm2518_vm1, %v593_v17, %v10301_v30  ;;  %v3483_v59 = vadd.f32 %v3482_v53, %v11890_v23  ;;  %v3854_v6 = vmax.f32 %v3479_v18, 0.0 }
 0x1f4   : > { %v2706_v0 = vsel %vm2615_vm2, %v2609_v54, %v10305_v49  ;;  %v2707_v11 = vsel %vm2615_vm2, %v2610_v56, %v10306_v47  ;;  %v3855_v12 = vmax.f32 %v3481_v50, 0.0  ;;  %v10309_v25 = vpop.permute.xlu0 %10308  ;;  %3745 = vmatmul.mubr.bf16.gmra.mrb[176].mxu0 %v2994_v46  ;;  %v594_v46 = vld [vmem:[%s10937_s22 + $0x3d0] sm:$0xff]  ;;  %v595_v47 = vld [vmem:[%s10937_s22 + $0x3e0] sm:$0xff] }
 0x1f5   : > { %v3856_v26 = vmax.f32 %v3483_v59, 0.0  ;;  %v10311_v13 = vunpack.i.h.bf16 %v10309_v25  ;;  %v10310_v41 = vunpack.i.l.bf16 %v10309_v25  ;;  %v10314_v32 = vpop.permute.xlu1 %10313 }
 0x1f6   : > { %v10316_v34 = vunpack.i.h.bf16 %v10314_v32  ;;  %v10315_v60 = vunpack.i.l.bf16 %v10314_v32  ;;  %v12457_v17 = vpack.c.bf16 %v3855_v12, %v3853_v61 }
 0x1f7   : > { %v12459_v28 = vpack.c.bf16 %v3856_v26, %v3854_v6  ;;  %v2803_v10 = vsel %vm2712_vm3, %v2706_v0, %v10310_v41  ;;  %v2804_v30 = vsel %vm2712_vm3, %v2707_v11, %v10311_v13  ;;  %v3486_v43 = vpop.f32.mrb[72].mxu0 }
 0x1f8   : > { %v2997_v63 = vpack.c.bf16 %v10316_v34, %v10315_v60  ;;  %v3487_v31 = vadd.f32 %v3486_v43, %v11877_v15  ;;  %v10319_v18 = vpop.permute.xlu0 %10318  ;;  %v3488_v49 = vpop.f32.mrb[73].mxu0  ;;  %v2900_v50 = vsel %vm2809_vm4, %v2803_v10, %v10315_v60  ;;  %v2901_v53 = vsel %vm2809_vm4, %v2804_v30, %v10316_v34 }
 0x1f9   : > { %v10321_v54 = vunpack.i.h.bf16 %v10319_v18  ;;  %v10320_v56 = vunpack.i.l.bf16 %v10319_v18  ;;  %v3489_v59 = vadd.f32 %v3488_v49, %v11890_v23  ;;  %v10324_v61 = vpop.permute.xlu1 %10323  ;;  %v3490_v0 = vpop.f32.mrb[74].mxu0  ;;  %8785 = vmatprep.mubr.msk.bf16.mxu1 %vm4145_vm6, %v12459_v28  ;;  %v2996_v11 = vpack.c.bf16 %v2901_v53, %v2900_v50 }
 0x1fa   : > { %v10326_v12 = vunpack.i.h.bf16 %v10324_v61  ;;  %v10325_v25 = vunpack.i.l.bf16 %v10324_v61  ;;  %v3491_v6 = vadd.f32 %v3490_v0, %v11877_v15  ;;  %v3492_v26 = vpop.f32.mrb[75].mxu0  ;;  %4459 = vmatmul.mubr.bf16.gmra.mrb[68].mxu1 %v12457_v17  ;;  %8756 = vmatprep.mubr.msk.bf16.mxu0 %vm3120_vm5, %v2997_v63  ;;  %v3857_v34 = vmax.f32 %v3487_v31, 0.0 }
 0x1fb   : > { %v2611_v13 = vsel %vm2518_vm1, %v594_v46, %v10320_v56  ;;  %v2612_v41 = vsel %vm2518_vm1, %v595_v47, %v10321_v54  ;;  %v3493_v32 = vadd.f32 %v3492_v26, %v11890_v23  ;;  %v3858_v18 = vmax.f32 %v3489_v59, 0.0 }
 0x1fc   : > { %v2708_v60 = vsel %vm2615_vm2, %v2611_v13, %v10325_v25  ;;  %v2709_v10 = vsel %vm2615_vm2, %v2612_v41, %v10326_v12  ;;  %v3859_v30 = vmax.f32 %v3491_v6, 0.0  ;;  %v10329_v43 = vpop.permute.xlu0 %10328  ;;  %3755 = vmatmul.mubr.bf16.gmra.mrb[180].mxu0 %v2996_v11  ;;  %v596_v25 = vld [vmem:[%s10937_s22 + $0x3e8] sm:$0xff]  ;;  %v597_v6 = vld [vmem:[%s10937_s22 + $0x3f0] sm:$0xff] }
 0x1fd   : > { %v3860_v49 = vmax.f32 %v3493_v32, 0.0  ;;  %v10331_v50 = vunpack.i.h.bf16 %v10329_v43  ;;  %v10330_v63 = vunpack.i.l.bf16 %v10329_v43  ;;  %v10334_v53 = vpop.permute.xlu1 %10333 }
 0x1fe   : > { %v10336_v46 = vunpack.i.h.bf16 %v10334_v53  ;;  %v10335_v56 = vunpack.i.l.bf16 %v10334_v53  ;;  %v12479_v47 = vpack.c.bf16 %v3859_v30, %v3857_v34 }
 0x1ff   : > { %v12481_v54 = vpack.c.bf16 %v3860_v49, %v3858_v18  ;;  %v2805_v31 = vsel %vm2712_vm3, %v2708_v60, %v10330_v63  ;;  %v2806_v61 = vsel %vm2712_vm3, %v2709_v10, %v10331_v50  ;;  %v3496_v0 = vpop.f32.mrb[76].mxu0 }
 0x200   : > { %14368 = vst [vmem:[#allocation4_spill] sm:$0xff] %v12479_v47  ;;  %v2999_v12 = vpack.c.bf16 %v10336_v46, %v10335_v56  ;;  %v3497_v11 = vadd.f32 %v3496_v0, %v11877_v15  ;;  %v10339_v59 = vpop.permute.xlu0 %10338  ;;  %v3498_v26 = vpop.f32.mrb[77].mxu0  ;;  %v2902_v13 = vsel %vm2809_vm4, %v2805_v31, %v10335_v56  ;;  %v2903_v41 = vsel %vm2809_vm4, %v2806_v61, %v10336_v46 }
 0x201   : > { %14369 = vst [vmem:[#allocation5_spill] sm:$0xff] %v12481_v54  ;;  %v10341_v32 = vunpack.i.h.bf16 %v10339_v59  ;;  %v10340_v34 = vunpack.i.l.bf16 %v10339_v59  ;;  %v3499_v30 = vadd.f32 %v3498_v26, %v11890_v23  ;;  %v10344_v43 = vpop.permute.xlu1 %10343  ;;  %v3500_v60 = vpop.f32.mrb[78].mxu0  ;;  %8786 = vmatprep.mubr.msk.bf16.mxu1 %vm4145_vm6, %v12481_v54  ;;  %v2998_v10 = vpack.c.bf16 %v2903_v41, %v2902_v13 }
 0x202   : > { %v10346_v18 = vunpack.i.h.bf16 %v10344_v43  ;;  %v10345_v49 = vunpack.i.l.bf16 %v10344_v43  ;;  %v3501_v50 = vadd.f32 %v3500_v60, %v11877_v15  ;;  %v3502_v63 = vpop.f32.mrb[79].mxu0  ;;  %4467 = vmatmul.mubr.bf16.gmra.mrb[72].mxu1 %v12479_v47  ;;  %8757 = vmatprep.mubr.msk.bf16.mxu0 %vm3120_vm5, %v2999_v12  ;;  %v3861_v31 = vmax.f32 %v3497_v11, 0.0 }
 0x203   : > { %v2613_v53 = vsel %vm2518_vm1, %v596_v25, %v10340_v34  ;;  %v2614_v46 = vsel %vm2518_vm1, %v597_v6, %v10341_v32  ;;  %v3503_v56 = vadd.f32 %v3502_v63, %v11890_v23  ;;  %v3862_v13 = vmax.f32 %v3499_v30, 0.0 }
 0x204   : > { %v2710_v61 = vsel %vm2615_vm2, %v2613_v53, %v10345_v49  ;;  %v2711_v0 = vsel %vm2615_vm2, %v2614_v46, %v10346_v18  ;;  %v3863_v59 = vmax.f32 %v3501_v50, 0.0  ;;  %v10349_v26 = vpop.permute.xlu0 %10348  ;;  %3765 = vmatmul.mubr.bf16.gmra.mrb[184].mxu0 %v2998_v10 }
 0x205   : > { %v3864_v41 = vmax.f32 %v3503_v56, 0.0  ;;  %v10351_v43 = vunpack.i.h.bf16 %v10349_v26  ;;  %v10350_v60 = vunpack.i.l.bf16 %v10349_v26  ;;  %v10354_v47 = vpop.permute.xlu1 %10353 }
 0x206   : > { %v10356_v12 = vunpack.i.h.bf16 %v10354_v47  ;;  %v10355_v54 = vunpack.i.l.bf16 %v10354_v47  ;;  %v12501_v25 = vpack.c.bf16 %v3863_v59, %v3861_v31 }
 0x207   : > { %v12503_v6 = vpack.c.bf16 %v3864_v41, %v3862_v13  ;;  %v2807_v11 = vsel %vm2712_vm3, %v2710_v61, %v10350_v60  ;;  %v2808_v32 = vsel %vm2712_vm3, %v2711_v0, %v10351_v43  ;;  %v3506_v34 = vpop.f32.mrb[80].mxu0 }
 0x208   : > { %v3001_v18 = vpack.c.bf16 %v10356_v12, %v10355_v54  ;;  %v3507_v49 = vadd.f32 %v3506_v34, %v11877_v15  ;;  %v3508_v10 = vpop.f32.mrb[81].mxu0  ;;  %v2904_v30 = vsel %vm2809_vm4, %v2807_v11, %v10355_v54  ;;  %v2905_v50 = vsel %vm2809_vm4, %v2808_v32, %v10356_v12 }
 0x209   : > { %v3509_v63 = vadd.f32 %v3508_v10, %v11890_v23  ;;  %v3510_v47 = vpop.f32.mrb[82].mxu0  ;;  %8787 = vmatprep.mubr.msk.bf16.mxu1 %vm4145_vm6, %v12503_v6  ;;  %v3000_v53 = vpack.c.bf16 %v2905_v50, %v2904_v30 }
 0x20a   : > { %v3511_v46 = vadd.f32 %v3510_v47, %v11877_v15  ;;  %v3512_v56 = vpop.f32.mrb[83].mxu0  ;;  %4475 = vmatmul.mubr.bf16.gmra.mrb[76].mxu1 %v12501_v25  ;;  %8758 = vmatprep.mubr.msk.bf16.mxu0 %vm3120_vm5, %v3001_v18  ;;  %v3865_v61 = vmax.f32 %v3507_v49, 0.0 }
 0x20b   : > { %v3513_v31 = vadd.f32 %v3512_v56, %v11890_v23  ;;  %v3866_v0 = vmax.f32 %v3509_v63, 0.0 }
 0x20c   : > { %v3867_v54 = vmax.f32 %v3511_v46, 0.0  ;;  %3775 = vmatmul.mubr.bf16.gmra.mrb[188].mxu0 %v3000_v53 }
 0x20d   : > { %v3868_v59 = vmax.f32 %v3513_v31, 0.0  ;;  %8825 = vmatprep.mubr.msk.bf16.mxu0 %vm4145_vm6, %v11966_v29 }
 0x20e   : > { %v12519_v26 = vpack.c.bf16 %v3867_v54, %v3865_v61 }
 0x20f   : > { %v12521_v13 = vpack.c.bf16 %v3868_v59, %v3866_v0  ;;  %v3516_v41 = vpop.f32.mrb[84].mxu0 }
 0x210   : > { %v3517_v43 = vadd.f32 %v3516_v41, %v11877_v15  ;;  %v3518_v60 = vpop.f32.mrb[85].mxu0 }
 0x211   : > { %v3519_v12 = vadd.f32 %v3518_v60, %v11890_v23  ;;  %v3520_v11 = vpop.f32.mrb[86].mxu0  ;;  %8788 = vmatprep.mubr.msk.bf16.mxu1 %vm4145_vm6, %v12521_v13 }
 0x212   : > { %v3521_v32 = vadd.f32 %v3520_v11, %v11877_v15  ;;  %v3522_v34 = vpop.f32.mrb[87].mxu0  ;;  %4483 = vmatmul.mubr.bf16.gmra.mrb[80].mxu1 %v12519_v26  ;;  %v3869_v18 = vmax.f32 %v3517_v43, 0.0 }
 0x213   : > { %v3523_v29 = vadd.f32 %v3522_v34, %v11890_v23  ;;  %v3870_v10 = vmax.f32 %v3519_v12, 0.0 }
 0x214   : > { %v3871_v49 = vmax.f32 %v3521_v32, 0.0  ;;  %4812 = vmatmul.mubr.bf16.vlgmr.msra.gmra.mrb[192].mxu0 %v11961_v22 }
 0x215   : > { %v3872_v30 = vmax.f32 %v3523_v29, 0.0  ;;  %8826 = vmatprep.mubr.msk.bf16.mxu0 %vm4145_vm6, %v12027_v20 }
 0x216   : > { %v12533_v50 = vpack.c.bf16 %v3871_v49, %v3869_v18 }
 0x217   : > { %v12535_v63 = vpack.c.bf16 %v3872_v30, %v3870_v10  ;;  %v3526_v47 = vpop.f32.mrb[88].mxu0 }
 0x218   : > { %v3527_v53 = vadd.f32 %v3526_v47, %v11877_v15  ;;  %v3528_v46 = vpop.f32.mrb[89].mxu0 }
 0x219   : > { %v3529_v56 = vadd.f32 %v3528_v46, %v11890_v23  ;;  %v3530_v31 = vpop.f32.mrb[90].mxu0  ;;  %8789 = vmatprep.mubr.msk.bf16.mxu1 %vm4145_vm6, %v12535_v63 }
 0x21a   : > { %v3531_v22 = vadd.f32 %v3530_v31, %v11877_v15  ;;  %v3532_v61 = vpop.f32.mrb[91].mxu0  ;;  %4491 = vmatmul.mubr.bf16.gmra.mrb[84].mxu1 %v12533_v50  ;;  %v3873_v54 = vmax.f32 %v3527_v53, 0.0 }
 0x21b   : > { %v3533_v20 = vadd.f32 %v3532_v61, %v11890_v23  ;;  %v3874_v59 = vmax.f32 %v3529_v56, 0.0 }
 0x21c   : > { %v3875_v0 = vmax.f32 %v3531_v22, 0.0  ;;  %4820 = vmatmul.mubr.bf16.gmra.mrb[196].mxu0 %v12023_v16 }
 0x21d   : > { %v3876_v41 = vmax.f32 %v3533_v20, 0.0  ;;  %8827 = vmatprep.mubr.msk.bf16.mxu0 %vm4145_vm6, %v12089_v27 }
 0x21e   : > { %v12547_v43 = vpack.c.bf16 %v3875_v0, %v3873_v54 }
 0x21f   : > { %v12549_v60 = vpack.c.bf16 %v3876_v41, %v3874_v59  ;;  %v3536_v12 = vpop.f32.mrb[92].mxu0 }
 0x220   : > { %v3537_v11 = vadd.f32 %v3536_v12, %v11877_v15  ;;  %v3538_v32 = vpop.f32.mrb[93].mxu0 }
 0x221   : > { %v3539_v34 = vadd.f32 %v3538_v32, %v11890_v23  ;;  %v3540_v29 = vpop.f32.mrb[94].mxu0  ;;  %8790 = vmatprep.mubr.msk.bf16.mxu1 %vm4145_vm6, %v12549_v60 }
 0x222   : > { %v3541_v16 = vadd.f32 %v3540_v29, %v11877_v15  ;;  %v3542_v18 = vpop.f32.mrb[95].mxu0  ;;  %4499 = vmatmul.mubr.bf16.gmra.mrb[88].mxu1 %v12547_v43  ;;  %v3877_v49 = vmax.f32 %v3537_v11, 0.0 }
 0x223   : > { %v3543_v27 = vadd.f32 %v3542_v18, %v11890_v23  ;;  %v3878_v30 = vmax.f32 %v3539_v34, 0.0 }
 0x224   : > { %v3879_v10 = vmax.f32 %v3541_v16, 0.0  ;;  %4828 = vmatmul.mubr.bf16.gmra.mrb[200].mxu0 %v12085_v7 }
 0x225   : > { %v3880_v47 = vmax.f32 %v3543_v27, 0.0  ;;  %8828 = vmatprep.mubr.msk.bf16.mxu0 %vm4145_vm6, %v12136_v19 }
 0x226   : > { %v12561_v53 = vpack.c.bf16 %v3879_v10, %v3877_v49 }
 0x227   : > { %v12563_v46 = vpack.c.bf16 %v3880_v47, %v3878_v30  ;;  %v3546_v56 = vpop.f32.mrb[96].mxu0 }
 0x228   : > { %v3547_v31 = vadd.f32 %v3546_v56, %v11877_v15  ;;  %v3548_v22 = vpop.f32.mrb[97].mxu0 }
 0x229   : > { %v3549_v61 = vadd.f32 %v3548_v22, %v11890_v23  ;;  %v3550_v20 = vpop.f32.mrb[98].mxu0  ;;  %8791 = vmatprep.mubr.msk.bf16.mxu1 %vm4145_vm6, %v12563_v46 }
 0x22a   : > { %v3551_v7 = vadd.f32 %v3550_v20, %v11877_v15  ;;  %v3552_v54 = vpop.f32.mrb[99].mxu0  ;;  %4507 = vmatmul.mubr.bf16.gmra.mrb[92].mxu1 %v12561_v53  ;;  %v3881_v0 = vmax.f32 %v3547_v31, 0.0 }
 0x22b   : > { %v3553_v19 = vadd.f32 %v3552_v54, %v11890_v23  ;;  %v3882_v41 = vmax.f32 %v3549_v61, 0.0 }
 0x22c   : > { %v3883_v59 = vmax.f32 %v3551_v7, 0.0  ;;  %4836 = vmatmul.mubr.bf16.gmra.mrb[204].mxu0 %v12134_v62 }
 0x22d   : > { %v3884_v12 = vmax.f32 %v3553_v19, 0.0  ;;  %8829 = vmatprep.mubr.msk.bf16.mxu0 %vm4145_vm6, %v12170_v58 }
 0x22e   : > { %v12575_v11 = vpack.c.bf16 %v3883_v59, %v3881_v0 }
 0x22f   : > { %v12577_v32 = vpack.c.bf16 %v3884_v12, %v3882_v41  ;;  %v3556_v34 = vpop.f32.mrb[100].mxu0 }
 0x230   : > { %v3557_v29 = vadd.f32 %v3556_v34, %v11877_v15  ;;  %v3558_v16 = vpop.f32.mrb[101].mxu0 }
 0x231   : > { %v3559_v18 = vadd.f32 %v3558_v16, %v11890_v23  ;;  %v3560_v27 = vpop.f32.mrb[102].mxu0  ;;  %8792 = vmatprep.mubr.msk.bf16.mxu1 %vm4145_vm6, %v12577_v32 }
 0x232   : > { %v3561_v62 = vadd.f32 %v3560_v27, %v11877_v15  ;;  %v3562_v49 = vpop.f32.mrb[103].mxu0  ;;  %4515 = vmatmul.mubr.bf16.gmra.mrb[96].mxu1 %v12575_v11  ;;  %v3885_v10 = vmax.f32 %v3557_v29, 0.0 }
 0x233   : > { %v3563_v58 = vadd.f32 %v3562_v49, %v11890_v23  ;;  %v3886_v47 = vmax.f32 %v3559_v18, 0.0 }
 0x234   : > { %v3887_v30 = vmax.f32 %v3561_v62, 0.0  ;;  %4844 = vmatmul.mubr.bf16.gmra.mrb[208].mxu0 %v12168_v57 }
 0x235   : > { %v3888_v56 = vmax.f32 %v3563_v58, 0.0  ;;  %8830 = vmatprep.mubr.msk.bf16.mxu0 %vm4145_vm6, %v12195_v39 }
 0x236   : > { %v12589_v31 = vpack.c.bf16 %v3887_v30, %v3885_v10 }
 0x237   : > { %v12591_v22 = vpack.c.bf16 %v3888_v56, %v3886_v47  ;;  %v3566_v61 = vpop.f32.mrb[104].mxu0 }
 0x238   : > { %v3567_v20 = vadd.f32 %v3566_v61, %v11877_v15  ;;  %v3568_v7 = vpop.f32.mrb[105].mxu0 }
 0x239   : > { %v3569_v54 = vadd.f32 %v3568_v7, %v11890_v23  ;;  %v3570_v19 = vpop.f32.mrb[106].mxu0  ;;  %8793 = vmatprep.mubr.msk.bf16.mxu1 %vm4145_vm6, %v12591_v22 }
 0x23a   : > { %v3571_v57 = vadd.f32 %v3570_v19, %v11877_v15  ;;  %v3572_v0 = vpop.f32.mrb[107].mxu0  ;;  %4523 = vmatmul.mubr.bf16.gmra.mrb[100].mxu1 %v12589_v31  ;;  %v3889_v59 = vmax.f32 %v3567_v20, 0.0 }
 0x23b   : > { %v3573_v39 = vadd.f32 %v3572_v0, %v11890_v23  ;;  %v3890_v12 = vmax.f32 %v3569_v54, 0.0 }
 0x23c   : > { %v3891_v41 = vmax.f32 %v3571_v57, 0.0  ;;  %4852 = vmatmul.mubr.bf16.gmra.mrb[212].mxu0 %v12193_v3 }
 0x23d   : > { %v3892_v34 = vmax.f32 %v3573_v39, 0.0  ;;  %8831 = vmatprep.mubr.msk.bf16.mxu0 %vm4145_vm6, %v12217_v21 }
 0x23e   : > { %v12603_v29 = vpack.c.bf16 %v3891_v41, %v3889_v59 }
 0x23f   : > { %v12605_v16 = vpack.c.bf16 %v3892_v34, %v3890_v12  ;;  %v3576_v18 = vpop.f32.mrb[108].mxu0 }
 0x240   : > { %v3577_v27 = vadd.f32 %v3576_v18, %v11877_v15  ;;  %v3578_v62 = vpop.f32.mrb[109].mxu0 }
 0x241   : > { %v3579_v49 = vadd.f32 %v3578_v62, %v11890_v23  ;;  %v3580_v58 = vpop.f32.mrb[110].mxu0  ;;  %8794 = vmatprep.mubr.msk.bf16.mxu1 %vm4145_vm6, %v12605_v16 }
 0x242   : > { %v3581_v3 = vadd.f32 %v3580_v58, %v11877_v15  ;;  %v3582_v10 = vpop.f32.mrb[111].mxu0  ;;  %4531 = vmatmul.mubr.bf16.gmra.mrb[104].mxu1 %v12603_v29  ;;  %v3893_v30 = vmax.f32 %v3577_v27, 0.0 }
 0x243   : > { %v3583_v21 = vadd.f32 %v3582_v10, %v11890_v23  ;;  %v3894_v56 = vmax.f32 %v3579_v49, 0.0 }
 0x244   : > { %v3895_v47 = vmax.f32 %v3581_v3, 0.0  ;;  %4860 = vmatmul.mubr.bf16.gmra.mrb[216].mxu0 %v12215_v14 }
 0x245   : > { %v3896_v61 = vmax.f32 %v3583_v21, 0.0  ;;  %v12615_v20 = vpop.f32.mrb[0].mxu1  ;;  %8832 = vmatprep.mubr.msk.bf16.mxu0 %vm4145_vm6, %v12239_v1 }
 0x246   : > { %v4326_v7 = vpop.f32.mrb[1].mxu1  ;;  %v12619_v54 = vpack.c.bf16 %v3895_v47, %v3893_v30 }
 0x247   : > { %v12621_v19 = vpack.c.bf16 %v3896_v61, %v3894_v56  ;;  %v3586_v57 = vpop.f32.mrb[112].mxu0  ;;  %v12623_v0 = vpop.f32.mrb[2].mxu1 }
 0x248   : > { %v3587_v39 = vadd.f32 %v3586_v57, %v11877_v15  ;;  %v3588_v59 = vpop.f32.mrb[113].mxu0  ;;  %v4329_v41 = vpop.f32.mrb[3].mxu1 }
 0x249   : > { %v3589_v14 = vadd.f32 %v3588_v59, %v11890_v23  ;;  %v3590_v12 = vpop.f32.mrb[114].mxu0  ;;  %8795 = vmatprep.mubr.msk.bf16.mxu1 %vm4145_vm6, %v12621_v19 }
 0x24a   : > { %v3591_v1 = vadd.f32 %v3590_v12, %v11877_v15  ;;  %v3592_v34 = vpop.f32.mrb[115].mxu0  ;;  %4539 = vmatmul.mubr.bf16.gmra.mrb[108].mxu1 %v12619_v54  ;;  %v3897_v27 = vmax.f32 %v3587_v39, 0.0 }
 0x24b   : > { %v3593_v18 = vadd.f32 %v3592_v34, %v11890_v23  ;;  %v3898_v49 = vmax.f32 %v3589_v14, 0.0 }
 0x24c   : > { %v3899_v62 = vmax.f32 %v3591_v1, 0.0  ;;  %4868 = vmatmul.mubr.bf16.gmra.mrb[220].mxu0 %v12237_v40 }
 0x24d   : > { %v3900_v58 = vmax.f32 %v3593_v18, 0.0  ;;  %v12633_v3 = vpop.f32.mrb[4].mxu1  ;;  %8833 = vmatprep.mubr.msk.bf16.mxu0 %vm4145_vm6, %v12261_v5 }
 0x24e   : > { %v4334_v10 = vpop.f32.mrb[5].mxu1  ;;  %v12637_v21 = vpack.c.bf16 %v3899_v62, %v3897_v27 }
 0x24f   : > { %v12639_v30 = vpack.c.bf16 %v3900_v58, %v3898_v49  ;;  %v3596_v47 = vpop.f32.mrb[116].mxu0  ;;  %v12641_v56 = vpop.f32.mrb[6].mxu1 }
 0x250   : > { %v3597_v61 = vadd.f32 %v3596_v47, %v11877_v15  ;;  %v3598_v7 = vpop.f32.mrb[117].mxu0  ;;  %v4337_v57 = vpop.f32.mrb[7].mxu1 }
 0x251   : > { %v3599_v40 = vadd.f32 %v3598_v7, %v11890_v23  ;;  %v3600_v39 = vpop.f32.mrb[118].mxu0  ;;  %8796 = vmatprep.mubr.msk.bf16.mxu1 %vm4145_vm6, %v12639_v30 }
 0x252   : > { %v3601_v5 = vadd.f32 %v3600_v39, %v11877_v15  ;;  %v3602_v59 = vpop.f32.mrb[119].mxu0  ;;  %4547 = vmatmul.mubr.bf16.gmra.mrb[112].mxu1 %v12637_v21  ;;  %v3901_v14 = vmax.f32 %v3597_v61, 0.0 }
 0x253   : > { %v3603_v41 = vadd.f32 %v3602_v59, %v11890_v23  ;;  %v3902_v1 = vmax.f32 %v3599_v40, 0.0 }
 0x254   : > { %v3903_v12 = vmax.f32 %v3601_v5, 0.0  ;;  %4876 = vmatmul.mubr.bf16.gmra.mrb[224].mxu0 %v12259_v55 }
 0x255   : > { %v3904_v34 = vmax.f32 %v3603_v41, 0.0  ;;  %v12651_v18 = vpop.f32.mrb[8].mxu1  ;;  %8834 = vmatprep.mubr.msk.bf16.mxu0 %vm4145_vm6, %v12283_v42 }
 0x256   : > { %v4342_v27 = vpop.f32.mrb[9].mxu1  ;;  %v12655_v62 = vpack.c.bf16 %v3903_v12, %v3901_v14 }
 0x257   : > { %v12657_v49 = vpack.c.bf16 %v3904_v34, %v3902_v1  ;;  %v3606_v58 = vpop.f32.mrb[120].mxu0  ;;  %v12659_v10 = vpop.f32.mrb[10].mxu1 }
 0x258   : > { %v3607_v47 = vadd.f32 %v3606_v58, %v11877_v15  ;;  %v3608_v61 = vpop.f32.mrb[121].mxu0  ;;  %v4345_v7 = vpop.f32.mrb[11].mxu1 }
 0x259   : > { %v3609_v55 = vadd.f32 %v3608_v61, %v11890_v23  ;;  %v3610_v57 = vpop.f32.mrb[122].mxu0  ;;  %8797 = vmatprep.mubr.msk.bf16.mxu1 %vm4145_vm6, %v12657_v49 }
 0x25a   : > { %v3611_v42 = vadd.f32 %v3610_v57, %v11877_v15  ;;  %v3612_v40 = vpop.f32.mrb[123].mxu0  ;;  %4555 = vmatmul.mubr.bf16.gmra.mrb[116].mxu1 %v12655_v62  ;;  %v3905_v5 = vmax.f32 %v3607_v47, 0.0 }
 0x25b   : > { %v3613_v39 = vadd.f32 %v3612_v40, %v11890_v23  ;;  %v3906_v41 = vmax.f32 %v3609_v55, 0.0 }
 0x25c   : > { %v3907_v59 = vmax.f32 %v3611_v42, 0.0  ;;  %4884 = vmatmul.mubr.bf16.gmra.mrb[228].mxu0 %v12281_v9 }
 0x25d   : > { %v3908_v14 = vmax.f32 %v3613_v39, 0.0  ;;  %v12669_v12 = vpop.f32.mrb[12].mxu1  ;;  %8835 = vmatprep.mubr.msk.bf16.mxu0 %vm4145_vm6, %v12305_v45 }
 0x25e   : > { %v4350_v1 = vpop.f32.mrb[13].mxu1  ;;  %v12673_v34 = vpack.c.bf16 %v3907_v59, %v3905_v5 }
 0x25f   : > { %v12675_v27 = vpack.c.bf16 %v3908_v14, %v3906_v41  ;;  %v3616_v58 = vpop.f32.mrb[124].mxu0  ;;  %v12677_v61 = vpop.f32.mrb[14].mxu1 }
 0x260   : > { %v3617_v47 = vadd.f32 %v3616_v58, %v11877_v15  ;;  %v3618_v7 = vpop.f32.mrb[125].mxu0  ;;  %v4353_v57 = vpop.f32.mrb[15].mxu1 }
 0x261   : > { %v3619_v9 = vadd.f32 %v3618_v7, %v11890_v23  ;;  %v3620_v55 = vpop.f32.mrb[126].mxu0  ;;  %8798 = vmatprep.mubr.msk.bf16.mxu1 %vm4145_vm6, %v12675_v27 }
 0x262   : > { %v3621_v45 = vadd.f32 %v3620_v55, %v11877_v15  ;;  %v3622_v42 = vpop.f32.mrb[127].mxu0  ;;  %4563 = vmatmul.mubr.bf16.gmra.mrb[120].mxu1 %v12673_v34  ;;  %v3909_v39 = vmax.f32 %v3617_v47, 0.0 }
 0x263   : > { %v3623_v40 = vadd.f32 %v3622_v42, %v11890_v23  ;;  %v3910_v59 = vmax.f32 %v3619_v9, 0.0 }
 0x264   : > { %v3911_v5 = vmax.f32 %v3621_v45, 0.0  ;;  %4892 = vmatmul.mubr.bf16.gmra.mrb[232].mxu0 %v12303_v44 }
 0x265   : > { %v3912_v41 = vmax.f32 %v3623_v40, 0.0  ;;  %v12687_v14 = vpop.f32.mrb[16].mxu1  ;;  %8836 = vmatprep.mubr.msk.bf16.mxu0 %vm4145_vm6, %v12327_v38 }
 0x266   : > { %v4358_v1 = vpop.f32.mrb[17].mxu1  ;;  %v12691_v58 = vpack.c.bf16 %v3911_v5, %v3909_v39 }
 0x267   : > { %v12693_v7 = vpack.c.bf16 %v3912_v41, %v3910_v59  ;;  %v3626_v57 = vpop.f32.mrb[128].mxu0  ;;  %v12695_v55 = vpop.f32.mrb[18].mxu1 }
 0x268   : > { %14370 = vst [vmem:[#allocation6_spill] sm:$0xff] %v12691_v58  ;;  %14371 = vst [vmem:[#allocation7_spill] sm:$0xff] %v12695_v55  ;;  %v3627_v47 = vadd.f32 %v3626_v57, %v11877_v15  ;;  %v3628_v45 = vpop.f32.mrb[129].mxu0  ;;  %v4361_v42 = vpop.f32.mrb[19].mxu1 }
 0x269   : > { %v3629_v44 = vadd.f32 %v3628_v45, %v11890_v23  ;;  %v3630_v9 = vpop.f32.mrb[130].mxu0  ;;  %8799 = vmatprep.mubr.msk.bf16.mxu1 %vm4145_vm6, %v12693_v7 }
 0x26a   : > { %v3631_v38 = vadd.f32 %v3630_v9, %v11877_v15  ;;  %v3632_v40 = vpop.f32.mrb[131].mxu0  ;;  %4571 = vmatmul.mubr.bf16.gmra.mrb[124].mxu1 %v12691_v58  ;;  %v3913_v5 = vmax.f32 %v3627_v47, 0.0 }
 0x26b   : > { %v3633_v39 = vadd.f32 %v3632_v40, %v11890_v23  ;;  %v3914_v41 = vmax.f32 %v3629_v44, 0.0 }
 0x26c   : > { %v3915_v59 = vmax.f32 %v3631_v38, 0.0  ;;  %4900 = vmatmul.mubr.bf16.gmra.mrb[236].mxu0 %v12325_v35 }
 0x26d   : > { %v3916_v1 = vmax.f32 %v3633_v39, 0.0  ;;  %v12705_v57 = vpop.f32.mrb[20].mxu1  ;;  %8837 = vmatprep.mubr.msk.bf16.mxu0 %vm4145_vm6, %v12349_v37 }
 0x26e   : > { %v12709_v45 = vpack.c.bf16 %v3915_v59, %v3913_v5  ;;  %v4366_v42 = vpop.f32.mrb[21].mxu1 }
 0x26f   : > { %v12711_v9 = vpack.c.bf16 %v3916_v1, %v3914_v41  ;;  %v3636_v55 = vpop.f32.mrb[132].mxu0  ;;  %v12713_v58 = vpop.f32.mrb[22].mxu1 }
 0x270   : > { %14372 = vst [vmem:[#allocation8_spill] sm:$0xff] %v12709_v45  ;;  %v3637_v47 = vadd.f32 %v3636_v55, %v11877_v15  ;;  %v3638_v38 = vpop.f32.mrb[133].mxu0  ;;  %v4369_v40 = vpop.f32.mrb[23].mxu1  ;;  %v10742_v55 = vld [vmem:[%s14319_s5 + $0x40] sm:$0xff]  }
 0x271   : > { %v3639_v35 = vadd.f32 %v3638_v38, %v11890_v23  ;;  %v3640_v44 = vpop.f32.mrb[134].mxu0  ;;  %8800 = vmatprep.mubr.msk.bf16.mxu1 %vm4145_vm6, %v12711_v9  ;;  %v10743_v40 = vld [vmem:[%s14319_s5] sm:$0xff]   ;;  %8969 = vmatprep.subr.bf16.mxu1 %v10742_v55 }
 0x272   : > { %v3641_v37 = vadd.f32 %v3640_v44, %v11877_v15  ;;  %v3642_v39 = vpop.f32.mrb[135].mxu0  ;;  %4579 = vmatmul.mubr.bf16.gmra.mrb[128].mxu1 %v12709_v45  ;;  %v3917_v59 = vmax.f32 %v3637_v47, 0.0 }
 0x273   : > { %v3643_v5 = vadd.f32 %v3642_v39, %v11890_v23  ;;  %v3918_v1 = vmax.f32 %v3639_v35, 0.0  ;;  %8970 = vmatpush3.bf16.msra.mxu1 %v10743_v40 }
 0x274   : > { %v3919_v41 = vmax.f32 %v3641_v37, 0.0  ;;  %4908 = vmatmul.mubr.bf16.gmra.mrb[240].mxu0 %v12347_v36 }
 0x275   : > { %v3920_v42 = vmax.f32 %v3643_v5, 0.0  ;;  %v12726_v38 = vpop.f32.mrb[24].mxu1  ;;  %8838 = vmatprep.mubr.msk.bf16.mxu0 %vm4145_vm6, %v12371_v52 }
 0x276   : > { %14373 = vst [vmem:[#allocation9_spill] sm:$0xff] %v12726_v38  ;;  %v12733_v44 = vpack.c.bf16 %v3919_v41, %v3917_v59  ;;  %v4374_v47 = vpop.f32.mrb[25].mxu1 }
 0x277   : > { %v12735_v36 = vpack.c.bf16 %v3920_v42, %v3918_v1  ;;  %v3646_v37 = vpop.f32.mrb[136].mxu0  ;;  %v12737_v39 = vpop.f32.mrb[26].mxu1 }
 0x278   : > { %14374 = vst [vmem:[#allocation10_spill] sm:$0xff] %v12733_v44  ;;  %14375 = vst [vmem:[#allocation11_spill] sm:$0xff] %v12737_v39  ;;  %v3647_v35 = vadd.f32 %v3646_v37, %v11877_v15  ;;  %v3648_v5 = vpop.f32.mrb[137].mxu0  ;;  %v4377_v38 = vpop.f32.mrb[27].mxu1 }
 0x279   : > { %v3649_v52 = vadd.f32 %v3648_v5, %v11890_v23  ;;  %v3650_v45 = vpop.f32.mrb[138].mxu0  ;;  %8801 = vmatprep.mubr.msk.bf16.mxu1 %vm4145_vm6, %v12735_v36 }
 0x27a   : > { %v3651_v59 = vadd.f32 %v3650_v45, %v11877_v15  ;;  %v3652_v41 = vpop.f32.mrb[139].mxu0  ;;  %4587 = vmatmul.mubr.bf16.gmra.mrb[132].mxu1 %v12733_v44  ;;  %v3921_v1 = vmax.f32 %v3647_v35, 0.0 }
 0x27b   : > { %v3653_v55 = vadd.f32 %v3652_v41, %v11890_v23  ;;  %v3922_v40 = vmax.f32 %v3649_v52, 0.0 }
 0x27c   : > { %v3923_v42 = vmax.f32 %v3651_v59, 0.0  ;;  %4916 = vmatmul.mubr.bf16.gmra.mrb[244].mxu0 %v12369_v51 }
 0x27d   : > { %v3924_v47 = vmax.f32 %v3653_v55, 0.0  ;;  %v12747_v38 = vpop.f32.mrb[28].mxu1  ;;  %8839 = vmatprep.mubr.msk.bf16.mxu0 %vm4145_vm6, %v12393_v8 }
 0x27e   : > { %v12751_v37 = vpack.c.bf16 %v3923_v42, %v3921_v1  ;;  %v4382_v5 = vpop.f32.mrb[29].mxu1 }
 0x27f   : > { %v12753_v45 = vpack.c.bf16 %v3924_v47, %v3922_v40  ;;  %v3656_v39 = vpop.f32.mrb[140].mxu0  ;;  %v12755_v44 = vpop.f32.mrb[30].mxu1 }
 0x280   : > { %14376 = vst [vmem:[#allocation12_spill] sm:$0xff] %v12751_v37  ;;  %14377 = vst [vmem:[#allocation13_spill] sm:$0xff] %v12755_v44  ;;  %v3657_v35 = vadd.f32 %v3656_v39, %v11877_v15  ;;  %v3658_v59 = vpop.f32.mrb[141].mxu0  ;;  %v4385_v41 = vpop.f32.mrb[31].mxu1 }
 0x281   : > { %v3659_v51 = vadd.f32 %v3658_v59, %v11890_v23  ;;  %v3660_v52 = vpop.f32.mrb[142].mxu0  ;;  %8802 = vmatprep.mubr.msk.bf16.mxu1 %vm4145_vm6, %v12753_v45 }
 0x282   : > { %v3661_v8 = vadd.f32 %v3660_v52, %v11877_v15  ;;  %v3662_v55 = vpop.f32.mrb[143].mxu0  ;;  %4595 = vmatmul.mubr.bf16.gmra.mrb[136].mxu1 %v12751_v37  ;;  %v3925_v42 = vmax.f32 %v3657_v35, 0.0 }
 0x283   : > { %v3663_v1 = vadd.f32 %v3662_v55, %v11890_v23  ;;  %v3926_v39 = vmax.f32 %v3659_v51, 0.0 }
 0x284   : > { %v3927_v40 = vmax.f32 %v3661_v8, 0.0  ;;  %4924 = vmatmul.mubr.bf16.gmra.mrb[248].mxu0 %v12391_v48 }
 0x285   : > { %v3928_v47 = vmax.f32 %v3663_v1, 0.0  ;;  %v12765_v5 = vpop.f32.mrb[32].mxu1  ;;  %8840 = vmatprep.mubr.msk.bf16.mxu0 %vm4145_vm6, %v12415_v24 }
 0x286   : > { %v12769_v59 = vpack.c.bf16 %v3927_v40, %v3925_v42  ;;  %v4390_v41 = vpop.f32.mrb[33].mxu1 }
 0x287   : > { %v12771_v52 = vpack.c.bf16 %v3928_v47, %v3926_v39  ;;  %v3666_v44 = vpop.f32.mrb[144].mxu0  ;;  %v12773_v37 = vpop.f32.mrb[34].mxu1 }
 0x288   : > { %14378 = vst [vmem:[#allocation14_spill] sm:$0xff] %v12769_v59  ;;  %14379 = vst [vmem:[#allocation15_spill] sm:$0xff] %v12773_v37  ;;  %v3667_v35 = vadd.f32 %v3666_v44, %v11877_v15  ;;  %v3668_v8 = vpop.f32.mrb[145].mxu0  ;;  %v4393_v55 = vpop.f32.mrb[35].mxu1 }
 0x289   : > { %v3669_v48 = vadd.f32 %v3668_v8, %v11890_v23  ;;  %v3670_v51 = vpop.f32.mrb[146].mxu0  ;;  %8803 = vmatprep.mubr.msk.bf16.mxu1 %vm4145_vm6, %v12771_v52 }
 0x28a   : > { %v3671_v24 = vadd.f32 %v3670_v51, %v11877_v15  ;;  %v3672_v1 = vpop.f32.mrb[147].mxu0  ;;  %4603 = vmatmul.mubr.bf16.gmra.mrb[140].mxu1 %v12769_v59  ;;  %v3929_v40 = vmax.f32 %v3667_v35, 0.0 }
 0x28b   : > { %v3673_v42 = vadd.f32 %v3672_v1, %v11890_v23  ;;  %v3930_v44 = vmax.f32 %v3669_v48, 0.0 }
 0x28c   : > { %v3931_v39 = vmax.f32 %v3671_v24, 0.0  ;;  %4932 = vmatmul.mubr.bf16.gmra.mrb[252].mxu0 %v12413_v4 }
 0x28d   : > { %v3932_v47 = vmax.f32 %v3673_v42, 0.0  ;;  %v12783_v41 = vpop.f32.mrb[36].mxu1  ;;  %8841 = vmatprep.mubr.msk.bf16.mxu0 %vm4145_vm6, %v12437_v2 }
 0x28e   : > { %v12787_v8 = vpack.c.bf16 %v3931_v39, %v3929_v40  ;;  %v4398_v55 = vpop.f32.mrb[37].mxu1 }
 0x28f   : > { %v12789_v51 = vpack.c.bf16 %v3932_v47, %v3930_v44  ;;  %v3676_v37 = vpop.f32.mrb[148].mxu0  ;;  %v12791_v59 = vpop.f32.mrb[38].mxu1 }
 0x290   : > { %14380 = vst [vmem:[#allocation16_spill] sm:$0xff] %v12787_v8  ;;  %14381 = vst [vmem:[#allocation17_spill] sm:$0xff] %v12791_v59  ;;  %v3677_v35 = vadd.f32 %v3676_v37, %v11877_v15  ;;  %v3678_v24 = vpop.f32.mrb[149].mxu0  ;;  %v4401_v1 = vpop.f32.mrb[39].mxu1 }
 0x291   : > { %v3679_v4 = vadd.f32 %v3678_v24, %v11890_v23  ;;  %v3680_v48 = vpop.f32.mrb[150].mxu0  ;;  %8804 = vmatprep.mubr.msk.bf16.mxu1 %vm4145_vm6, %v12789_v51 }
 0x292   : > { %v3681_v2 = vadd.f32 %v3680_v48, %v11877_v15  ;;  %v3682_v42 = vpop.f32.mrb[151].mxu0  ;;  %4611 = vmatmul.mubr.bf16.gmra.mrb[144].mxu1 %v12787_v8  ;;  %v3933_v39 = vmax.f32 %v3677_v35, 0.0 }
 0x293   : > { %v3683_v40 = vadd.f32 %v3682_v42, %v11890_v23  ;;  %v3934_v37 = vmax.f32 %v3679_v4, 0.0 }
 0x294   : > { %v3935_v44 = vmax.f32 %v3681_v2, 0.0  ;;  %4940 = vmatmul.mubr.bf16.gmra.mrb[0].mxu0 %v12435_v33 }
 0x295   : > { %v3936_v47 = vmax.f32 %v3683_v40, 0.0  ;;  %v12801_v55 = vpop.f32.mrb[40].mxu1  ;;  %8842 = vmatprep.mubr.msk.bf16.mxu0 %vm4145_vm6, %v12459_v28 }
 0x296   : > { %14382 = vst [vmem:[#allocation18_spill] sm:$0xff] %v12801_v55  ;;  %v12805_v24 = vpack.c.bf16 %v3935_v44, %v3933_v39  ;;  %v4406_v1 = vpop.f32.mrb[41].mxu1 }
 0x297   : > { %v12807_v48 = vpack.c.bf16 %v3936_v47, %v3934_v37  ;;  %v3686_v59 = vpop.f32.mrb[152].mxu0  ;;  %v12809_v8 = vpop.f32.mrb[42].mxu1 }
 0x298   : > { %14383 = vst [vmem:[#allocation19_spill] sm:$0xff] %v12805_v24  ;;  %14384 = vst [vmem:[#allocation20_spill] sm:$0xff] %v12809_v8  ;;  %v3687_v35 = vadd.f32 %v3686_v59, %v11877_v15  ;;  %v3688_v2 = vpop.f32.mrb[153].mxu0  ;;  %v4409_v42 = vpop.f32.mrb[43].mxu1 }
 0x299   : > { %v3689_v33 = vadd.f32 %v3688_v2, %v11890_v23  ;;  %v3690_v4 = vpop.f32.mrb[154].mxu0  ;;  %8805 = vmatprep.mubr.msk.bf16.mxu1 %vm4145_vm6, %v12807_v48  ;;  %v14385_v2 = vld [vmem:[#allocation5_spill] sm:$0xff] }
 0x29a   : > { %v3691_v28 = vadd.f32 %v3690_v4, %v11877_v15  ;;  %v3692_v40 = vpop.f32.mrb[155].mxu0  ;;  %4619 = vmatmul.mubr.bf16.gmra.mrb[148].mxu1 %v12805_v24  ;;  %v3937_v44 = vmax.f32 %v3687_v35, 0.0 }
 0x29b   : > { %v3693_v39 = vadd.f32 %v3692_v40, %v11890_v23  ;;  %v3938_v59 = vmax.f32 %v3689_v33, 0.0 }
 0x29c   : > { %v3939_v37 = vmax.f32 %v3691_v28, 0.0  ;;  %4948 = vmatmul.mubr.bf16.gmra.mrb[4].mxu0 %v12457_v17 }
 0x29d   : > { %v3940_v47 = vmax.f32 %v3693_v39, 0.0  ;;  %v12819_v1 = vpop.f32.mrb[44].mxu1  ;;  %8843 = vmatprep.mubr.msk.bf16.mxu0 %vm4145_vm6, %v14385_v2 }
 0x29e   : > { %v12823_v42 = vpack.c.bf16 %v3939_v37, %v3937_v44  ;;  %v4414_v8 = vpop.f32.mrb[45].mxu1 }
 0x29f   : > { %v12825_v4 = vpack.c.bf16 %v3940_v47, %v3938_v59  ;;  %v3696_v55 = vpop.f32.mrb[156].mxu0  ;;  %v12827_v24 = vpop.f32.mrb[46].mxu1  ;;  %v14388_v47 = vld [vmem:[#allocation4_spill] sm:$0xff] }
 0x2a0   : > { %14386 = vst [vmem:[#allocation5_spill] sm:$0xff] %v12823_v42  ;;  %14387 = vst [vmem:[#allocation21_spill] sm:$0xff] %v12827_v24  ;;  %v3697_v35 = vadd.f32 %v3696_v55, %v11877_v15  ;;  %v3698_v28 = vpop.f32.mrb[157].mxu0  ;;  %v4417_v40 = vpop.f32.mrb[47].mxu1  ;;  %v10744_v55 = vld [vmem:[%s14319_s5 + $0x48] sm:$0xff]  }
 0x2a1   : > { %v3699_v17 = vadd.f32 %v3698_v28, %v11890_v23  ;;  %v3700_v33 = vpop.f32.mrb[158].mxu0  ;;  %8806 = vmatprep.mubr.msk.bf16.mxu1 %vm4145_vm6, %v12825_v4  ;;  %8971 = vmatprep.subr.bf16.mxu1 %v10744_v55 }
 0x2a2   : > { %v3701_v39 = vadd.f32 %v3700_v33, %v11877_v15  ;;  %v3702_v44 = vpop.f32.mrb[159].mxu0  ;;  %4627 = vmatmul.mubr.bf16.gmra.mrb[152].mxu1 %v12823_v42  ;;  %v3941_v37 = vmax.f32 %v3697_v35, 0.0  ;;  %v10745_v33 = vld [vmem:[%s14319_s5 + $0x8] sm:$0xff]  }
 0x2a3   : > { %v3703_v8 = vadd.f32 %v3702_v44, %v11890_v23  ;;  %v3942_v2 = vmax.f32 %v3699_v17, 0.0  ;;  %8972 = vmatpush3.bf16.msra.mxu1 %v10745_v33 }
 0x2a4   : > { %v3943_v59 = vmax.f32 %v3701_v39, 0.0  ;;  %4956 = vmatmul.mubr.bf16.gmra.mrb[8].mxu0 %v14388_v47 }
 0x2a5   : > { %v3944_v28 = vmax.f32 %v3703_v8, 0.0  ;;  %v12840_v40 = vpop.f32.mrb[48].mxu1  ;;  %8844 = vmatprep.mubr.msk.bf16.mxu0 %vm4145_vm6, %v12503_v6 }
 0x2a6   : > { %14389 = vst [vmem:[#allocation4_spill] sm:$0xff] %v12840_v40  ;;  %v12847_v44 = vpack.c.bf16 %v3943_v59, %v3941_v37  ;;  %v4422_v35 = vpop.f32.mrb[49].mxu1 }
 0x2a7   : > { %v12849_v39 = vpack.c.bf16 %v3944_v28, %v3942_v2  ;;  %v3706_v47 = vpop.f32.mrb[160].mxu0  ;;  %v12851_v42 = vpop.f32.mrb[50].mxu1 }
 0x2a8   : > { %14390 = vst [vmem:[#allocation22_spill] sm:$0xff] %v12847_v44  ;;  %14391 = vst [vmem:[#allocation23_spill] sm:$0xff] %v12851_v42  ;;  %v3707_v17 = vadd.f32 %v3706_v47, %v11877_v15  ;;  %v3708_v8 = vpop.f32.mrb[161].mxu0  ;;  %v4425_v40 = vpop.f32.mrb[51].mxu1 }
 0x2a9   : > { %v3709_v6 = vadd.f32 %v3708_v8, %v11890_v23  ;;  %v3710_v24 = vpop.f32.mrb[162].mxu0  ;;  %8807 = vmatprep.mubr.msk.bf16.mxu1 %vm4145_vm6, %v12849_v39 }
 0x2aa   : > { %v3711_v37 = vadd.f32 %v3710_v24, %v11877_v15  ;;  %v3712_v59 = vpop.f32.mrb[163].mxu0  ;;  %4635 = vmatmul.mubr.bf16.gmra.mrb[156].mxu1 %v12847_v44  ;;  %v3945_v2 = vmax.f32 %v3707_v17, 0.0 }
 0x2ab   : > { %v3713_v55 = vadd.f32 %v3712_v59, %v11890_v23  ;;  %v3946_v33 = vmax.f32 %v3709_v6, 0.0 }
 0x2ac   : > { %v3947_v28 = vmax.f32 %v3711_v37, 0.0  ;;  %4964 = vmatmul.mubr.bf16.gmra.mrb[12].mxu0 %v12501_v25 }
 0x2ad   : > { %v3948_v35 = vmax.f32 %v3713_v55, 0.0  ;;  %v12861_v40 = vpop.f32.mrb[52].mxu1  ;;  %8845 = vmatprep.mubr.msk.bf16.mxu0 %vm4145_vm6, %v12521_v13 }
 0x2ae   : > { %v12865_v47 = vpack.c.bf16 %v3947_v28, %v3945_v2  ;;  %v4430_v8 = vpop.f32.mrb[53].mxu1 }
 0x2af   : > { %v12867_v24 = vpack.c.bf16 %v3948_v35, %v3946_v33  ;;  %v3716_v42 = vpop.f32.mrb[164].mxu0  ;;  %v12869_v44 = vpop.f32.mrb[54].mxu1 }
 0x2b0   : > { %14392 = vst [vmem:[#allocation24_spill] sm:$0xff] %v12865_v47  ;;  %14393 = vst [vmem:[#allocation25_spill] sm:$0xff] %v12869_v44  ;;  %v3717_v17 = vadd.f32 %v3716_v42, %v11877_v15  ;;  %v3718_v37 = vpop.f32.mrb[165].mxu0  ;;  %v4433_v59 = vpop.f32.mrb[55].mxu1 }
 0x2b1   : > { %v3719_v25 = vadd.f32 %v3718_v37, %v11890_v23  ;;  %v3720_v6 = vpop.f32.mrb[166].mxu0  ;;  %8808 = vmatprep.mubr.msk.bf16.mxu1 %vm4145_vm6, %v12867_v24 }
 0x2b2   : > { %v3721_v13 = vadd.f32 %v3720_v6, %v11877_v15  ;;  %v3722_v55 = vpop.f32.mrb[167].mxu0  ;;  %4643 = vmatmul.mubr.bf16.gmra.mrb[160].mxu1 %v12865_v47  ;;  %v3949_v28 = vmax.f32 %v3717_v17, 0.0 }
 0x2b3   : > { %v3723_v2 = vadd.f32 %v3722_v55, %v11890_v23  ;;  %v3950_v42 = vmax.f32 %v3719_v25, 0.0 }
 0x2b4   : > { %v3951_v33 = vmax.f32 %v3721_v13, 0.0  ;;  %4972 = vmatmul.mubr.bf16.gmra.mrb[16].mxu0 %v12519_v26 }
 0x2b5   : > { %v3952_v35 = vmax.f32 %v3723_v2, 0.0  ;;  %v12879_v8 = vpop.f32.mrb[56].mxu1  ;;  %8846 = vmatprep.mubr.msk.bf16.mxu0 %vm4145_vm6, %v12535_v63 }
 0x2b6   : > { %v12883_v37 = vpack.c.bf16 %v3951_v33, %v3949_v28  ;;  %v4438_v59 = vpop.f32.mrb[57].mxu1 }
 0x2b7   : > { %v12885_v6 = vpack.c.bf16 %v3952_v35, %v3950_v42  ;;  %v3726_v44 = vpop.f32.mrb[168].mxu0  ;;  %v12887_v47 = vpop.f32.mrb[58].mxu1 }
 0x2b8   : > { %14394 = vst [vmem:[#allocation26_spill] sm:$0xff] %v12883_v37  ;;  %14395 = vst [vmem:[#allocation27_spill] sm:$0xff] %v12887_v47  ;;  %v3727_v17 = vadd.f32 %v3726_v44, %v11877_v15  ;;  %v3728_v13 = vpop.f32.mrb[169].mxu0  ;;  %v4441_v55 = vpop.f32.mrb[59].mxu1 }
 0x2b9   : > { %v3729_v26 = vadd.f32 %v3728_v13, %v11890_v23  ;;  %v3730_v25 = vpop.f32.mrb[170].mxu0  ;;  %8809 = vmatprep.mubr.msk.bf16.mxu1 %vm4145_vm6, %v12885_v6 }
 0x2ba   : > { %v3731_v63 = vadd.f32 %v3730_v25, %v11877_v15  ;;  %v3732_v2 = vpop.f32.mrb[171].mxu0  ;;  %4651 = vmatmul.mubr.bf16.gmra.mrb[164].mxu1 %v12883_v37  ;;  %v3953_v33 = vmax.f32 %v3727_v17, 0.0 }
 0x2bb   : > { %v3733_v28 = vadd.f32 %v3732_v2, %v11890_v23  ;;  %v3954_v44 = vmax.f32 %v3729_v26, 0.0 }
 0x2bc   : > { %v3955_v42 = vmax.f32 %v3731_v63, 0.0  ;;  %4980 = vmatmul.mubr.bf16.gmra.mrb[20].mxu0 %v12533_v50 }
 0x2bd   : > { %v3956_v35 = vmax.f32 %v3733_v28, 0.0  ;;  %v12897_v59 = vpop.f32.mrb[60].mxu1  ;;  %8847 = vmatprep.mubr.msk.bf16.mxu0 %vm4145_vm6, %v12549_v60 }
 0x2be   : > { %v12901_v13 = vpack.c.bf16 %v3955_v42, %v3953_v33  ;;  %v4446_v55 = vpop.f32.mrb[61].mxu1 }
 0x2bf   : > { %v12903_v25 = vpack.c.bf16 %v3956_v35, %v3954_v44  ;;  %v3736_v47 = vpop.f32.mrb[172].mxu0  ;;  %v12905_v37 = vpop.f32.mrb[62].mxu1 }
 0x2c0   : > { %14396 = vst [vmem:[#allocation28_spill] sm:$0xff] %v12901_v13  ;;  %14397 = vst [vmem:[#allocation29_spill] sm:$0xff] %v12905_v37  ;;  %v3737_v17 = vadd.f32 %v3736_v47, %v11877_v15  ;;  %v3738_v63 = vpop.f32.mrb[173].mxu0  ;;  %v4449_v2 = vpop.f32.mrb[63].mxu1 }
 0x2c1   : > { %v3739_v50 = vadd.f32 %v3738_v63, %v11890_v23  ;;  %v3740_v26 = vpop.f32.mrb[174].mxu0  ;;  %8810 = vmatprep.mubr.msk.bf16.mxu1 %vm4145_vm6, %v12903_v25 }
 0x2c2   : > { %v3741_v60 = vadd.f32 %v3740_v26, %v11877_v15  ;;  %v3742_v28 = vpop.f32.mrb[175].mxu0  ;;  %4659 = vmatmul.mubr.bf16.gmra.mrb[168].mxu1 %v12901_v13  ;;  %v3957_v42 = vmax.f32 %v3737_v17, 0.0 }
 0x2c3   : > { %v3743_v33 = vadd.f32 %v3742_v28, %v11890_v23  ;;  %v3958_v47 = vmax.f32 %v3739_v50, 0.0 }
 0x2c4   : > { %v3959_v44 = vmax.f32 %v3741_v60, 0.0  ;;  %4988 = vmatmul.mubr.bf16.gmra.mrb[24].mxu0 %v12547_v43 }
 0x2c5   : > { %v3960_v35 = vmax.f32 %v3743_v33, 0.0  ;;  %v12915_v55 = vpop.f32.mrb[64].mxu1  ;;  %8848 = vmatprep.mubr.msk.bf16.mxu0 %vm4145_vm6, %v12563_v46 }
 0x2c6   : > { %v12919_v63 = vpack.c.bf16 %v3959_v44, %v3957_v42  ;;  %v4454_v2 = vpop.f32.mrb[65].mxu1 }
 0x2c7   : > { %v12921_v26 = vpack.c.bf16 %v3960_v35, %v3958_v47  ;;  %v3746_v37 = vpop.f32.mrb[176].mxu0  ;;  %v12923_v13 = vpop.f32.mrb[66].mxu1 }
 0x2c8   : > { %14398 = vst [vmem:[#allocation30_spill] sm:$0xff] %v12919_v63  ;;  %14399 = vst [vmem:[#allocation31_spill] sm:$0xff] %v12923_v13  ;;  %v3747_v17 = vadd.f32 %v3746_v37, %v11877_v15  ;;  %v3748_v60 = vpop.f32.mrb[177].mxu0  ;;  %v4457_v28 = vpop.f32.mrb[67].mxu1 }
 0x2c9   : > { %v3749_v43 = vadd.f32 %v3748_v60, %v11890_v23  ;;  %v3750_v50 = vpop.f32.mrb[178].mxu0  ;;  %8811 = vmatprep.mubr.msk.bf16.mxu1 %vm4145_vm6, %v12921_v26 }
 0x2ca   : > { %v3751_v46 = vadd.f32 %v3750_v50, %v11877_v15  ;;  %v3752_v33 = vpop.f32.mrb[179].mxu0  ;;  %4667 = vmatmul.mubr.bf16.gmra.mrb[172].mxu1 %v12919_v63  ;;  %v3961_v44 = vmax.f32 %v3747_v17, 0.0 }
 0x2cb   : > { %v3753_v42 = vadd.f32 %v3752_v33, %v11890_v23  ;;  %v3962_v37 = vmax.f32 %v3749_v43, 0.0 }
 0x2cc   : > { %v3963_v47 = vmax.f32 %v3751_v46, 0.0  ;;  %4996 = vmatmul.mubr.bf16.gmra.mrb[28].mxu0 %v12561_v53 }
 0x2cd   : > { %v3964_v35 = vmax.f32 %v3753_v42, 0.0  ;;  %v12933_v2 = vpop.f32.mrb[68].mxu1  ;;  %8849 = vmatprep.mubr.msk.bf16.mxu0 %vm4145_vm6, %v12577_v32 }
 0x2ce   : > { %v12937_v60 = vpack.c.bf16 %v3963_v47, %v3961_v44  ;;  %v4462_v28 = vpop.f32.mrb[69].mxu1 }
 0x2cf   : > { %v12939_v50 = vpack.c.bf16 %v3964_v35, %v3962_v37  ;;  %v3756_v13 = vpop.f32.mrb[180].mxu0  ;;  %v12941_v63 = vpop.f32.mrb[70].mxu1 }
 0x2d0   : > { %14400 = vst [vmem:[#allocation32_spill] sm:$0xff] %v12937_v60  ;;  %v3757_v17 = vadd.f32 %v3756_v13, %v11877_v15  ;;  %v3758_v46 = vpop.f32.mrb[181].mxu0  ;;  %v4465_v33 = vpop.f32.mrb[71].mxu1  ;;  %v10746_v13 = vld [vmem:[%s14319_s5 + $0x50] sm:$0xff]  }
 0x2d1   : > { %v3759_v53 = vadd.f32 %v3758_v46, %v11890_v23  ;;  %v3760_v43 = vpop.f32.mrb[182].mxu0  ;;  %8812 = vmatprep.mubr.msk.bf16.mxu1 %vm4145_vm6, %v12939_v50  ;;  %v10747_v33 = vld [vmem:[%s14319_s5 + $0x10] sm:$0xff]   ;;  %8973 = vmatprep.subr.bf16.mxu1 %v10746_v13 }
 0x2d2   : > { %v3761_v32 = vadd.f32 %v3760_v43, %v11877_v15  ;;  %v3762_v42 = vpop.f32.mrb[183].mxu0  ;;  %4675 = vmatmul.mubr.bf16.gmra.mrb[176].mxu1 %v12937_v60  ;;  %v3965_v47 = vmax.f32 %v3757_v17, 0.0 }
 0x2d3   : > { %v3763_v44 = vadd.f32 %v3762_v42, %v11890_v23  ;;  %v3966_v35 = vmax.f32 %v3759_v53, 0.0  ;;  %8974 = vmatpush3.bf16.msra.mxu1 %v10747_v33 }
 0x2d4   : > { %v3967_v37 = vmax.f32 %v3761_v32, 0.0  ;;  %5004 = vmatmul.mubr.bf16.gmra.mrb[32].mxu0 %v12575_v11 }
 0x2d5   : > { %v3968_v28 = vmax.f32 %v3763_v44, 0.0  ;;  %v12954_v46 = vpop.f32.mrb[72].mxu1  ;;  %8850 = vmatprep.mubr.msk.bf16.mxu0 %vm4145_vm6, %v12591_v22 }
 0x2d6   : > { %14401 = vst [vmem:[#allocation33_spill] sm:$0xff] %v12954_v46  ;;  %v12961_v43 = vpack.c.bf16 %v3967_v37, %v3965_v47  ;;  %v4470_v17 = vpop.f32.mrb[73].mxu1 }
 0x2d7   : > { %v12963_v11 = vpack.c.bf16 %v3968_v28, %v3966_v35  ;;  %v3766_v32 = vpop.f32.mrb[184].mxu0  ;;  %v12965_v42 = vpop.f32.mrb[74].mxu1 }
 0x2d8   : > { %14402 = vst [vmem:[#allocation34_spill] sm:$0xff] %v12961_v43  ;;  %14403 = vst [vmem:[#allocation35_spill] sm:$0xff] %v12965_v42  ;;  %v3767_v53 = vadd.f32 %v3766_v32, %v11877_v15  ;;  %v3768_v44 = vpop.f32.mrb[185].mxu0  ;;  %v4473_v46 = vpop.f32.mrb[75].mxu1 }
 0x2d9   : > { %v3769_v22 = vadd.f32 %v3768_v44, %v11890_v23  ;;  %v3770_v60 = vpop.f32.mrb[186].mxu0  ;;  %8813 = vmatprep.mubr.msk.bf16.mxu1 %vm4145_vm6, %v12963_v11 }
 0x2da   : > { %v3771_v47 = vadd.f32 %v3770_v60, %v11877_v15  ;;  %v3772_v37 = vpop.f32.mrb[187].mxu0  ;;  %4683 = vmatmul.mubr.bf16.gmra.mrb[180].mxu1 %v12961_v43  ;;  %v3969_v35 = vmax.f32 %v3767_v53, 0.0 }
 0x2db   : > { %v3773_v13 = vadd.f32 %v3772_v37, %v11890_v23  ;;  %v3970_v33 = vmax.f32 %v3769_v22, 0.0 }
 0x2dc   : > { %v3971_v28 = vmax.f32 %v3771_v47, 0.0  ;;  %5012 = vmatmul.mubr.bf16.gmra.mrb[36].mxu0 %v12589_v31 }
 0x2dd   : > { %v3972_v17 = vmax.f32 %v3773_v13, 0.0  ;;  %v12975_v46 = vpop.f32.mrb[76].mxu1  ;;  %8851 = vmatprep.mubr.msk.bf16.mxu0 %vm4145_vm6, %v12605_v16 }
 0x2de   : > { %v12979_v32 = vpack.c.bf16 %v3971_v28, %v3969_v35  ;;  %v4478_v44 = vpop.f32.mrb[77].mxu1 }
 0x2df   : > { %v12981_v60 = vpack.c.bf16 %v3972_v17, %v3970_v33  ;;  %v3776_v42 = vpop.f32.mrb[188].mxu0  ;;  %v12983_v43 = vpop.f32.mrb[78].mxu1 }
 0x2e0   : > { %14404 = vst [vmem:[#allocation36_spill] sm:$0xff] %v12979_v32  ;;  %v3777_v53 = vadd.f32 %v3776_v42, %v11877_v15  ;;  %v3778_v47 = vpop.f32.mrb[189].mxu0  ;;  %v4481_v37 = vpop.f32.mrb[79].mxu1 }
 0x2e1   : > { %v3779_v31 = vadd.f32 %v3778_v47, %v11890_v23  ;;  %v3780_v22 = vpop.f32.mrb[190].mxu0  ;;  %8814 = vmatprep.mubr.msk.bf16.mxu1 %vm4145_vm6, %v12981_v60 }
 0x2e2   : > { %v3781_v16 = vadd.f32 %v3780_v22, %v11877_v15  ;;  %v3782_v13 = vpop.f32.mrb[191].mxu0  ;;  %4691 = vmatmul.mubr.bf16.gmra.mrb[184].mxu1 %v12979_v32  ;;  %v3973_v28 = vmax.f32 %v3777_v53, 0.0 }
 0x2e3   : > { %v3783_v35 = vadd.f32 %v3782_v13, %v11890_v23  ;;  %v3974_v42 = vmax.f32 %v3779_v31, 0.0 }
 0x2e4   : > { %v3975_v33 = vmax.f32 %v3781_v16, 0.0  ;;  %5020 = vmatmul.mubr.bf16.gmra.mrb[40].mxu0 %v12603_v29 }
 0x2e5   : > { %v3976_v17 = vmax.f32 %v3783_v35, 0.0  ;;  %v12993_v44 = vpop.f32.mrb[80].mxu1  ;;  %8852 = vmatprep.mubr.msk.bf16.mxu0 %vm4145_vm6, %v12621_v19 }
 0x2e6   : > { %v12997_v47 = vpack.c.bf16 %v3975_v33, %v3973_v28  ;;  %v4486_v37 = vpop.f32.mrb[81].mxu1 }
 0x2e7   : > { %v12999_v15 = vpack.c.bf16 %v3976_v17, %v3974_v42  ;;  %v13001_v22 = vpop.f32.mrb[82].mxu1  ;;  %v4813_v32 = vpop.f32.mrb[192].mxu0  ;;  %v10748_v17 = vld [vmem:[%s14319_s5 + $0x58] sm:$0xff]  }
 0x2e8   : > { %v5196_v23 = vmax.f32 %v12615_v20, %v4813_v32  ;;  %v4489_v53 = vpop.f32.mrb[83].mxu1  ;;  %v4815_v29 = vpop.f32.mrb[193].mxu0  ;;  %8975 = vmatprep.subr.bf16.mxu1 %v10748_v17 }
 0x2e9   : > { %8815 = vmatprep.mubr.msk.bf16.mxu1 %vm4145_vm6, %v12999_v15  ;;  %v4816_v31 = vpop.f32.mrb[194].mxu0  ;;  %v10751_v53 = vld [vmem:[%s14319_s5 + $0x20] sm:$0xff]  }
 0x2ea   : > { %5293 = vst.msk [vmem:[#allocation2] sm:$0xff] %vm5292_vm7, %v5196_v23  ;;  %v5197_v19 = vmax.f32 %v12623_v0, %v4816_v31  ;;  %4699 = vmatmul.mubr.bf16.gmra.mrb[188].mxu1 %v12997_v47  ;;  %v4818_v16 = vpop.f32.mrb[195].mxu0 }
 0x2ec   : > { %5294 = vst.msk [vmem:[#allocation2 + $0x8] sm:$0xff] %vm5292_vm7, %v5197_v19  ;;  %5028 = vmatmul.mubr.bf16.gmra.mrb[44].mxu0 %v12619_v54 }
 0x2ed   : > { %v13011_v13 = vpop.f32.mrb[84].mxu1  ;;  %8853 = vmatprep.mubr.msk.bf16.mxu0 %vm4145_vm6, %v12639_v30  ;;  %v10749_v30 = vld [vmem:[%s14319_s5 + $0x18] sm:$0xff]  }
 0x2ee   : > { %v4494_v20 = vpop.f32.mrb[85].mxu1  ;;  %8976 = vmatpush3.bf16.msra.mxu1 %v10749_v30 }
 0x2ef   : > { %v13015_v32 = vpop.f32.mrb[86].mxu1  ;;  %v4821_v35 = vpop.f32.mrb[196].mxu0 }
 0x2f0   : > { %v5198_v28 = vmax.f32 %v12633_v3, %v4821_v35  ;;  %v4497_v33 = vpop.f32.mrb[87].mxu1  ;;  %v4823_v0 = vpop.f32.mrb[197].mxu0 }
 0x2f1   : > { %v4824_v42 = vpop.f32.mrb[198].mxu0  ;;  %v10753_v33 = vld [vmem:[%s14319_s5 + $0x28] sm:$0xff]  }
 0x2f2   : > { %5295 = vst.msk [vmem:[#allocation2 + $0x10] sm:$0xff] %vm5292_vm7, %v5198_v28  ;;  %v5199_v54 = vmax.f32 %v12641_v56, %v4824_v42  ;;  %v4826_v37 = vpop.f32.mrb[199].mxu0  ;;  %v10750_v56 = vld [vmem:[%s14319_s5 + $0x60] sm:$0xff]   ;;  %v10755_v42 = vld [vmem:[%s14319_s5 + $0x30] sm:$0xff]  }
 0x2f3   : > { %8977 = vmatprep.subr.bf16.mxu1 %v10750_v56 }
 0x2f4   : > { %5296 = vst.msk [vmem:[#allocation2 + $0x18] sm:$0xff] %vm5292_vm7, %v5199_v54  ;;  %5036 = vmatmul.mubr.bf16.gmra.mrb[48].mxu0 %v12637_v21  ;;  %8978 = vmatpush3.bf16.msra.mxu1 %v10751_v53  ;;  %v10756_v53 = vld [vmem:[%s14319_s5 + $0x78] sm:$0xff]  }
 0x2f5   : > { %v13028_v3 = vpop.f32.mrb[88].mxu1  ;;  %8854 = vmatprep.mubr.msk.bf16.mxu0 %vm4145_vm6, %v12657_v49  ;;  %v10752_v49 = vld [vmem:[%s14319_s5 + $0x68] sm:$0xff]  }
 0x2f6   : > { %v4502_v23 = vpop.f32.mrb[89].mxu1  ;;  %8979 = vmatprep.subr.bf16.mxu1 %v10752_v49 }
 0x2f7   : > { %v13038_v29 = vpop.f32.mrb[90].mxu1  ;;  %v4829_v31 = vpop.f32.mrb[200].mxu0 }
 0x2f8   : > { %v5200_v21 = vmax.f32 %v12651_v18, %v4829_v31  ;;  %v4505_v19 = vpop.f32.mrb[91].mxu1  ;;  %v4831_v16 = vpop.f32.mrb[201].mxu0  ;;  %8980 = vmatpush3.bf16.msra.mxu1 %v10753_v33 }
 0x2f9   : > { %v4832_v20 = vpop.f32.mrb[202].mxu0  ;;  %v5773_v23 = vld [vmem:[#allocation2 + $0x5] ss:$2 sm:$0xff]  ;;  %v5549_v19 = vld [vmem:[#allocation2 + $0x2] ss:$2 sm:$0xff] }
 0x2fa   : > { %5297 = vst.msk [vmem:[#allocation2 + $0x20] sm:$0xff] %vm5292_vm7, %v5200_v21  ;;  %v5201_v35 = vmax.f32 %v12659_v10, %v4832_v20  ;;  %v4834_v28 = vpop.f32.mrb[203].mxu0  ;;  %v10754_v10 = vld [vmem:[%s14319_s5 + $0x70] sm:$0xff]  }
 0x2fb   : > { %8981 = vmatprep.subr.bf16.mxu1 %v10754_v10  ;;  %v5613_v16 = vld [vmem:[#allocation2 + $0x3] ss:$2 sm:$0xff] }
 0x2fc   : > { %5298 = vst.msk [vmem:[#allocation2 + $0x28] sm:$0xff] %vm5292_vm7, %v5201_v35  ;;  %5044 = vmatmul.mubr.bf16.gmra.mrb[52].mxu0 %v12655_v62  ;;  %8982 = vmatpush3.bf16.msra.mxu1 %v10755_v42 }
 0x2fd   : > { %v13051_v18 = vpop.f32.mrb[92].mxu1  ;;  %8855 = vmatprep.mubr.msk.bf16.mxu0 %vm4145_vm6, %v12675_v27  ;;  %v5709_v27 = vld [vmem:[#allocation2 + $0x4] ss:$2 sm:$0xff]  ;;  %8983 = vmatprep.subr.bf16.mxu1 %v10756_v53  ;;  %v5933_v53 = vld [vmem:[#allocation2 + $0x7] ss:$2 sm:$0xff] }
 0x2fe   : > { %v4510_v0 = vpop.f32.mrb[93].mxu1  ;;  %v5836_v28 = vmax.f32 %v5709_v27, %v5773_v23 }
 0x2ff   : > { %v13061_v17 = vpop.f32.mrb[94].mxu1  ;;  %v4837_v54 = vpop.f32.mrb[204].mxu0 }
 0x300   : > { %v5202_v62 = vmax.f32 %v12669_v12, %v4837_v54  ;;  %v4513_v37 = vpop.f32.mrb[95].mxu1  ;;  %v4839_v30 = vpop.f32.mrb[205].mxu0  ;;  %v10757_v12 = vld [vmem:[%s14319_s5 + $0x38] sm:$0xff]   ;;  %v5676_v54 = vmax.f32 %v5549_v19, %v5613_v16 }
 0x301   : > { %v4840_v56 = vpop.f32.mrb[206].mxu0  ;;  %8984 = vmatpush3.bf16.msra.mxu1 %v10757_v12  ;;  %v14405_v16 = vld [vmem:[#allocation7_spill] sm:$0xff] }
 0x302   : > { %5299 = vst.msk [vmem:[#allocation2 + $0x30] sm:$0xff] %vm5292_vm7, %v5202_v62  ;;  %v5203_v31 = vmax.f32 %v12677_v61, %v4840_v56  ;;  %v4842_v21 = vpop.f32.mrb[207].mxu0  ;;  %v5869_v56 = vld [vmem:[#allocation2 + $0x6] ss:$2 sm:$0xff] }
 0x303   : > { %v5711_v20 = vld [vmem:[#allocation2 + $0x1c] ss:$2 sm:$0xff]  ;;  %v5775_v49 = vld [vmem:[#allocation2 + $0x1d] ss:$2 sm:$0xff]  ;;  %v5996_v19 = vmax.f32 %v5869_v56, %v5933_v53 }
 0x304   : > { %v5551_v35 = vld [vmem:[#allocation2 + $0x1a] ss:$2 sm:$0xff]  ;;  %5300 = vst.msk [vmem:[#allocation2 + $0x38] sm:$0xff] %vm5292_vm7, %v5203_v31  ;;  %5052 = vmatmul.mubr.bf16.gmra.mrb[56].mxu0 %v12673_v34  ;;  %v5837_v33 = vmax.f32 %v5711_v20, %v5775_v49  ;;  %v5615_v10 = vld [vmem:[#allocation2 + $0x1b] ss:$2 sm:$0xff] }
 0x305   : > { %v5871_v0 = vld [vmem:[#allocation2 + $0x1e] ss:$2 sm:$0xff]  ;;  %v5935_v61 = vld [vmem:[#allocation2 + $0x1f] ss:$2 sm:$0xff]  ;;  %v13074_v42 = vpop.f32.mrb[96].mxu1  ;;  %8856 = vmatprep.mubr.msk.bf16.mxu0 %vm4145_vm6, %v12693_v7  ;;  %v5677_v62 = vmax.f32 %v5551_v35, %v5615_v10 }
 0x306   : > { %v4518_v37 = vpop.f32.mrb[97].mxu1  ;;  %v10362_v30 = vpack.i.bf16 %v5837_v33, %v5836_v28  ;;  %v5997_v23 = vmax.f32 %v5871_v0, %v5935_v61  ;;  %v14406_v33 = vld [vmem:[#allocation6_spill] sm:$0xff] }
 0x307   : > { %v13078_v31 = vpop.f32.mrb[98].mxu1  ;;  %v4845_v34 = vpop.f32.mrb[208].mxu0  ;;  %v10357_v27 = vpack.i.bf16 %v5677_v62, %v5676_v54 }
 0x308   : > { %v5204_v21 = vmax.f32 %v12687_v14, %v4845_v34  ;;  %v4847_v20 = vpop.f32.mrb[209].mxu0  ;;  %10363 = vrot.lane.b32.xlu1 %v10362_v30, %s10824_s24  ;;  %v4521_v12 = vpop.f32.mrb[99].mxu1  ;;  %v10367_v28 = vpack.i.bf16 %v5997_v23, %v5996_v19  ;;  %v14407_v34 = vld [vmem:[#allocation8_spill] sm:$0xff] }
 0x309   : > { %10358 = vrot.lane.b32.xlu0 %v10357_v27, %s10825_s25  ;;  %v4848_v7 = vpop.f32.mrb[210].mxu0 }
 0x30a   : > { %5301 = vst.msk [vmem:[#allocation2 + $0x40] sm:$0xff] %vm5292_vm7, %v5204_v21  ;;  %v5205_v49 = vmax.f32 %v14405_v16, %v4848_v7  ;;  %v4850_v35 = vpop.f32.mrb[211].mxu0  ;;  %v14408_v21 = vld [vmem:[#allocation9_spill] sm:$0xff] }
 0x30c   : > { %5302 = vst.msk [vmem:[#allocation2 + $0x48] sm:$0xff] %vm5292_vm7, %v5205_v49  ;;  %5060 = vmatmul.mubr.bf16.gmra.mrb[60].mxu0 %v14406_v33  ;;  %v14409_v49 = vld [vmem:[#allocation11_spill] sm:$0xff] }
 0x30d   : > { %10368 = vrot.lane.b32.xlu0 %v10367_v28, %s10826_s26  ;;  %v13088_v14 = vpop.f32.mrb[100].mxu1  ;;  %8857 = vmatprep.mubr.msk.bf16.mxu0 %vm4145_vm6, %v12711_v9 }
 0x30e   : > { %v4526_v10 = vpop.f32.mrb[101].mxu1 }
 0x30f   : > { %v13092_v0 = vpop.f32.mrb[102].mxu1  ;;  %v4853_v61 = vpop.f32.mrb[212].mxu0 }
 0x310   : > { %v5206_v54 = vmax.f32 %v12705_v57, %v4853_v61  ;;  %v4529_v62 = vpop.f32.mrb[103].mxu1  ;;  %v4855_v37 = vpop.f32.mrb[213].mxu0 }
 0x311   : > { %v4856_v30 = vpop.f32.mrb[214].mxu0  ;;  %v5777_v16 = vld [vmem:[#allocation2 + $0x35] ss:$2 sm:$0xff]  ;;  %v5553_v33 = vld [vmem:[#allocation2 + $0x32] ss:$2 sm:$0xff] }
 0x312   : > { %5303 = vst.msk [vmem:[#allocation2 + $0x50] sm:$0xff] %vm5292_vm7, %v5206_v54  ;;  %v5207_v56 = vmax.f32 %v12713_v58, %v4856_v30  ;;  %v4858_v53 = vpop.f32.mrb[215].mxu0  ;;  %v5713_v58 = vld [vmem:[#allocation2 + $0x34] ss:$2 sm:$0xff]  ;;  %v5617_v10 = vld [vmem:[#allocation2 + $0x33] ss:$2 sm:$0xff] }
 0x313   : > { %v14410_v62 = vld [vmem:[#allocation10_spill] sm:$0xff]  ;;  %v5838_v37 = vmax.f32 %v5713_v58, %v5777_v16 }
 0x314   : > { %5304 = vst.msk [vmem:[#allocation2 + $0x58] sm:$0xff] %vm5292_vm7, %v5207_v56  ;;  %5068 = vmatmul.mubr.bf16.gmra.mrb[64].mxu0 %v14407_v34 }
 0x315   : > { %v13099_v27 = vpop.f32.mrb[104].mxu1  ;;  %8858 = vmatprep.mubr.msk.bf16.mxu0 %vm4145_vm6, %v12735_v36 }
 0x316   : > { %v4534_v9 = vpop.f32.mrb[105].mxu1 }
 0x317   : > { %v13103_v23 = vpop.f32.mrb[106].mxu1  ;;  %v4861_v57 = vpop.f32.mrb[216].mxu0 }
 0x318   : > { %v5208_v20 = vmax.f32 %v14408_v21, %v4861_v57  ;;  %v4537_v12 = vpop.f32.mrb[107].mxu1  ;;  %v4863_v7 = vpop.f32.mrb[217].mxu0  ;;  %v5678_v57 = vmax.f32 %v5553_v33, %v5617_v10  ;;  %v14411_v10 = vld [vmem:[#allocation13_spill] sm:$0xff] }
 0x319   : > { %v4864_v19 = vpop.f32.mrb[218].mxu0  ;;  %v5873_v7 = vld [vmem:[#allocation2 + $0x36] ss:$2 sm:$0xff] }
 0x31a   : > { %5305 = vst.msk [vmem:[#allocation2 + $0x60] sm:$0xff] %vm5292_vm7, %v5208_v20  ;;  %v5209_v35 = vmax.f32 %v14409_v49, %v4864_v19  ;;  %v4866_v28 = vpop.f32.mrb[219].mxu0  ;;  %v5937_v19 = vld [vmem:[#allocation2 + $0x37] ss:$2 sm:$0xff] }
 0x31b   : > { %v5715_v61 = vld [vmem:[#allocation2 + $0x4c] ss:$2 sm:$0xff]  ;;  %v5779_v36 = vld [vmem:[#allocation2 + $0x4d] ss:$2 sm:$0xff]  ;;  %v5998_v33 = vmax.f32 %v5873_v7, %v5937_v19 }
 0x31c   : > { %v5555_v54 = vld [vmem:[#allocation2 + $0x4a] ss:$2 sm:$0xff]  ;;  %5306 = vst.msk [vmem:[#allocation2 + $0x68] sm:$0xff] %vm5292_vm7, %v5209_v35  ;;  %5076 = vmatmul.mubr.bf16.gmra.mrb[68].mxu0 %v14410_v62  ;;  %v5839_v30 = vmax.f32 %v5715_v61, %v5779_v36  ;;  %v5619_v56 = vld [vmem:[#allocation2 + $0x4b] ss:$2 sm:$0xff] }
 0x31d   : > { %v5875_v53 = vld [vmem:[#allocation2 + $0x4e] ss:$2 sm:$0xff]  ;;  %v5939_v34 = vld [vmem:[#allocation2 + $0x4f] ss:$2 sm:$0xff]  ;;  %v13110_v9 = vpop.f32.mrb[108].mxu1  ;;  %8859 = vmatprep.mubr.msk.bf16.mxu0 %vm4145_vm6, %v12753_v45  ;;  %v5679_v21 = vmax.f32 %v5555_v54, %v5619_v56 }
 0x31e   : > { %v4542_v20 = vpop.f32.mrb[109].mxu1  ;;  %v10377_v12 = vpack.i.bf16 %v5839_v30, %v5838_v37  ;;  %v5999_v58 = vmax.f32 %v5875_v53, %v5939_v34  ;;  %v14412_v30 = vld [vmem:[#allocation12_spill] sm:$0xff]  ;;  %v14413_v7 = vld [vmem:[#allocation15_spill] sm:$0xff] }
 0x31f   : > { %v13114_v49 = vpop.f32.mrb[110].mxu1  ;;  %v4869_v35 = vpop.f32.mrb[220].mxu0  ;;  %v10372_v28 = vpack.i.bf16 %v5679_v21, %v5678_v57 }
 0x320   : > { %v5210_v16 = vmax.f32 %v12747_v38, %v4869_v35  ;;  %v4871_v61 = vpop.f32.mrb[221].mxu0  ;;  %10378 = vrot.lane.b32.xlu0 %v10377_v12, %s10824_s24  ;;  %v4545_v36 = vpop.f32.mrb[111].mxu1  ;;  %v10382_v37 = vpack.i.bf16 %v5999_v58, %v5998_v33 }
 0x321   : > { %10373 = vrot.lane.b32.xlu1 %v10372_v28, %s10825_s25  ;;  %v4872_v45 = vpop.f32.mrb[222].mxu0  ;;  %v14414_v28 = vld [vmem:[#allocation14_spill] sm:$0xff] }
 0x322   : > { %5307 = vst.msk [vmem:[#allocation2 + $0x70] sm:$0xff] %vm5292_vm7, %v5210_v16  ;;  %v5211_v54 = vmax.f32 %v14411_v10, %v4872_v45  ;;  %v4874_v62 = vpop.f32.mrb[223].mxu0 }
 0x323   : > { %v14415_v62 = vld [vmem:[#allocation17_spill] sm:$0xff] }
 0x324   : > { %5308 = vst.msk [vmem:[#allocation2 + $0x78] sm:$0xff] %vm5292_vm7, %v5211_v54  ;;  %5084 = vmatmul.mubr.bf16.gmra.mrb[72].mxu0 %v14412_v30 }
 0x325   : > { %10383 = vrot.lane.b32.xlu1 %v10382_v37, %s10826_s26  ;;  %v13124_v38 = vpop.f32.mrb[112].mxu1  ;;  %8860 = vmatprep.mubr.msk.bf16.mxu0 %vm4145_vm6, %v12771_v52 }
 0x326   : > { %v4550_v56 = vpop.f32.mrb[113].mxu1 }
 0x327   : > { %v13128_v53 = vpop.f32.mrb[114].mxu1  ;;  %v4877_v34 = vpop.f32.mrb[224].mxu0 }
 0x328   : > { %v5212_v57 = vmax.f32 %v12765_v5, %v4877_v34  ;;  %v4553_v21 = vpop.f32.mrb[115].mxu1  ;;  %v4879_v20 = vpop.f32.mrb[225].mxu0 }
 0x329   : > { %v4880_v12 = vpop.f32.mrb[226].mxu0  ;;  %v5717_v10 = vld [vmem:[#allocation2 + $0x64] ss:$2 sm:$0xff]  ;;  %v5781_v54 = vld [vmem:[#allocation2 + $0x65] ss:$2 sm:$0xff] }
 0x32a   : > { %5309 = vst.msk [vmem:[#allocation2 + $0x80] sm:$0xff] %vm5292_vm7, %v5212_v57  ;;  %v5213_v19 = vmax.f32 %v14413_v7, %v4880_v12  ;;  %v4882_v35 = vpop.f32.mrb[227].mxu0  ;;  %v5557_v56 = vld [vmem:[#allocation2 + $0x62] ss:$2 sm:$0xff]  ;;  %v5621_v34 = vld [vmem:[#allocation2 + $0x63] ss:$2 sm:$0xff] }
 0x32b   : > { %v14416_v20 = vld [vmem:[#allocation16_spill] sm:$0xff] }
 0x32c   : > { %5310 = vst.msk [vmem:[#allocation2 + $0x88] sm:$0xff] %vm5292_vm7, %v5213_v19  ;;  %5092 = vmatmul.mubr.bf16.gmra.mrb[76].mxu0 %v14414_v28 }
 0x32d   : > { %v13135_v58 = vpop.f32.mrb[116].mxu1  ;;  %8861 = vmatprep.mubr.msk.bf16.mxu0 %vm4145_vm6, %v12789_v51 }
 0x32e   : > { %v4558_v52 = vpop.f32.mrb[117].mxu1 }
 0x32f   : > { %v13139_v16 = vpop.f32.mrb[118].mxu1  ;;  %v4885_v5 = vpop.f32.mrb[228].mxu0  ;;  %v5680_v52 = vmax.f32 %v5557_v56, %v5621_v34  ;;  %v14418_v34 = vld [vmem:[#allocation20_spill] sm:$0xff] }
 0x330   : > { %v5214_v61 = vmax.f32 %v12783_v41, %v4885_v5  ;;  %v4561_v36 = vpop.f32.mrb[119].mxu1  ;;  %v4887_v45 = vpop.f32.mrb[229].mxu0  ;;  %v5840_v41 = vmax.f32 %v5717_v10, %v5781_v54  ;;  %v14417_v54 = vld [vmem:[#allocation18_spill] sm:$0xff] }
 0x331   : > { %v4888_v33 = vpop.f32.mrb[230].mxu0  ;;  %v5877_v45 = vld [vmem:[#allocation2 + $0x66] ss:$2 sm:$0xff] }
 0x332   : > { %5311 = vst.msk [vmem:[#allocation2 + $0x90] sm:$0xff] %vm5292_vm7, %v5214_v61  ;;  %v5215_v37 = vmax.f32 %v14415_v62, %v4888_v33  ;;  %v4890_v30 = vpop.f32.mrb[231].mxu0  ;;  %v5941_v33 = vld [vmem:[#allocation2 + $0x67] ss:$2 sm:$0xff] }
 0x333   : > { %v5719_v57 = vld [vmem:[#allocation2 + $0x7c] ss:$2 sm:$0xff]  ;;  %v5783_v51 = vld [vmem:[#allocation2 + $0x7d] ss:$2 sm:$0xff]  ;;  %v6000_v56 = vmax.f32 %v5877_v45, %v5941_v33 }
 0x334   : > { %v5559_v21 = vld [vmem:[#allocation2 + $0x7a] ss:$2 sm:$0xff]  ;;  %5312 = vst.msk [vmem:[#allocation2 + $0x98] sm:$0xff] %vm5292_vm7, %v5215_v37  ;;  %5100 = vmatmul.mubr.bf16.gmra.mrb[80].mxu0 %v14416_v20  ;;  %v5841_v12 = vmax.f32 %v5719_v57, %v5783_v51  ;;  %v5623_v7 = vld [vmem:[#allocation2 + $0x7b] ss:$2 sm:$0xff] }
 0x335   : > { %v5879_v19 = vld [vmem:[#allocation2 + $0x7e] ss:$2 sm:$0xff]  ;;  %v5943_v35 = vld [vmem:[#allocation2 + $0x7f] ss:$2 sm:$0xff]  ;;  %v13146_v28 = vpop.f32.mrb[120].mxu1  ;;  %8862 = vmatprep.mubr.msk.bf16.mxu0 %vm4145_vm6, %v12807_v48  ;;  %v5681_v5 = vmax.f32 %v5559_v21, %v5623_v7 }
 0x336   : > { %v4566_v61 = vpop.f32.mrb[121].mxu1  ;;  %v10392_v36 = vpack.i.bf16 %v5841_v12, %v5840_v41  ;;  %v6001_v10 = vmax.f32 %v5879_v19, %v5943_v35  ;;  %v14419_v7 = vld [vmem:[#allocation19_spill] sm:$0xff] }
 0x337   : > { %v13150_v62 = vpop.f32.mrb[122].mxu1  ;;  %v4893_v37 = vpop.f32.mrb[232].mxu0  ;;  %v10387_v30 = vpack.i.bf16 %v5681_v5, %v5680_v52 }
 0x338   : > { %v5216_v57 = vmax.f32 %v14417_v54, %v4893_v37  ;;  %v4895_v51 = vpop.f32.mrb[233].mxu0  ;;  %10393 = vrot.lane.b32.xlu1 %v10392_v36, %s10824_s24  ;;  %v4569_v20 = vpop.f32.mrb[123].mxu1  ;;  %v10397_v12 = vpack.i.bf16 %v6001_v10, %v6000_v56  ;;  %v14420_v37 = vld [vmem:[#allocation21_spill] sm:$0xff] }
 0x339   : > { %10388 = vrot.lane.b32.xlu0 %v10387_v30, %s10825_s25  ;;  %v4896_v48 = vpop.f32.mrb[234].mxu0  ;;  %v14421_v54 = vld [vmem:[#allocation5_spill] sm:$0xff]  ;;  %v14423_v20 = vld [vmem:[#allocation4_spill] sm:$0xff] }
 0x33a   : > { %5313 = vst.msk [vmem:[#allocation2 + $0xa0] sm:$0xff] %vm5292_vm7, %v5216_v57  ;;  %v5217_v21 = vmax.f32 %v14418_v34, %v4896_v48  ;;  %v4898_v41 = vpop.f32.mrb[235].mxu0 }
 0x33c   : > { %5314 = vst.msk [vmem:[#allocation2 + $0xa8] sm:$0xff] %vm5292_vm7, %v5217_v21  ;;  %5108 = vmatmul.mubr.bf16.gmra.mrb[84].mxu0 %v14419_v7  ;;  %v14424_v7 = vld [vmem:[#allocation23_spill] sm:$0xff] }
 0x33d   : > { %10398 = vrot.lane.b32.xlu0 %v10397_v12, %s10826_s26  ;;  %v13160_v19 = vpop.f32.mrb[124].mxu1  ;;  %8863 = vmatprep.mubr.msk.bf16.mxu0 %vm4145_vm6, %v12825_v4 }
 0x33e   : > { %v4574_v35 = vpop.f32.mrb[125].mxu1 }
 0x33f   : > { %v13164_v52 = vpop.f32.mrb[126].mxu1  ;;  %v4901_v5 = vpop.f32.mrb[236].mxu0 }
 0x340   : > { %v5218_v61 = vmax.f32 %v12819_v1, %v4901_v5  ;;  %v4577_v36 = vpop.f32.mrb[127].mxu1  ;;  %v4903_v45 = vpop.f32.mrb[237].mxu0 }
 0x341   : > { %v4904_v33 = vpop.f32.mrb[238].mxu0  ;;  %v5721_v41 = vld [vmem:[#allocation2 + $0x94] ss:$2 sm:$0xff]  ;;  %v5785_v12 = vld [vmem:[#allocation2 + $0x95] ss:$2 sm:$0xff] }
 0x342   : > { %5315 = vst.msk [vmem:[#allocation2 + $0xb0] sm:$0xff] %vm5292_vm7, %v5218_v61  ;;  %v5219_v30 = vmax.f32 %v14420_v37, %v4904_v33  ;;  %v4906_v10 = vpop.f32.mrb[239].mxu0  ;;  %v5561_v61 = vld [vmem:[#allocation2 + $0x92] ss:$2 sm:$0xff]  ;;  %v5625_v36 = vld [vmem:[#allocation2 + $0x93] ss:$2 sm:$0xff] }
 0x343   : > { %v14425_v37 = vld [vmem:[#allocation22_spill] sm:$0xff] }
 0x344   : > { %5316 = vst.msk [vmem:[#allocation2 + $0xb8] sm:$0xff] %vm5292_vm7, %v5219_v30  ;;  %5116 = vmatmul.mubr.bf16.gmra.mrb[88].mxu0 %v14421_v54  ;;  %v5842_v30 = vmax.f32 %v5721_v41, %v5785_v12 }
 0x345   : > { %v13171_v57 = vpop.f32.mrb[128].mxu1  ;;  %8864 = vmatprep.mubr.msk.bf16.mxu0 %vm4145_vm6, %v12849_v39 }
 0x346   : > { %v4582_v4 = vpop.f32.mrb[129].mxu1 }
 0x347   : > { %v13175_v51 = vpop.f32.mrb[130].mxu1  ;;  %v4909_v1 = vpop.f32.mrb[240].mxu0 }
 0x348   : > { %14422 = vst [vmem:[#allocation7_spill] sm:$0xff] %v13175_v51  ;;  %v5220_v48 = vmax.f32 %v14423_v20, %v4909_v1  ;;  %v4585_v56 = vpop.f32.mrb[131].mxu1  ;;  %v4911_v34 = vpop.f32.mrb[241].mxu0 }
 0x349   : > { %v4912_v21 = vpop.f32.mrb[242].mxu0 }
 0x34a   : > { %5317 = vst.msk [vmem:[#allocation2 + $0xc0] sm:$0xff] %vm5292_vm7, %v5220_v48  ;;  %v5221_v35 = vmax.f32 %v14424_v7, %v4912_v21  ;;  %v4914_v5 = vpop.f32.mrb[243].mxu0  ;;  %v5682_v48 = vmax.f32 %v5561_v61, %v5625_v36  ;;  %v5881_v7 = vld [vmem:[#allocation2 + $0x96] ss:$2 sm:$0xff]  ;;  %v14426_v36 = vld [vmem:[#allocation25_spill] sm:$0xff] }
 0x34b   : > { %v5723_v45 = vld [vmem:[#allocation2 + $0xac] ss:$2 sm:$0xff]  ;;  %v5787_v39 = vld [vmem:[#allocation2 + $0xad] ss:$2 sm:$0xff] }
 0x34c   : > { %v5563_v33 = vld [vmem:[#allocation2 + $0xaa] ss:$2 sm:$0xff]  ;;  %5318 = vst.msk [vmem:[#allocation2 + $0xc8] sm:$0xff] %vm5292_vm7, %v5221_v35  ;;  %5124 = vmatmul.mubr.bf16.gmra.mrb[92].mxu0 %v14425_v37  ;;  %v5843_v10 = vmax.f32 %v5723_v45, %v5787_v39  ;;  %v5627_v54 = vld [vmem:[#allocation2 + $0xab] ss:$2 sm:$0xff] }
 0x34d   : > { %v5883_v4 = vld [vmem:[#allocation2 + $0xae] ss:$2 sm:$0xff]  ;;  %v5947_v1 = vld [vmem:[#allocation2 + $0xaf] ss:$2 sm:$0xff]  ;;  %v13182_v20 = vpop.f32.mrb[132].mxu1  ;;  %8865 = vmatprep.mubr.msk.bf16.mxu0 %vm4145_vm6, %v12867_v24  ;;  %v5683_v56 = vmax.f32 %v5563_v33, %v5627_v54  ;;  %v14427_v54 = vld [vmem:[#allocation24_spill] sm:$0xff] }
 0x34e   : > { %v4590_v34 = vpop.f32.mrb[133].mxu1  ;;  %v10407_v21 = vpack.i.bf16 %v5843_v10, %v5842_v30  ;;  %v5945_v5 = vld [vmem:[#allocation2 + $0x97] ss:$2 sm:$0xff]  ;;  %v6003_v41 = vmax.f32 %v5883_v4, %v5947_v1 }
 0x34f   : > { %v13186_v51 = vpop.f32.mrb[134].mxu1  ;;  %v4917_v35 = vpop.f32.mrb[244].mxu0  ;;  %v10402_v37 = vpack.i.bf16 %v5683_v56, %v5682_v48  ;;  %v6002_v61 = vmax.f32 %v5881_v7, %v5945_v5  ;;  %v14430_v5 = vld [vmem:[#allocation27_spill] sm:$0xff] }
 0x350   : > { %v5222_v12 = vmax.f32 %v12861_v40, %v4917_v35  ;;  %v4919_v45 = vpop.f32.mrb[245].mxu0  ;;  %10408 = vrot.lane.b32.xlu0 %v10407_v21, %s10824_s24  ;;  %v4593_v39 = vpop.f32.mrb[135].mxu1 }
 0x351   : > { %10403 = vrot.lane.b32.xlu1 %v10402_v37, %s10825_s25  ;;  %v4920_v24 = vpop.f32.mrb[246].mxu0  ;;  %v10412_v10 = vpack.i.bf16 %v6003_v41, %v6002_v61  ;;  %v14431_v41 = vld [vmem:[#allocation26_spill] sm:$0xff] }
 0x352   : > { %5319 = vst.msk [vmem:[#allocation2 + $0xd0] sm:$0xff] %vm5292_vm7, %v5222_v12  ;;  %v5223_v33 = vmax.f32 %v14426_v36, %v4920_v24  ;;  %v4922_v30 = vpop.f32.mrb[247].mxu0 }
 0x354   : > { %5320 = vst.msk [vmem:[#allocation2 + $0xd8] sm:$0xff] %vm5292_vm7, %v5223_v33  ;;  %5132 = vmatmul.mubr.bf16.gmra.mrb[96].mxu0 %v14427_v54 }
 0x355   : > { %10413 = vrot.lane.b32.xlu1 %v10412_v10, %s10826_s26  ;;  %v13196_v40 = vpop.f32.mrb[136].mxu1  ;;  %8866 = vmatprep.mubr.msk.bf16.mxu0 %vm4145_vm6, %v12885_v6  ;;  %v14434_v10 = vld [vmem:[#allocation29_spill] sm:$0xff] }
 0x356   : > { %14428 = vst [vmem:[#allocation6_spill] sm:$0xff] %v13196_v40  ;;  %v4598_v4 = vpop.f32.mrb[137].mxu1 }
 0x357   : > { %v13200_v1 = vpop.f32.mrb[138].mxu1  ;;  %v4925_v48 = vpop.f32.mrb[248].mxu0 }
 0x358   : > { %14429 = vst [vmem:[#allocation8_spill] sm:$0xff] %v13200_v1  ;;  %v5224_v56 = vmax.f32 %v12879_v8, %v4925_v48  ;;  %v4601_v34 = vpop.f32.mrb[139].mxu1  ;;  %v4927_v21 = vpop.f32.mrb[249].mxu0 }
 0x359   : > { %v4928_v7 = vpop.f32.mrb[250].mxu0  ;;  %v5725_v33 = vld [vmem:[#allocation2 + $0xc4] ss:$2 sm:$0xff]  ;;  %v5789_v30 = vld [vmem:[#allocation2 + $0xc5] ss:$2 sm:$0xff] }
 0x35a   : > { %5321 = vst.msk [vmem:[#allocation2 + $0xe0] sm:$0xff] %vm5292_vm7, %v5224_v56  ;;  %v5225_v35 = vmax.f32 %v14430_v5, %v4928_v7  ;;  %v4930_v37 = vpop.f32.mrb[251].mxu0  ;;  %v5565_v48 = vld [vmem:[#allocation2 + $0xc2] ss:$2 sm:$0xff]  ;;  %v5629_v56 = vld [vmem:[#allocation2 + $0xc3] ss:$2 sm:$0xff] }
 0x35b   : > { %v14435_v7 = vld [vmem:[#allocation28_spill] sm:$0xff] }
 0x35c   : > { %5322 = vst.msk [vmem:[#allocation2 + $0xe8] sm:$0xff] %vm5292_vm7, %v5225_v35  ;;  %5140 = vmatmul.mubr.bf16.gmra.mrb[100].mxu0 %v14431_v41 }
 0x35d   : > { %v13207_v12 = vpop.f32.mrb[140].mxu1  ;;  %8867 = vmatprep.mubr.msk.bf16.mxu0 %vm4145_vm6, %v12903_v25 }
 0x35e   : > { %14432 = vst [vmem:[#allocation9_spill] sm:$0xff] %v13207_v12  ;;  %v4606_v6 = vpop.f32.mrb[141].mxu1 }
 0x35f   : > { %v13211_v45 = vpop.f32.mrb[142].mxu1  ;;  %v4933_v8 = vpop.f32.mrb[252].mxu0 }
 0x360   : > { %14433 = vst [vmem:[#allocation11_spill] sm:$0xff] %v13211_v45  ;;  %v5226_v39 = vmax.f32 %v12897_v59, %v4933_v8  ;;  %v4609_v24 = vpop.f32.mrb[143].mxu1  ;;  %v4935_v61 = vpop.f32.mrb[253].mxu0  ;;  %v5844_v59 = vmax.f32 %v5725_v33, %v5789_v30  ;;  %v5684_v8 = vmax.f32 %v5565_v48, %v5629_v56  ;;  %v14438_v56 = vld [vmem:[#allocation31_spill] sm:$0xff] }
 0x361   : > { %v4936_v36 = vpop.f32.mrb[254].mxu0 }
 0x362   : > { %5323 = vst.msk [vmem:[#allocation2 + $0xf0] sm:$0xff] %vm5292_vm7, %v5226_v39  ;;  %v5227_v54 = vmax.f32 %v14434_v10, %v4936_v36  ;;  %v4938_v4 = vpop.f32.mrb[255].mxu0  ;;  %v5885_v36 = vld [vmem:[#allocation2 + $0xc6] ss:$2 sm:$0xff]  ;;  %v5949_v10 = vld [vmem:[#allocation2 + $0xc7] ss:$2 sm:$0xff] }
 0x363   : > { %v5727_v34 = vld [vmem:[#allocation2 + $0xdc] ss:$2 sm:$0xff]  ;;  %v5791_v25 = vld [vmem:[#allocation2 + $0xdd] ss:$2 sm:$0xff]  ;;  %v6004_v48 = vmax.f32 %v5885_v36, %v5949_v10 }
 0x364   : > { %v5567_v21 = vld [vmem:[#allocation2 + $0xda] ss:$2 sm:$0xff]  ;;  %5324 = vst.msk [vmem:[#allocation2 + $0xf8] sm:$0xff] %vm5292_vm7, %v5227_v54  ;;  %5148 = vmatmul.mubr.bf16.gmra.mrb[104].mxu0 %v14435_v7  ;;  %v5845_v5 = vmax.f32 %v5727_v34, %v5791_v25  ;;  %v5631_v35 = vld [vmem:[#allocation2 + $0xdb] ss:$2 sm:$0xff] }
 0x365   : > { %v5887_v37 = vld [vmem:[#allocation2 + $0xde] ss:$2 sm:$0xff]  ;;  %v5951_v41 = vld [vmem:[#allocation2 + $0xdf] ss:$2 sm:$0xff]  ;;  %v13218_v6 = vpop.f32.mrb[144].mxu1  ;;  %8868 = vmatprep.mubr.msk.bf16.mxu0 %vm4145_vm6, %v12921_v26  ;;  %v5685_v39 = vmax.f32 %v5567_v21, %v5631_v35  ;;  %v14439_v35 = vld [vmem:[#allocation30_spill] sm:$0xff] }
 0x366   : > { %14436 = vst [vmem:[#allocation10_spill] sm:$0xff] %v13218_v6  ;;  %v4614_v24 = vpop.f32.mrb[145].mxu1  ;;  %v10422_v61 = vpack.i.bf16 %v5845_v5, %v5844_v59  ;;  %v6005_v33 = vmax.f32 %v5887_v37, %v5951_v41 }
 0x367   : > { %v13222_v4 = vpop.f32.mrb[146].mxu1  ;;  %v4941_v54 = vpop.f32.mrb[0].mxu0  ;;  %v10417_v7 = vpack.i.bf16 %v5685_v39, %v5684_v8 }
 0x368   : > { %14437 = vst [vmem:[#allocation13_spill] sm:$0xff] %v13222_v4  ;;  %v5228_v30 = vmax.f32 %v12915_v55, %v4941_v54  ;;  %v4943_v34 = vpop.f32.mrb[1].mxu0  ;;  %10423 = vrot.lane.b32.xlu1 %v10422_v61, %s10824_s24  ;;  %v4617_v25 = vpop.f32.mrb[147].mxu1  ;;  %v10427_v5 = vpack.i.bf16 %v6005_v33, %v6004_v48 }
 0x369   : > { %10418 = vrot.lane.b32.xlu0 %v10417_v7, %s10825_s25  ;;  %v4944_v26 = vpop.f32.mrb[2].mxu0  ;;  %v14442_v7 = vld [vmem:[#allocation32_spill] sm:$0xff]  ;;  %v14445_v34 = vld [vmem:[#allocation33_spill] sm:$0xff] }
 0x36a   : > { %5325 = vst.msk [vmem:[#allocation2 + $0x100] sm:$0xff] %vm5292_vm7, %v5228_v30  ;;  %v5229_v21 = vmax.f32 %v14438_v56, %v4944_v26  ;;  %v4946_v59 = vpop.f32.mrb[3].mxu0 }
 0x36b   : > { %v5389_v59 = vld [vmem:[#allocation2] ss:$2 sm:$0xff] }
 0x36c   : > { %5326 = vst.msk [vmem:[#allocation2 + $0x108] sm:$0xff] %vm5292_vm7, %v5229_v21  ;;  %5156 = vmatmul.mubr.bf16.gmra.mrb[108].mxu0 %v14439_v35  ;;  %v5453_v35 = vld [vmem:[#allocation2 + $0x1] ss:$2 sm:$0xff] }
 0x36d   : > { %10428 = vrot.lane.b32.xlu0 %v10427_v5, %s10826_s26  ;;  %v13232_v55 = vpop.f32.mrb[148].mxu1  ;;  %8869 = vmatprep.mubr.msk.bf16.mxu0 %vm4145_vm6, %v12939_v50  ;;  %v5391_v5 = vld [vmem:[#allocation2 + $0x18] ss:$2 sm:$0xff]  ;;  %v5516_v12 = vmax.f32 %v5389_v59, %v5453_v35 }
 0x36e   : > { %14440 = vst [vmem:[#allocation12_spill] sm:$0xff] %v13232_v55  ;;  %v4622_v37 = vpop.f32.mrb[149].mxu1 }
 0x36f   : > { %v13236_v41 = vpop.f32.mrb[150].mxu1  ;;  %v4949_v8 = vpop.f32.mrb[4].mxu0  ;;  %v5455_v37 = vld [vmem:[#allocation2 + $0x19] ss:$2 sm:$0xff] }
 0x370   : > { %14441 = vst [vmem:[#allocation15_spill] sm:$0xff] %v13236_v41  ;;  %v5230_v39 = vmax.f32 %v12933_v2, %v4949_v8  ;;  %v4625_v24 = vpop.f32.mrb[151].mxu1  ;;  %v4951_v61 = vpop.f32.mrb[5].mxu0 }
 0x371   : > { %v4952_v36 = vpop.f32.mrb[6].mxu0  ;;  %v5729_v56 = vld [vmem:[#allocation2 + $0xf4] ss:$2 sm:$0xff] }
 0x372   : > { %5327 = vst.msk [vmem:[#allocation2 + $0x110] sm:$0xff] %vm5292_vm7, %v5230_v39  ;;  %v5231_v10 = vmax.f32 %v12941_v63, %v4952_v36  ;;  %v4954_v54 = vpop.f32.mrb[7].mxu0  ;;  %v5793_v63 = vld [vmem:[#allocation2 + $0xf5] ss:$2 sm:$0xff]  ;;  %v5569_v8 = vld [vmem:[#allocation2 + $0xf2] ss:$2 sm:$0xff] }
 0x373   : > { %v5633_v39 = vld [vmem:[#allocation2 + $0xf3] ss:$2 sm:$0xff] }
 0x374   : > { %5328 = vst.msk [vmem:[#allocation2 + $0x118] sm:$0xff] %vm5292_vm7, %v5231_v10  ;;  %5164 = vmatmul.mubr.bf16.gmra.mrb[112].mxu0 %v14442_v7  ;;  %v5889_v10 = vld [vmem:[#allocation2 + $0xf6] ss:$2 sm:$0xff]  ;;  %v5953_v54 = vld [vmem:[#allocation2 + $0xf7] ss:$2 sm:$0xff]  ;;  %v5686_v6 = vmax.f32 %v5569_v8, %v5633_v39 }
 0x375   : > { %v13243_v33 = vpop.f32.mrb[152].mxu1  ;;  %8870 = vmatprep.mubr.msk.bf16.mxu0 %vm4145_vm6, %v12963_v11  ;;  %v14446_v11 = vld [vmem:[#allocation35_spill] sm:$0xff] }
 0x376   : > { %14443 = vst [vmem:[#allocation14_spill] sm:$0xff] %v13243_v33  ;;  %v4630_v50 = vpop.f32.mrb[153].mxu1  ;;  %v5846_v33 = vmax.f32 %v5729_v56, %v5793_v63 }
 0x377   : > { %v13247_v30 = vpop.f32.mrb[154].mxu1  ;;  %v4957_v2 = vpop.f32.mrb[8].mxu0 }
 0x378   : > { %14444 = vst [vmem:[#allocation17_spill] sm:$0xff] %v13247_v30  ;;  %v5232_v25 = vmax.f32 %v14445_v34, %v4957_v2  ;;  %v4633_v26 = vpop.f32.mrb[155].mxu1  ;;  %v4959_v48 = vpop.f32.mrb[9].mxu0  ;;  %v14447_v30 = vld [vmem:[#allocation34_spill] sm:$0xff] }
 0x379   : > { %v4960_v21 = vpop.f32.mrb[10].mxu0 }
 0x37a   : > { %5329 = vst.msk [vmem:[#allocation2 + $0x120] sm:$0xff] %vm5292_vm7, %v5232_v25  ;;  %v5233_v24 = vmax.f32 %v14446_v11, %v4960_v21  ;;  %v4962_v61 = vpop.f32.mrb[11].mxu0  ;;  %v10364_v36 = vpop.permute.xlu1 %10363 }
 0x37b   : > { %v10359_v7 = vpop.permute.xlu0 %10358  ;;  %v5731_v50 = vld [vmem:[#allocation2 + $0x10c] ss:$2 sm:$0xff]  ;;  %v5795_v2 = vld [vmem:[#allocation2 + $0x10d] ss:$2 sm:$0xff]  ;;  %v10366_v26 = vunpack.i.h.bf16 %v10364_v36  ;;  %v10365_v21 = vunpack.i.l.bf16 %v10364_v36 }
 0x37c   : > { %v5571_v34 = vld [vmem:[#allocation2 + $0x10a] ss:$2 sm:$0xff]  ;;  %5330 = vst.msk [vmem:[#allocation2 + $0x128] sm:$0xff] %vm5292_vm7, %v5233_v24  ;;  %v10361_v48 = vunpack.i.h.bf16 %v10359_v7  ;;  %5172 = vmatmul.mubr.bf16.gmra.mrb[116].mxu0 %v14447_v30  ;;  %v5847_v41 = vmax.f32 %v5731_v50, %v5795_v2  ;;  %v5635_v55 = vld [vmem:[#allocation2 + $0x10b] ss:$2 sm:$0xff]  ;;  %v10360_v11 = vunpack.i.l.bf16 %v10359_v7  ;;  %v5517_v24 = vmax.f32 %v5391_v5, %v5455_v37 }
 0x37d   : > { %v5891_v25 = vld [vmem:[#allocation2 + $0x10e] ss:$2 sm:$0xff]  ;;  %v5955_v4 = vld [vmem:[#allocation2 + $0x10f] ss:$2 sm:$0xff]  ;;  %v13254_v61 = vpop.f32.mrb[156].mxu1  ;;  %8871 = vmatprep.mubr.msk.bf16.mxu0 %vm4145_vm6, %v12981_v60  ;;  %v5687_v45 = vmax.f32 %v5571_v34, %v5635_v55  ;;  %v6006_v50 = vmax.f32 %v5889_v10, %v5953_v54  ;;  %v14448_v10 = vld [vmem:[#allocation36_spill] sm:$0xff] }
 0x37e   : > { %v4638_v1 = vpop.f32.mrb[157].mxu1  ;;  %v10437_v56 = vpack.i.bf16 %v5847_v41, %v5846_v33  ;;  %v6007_v36 = vmax.f32 %v5891_v25, %v5955_v4  ;;  %v6701_v7 = vsel %vm5292_vm7, %v5517_v24, %v10361_v48  ;;  %v6733_v2 = vsel %vm4145_vm6, %v10361_v48, %v10366_v26 }
 0x37f   : > { %v13258_v40 = vpop.permute.xlu0 %10368  ;;  %v13260_v30 = vpop.f32.mrb[158].mxu1  ;;  %v10432_v63 = vpack.i.bf16 %v5687_v45, %v5686_v6  ;;  %v6700_v1 = vsel %vm5292_vm7, %v5516_v12, %v10360_v11  ;;  %v6732_v35 = vsel %vm4145_vm6, %v10360_v11, %v10365_v21 }
 0x380   : > { %v14353_v60 = vunpack.i.h.bf16 %v13258_v40  ;;  %v14350_v55 = vunpack.i.l.bf16 %v13258_v40  ;;  %v4965_v59 = vpop.f32.mrb[12].mxu0  ;;  %v4641_v5 = vpop.f32.mrb[159].mxu1  ;;  %10438 = vrot.lane.b32.xlu0 %v10437_v56, %s10824_s24  ;;  %v10442_v8 = vpack.i.bf16 %v6007_v36, %v6006_v50  ;;  %v6830_v39 = vpack.c.bf16 %v6701_v7, %v6700_v1 }
 0x381   : > { %v5234_v37 = vmax.f32 %v12975_v46, %v4965_v59  ;;  %v4967_v41 = vpop.f32.mrb[13].mxu0  ;;  %10433 = vrot.lane.b32.xlu1 %v10432_v63, %s10825_s25 }
 0x382   : > { %v4968_v45 = vpop.f32.mrb[14].mxu0  ;;  %v6765_v6 = vsel %vm6764_vm8, %v6732_v35, %v14350_v55  ;;  %v6766_v4 = vsel %vm6764_vm8, %v6733_v2, %v14353_v60 }
 0x383   : > { %5331 = vst.msk [vmem:[#allocation2 + $0x130] sm:$0xff] %vm5292_vm7, %v5234_v37  ;;  %v5235_v12 = vmax.f32 %v12983_v43, %v4968_v45  ;;  %v4970_v33 = vpop.f32.mrb[15].mxu0  ;;  %v6831_v46 = vpack.c.bf16 %v6766_v4, %v6765_v6  ;;  %v5393_v45 = vld [vmem:[#allocation2 + $0x30] ss:$2 sm:$0xff]  ;;  %v5457_v4 = vld [vmem:[#allocation2 + $0x31] ss:$2 sm:$0xff] }
 0x384   : > { %5180 = vmatmul.mubr.bf16.gmra.mrb[120].mxu0 %v14448_v10  ;;  %v5395_v6 = vld [vmem:[#allocation2 + $0x48] ss:$2 sm:$0xff] }
 0x385   : > { %5332 = vst.msk [vmem:[#allocation2 + $0x138] sm:$0xff] %vm5292_vm7, %v5235_v12  ;;  %7150 = vmatprep.mubr.bf16.mxu1 %v6831_v46  ;;  %10443 = vrot.lane.b32.xlu1 %v10442_v8, %s10826_s26  ;;  %v13282_v54 = vpop.f32.mrb[160].mxu1  ;;  %v5459_v12 = vld [vmem:[#allocation2 + $0x49] ss:$2 sm:$0xff] }
 0x386   : > { %8872 = vmatprep.mubr.msk.bf16.mxu0 %vm4145_vm6, %v12999_v15  ;;  %7151 = vmatmul.mubr.bf16.vlgmr.msra.gmra.mrb[192].mxu1 %v6830_v39  ;;  %v4646_v34 = vpop.f32.mrb[161].mxu1 }
 0x387   : > { %v13286_v26 = vpop.f32.mrb[162].mxu1  ;;  %v4973_v43 = vpop.f32.mrb[16].mxu0 }
 0x388   : > { %v5236_v48 = vmax.f32 %v12993_v44, %v4973_v43  ;;  %v4649_v25 = vpop.f32.mrb[163].mxu1  ;;  %v4975_v21 = vpop.f32.mrb[17].mxu0 }
 0x389   : > { %v4976_v11 = vpop.f32.mrb[18].mxu0 }
 0x38a   : > { %5333 = vst.msk [vmem:[#allocation2 + $0x140] sm:$0xff] %vm5292_vm7, %v5236_v48  ;;  %v5237_v24 = vmax.f32 %v13001_v22, %v4976_v11  ;;  %v4978_v56 = vpop.f32.mrb[19].mxu0  ;;  %v5733_v5 = vld [vmem:[#allocation2 + $0x124] ss:$2 sm:$0xff]  ;;  %v5797_v1 = vld [vmem:[#allocation2 + $0x125] ss:$2 sm:$0xff] }
 0x38b   : > { %v5637_v41 = vld [vmem:[#allocation2 + $0x123] ss:$2 sm:$0xff]  ;;  %v5848_v34 = vmax.f32 %v5733_v5, %v5797_v1  ;;  %v5518_v1 = vmax.f32 %v5393_v45, %v5457_v4 }
 0x38c   : > { %5334 = vst.msk [vmem:[#allocation2 + $0x148] sm:$0xff] %vm5292_vm7, %v5237_v24  ;;  %5188 = vmatmul.mubr.bf16.gmra.mrb[124].mxu0 %v12997_v47  ;;  %v5573_v47 = vld [vmem:[#allocation2 + $0x122] ss:$2 sm:$0xff] }
 0x38d   : > { %v13293_v15 = vpop.f32.mrb[164].mxu1  ;;  %v5688_v56 = vmax.f32 %v5573_v47, %v5637_v41 }
 0x38e   : > { %v4654_v63 = vpop.f32.mrb[165].mxu1 }
 0x38f   : > { %v13295_v50 = vpop.f32.mrb[166].mxu1  ;;  %v4981_v36 = vpop.f32.mrb[20].mxu0 }
 0x390   : > { %v5238_v44 = vmax.f32 %v13011_v13, %v4981_v36  ;;  %v4657_v7 = vpop.f32.mrb[167].mxu1  ;;  %v4983_v2 = vpop.f32.mrb[21].mxu0  ;;  %v5893_v36 = vld [vmem:[#allocation2 + $0x126] ss:$2 sm:$0xff] }
 0x391   : > { %v4984_v59 = vpop.f32.mrb[22].mxu0 }
 0x392   : > { %5335 = vst.msk [vmem:[#allocation2 + $0x150] sm:$0xff] %vm5292_vm7, %v5238_v44  ;;  %v5239_v22 = vmax.f32 %v13015_v32, %v4984_v59  ;;  %v4986_v35 = vpop.f32.mrb[23].mxu0  ;;  %v10379_v37 = vpop.permute.xlu0 %10378  ;;  %v5957_v44 = vld [vmem:[#allocation2 + $0x127] ss:$2 sm:$0xff] }
 0x393   : > { %v10374_v33 = vpop.permute.xlu1 %10373  ;;  %v5735_v46 = vld [vmem:[#allocation2 + $0x13c] ss:$2 sm:$0xff]  ;;  %v5799_v13 = vld [vmem:[#allocation2 + $0x13d] ss:$2 sm:$0xff]  ;;  %v10381_v39 = vunpack.i.h.bf16 %v10379_v37  ;;  %v10380_v21 = vunpack.i.l.bf16 %v10379_v37 }
 0x394   : > { %v5575_v8 = vld [vmem:[#allocation2 + $0x13a] ss:$2 sm:$0xff]  ;;  %5336 = vst.msk [vmem:[#allocation2 + $0x158] sm:$0xff] %vm5292_vm7, %v5239_v22  ;;  %v10376_v10 = vunpack.i.h.bf16 %v10374_v33  ;;  %v5849_v43 = vmax.f32 %v5735_v46, %v5799_v13  ;;  %v5639_v48 = vld [vmem:[#allocation2 + $0x13b] ss:$2 sm:$0xff]  ;;  %v10375_v11 = vunpack.i.l.bf16 %v10374_v33  ;;  %v5519_v46 = vmax.f32 %v5395_v6, %v5459_v12 }
 0x395   : > { %v5895_v32 = vld [vmem:[#allocation2 + $0x13e] ss:$2 sm:$0xff]  ;;  %v5959_v25 = vld [vmem:[#allocation2 + $0x13f] ss:$2 sm:$0xff]  ;;  %v13301_v24 = vpop.f32.mrb[168].mxu1  ;;  %v5689_v63 = vmax.f32 %v5575_v8, %v5639_v48  ;;  %v6008_v8 = vmax.f32 %v5893_v36, %v5957_v44 }
 0x396   : > { %v4662_v7 = vpop.f32.mrb[169].mxu1  ;;  %v10452_v2 = vpack.i.bf16 %v5849_v43, %v5848_v34  ;;  %v6009_v5 = vmax.f32 %v5895_v32, %v5959_v25  ;;  %v6735_v13 = vsel %vm4145_vm6, %v10376_v10, %v10381_v39  ;;  %v6734_v34 = vsel %vm4145_vm6, %v10375_v11, %v10380_v21 }
 0x397   : > { %v13303_v59 = vpop.permute.xlu1 %10383  ;;  %v13305_v22 = vpop.f32.mrb[170].mxu1  ;;  %v10447_v35 = vpack.i.bf16 %v5689_v63, %v5688_v56  ;;  %v6702_v45 = vsel %vm5292_vm7, %v5518_v1, %v10375_v11  ;;  %v6703_v6 = vsel %vm5292_vm7, %v5519_v46, %v10376_v10 }
 0x398   : > { %14449 = vst [vmem:[#allocation16_spill] sm:$0xff] %v13303_v59  ;;  %v14349_v37 = vunpack.i.h.bf16 %v13303_v59  ;;  %v14348_v33 = vunpack.i.l.bf16 %v13303_v59  ;;  %v4989_v47 = vpop.f32.mrb[24].mxu0  ;;  %10453 = vrot.lane.b32.xlu1 %v10452_v2, %s10824_s24  ;;  %v4665_v41 = vpop.f32.mrb[171].mxu1  ;;  %v10457_v21 = vpack.i.bf16 %v6009_v5, %v6008_v8  ;;  %v6833_v56 = vpack.c.bf16 %v6703_v6, %v6702_v45 }
 0x399   : > { %v5240_v43 = vmax.f32 %v13028_v3, %v4989_v47  ;;  %v4991_v48 = vpop.f32.mrb[25].mxu0  ;;  %10448 = vrot.lane.b32.xlu0 %v10447_v35, %s10825_s25 }
 0x39a   : > { %v4992_v4 = vpop.f32.mrb[26].mxu0  ;;  %v6767_v12 = vsel %vm6764_vm8, %v6734_v34, %v14348_v33  ;;  %v6768_v39 = vsel %vm6764_vm8, %v6735_v13, %v14349_v37 }
 0x39b   : > { %5337 = vst.msk [vmem:[#allocation2 + $0x160] sm:$0xff] %vm5292_vm7, %v5240_v43  ;;  %v5241_v3 = vmax.f32 %v13038_v29, %v4992_v4  ;;  %v4994_v32 = vpop.f32.mrb[27].mxu0  ;;  %v6834_v25 = vpack.c.bf16 %v6768_v39, %v6767_v12  ;;  %v5397_v39 = vld [vmem:[#allocation2 + $0x60] ss:$2 sm:$0xff] }
 0x39c   : > { %v5461_v32 = vld [vmem:[#allocation2 + $0x61] ss:$2 sm:$0xff] }
 0x39d   : > { %5338 = vst.msk [vmem:[#allocation2 + $0x168] sm:$0xff] %vm5292_vm7, %v5241_v3  ;;  %7158 = vmatprep.mubr.bf16.mxu1 %v6834_v25  ;;  %10458 = vrot.lane.b32.xlu0 %v10457_v21, %s10826_s26  ;;  %v13326_v10 = vpop.f32.mrb[172].mxu1  ;;  %v5399_v3 = vld [vmem:[#allocation2 + $0x78] ss:$2 sm:$0xff]  ;;  %v5463_v25 = vld [vmem:[#allocation2 + $0x79] ss:$2 sm:$0xff] }
 0x39e   : > { %7159 = vmatmul.mubr.bf16.gmra.mrb[196].mxu1 %v6833_v56  ;;  %v4670_v11 = vpop.f32.mrb[173].mxu1 }
 0x39f   : > { %v13328_v63 = vpop.f32.mrb[174].mxu1  ;;  %v4997_v36 = vpop.f32.mrb[28].mxu0 }
 0x3a0   : > { %v5242_v44 = vmax.f32 %v13051_v18, %v4997_v36  ;;  %v4673_v7 = vpop.f32.mrb[175].mxu1  ;;  %v4999_v29 = vpop.f32.mrb[29].mxu0 }
 0x3a1   : > { %v5000_v2 = vpop.f32.mrb[30].mxu0 }
 0x3a2   : > { %5339 = vst.msk [vmem:[#allocation2 + $0x170] sm:$0xff] %vm5292_vm7, %v5242_v44  ;;  %v5243_v35 = vmax.f32 %v13061_v17, %v5000_v2  ;;  %v5002_v5 = vpop.f32.mrb[31].mxu0  ;;  %v5737_v43 = vld [vmem:[#allocation2 + $0x154] ss:$2 sm:$0xff]  ;;  %v5801_v48 = vld [vmem:[#allocation2 + $0x155] ss:$2 sm:$0xff] }
 0x3a3   : > { %v5577_v4 = vld [vmem:[#allocation2 + $0x152] ss:$2 sm:$0xff]  ;;  %v5641_v12 = vld [vmem:[#allocation2 + $0x153] ss:$2 sm:$0xff]  ;;  %v5850_v7 = vmax.f32 %v5737_v43, %v5801_v48  ;;  %v5520_v48 = vmax.f32 %v5397_v39, %v5461_v32 }
 0x3a4   : > { %5340 = vst.msk [vmem:[#allocation2 + $0x178] sm:$0xff] %vm5292_vm7, %v5243_v35 }
 0x3a5   : > { %v13334_v1 = vpop.f32.mrb[176].mxu1 }
 0x3a6   : > { %v4678_v46 = vpop.f32.mrb[177].mxu1 }
 0x3a7   : > { %v13336_v13 = vpop.f32.mrb[178].mxu1  ;;  %v5005_v47 = vpop.f32.mrb[32].mxu0 }
 0x3a8   : > { %v5244_v41 = vmax.f32 %v13074_v42, %v5005_v47  ;;  %v4681_v8 = vpop.f32.mrb[179].mxu1  ;;  %v5007_v18 = vpop.f32.mrb[33].mxu0 }
 0x3a9   : > { %v5008_v34 = vpop.f32.mrb[34].mxu0  ;;  %v5897_v18 = vld [vmem:[#allocation2 + $0x156] ss:$2 sm:$0xff] }
 0x3aa   : > { %5341 = vst.msk [vmem:[#allocation2 + $0x180] sm:$0xff] %vm5292_vm7, %v5244_v41  ;;  %v5245_v17 = vmax.f32 %v13078_v31, %v5008_v34  ;;  %v5010_v45 = vpop.f32.mrb[35].mxu0  ;;  %v10394_v6 = vpop.permute.xlu1 %10393  ;;  %v5690_v41 = vmax.f32 %v5577_v4, %v5641_v12  ;;  %v5961_v34 = vld [vmem:[#allocation2 + $0x157] ss:$2 sm:$0xff] }
 0x3ab   : > { %v10389_v21 = vpop.permute.xlu0 %10388  ;;  %v5739_v56 = vld [vmem:[#allocation2 + $0x16c] ss:$2 sm:$0xff]  ;;  %v5803_v42 = vld [vmem:[#allocation2 + $0x16d] ss:$2 sm:$0xff]  ;;  %v10396_v36 = vunpack.i.h.bf16 %v10394_v6  ;;  %v10395_v5 = vunpack.i.l.bf16 %v10394_v6 }
 0x3ac   : > { %v5579_v11 = vld [vmem:[#allocation2 + $0x16a] ss:$2 sm:$0xff]  ;;  %5342 = vst.msk [vmem:[#allocation2 + $0x188] sm:$0xff] %vm5292_vm7, %v5245_v17  ;;  %v10391_v44 = vunpack.i.h.bf16 %v10389_v21  ;;  %v5851_v29 = vmax.f32 %v5739_v56, %v5803_v42  ;;  %v5643_v2 = vld [vmem:[#allocation2 + $0x16b] ss:$2 sm:$0xff]  ;;  %v10390_v46 = vunpack.i.l.bf16 %v10389_v21  ;;  %v5521_v56 = vmax.f32 %v5399_v3, %v5463_v25 }
 0x3ad   : > { %v5899_v31 = vld [vmem:[#allocation2 + $0x16e] ss:$2 sm:$0xff]  ;;  %v5963_v35 = vld [vmem:[#allocation2 + $0x16f] ss:$2 sm:$0xff]  ;;  %v13342_v47 = vpop.f32.mrb[180].mxu1  ;;  %v5691_v8 = vmax.f32 %v5579_v11, %v5643_v2  ;;  %v6010_v11 = vmax.f32 %v5897_v18, %v5961_v34 }
 0x3ae   : > { %v4686_v45 = vpop.f32.mrb[181].mxu1  ;;  %v10467_v33 = vpack.i.bf16 %v5851_v29, %v5850_v7  ;;  %v6011_v43 = vmax.f32 %v5899_v31, %v5963_v35  ;;  %v6737_v42 = vsel %vm4145_vm6, %v10391_v44, %v10396_v36  ;;  %v6736_v7 = vsel %vm4145_vm6, %v10390_v46, %v10395_v5 }
 0x3af   : > { %v13344_v37 = vpop.permute.xlu0 %10398  ;;  %v13346_v17 = vpop.f32.mrb[182].mxu1  ;;  %v10462_v55 = vpack.i.bf16 %v5691_v8, %v5690_v41  ;;  %v6704_v39 = vsel %vm5292_vm7, %v5520_v48, %v10390_v46  ;;  %v6705_v3 = vsel %vm5292_vm7, %v5521_v56, %v10391_v44 }
 0x3b0   : > { %v14352_v6 = vunpack.i.h.bf16 %v13344_v37  ;;  %v14351_v21 = vunpack.i.l.bf16 %v13344_v37  ;;  %v5013_v4 = vpop.f32.mrb[36].mxu0  ;;  %10468 = vrot.lane.b32.xlu0 %v10467_v33, %s10824_s24  ;;  %v4689_v12 = vpop.f32.mrb[183].mxu1  ;;  %v6836_v35 = vpack.c.bf16 %v6705_v3, %v6704_v39 }
 0x3b1   : > { %v5246_v29 = vmax.f32 %v13088_v14, %v5013_v4  ;;  %v5015_v2 = vpop.f32.mrb[37].mxu0  ;;  %10463 = vrot.lane.b32.xlu1 %v10462_v55, %s10825_s25  ;;  %v10472_v55 = vpack.i.bf16 %v6011_v43, %v6010_v11 }
 0x3b2   : > { %v5016_v32 = vpop.f32.mrb[38].mxu0  ;;  %v6769_v25 = vsel %vm6764_vm8, %v6736_v7, %v14351_v21  ;;  %v6770_v33 = vsel %vm6764_vm8, %v6737_v42, %v14352_v6 }
 0x3b3   : > { %5343 = vst.msk [vmem:[#allocation2 + $0x190] sm:$0xff] %vm5292_vm7, %v5246_v29  ;;  %v5247_v14 = vmax.f32 %v13092_v0, %v5016_v32  ;;  %v5018_v36 = vpop.f32.mrb[39].mxu0  ;;  %v6837_v31 = vpack.c.bf16 %v6770_v33, %v6769_v25  ;;  %v5401_v33 = vld [vmem:[#allocation2 + $0x90] ss:$2 sm:$0xff] }
 0x3b4   : > { %v5465_v36 = vld [vmem:[#allocation2 + $0x91] ss:$2 sm:$0xff] }
 0x3b5   : > { %5344 = vst.msk [vmem:[#allocation2 + $0x198] sm:$0xff] %vm5292_vm7, %v5247_v14  ;;  %7166 = vmatprep.mubr.bf16.mxu1 %v6837_v31  ;;  %10473 = vrot.lane.b32.xlu1 %v10472_v55, %s10826_s26  ;;  %v13367_v44 = vpop.f32.mrb[184].mxu1  ;;  %v5403_v14 = vld [vmem:[#allocation2 + $0xa8] ss:$2 sm:$0xff]  ;;  %v5467_v31 = vld [vmem:[#allocation2 + $0xa9] ss:$2 sm:$0xff] }
 0x3b6   : > { %7167 = vmatmul.mubr.bf16.gmra.mrb[200].mxu1 %v6836_v35  ;;  %v4694_v5 = vpop.f32.mrb[185].mxu1  ;;  %v5523_v59 = vmax.f32 %v5403_v14, %v5467_v31 }
 0x3b7   : > { %v13369_v46 = vpop.f32.mrb[186].mxu1  ;;  %v5021_v41 = vpop.f32.mrb[40].mxu0 }
 0x3b8   : > { %v5248_v8 = vmax.f32 %v13099_v27, %v5021_v41  ;;  %v4697_v18 = vpop.f32.mrb[187].mxu1  ;;  %v5023_v0 = vpop.f32.mrb[41].mxu0 }
 0x3b9   : > { %v5024_v34 = vpop.f32.mrb[42].mxu0 }
 0x3ba   : > { %5345 = vst.msk [vmem:[#allocation2 + $0x1a0] sm:$0xff] %vm5292_vm7, %v5248_v8  ;;  %v5249_v45 = vmax.f32 %v13103_v23, %v5024_v34  ;;  %v5026_v43 = vpop.f32.mrb[43].mxu0  ;;  %v5741_v7 = vld [vmem:[#allocation2 + $0x184] ss:$2 sm:$0xff]  ;;  %v5805_v29 = vld [vmem:[#allocation2 + $0x185] ss:$2 sm:$0xff] }
 0x3bb   : > { %v5581_v39 = vld [vmem:[#allocation2 + $0x182] ss:$2 sm:$0xff]  ;;  %v5645_v3 = vld [vmem:[#allocation2 + $0x183] ss:$2 sm:$0xff]  ;;  %v5852_v8 = vmax.f32 %v5741_v7, %v5805_v29 }
 0x3bc   : > { %5346 = vst.msk [vmem:[#allocation2 + $0x1a8] sm:$0xff] %vm5292_vm7, %v5249_v45  ;;  %v5692_v34 = vmax.f32 %v5581_v39, %v5645_v3 }
 0x3bd   : > { %v13375_v48 = vpop.f32.mrb[188].mxu1 }
 0x3be   : > { %v4702_v56 = vpop.f32.mrb[189].mxu1 }
 0x3bf   : > { %v13377_v42 = vpop.f32.mrb[190].mxu1  ;;  %v5029_v4 = vpop.f32.mrb[44].mxu0 }
 0x3c0   : > { %v5250_v12 = vmax.f32 %v13110_v9, %v5029_v4  ;;  %v4705_v11 = vpop.f32.mrb[191].mxu1  ;;  %v5031_v27 = vpop.f32.mrb[45].mxu0 }
 0x3c1   : > { %v5032_v2 = vpop.f32.mrb[46].mxu0  ;;  %v5901_v11 = vld [vmem:[#allocation2 + $0x186] ss:$2 sm:$0xff]  ;;  %v5965_v27 = vld [vmem:[#allocation2 + $0x187] ss:$2 sm:$0xff] }
 0x3c2   : > { %5347 = vst.msk [vmem:[#allocation2 + $0x1b0] sm:$0xff] %vm5292_vm7, %v5250_v12  ;;  %v5251_v23 = vmax.f32 %v13114_v49, %v5032_v2  ;;  %v5034_v32 = vpop.f32.mrb[47].mxu0  ;;  %v10409_v25 = vpop.permute.xlu0 %10408 }
 0x3c3   : > { %v10404_v55 = vpop.permute.xlu1 %10403  ;;  %v5743_v35 = vld [vmem:[#allocation2 + $0x19c] ss:$2 sm:$0xff]  ;;  %v5807_v9 = vld [vmem:[#allocation2 + $0x19d] ss:$2 sm:$0xff]  ;;  %v10411_v41 = vunpack.i.h.bf16 %v10409_v25  ;;  %v10410_v49 = vunpack.i.l.bf16 %v10409_v25  ;;  %v6012_v25 = vmax.f32 %v5901_v11, %v5965_v27 }
 0x3c4   : > { %v5583_v5 = vld [vmem:[#allocation2 + $0x19a] ss:$2 sm:$0xff]  ;;  %5348 = vst.msk [vmem:[#allocation2 + $0x1b8] sm:$0xff] %vm5292_vm7, %v5251_v23  ;;  %v5853_v18 = vmax.f32 %v5743_v35, %v5807_v9  ;;  %v5647_v0 = vld [vmem:[#allocation2 + $0x19b] ss:$2 sm:$0xff]  ;;  %v10406_v56 = vunpack.i.h.bf16 %v10404_v55  ;;  %v10405_v4 = vunpack.i.l.bf16 %v10404_v55  ;;  %v5522_v23 = vmax.f32 %v5401_v33, %v5465_v36 }
 0x3c5   : > { %v5903_v45 = vld [vmem:[#allocation2 + $0x19e] ss:$2 sm:$0xff]  ;;  %v5967_v43 = vld [vmem:[#allocation2 + $0x19f] ss:$2 sm:$0xff]  ;;  %v5693_v12 = vmax.f32 %v5583_v5, %v5647_v0 }
 0x3c6   : > { %v10482_v2 = vpack.i.bf16 %v5853_v18, %v5852_v8  ;;  %v6013_v60 = vmax.f32 %v5903_v45, %v5967_v43  ;;  %v6739_v55 = vsel %vm4145_vm6, %v10406_v56, %v10411_v41  ;;  %v6738_v35 = vsel %vm4145_vm6, %v10405_v4, %v10410_v49 }
 0x3c7   : > { %v13383_v32 = vpop.permute.xlu1 %10413  ;;  %v5037_v21 = vpop.f32.mrb[48].mxu0  ;;  %v10477_v6 = vpack.i.bf16 %v5693_v12, %v5692_v34  ;;  %v6706_v33 = vsel %vm5292_vm7, %v5522_v23, %v10405_v4  ;;  %v6707_v14 = vsel %vm5292_vm7, %v5523_v59, %v10406_v56  ;;  %v5405_v23 = vld [vmem:[#allocation2 + $0xc0] ss:$2 sm:$0xff] }
 0x3c8   : > { %v10416_v7 = vunpack.i.h.bf16 %v13383_v32  ;;  %v10415_v29 = vunpack.i.l.bf16 %v13383_v32  ;;  %v5252_v39 = vmax.f32 %v13124_v38, %v5037_v21  ;;  %v5039_v3 = vpop.f32.mrb[49].mxu0  ;;  %10483 = vrot.lane.b32.xlu1 %v10482_v2, %s10824_s24  ;;  %v6839_v41 = vpack.c.bf16 %v6707_v14, %v6706_v33 }
 0x3c9   : > { %10478 = vrot.lane.b32.xlu0 %v10477_v6, %s10825_s25  ;;  %v5040_v9 = vpop.f32.mrb[50].mxu0  ;;  %v10487_v6 = vpack.i.bf16 %v6013_v60, %v6012_v25  ;;  %v5471_v3 = vld [vmem:[#allocation2 + $0xd9] ss:$2 sm:$0xff] }
 0x3ca   : > { %5349 = vst.msk [vmem:[#allocation2 + $0x1c0] sm:$0xff] %vm5292_vm7, %v5252_v39  ;;  %v5253_v36 = vmax.f32 %v13128_v53, %v5040_v9  ;;  %v5042_v38 = vpop.f32.mrb[51].mxu0  ;;  %v6771_v21 = vsel %vm6764_vm8, %v6738_v35, %v10415_v29  ;;  %v6772_v31 = vsel %vm6764_vm8, %v6739_v55, %v10416_v7  ;;  %v5469_v39 = vld [vmem:[#allocation2 + $0xc1] ss:$2 sm:$0xff] }
 0x3cb   : > { %v6840_v5 = vpack.c.bf16 %v6772_v31, %v6771_v21 }
 0x3cc   : > { %5350 = vst.msk [vmem:[#allocation2 + $0x1c8] sm:$0xff] %vm5292_vm7, %v5253_v36 }
 0x3cd   : > { %7174 = vmatprep.mubr.bf16.mxu1 %v6840_v5  ;;  %10488 = vrot.lane.b32.xlu0 %v10487_v6, %s10826_s26 }
 0x3ce   : > { %7175 = vmatmul.mubr.bf16.gmra.mrb[204].mxu1 %v6839_v41 }
 0x3cf   : > { %v5045_v59 = vpop.f32.mrb[52].mxu0 }
 0x3d0   : > { %v5254_v53 = vmax.f32 %v13135_v58, %v5045_v59  ;;  %v5047_v8 = vpop.f32.mrb[53].mxu0 }
 0x3d1   : > { %v5048_v18 = vpop.f32.mrb[54].mxu0  ;;  %v5745_v49 = vld [vmem:[#allocation2 + $0x1b4] ss:$2 sm:$0xff]  ;;  %v5809_v56 = vld [vmem:[#allocation2 + $0x1b5] ss:$2 sm:$0xff] }
 0x3d2   : > { %5351 = vst.msk [vmem:[#allocation2 + $0x1d0] sm:$0xff] %vm5292_vm7, %v5254_v53  ;;  %v5255_v0 = vmax.f32 %v13139_v16, %v5048_v18  ;;  %v5050_v34 = vpop.f32.mrb[55].mxu0  ;;  %v5585_v12 = vld [vmem:[#allocation2 + $0x1b2] ss:$2 sm:$0xff]  ;;  %v5649_v11 = vld [vmem:[#allocation2 + $0x1b3] ss:$2 sm:$0xff]  ;;  %v5854_v33 = vmax.f32 %v5745_v49, %v5809_v56 }
 0x3d3   : > { %v5407_v16 = vld [vmem:[#allocation2 + $0xd8] ss:$2 sm:$0xff]  ;;  %v5694_v38 = vmax.f32 %v5585_v12, %v5649_v11  ;;  %v5969_v53 = vld [vmem:[#allocation2 + $0x1b7] ss:$2 sm:$0xff] }
 0x3d4   : > { %5352 = vst.msk [vmem:[#allocation2 + $0x1d8] sm:$0xff] %vm5292_vm7, %v5255_v0  ;;  %v5905_v59 = vld [vmem:[#allocation2 + $0x1b6] ss:$2 sm:$0xff] }
 0x3d5   : > { %v6014_v11 = vmax.f32 %v5905_v59, %v5969_v53 }
 0x3d7   : > { %v5053_v60 = vpop.f32.mrb[56].mxu0 }
 0x3d8   : > { %v5256_v45 = vmax.f32 %v13146_v28, %v5053_v60  ;;  %v5055_v43 = vpop.f32.mrb[57].mxu0 }
 0x3d9   : > { %v5056_v4 = vpop.f32.mrb[58].mxu0  ;;  %v5525_v43 = vmax.f32 %v5407_v16, %v5471_v3 }
 0x3da   : > { %5353 = vst.msk [vmem:[#allocation2 + $0x1e0] sm:$0xff] %vm5292_vm7, %v5256_v45  ;;  %v5257_v58 = vmax.f32 %v13150_v62, %v5056_v4  ;;  %v5058_v27 = vpop.f32.mrb[59].mxu0  ;;  %v10424_v2 = vpop.permute.xlu1 %10423  ;;  %v5524_v45 = vmax.f32 %v5405_v23, %v5469_v39 }
 0x3db   : > { %v10419_v25 = vpop.permute.xlu0 %10418  ;;  %v5747_v55 = vld [vmem:[#allocation2 + $0x1cc] ss:$2 sm:$0xff]  ;;  %v5811_v35 = vld [vmem:[#allocation2 + $0x1cd] ss:$2 sm:$0xff]  ;;  %v10426_v9 = vunpack.i.h.bf16 %v10424_v2  ;;  %v10425_v62 = vunpack.i.l.bf16 %v10424_v2 }
 0x3dc   : > { %v5587_v28 = vld [vmem:[#allocation2 + $0x1ca] ss:$2 sm:$0xff]  ;;  %5354 = vst.msk [vmem:[#allocation2 + $0x1e8] sm:$0xff] %vm5292_vm7, %v5257_v58  ;;  %v5855_v14 = vmax.f32 %v5747_v55, %v5811_v35  ;;  %v5651_v36 = vld [vmem:[#allocation2 + $0x1cb] ss:$2 sm:$0xff]  ;;  %v10421_v5 = vunpack.i.h.bf16 %v10419_v25  ;;  %v10420_v6 = vunpack.i.l.bf16 %v10419_v25 }
 0x3dd   : > { %v5907_v21 = vld [vmem:[#allocation2 + $0x1ce] ss:$2 sm:$0xff]  ;;  %v5971_v31 = vld [vmem:[#allocation2 + $0x1cf] ss:$2 sm:$0xff]  ;;  %v5695_v41 = vmax.f32 %v5587_v28, %v5651_v36 }
 0x3de   : > { %v10497_v8 = vpack.i.bf16 %v5855_v14, %v5854_v33  ;;  %v6015_v60 = vmax.f32 %v5907_v21, %v5971_v31  ;;  %v6741_v58 = vsel %vm4145_vm6, %v10421_v5, %v10426_v9  ;;  %v6740_v27 = vsel %vm4145_vm6, %v10420_v6, %v10425_v62  ;;  %v14450_v36 = vld [vmem:[#allocation7_spill] sm:$0xff] }
 0x3df   : > { %v13412_v18 = vpop.permute.xlu0 %10428  ;;  %v5061_v0 = vpop.f32.mrb[60].mxu0  ;;  %v10492_v34 = vpack.i.bf16 %v5695_v41, %v5694_v38  ;;  %v6708_v23 = vsel %vm5292_vm7, %v5524_v45, %v10420_v6  ;;  %v6709_v16 = vsel %vm5292_vm7, %v5525_v43, %v10421_v5 }
 0x3e0   : > { %v10431_v49 = vunpack.i.h.bf16 %v13412_v18  ;;  %v10430_v56 = vunpack.i.l.bf16 %v13412_v18  ;;  %v5258_v4 = vmax.f32 %v13160_v19, %v5061_v0  ;;  %v5063_v12 = vpop.f32.mrb[61].mxu0  ;;  %10498 = vrot.lane.b32.xlu0 %v10497_v8, %s10824_s24  ;;  %v10502_v35 = vpack.i.bf16 %v6015_v60, %v6014_v11  ;;  %v5409_v0 = vld [vmem:[#allocation2 + $0xf0] ss:$2 sm:$0xff]  ;;  %v5475_v60 = vld [vmem:[#allocation2 + $0x109] ss:$2 sm:$0xff] }
 0x3e1   : > { %10493 = vrot.lane.b32.xlu1 %v10492_v34, %s10825_s25  ;;  %v5064_v2 = vpop.f32.mrb[62].mxu0  ;;  %v6842_v28 = vpack.c.bf16 %v6709_v16, %v6708_v23  ;;  %v5473_v34 = vld [vmem:[#allocation2 + $0xf1] ss:$2 sm:$0xff] }
 0x3e2   : > { %5355 = vst.msk [vmem:[#allocation2 + $0x1f0] sm:$0xff] %vm5292_vm7, %v5258_v4  ;;  %v5259_v39 = vmax.f32 %v13164_v52, %v5064_v2  ;;  %v5066_v19 = vpop.f32.mrb[63].mxu0  ;;  %v6773_v3 = vsel %vm6764_vm8, %v6740_v27, %v10430_v56  ;;  %v6774_v25 = vsel %vm6764_vm8, %v6741_v58, %v10431_v49 }
 0x3e3   : > { %v6843_v55 = vpack.c.bf16 %v6774_v25, %v6773_v3 }
 0x3e4   : > { %5356 = vst.msk [vmem:[#allocation2 + $0x1f8] sm:$0xff] %vm5292_vm7, %v5259_v39 }
 0x3e5   : > { %7182 = vmatprep.mubr.bf16.mxu1 %v6843_v55  ;;  %10503 = vrot.lane.b32.xlu1 %v10502_v35, %s10826_s26 }
 0x3e6   : > { %7183 = vmatmul.mubr.bf16.gmra.mrb[208].mxu1 %v6842_v28 }
 0x3e7   : > { %v5069_v9 = vpop.f32.mrb[64].mxu0 }
 0x3e8   : > { %v5260_v52 = vmax.f32 %v13171_v57, %v5069_v9  ;;  %v5071_v33 = vpop.f32.mrb[65].mxu0  ;;  %v5411_v57 = vld [vmem:[#allocation2 + $0x108] ss:$2 sm:$0xff] }
 0x3e9   : > { %v5072_v14 = vpop.f32.mrb[66].mxu0  ;;  %v5749_v6 = vld [vmem:[#allocation2 + $0x1e4] ss:$2 sm:$0xff]  ;;  %v5813_v41 = vld [vmem:[#allocation2 + $0x1e5] ss:$2 sm:$0xff]  ;;  %v5526_v33 = vmax.f32 %v5409_v0, %v5473_v34 }
 0x3ea   : > { %5357 = vst.msk [vmem:[#allocation2 + $0x200] sm:$0xff] %vm5292_vm7, %v5260_v52  ;;  %v5261_v38 = vmax.f32 %v14450_v36, %v5072_v14  ;;  %v5074_v21 = vpop.f32.mrb[67].mxu0  ;;  %v5589_v53 = vld [vmem:[#allocation2 + $0x1e2] ss:$2 sm:$0xff]  ;;  %v5653_v8 = vld [vmem:[#allocation2 + $0x1e3] ss:$2 sm:$0xff]  ;;  %v5856_v39 = vmax.f32 %v5749_v6, %v5813_v41  ;;  %v5527_v14 = vmax.f32 %v5411_v57, %v5475_v60 }
 0x3eb   : > { %v5909_v4 = vld [vmem:[#allocation2 + $0x1e6] ss:$2 sm:$0xff]  ;;  %v5973_v12 = vld [vmem:[#allocation2 + $0x1e7] ss:$2 sm:$0xff]  ;;  %v5696_v3 = vmax.f32 %v5589_v53, %v5653_v8 }
 0x3ec   : > { %5358 = vst.msk [vmem:[#allocation2 + $0x208] sm:$0xff] %vm5292_vm7, %v5261_v38  ;;  %v10758_v52 = vld [vmem:[%s14319_s5 + $0x80] sm:$0xff]   ;;  %v14451_v53 = vld [vmem:[#allocation6_spill] sm:$0xff] }
 0x3ed   : > { %9198 = vmatprep.subr.bf16.mxu1 %v10758_v52 }
 0x3ee   : > { %9199 = vmatpush3.bf16.msra.mxu1 %v10758_v52 }
 0x3ef   : > { %v5077_v31 = vpop.f32.mrb[68].mxu0 }
 0x3f0   : > { %v5262_v62 = vmax.f32 %v13182_v20, %v5077_v31  ;;  %v5079_v5 = vpop.f32.mrb[69].mxu0 }
 0x3f1   : > { %v5080_v59 = vpop.f32.mrb[70].mxu0 }
 0x3f2   : > { %5359 = vst.msk [vmem:[#allocation2 + $0x210] sm:$0xff] %vm5292_vm7, %v5262_v62  ;;  %v5263_v45 = vmax.f32 %v13186_v51, %v5080_v59  ;;  %v5082_v43 = vpop.f32.mrb[71].mxu0  ;;  %v10439_v11 = vpop.permute.xlu0 %10438  ;;  %v6016_v62 = vmax.f32 %v5909_v4, %v5973_v12 }
 0x3f3   : > { %v10434_v58 = vpop.permute.xlu1 %10433  ;;  %v5751_v20 = vld [vmem:[#allocation2 + $0x1fc] ss:$2 sm:$0xff]  ;;  %v5815_v27 = vld [vmem:[#allocation2 + $0x1fd] ss:$2 sm:$0xff]  ;;  %v10441_v23 = vunpack.i.h.bf16 %v10439_v11  ;;  %v10440_v35 = vunpack.i.l.bf16 %v10439_v11 }
 0x3f4   : > { %v5591_v2 = vld [vmem:[#allocation2 + $0x1fa] ss:$2 sm:$0xff]  ;;  %5360 = vst.msk [vmem:[#allocation2 + $0x218] sm:$0xff] %vm5292_vm7, %v5263_v45  ;;  %v10436_v16 = vunpack.i.h.bf16 %v10434_v58  ;;  %v5655_v19 = vld [vmem:[#allocation2 + $0x1fb] ss:$2 sm:$0xff]  ;;  %v10435_v28 = vunpack.i.l.bf16 %v10434_v58  ;;  %v5857_v51 = vmax.f32 %v5751_v20, %v5815_v27 }
 0x3f5   : > { %v5911_v25 = vld [vmem:[#allocation2 + $0x1fe] ss:$2 sm:$0xff]  ;;  %v5975_v55 = vld [vmem:[#allocation2 + $0x1ff] ss:$2 sm:$0xff]  ;;  %v5697_v9 = vmax.f32 %v5591_v2, %v5655_v19 }
 0x3f6   : > { %v10512_v21 = vpack.i.bf16 %v5857_v51, %v5856_v39  ;;  %v6017_v5 = vmax.f32 %v5911_v25, %v5975_v55  ;;  %v6743_v6 = vsel %vm4145_vm6, %v10436_v16, %v10441_v23  ;;  %v6742_v0 = vsel %vm4145_vm6, %v10435_v28, %v10440_v35  ;;  %v14452_v43 = vld [vmem:[#allocation8_spill] sm:$0xff]  ;;  %v14454_v25 = vld [vmem:[#allocation11_spill] sm:$0xff]  ;;  %v14455_v51 = vld [vmem:[#allocation10_spill] sm:$0xff] }
 0x3f7   : > { %v13444_v36 = vpop.permute.xlu1 %10443  ;;  %v5085_v38 = vpop.f32.mrb[72].mxu0  ;;  %v10507_v31 = vpack.i.bf16 %v5697_v9, %v5696_v3  ;;  %v6710_v34 = vsel %vm5292_vm7, %v5526_v33, %v10435_v28  ;;  %v6711_v60 = vsel %vm5292_vm7, %v5527_v14, %v10436_v16  ;;  %v14453_v16 = vld [vmem:[#allocation9_spill] sm:$0xff] }
 0x3f8   : > { %v10446_v41 = vunpack.i.h.bf16 %v13444_v36  ;;  %v10445_v59 = vunpack.i.l.bf16 %v13444_v36  ;;  %v5264_v8 = vmax.f32 %v14451_v53, %v5085_v38  ;;  %v5087_v45 = vpop.f32.mrb[73].mxu0  ;;  %10513 = vrot.lane.b32.xlu1 %v10512_v21, %s10824_s24  ;;  %v10517_v27 = vpack.i.bf16 %v6017_v5, %v6016_v62  ;;  %v10759_v38 = vld [vmem:[%s14319_s5 + $0x88] sm:$0xff]  }
 0x3f9   : > { %10508 = vrot.lane.b32.xlu0 %v10507_v31, %s10825_s25  ;;  %v5088_v57 = vpop.f32.mrb[74].mxu0  ;;  %v6845_v2 = vpack.c.bf16 %v6711_v60, %v6710_v34  ;;  %v14456_v5 = vld [vmem:[#allocation13_spill] sm:$0xff]  ;;  %v5479_v34 = vld [vmem:[#allocation2 + $0x139] ss:$2 sm:$0xff]  ;;  %9200 = vmatprep.subr.bf16.mxu1 %v10759_v38 }
 0x3fa   : > { %5361 = vst.msk [vmem:[#allocation2 + $0x220] sm:$0xff] %vm5292_vm7, %v5264_v8  ;;  %v5265_v4 = vmax.f32 %v14452_v43, %v5088_v57  ;;  %v5090_v12 = vpop.f32.mrb[75].mxu0  ;;  %v6775_v11 = vsel %vm6764_vm8, %v6742_v0, %v10445_v59  ;;  %v6776_v58 = vsel %vm6764_vm8, %v6743_v6, %v10446_v41  ;;  %v5413_v45 = vld [vmem:[#allocation2 + $0x120] ss:$2 sm:$0xff]  ;;  %v5477_v57 = vld [vmem:[#allocation2 + $0x121] ss:$2 sm:$0xff]  ;;  %9201 = vmatpush3.bf16.msra.mxu1 %v10759_v38 }
 0x3fb   : > { %v6846_v20 = vpack.c.bf16 %v6776_v58, %v6775_v11  ;;  %v5415_v0 = vld [vmem:[#allocation2 + $0x138] ss:$2 sm:$0xff] }
 0x3fc   : > { %5362 = vst.msk [vmem:[#allocation2 + $0x228] sm:$0xff] %vm5292_vm7, %v5265_v4 }
 0x3fd   : > { %7190 = vmatprep.mubr.bf16.mxu1 %v6846_v20  ;;  %10518 = vrot.lane.b32.xlu0 %v10517_v27, %s10826_s26 }
 0x3fe   : > { %7191 = vmatmul.mubr.bf16.gmra.mrb[212].mxu1 %v6845_v2 }
 0x3ff   : > { %v5093_v23 = vpop.f32.mrb[76].mxu0 }
 0x400   : > { %v5266_v39 = vmax.f32 %v14453_v16, %v5093_v23  ;;  %v5095_v19 = vpop.f32.mrb[77].mxu0 }
 0x401   : > { %v5096_v3 = vpop.f32.mrb[78].mxu0  ;;  %v5753_v33 = vld [vmem:[#allocation2 + $0x214] ss:$2 sm:$0xff]  ;;  %v5817_v14 = vld [vmem:[#allocation2 + $0x215] ss:$2 sm:$0xff] }
 0x402   : > { %5363 = vst.msk [vmem:[#allocation2 + $0x230] sm:$0xff] %vm5292_vm7, %v5266_v39  ;;  %v5267_v55 = vmax.f32 %v14454_v25, %v5096_v3  ;;  %v5098_v35 = vpop.f32.mrb[79].mxu0  ;;  %v5593_v31 = vld [vmem:[#allocation2 + $0x212] ss:$2 sm:$0xff]  ;;  %v5657_v62 = vld [vmem:[#allocation2 + $0x213] ss:$2 sm:$0xff]  ;;  %v5858_v58 = vmax.f32 %v5753_v33, %v5817_v14 }
 0x403   : > { %v5698_v2 = vmax.f32 %v5593_v31, %v5657_v62  ;;  %v5977_v35 = vld [vmem:[#allocation2 + $0x217] ss:$2 sm:$0xff] }
 0x404   : > { %5364 = vst.msk [vmem:[#allocation2 + $0x238] sm:$0xff] %vm5292_vm7, %v5267_v55  ;;  %v5913_v55 = vld [vmem:[#allocation2 + $0x216] ss:$2 sm:$0xff] }
 0x405   : > { %v14457_v31 = vld [vmem:[#allocation12_spill] sm:$0xff] }
 0x407   : > { %v5101_v28 = vpop.f32.mrb[80].mxu0 }
 0x408   : > { %v5268_v9 = vmax.f32 %v14455_v51, %v5101_v28  ;;  %v5103_v52 = vpop.f32.mrb[81].mxu0 }
 0x409   : > { %v5104_v21 = vpop.f32.mrb[82].mxu0 }
 0x40a   : > { %5365 = vst.msk [vmem:[#allocation2 + $0x240] sm:$0xff] %vm5292_vm7, %v5268_v9  ;;  %v5269_v6 = vmax.f32 %v14456_v5, %v5104_v21  ;;  %v5106_v53 = vpop.f32.mrb[83].mxu0  ;;  %v10454_v8 = vpop.permute.xlu1 %10453  ;;  %v5528_v21 = vmax.f32 %v5413_v45, %v5477_v57  ;;  %v5529_v5 = vmax.f32 %v5415_v0, %v5479_v34  ;;  %v14458_v57 = vld [vmem:[#allocation15_spill] sm:$0xff] }
 0x40b   : > { %v10449_v60 = vpop.permute.xlu0 %10448  ;;  %v5755_v43 = vld [vmem:[#allocation2 + $0x22c] ss:$2 sm:$0xff]  ;;  %v5819_v4 = vld [vmem:[#allocation2 + $0x22d] ss:$2 sm:$0xff]  ;;  %v10456_v11 = vunpack.i.h.bf16 %v10454_v8  ;;  %v10455_v39 = vunpack.i.l.bf16 %v10454_v8  ;;  %v6018_v53 = vmax.f32 %v5913_v55, %v5977_v35 }
 0x40c   : > { %v5595_v12 = vld [vmem:[#allocation2 + $0x22a] ss:$2 sm:$0xff]  ;;  %5366 = vst.msk [vmem:[#allocation2 + $0x248] sm:$0xff] %vm5292_vm7, %v5269_v6  ;;  %v5859_v20 = vmax.f32 %v5755_v43, %v5819_v4  ;;  %v5659_v27 = vld [vmem:[#allocation2 + $0x22b] ss:$2 sm:$0xff]  ;;  %v10451_v19 = vunpack.i.h.bf16 %v10449_v60  ;;  %v10450_v3 = vunpack.i.l.bf16 %v10449_v60 }
 0x40d   : > { %v5915_v23 = vld [vmem:[#allocation2 + $0x22e] ss:$2 sm:$0xff]  ;;  %v5979_v16 = vld [vmem:[#allocation2 + $0x22f] ss:$2 sm:$0xff]  ;;  %v5699_v25 = vmax.f32 %v5595_v12, %v5659_v27 }
 0x40e   : > { %v10527_v28 = vpack.i.bf16 %v5859_v20, %v5858_v58  ;;  %v6019_v38 = vmax.f32 %v5915_v23, %v5979_v16  ;;  %v6745_v8 = vsel %vm4145_vm6, %v10451_v19, %v10456_v11  ;;  %v6744_v60 = vsel %vm4145_vm6, %v10450_v3, %v10455_v39  ;;  %v14459_v16 = vld [vmem:[#allocation14_spill] sm:$0xff] }
 0x40f   : > { %v13476_v51 = vpop.permute.xlu0 %10458  ;;  %v5109_v9 = vpop.f32.mrb[84].mxu0  ;;  %v10522_v52 = vpack.i.bf16 %v5699_v25, %v5698_v2  ;;  %v6712_v45 = vsel %vm5292_vm7, %v5528_v21, %v10450_v3  ;;  %v6713_v0 = vsel %vm5292_vm7, %v5529_v5, %v10451_v19  ;;  %v10760_v2 = vld [vmem:[%s14319_s5 + $0x90] sm:$0xff]   ;;  %v14460_v25 = vld [vmem:[#allocation17_spill] sm:$0xff] }
 0x410   : > { %v10461_v33 = vunpack.i.h.bf16 %v13476_v51  ;;  %v10460_v14 = vunpack.i.l.bf16 %v13476_v51  ;;  %v5270_v62 = vmax.f32 %v14457_v31, %v5109_v9  ;;  %v5111_v6 = vpop.f32.mrb[85].mxu0  ;;  %10528 = vrot.lane.b32.xlu0 %v10527_v28, %s10824_s24  ;;  %v10532_v20 = vpack.i.bf16 %v6019_v38, %v6018_v53  ;;  %9202 = vmatprep.subr.bf16.mxu1 %v10760_v2  ;;  %v5481_v53 = vld [vmem:[#allocation2 + $0x151] ss:$2 sm:$0xff] }
 0x411   : > { %10523 = vrot.lane.b32.xlu1 %v10522_v52, %s10825_s25  ;;  %v5112_v43 = vpop.f32.mrb[86].mxu0  ;;  %v6848_v27 = vpack.c.bf16 %v6713_v0, %v6712_v45  ;;  %9203 = vmatpush3.bf16.msra.mxu1 %v10760_v2  ;;  %v5417_v6 = vld [vmem:[#allocation2 + $0x150] ss:$2 sm:$0xff] }
 0x412   : > { %5367 = vst.msk [vmem:[#allocation2 + $0x250] sm:$0xff] %vm5292_vm7, %v5270_v62  ;;  %v5271_v34 = vmax.f32 %v14458_v57, %v5112_v43  ;;  %v5114_v4 = vpop.f32.mrb[87].mxu0  ;;  %v6777_v12 = vsel %vm6764_vm8, %v6744_v60, %v10460_v14  ;;  %v6778_v11 = vsel %vm6764_vm8, %v6745_v8, %v10461_v33  ;;  %v5419_v57 = vld [vmem:[#allocation2 + $0x168] ss:$2 sm:$0xff] }
 0x413   : > { %v6849_v58 = vpack.c.bf16 %v6778_v11, %v6777_v12 }
 0x414   : > { %5368 = vst.msk [vmem:[#allocation2 + $0x258] sm:$0xff] %vm5292_vm7, %v5271_v34  ;;  %v5483_v34 = vld [vmem:[#allocation2 + $0x169] ss:$2 sm:$0xff] }
 0x415   : > { %7198 = vmatprep.mubr.bf16.mxu1 %v6849_v58  ;;  %10533 = vrot.lane.b32.xlu1 %v10532_v20, %s10826_s26 }
 0x416   : > { %7199 = vmatmul.mubr.bf16.gmra.mrb[216].mxu1 %v6848_v27 }
 0x417   : > { %v5117_v23 = vpop.f32.mrb[88].mxu0 }
 0x418   : > { %v5272_v39 = vmax.f32 %v14459_v16, %v5117_v23  ;;  %v5119_v19 = vpop.f32.mrb[89].mxu0 }
 0x419   : > { %v5120_v3 = vpop.f32.mrb[90].mxu0  ;;  %v5757_v38 = vld [vmem:[#allocation2 + $0x244] ss:$2 sm:$0xff]  ;;  %v5821_v21 = vld [vmem:[#allocation2 + $0x245] ss:$2 sm:$0xff] }
 0x41a   : > { %5369 = vst.msk [vmem:[#allocation2 + $0x260] sm:$0xff] %vm5292_vm7, %v5272_v39  ;;  %v5273_v55 = vmax.f32 %v14460_v25, %v5120_v3  ;;  %v5122_v35 = vpop.f32.mrb[91].mxu0  ;;  %v5597_v31 = vld [vmem:[#allocation2 + $0x242] ss:$2 sm:$0xff]  ;;  %v5661_v62 = vld [vmem:[#allocation2 + $0x243] ss:$2 sm:$0xff]  ;;  %v5860_v27 = vmax.f32 %v5757_v38, %v5821_v21  ;;  %v5531_v21 = vmax.f32 %v5419_v57, %v5483_v34 }
 0x41b   : > { %v5917_v45 = vld [vmem:[#allocation2 + $0x246] ss:$2 sm:$0xff]  ;;  %v5981_v0 = vld [vmem:[#allocation2 + $0x247] ss:$2 sm:$0xff]  ;;  %v5700_v3 = vmax.f32 %v5597_v31, %v5661_v62  ;;  %v5530_v35 = vmax.f32 %v5417_v6, %v5481_v53 }
 0x41c   : > { %5370 = vst.msk [vmem:[#allocation2 + $0x268] sm:$0xff] %vm5292_vm7, %v5273_v55 }
 0x41f   : > { %v5125_v28 = vpop.f32.mrb[92].mxu0 }
 0x420   : > { %v5274_v9 = vmax.f32 %v13254_v61, %v5125_v28  ;;  %v5127_v52 = vpop.f32.mrb[93].mxu0  ;;  %v10761_v28 = vld [vmem:[%s14319_s5 + $0x98] sm:$0xff]  }
 0x421   : > { %v5128_v5 = vpop.f32.mrb[94].mxu0  ;;  %9204 = vmatprep.subr.bf16.mxu1 %v10761_v28 }
 0x422   : > { %5371 = vst.msk [vmem:[#allocation2 + $0x270] sm:$0xff] %vm5292_vm7, %v5274_v9  ;;  %v5275_v8 = vmax.f32 %v13260_v30, %v5128_v5  ;;  %v5130_v60 = vpop.f32.mrb[95].mxu0  ;;  %v10469_v43 = vpop.permute.xlu0 %10468  ;;  %9205 = vmatpush3.bf16.msra.mxu1 %v10761_v28 }
 0x423   : > { %v10464_v4 = vpop.permute.xlu1 %10463  ;;  %v5759_v61 = vld [vmem:[#allocation2 + $0x25c] ss:$2 sm:$0xff]  ;;  %v5823_v12 = vld [vmem:[#allocation2 + $0x25d] ss:$2 sm:$0xff]  ;;  %v10471_v58 = vunpack.i.h.bf16 %v10469_v43  ;;  %v10470_v30 = vunpack.i.l.bf16 %v10469_v43 }
 0x424   : > { %v5599_v11 = vld [vmem:[#allocation2 + $0x25a] ss:$2 sm:$0xff]  ;;  %5372 = vst.msk [vmem:[#allocation2 + $0x278] sm:$0xff] %vm5292_vm7, %v5275_v8  ;;  %v10466_v20 = vunpack.i.h.bf16 %v10464_v4  ;;  %v5861_v2 = vmax.f32 %v5759_v61, %v5823_v12  ;;  %v5663_v23 = vld [vmem:[#allocation2 + $0x25b] ss:$2 sm:$0xff]  ;;  %v10465_v19 = vunpack.i.l.bf16 %v10464_v4  ;;  %v6020_v8 = vmax.f32 %v5917_v45, %v5981_v0 }
 0x425   : > { %v5919_v16 = vld [vmem:[#allocation2 + $0x25e] ss:$2 sm:$0xff]  ;;  %v5983_v39 = vld [vmem:[#allocation2 + $0x25f] ss:$2 sm:$0xff]  ;;  %v5701_v25 = vmax.f32 %v5599_v11, %v5663_v23 }
 0x426   : > { %v10542_v55 = vpack.i.bf16 %v5861_v2, %v5860_v27  ;;  %v6021_v38 = vmax.f32 %v5919_v16, %v5983_v39  ;;  %v6747_v60 = vsel %vm4145_vm6, %v10466_v20, %v10471_v58  ;;  %v6746_v53 = vsel %vm4145_vm6, %v10465_v19, %v10470_v30 }
 0x427   : > { %v13511_v9 = vpop.permute.xlu1 %10473  ;;  %v5133_v52 = vpop.f32.mrb[96].mxu0  ;;  %v10537_v5 = vpack.i.bf16 %v5701_v25, %v5700_v3  ;;  %v6714_v45 = vsel %vm5292_vm7, %v5530_v35, %v10465_v19  ;;  %v6715_v0 = vsel %vm5292_vm7, %v5531_v21, %v10466_v20 }
 0x428   : > { %v10476_v43 = vunpack.i.h.bf16 %v13511_v9  ;;  %v10475_v31 = vunpack.i.l.bf16 %v13511_v9  ;;  %v5276_v62 = vmax.f32 %v13282_v54, %v5133_v52  ;;  %v5135_v6 = vpop.f32.mrb[97].mxu0  ;;  %10543 = vrot.lane.b32.xlu1 %v10542_v55, %s10824_s24  ;;  %v10547_v11 = vpack.i.bf16 %v6021_v38, %v6020_v8  ;;  %v5421_v52 = vld [vmem:[#allocation2 + $0x180] ss:$2 sm:$0xff] }
 0x429   : > { %10538 = vrot.lane.b32.xlu0 %v10537_v5, %s10825_s25  ;;  %v5136_v4 = vpop.f32.mrb[98].mxu0  ;;  %v6851_v58 = vpack.c.bf16 %v6715_v0, %v6714_v45 }
 0x42a   : > { %5373 = vst.msk [vmem:[#allocation2 + $0x280] sm:$0xff] %vm5292_vm7, %v5276_v62  ;;  %v5277_v57 = vmax.f32 %v13286_v26, %v5136_v4  ;;  %v5138_v34 = vpop.f32.mrb[99].mxu0  ;;  %v6779_v54 = vsel %vm6764_vm8, %v6746_v53, %v10475_v31  ;;  %v6780_v61 = vsel %vm6764_vm8, %v6747_v60, %v10476_v43  ;;  %v5423_v60 = vld [vmem:[#allocation2 + $0x198] ss:$2 sm:$0xff]  ;;  %v5487_v62 = vld [vmem:[#allocation2 + $0x199] ss:$2 sm:$0xff] }
 0x42b   : > { %v6852_v12 = vpack.c.bf16 %v6780_v61, %v6779_v54 }
 0x42c   : > { %5374 = vst.msk [vmem:[#allocation2 + $0x288] sm:$0xff] %vm5292_vm7, %v5277_v57 }
 0x42d   : > { %7206 = vmatprep.mubr.bf16.mxu1 %v6852_v12  ;;  %10548 = vrot.lane.b32.xlu0 %v10547_v11, %s10826_s26 }
 0x42e   : > { %7207 = vmatmul.mubr.bf16.gmra.mrb[220].mxu1 %v6851_v58 }
 0x42f   : > { %v5141_v20 = vpop.f32.mrb[100].mxu0 }
 0x430   : > { %v5278_v26 = vmax.f32 %v13293_v15, %v5141_v20  ;;  %v5143_v27 = vpop.f32.mrb[101].mxu0  ;;  %v5485_v15 = vld [vmem:[#allocation2 + $0x181] ss:$2 sm:$0xff] }
 0x431   : > { %v5144_v2 = vpop.f32.mrb[102].mxu0  ;;  %v5761_v3 = vld [vmem:[#allocation2 + $0x274] ss:$2 sm:$0xff]  ;;  %v5825_v25 = vld [vmem:[#allocation2 + $0x275] ss:$2 sm:$0xff]  ;;  %v5532_v27 = vmax.f32 %v5421_v52, %v5485_v15 }
 0x432   : > { %5375 = vst.msk [vmem:[#allocation2 + $0x290] sm:$0xff] %vm5292_vm7, %v5278_v26  ;;  %v5279_v23 = vmax.f32 %v13295_v50, %v5144_v2  ;;  %v5146_v16 = vpop.f32.mrb[103].mxu0  ;;  %v5601_v35 = vld [vmem:[#allocation2 + $0x272] ss:$2 sm:$0xff]  ;;  %v5665_v28 = vld [vmem:[#allocation2 + $0x273] ss:$2 sm:$0xff]  ;;  %v5862_v57 = vmax.f32 %v5761_v3, %v5825_v25  ;;  %v5533_v3 = vmax.f32 %v5423_v60, %v5487_v62 }
 0x433   : > { %v5921_v38 = vld [vmem:[#allocation2 + $0x276] ss:$2 sm:$0xff]  ;;  %v5985_v21 = vld [vmem:[#allocation2 + $0x277] ss:$2 sm:$0xff]  ;;  %v5702_v58 = vmax.f32 %v5601_v35, %v5665_v28 }
 0x434   : > { %5376 = vst.msk [vmem:[#allocation2 + $0x298] sm:$0xff] %vm5292_vm7, %v5279_v23  ;;  %v10762_v2 = vld [vmem:[%s14319_s5 + $0xa0] sm:$0xff]  }
 0x435   : > { %9206 = vmatprep.subr.bf16.mxu1 %v10762_v2 }
 0x436   : > { %9207 = vmatpush3.bf16.msra.mxu1 %v10762_v2 }
 0x437   : > { %v5149_v39 = vpop.f32.mrb[104].mxu0 }
 0x438   : > { %v5280_v30 = vmax.f32 %v13301_v24, %v5149_v39  ;;  %v5151_v19 = vpop.f32.mrb[105].mxu0 }
 0x439   : > { %v5152_v55 = vpop.f32.mrb[106].mxu0 }
 0x43a   : > { %5377 = vst.msk [vmem:[#allocation2 + $0x2a0] sm:$0xff] %vm5292_vm7, %v5280_v30  ;;  %v5281_v5 = vmax.f32 %v13305_v22, %v5152_v55  ;;  %v5154_v8 = vpop.f32.mrb[107].mxu0  ;;  %v10484_v50 = vpop.permute.xlu1 %10483  ;;  %v6022_v30 = vmax.f32 %v5921_v38, %v5985_v21 }
 0x43b   : > { %v10479_v6 = vpop.permute.xlu0 %10478  ;;  %v5763_v24 = vld [vmem:[#allocation2 + $0x28c] ss:$2 sm:$0xff]  ;;  %v5827_v53 = vld [vmem:[#allocation2 + $0x28d] ss:$2 sm:$0xff]  ;;  %v10486_v45 = vunpack.i.h.bf16 %v10484_v50  ;;  %v10485_v22 = vunpack.i.l.bf16 %v10484_v50 }
 0x43c   : > { %v5603_v4 = vld [vmem:[#allocation2 + $0x28a] ss:$2 sm:$0xff]  ;;  %5378 = vst.msk [vmem:[#allocation2 + $0x2a8] sm:$0xff] %vm5292_vm7, %v5281_v5  ;;  %v10481_v0 = vunpack.i.h.bf16 %v10479_v6  ;;  %v5863_v34 = vmax.f32 %v5763_v24, %v5827_v53  ;;  %v5667_v54 = vld [vmem:[#allocation2 + $0x28b] ss:$2 sm:$0xff]  ;;  %v10480_v11 = vunpack.i.l.bf16 %v10479_v6 }
 0x43d   : > { %v5923_v61 = vld [vmem:[#allocation2 + $0x28e] ss:$2 sm:$0xff]  ;;  %v5987_v12 = vld [vmem:[#allocation2 + $0x28f] ss:$2 sm:$0xff]  ;;  %v5703_v20 = vmax.f32 %v5603_v4, %v5667_v54 }
 0x43e   : > { %v10557_v26 = vpack.i.bf16 %v5863_v34, %v5862_v57  ;;  %v6023_v19 = vmax.f32 %v5923_v61, %v5987_v12  ;;  %v6749_v25 = vsel %vm4145_vm6, %v10481_v0, %v10486_v45  ;;  %v6748_v15 = vsel %vm4145_vm6, %v10480_v11, %v10485_v22 }
 0x43f   : > { %v13543_v23 = vpop.permute.xlu0 %10488  ;;  %v5157_v16 = vpop.f32.mrb[108].mxu0  ;;  %v10552_v39 = vpack.i.bf16 %v5703_v20, %v5702_v58  ;;  %v6716_v8 = vsel %vm5292_vm7, %v5532_v27, %v10480_v11  ;;  %v6717_v50 = vsel %vm5292_vm7, %v5533_v3, %v10481_v0  ;;  %v10763_v27 = vld [vmem:[%s14319_s5 + $0xa8] sm:$0xff]  }
 0x440   : > { %v10491_v55 = vunpack.i.h.bf16 %v13543_v23  ;;  %v10490_v35 = vunpack.i.l.bf16 %v13543_v23  ;;  %v5282_v28 = vmax.f32 %v13326_v10, %v5157_v16  ;;  %v5159_v52 = vpop.f32.mrb[109].mxu0  ;;  %10558 = vrot.lane.b32.xlu0 %v10557_v26, %s10824_s24  ;;  %v10562_v6 = vpack.i.bf16 %v6023_v19, %v6022_v30  ;;  %v5425_v26 = vld [vmem:[#allocation2 + $0x1b0] ss:$2 sm:$0xff]  ;;  %v5491_v19 = vld [vmem:[#allocation2 + $0x1c9] ss:$2 sm:$0xff]  ;;  %9208 = vmatprep.subr.bf16.mxu1 %v10763_v27 }
 0x441   : > { %10553 = vrot.lane.b32.xlu1 %v10552_v39, %s10825_s25  ;;  %v5160_v5 = vpop.f32.mrb[110].mxu0  ;;  %v6854_v24 = vpack.c.bf16 %v6717_v50, %v6716_v8  ;;  %v5427_v30 = vld [vmem:[#allocation2 + $0x1c8] ss:$2 sm:$0xff]  ;;  %9209 = vmatpush3.bf16.msra.mxu1 %v10763_v27 }
 0x442   : > { %5379 = vst.msk [vmem:[#allocation2 + $0x2b0] sm:$0xff] %vm5292_vm7, %v5282_v28  ;;  %v5283_v38 = vmax.f32 %v13328_v63, %v5160_v5  ;;  %v5162_v21 = vpop.f32.mrb[111].mxu0  ;;  %v6781_v10 = vsel %vm6764_vm8, %v6748_v15, %v10490_v35  ;;  %v6782_v60 = vsel %vm6764_vm8, %v6749_v25, %v10491_v55 }
 0x443   : > { %v6855_v62 = vpack.c.bf16 %v6782_v60, %v6781_v10 }
 0x444   : > { %5380 = vst.msk [vmem:[#allocation2 + $0x2b8] sm:$0xff] %vm5292_vm7, %v5283_v38 }
 0x445   : > { %7214 = vmatprep.mubr.bf16.mxu1 %v6855_v62  ;;  %10563 = vrot.lane.b32.xlu1 %v10562_v6, %s10826_s26 }
 0x446   : > { %7215 = vmatmul.mubr.bf16.gmra.mrb[224].mxu1 %v6854_v24 }
 0x447   : > { %v5165_v53 = vpop.f32.mrb[112].mxu0 }
 0x448   : > { %v5284_v63 = vmax.f32 %v13334_v1, %v5165_v53  ;;  %v5167_v4 = vpop.f32.mrb[113].mxu0  ;;  %v5489_v1 = vld [vmem:[#allocation2 + $0x1b1] ss:$2 sm:$0xff] }
 0x449   : > { %v5168_v45 = vpop.f32.mrb[114].mxu0  ;;  %v5765_v12 = vld [vmem:[#allocation2 + $0x2a4] ss:$2 sm:$0xff]  ;;  %v5829_v22 = vld [vmem:[#allocation2 + $0x2a5] ss:$2 sm:$0xff]  ;;  %v5534_v53 = vmax.f32 %v5425_v26, %v5489_v1 }
 0x44a   : > { %5381 = vst.msk [vmem:[#allocation2 + $0x2c0] sm:$0xff] %vm5292_vm7, %v5284_v63  ;;  %v5285_v0 = vmax.f32 %v13336_v13, %v5168_v45  ;;  %v5170_v57 = vpop.f32.mrb[115].mxu0  ;;  %v5605_v58 = vld [vmem:[#allocation2 + $0x2a2] ss:$2 sm:$0xff]  ;;  %v5669_v20 = vld [vmem:[#allocation2 + $0x2a3] ss:$2 sm:$0xff]  ;;  %v5864_v8 = vmax.f32 %v5765_v12, %v5829_v22 }
 0x44b   : > { %v5925_v39 = vld [vmem:[#allocation2 + $0x2a6] ss:$2 sm:$0xff]  ;;  %v5704_v62 = vmax.f32 %v5605_v58, %v5669_v20 }
 0x44c   : > { %5382 = vst.msk [vmem:[#allocation2 + $0x2c8] sm:$0xff] %vm5292_vm7, %v5285_v0  ;;  %v10764_v63 = vld [vmem:[%s14319_s5 + $0xb0] ss:$0 sps:$4 sm:$0xff]  }
 0x44d   : > { %9376 = vmatprep.subr.msk.bf16.mxu1 %vm7114_vm9, %v10764_v63 }
 0x44f   : > { %v5173_v34 = vpop.f32.mrb[116].mxu0 }
 0x450   : > { %v5286_v54 = vmax.f32 %v13342_v47, %v5173_v34  ;;  %v5175_v61 = vpop.f32.mrb[117].mxu0  ;;  %v5989_v47 = vld [vmem:[#allocation2 + $0x2a7] ss:$2 sm:$0xff] }
 0x451   : > { %v5176_v11 = vpop.f32.mrb[118].mxu0  ;;  %v6024_v57 = vmax.f32 %v5925_v39, %v5989_v47 }
 0x452   : > { %5383 = vst.msk [vmem:[#allocation2 + $0x2d0] sm:$0xff] %vm5292_vm7, %v5286_v54  ;;  %v5287_v13 = vmax.f32 %v13346_v17, %v5176_v11  ;;  %v5178_v2 = vpop.f32.mrb[119].mxu0  ;;  %v10499_v16 = vpop.permute.xlu0 %10498  ;;  %v5535_v54 = vmax.f32 %v5427_v30, %v5491_v19 }
 0x453   : > { %v10494_v3 = vpop.permute.xlu1 %10493  ;;  %v5767_v25 = vld [vmem:[#allocation2 + $0x2bc] ss:$2 sm:$0xff]  ;;  %v5831_v28 = vld [vmem:[#allocation2 + $0x2bd] ss:$2 sm:$0xff]  ;;  %v10501_v15 = vunpack.i.h.bf16 %v10499_v16  ;;  %v10500_v10 = vunpack.i.l.bf16 %v10499_v16 }
 0x454   : > { %v5607_v52 = vld [vmem:[#allocation2 + $0x2ba] ss:$2 sm:$0xff]  ;;  %5384 = vst.msk [vmem:[#allocation2 + $0x2d8] sm:$0xff] %vm5292_vm7, %v5287_v13  ;;  %v10496_v5 = vunpack.i.h.bf16 %v10494_v3  ;;  %v5865_v50 = vmax.f32 %v5767_v25, %v5831_v28  ;;  %v5671_v38 = vld [vmem:[#allocation2 + $0x2bb] ss:$2 sm:$0xff]  ;;  %v10495_v60 = vunpack.i.l.bf16 %v10494_v3 }
 0x455   : > { %v5927_v21 = vld [vmem:[#allocation2 + $0x2be] ss:$2 sm:$0xff]  ;;  %v5991_v17 = vld [vmem:[#allocation2 + $0x2bf] ss:$2 sm:$0xff]  ;;  %v5705_v6 = vmax.f32 %v5607_v52, %v5671_v38 }
 0x456   : > { %v10572_v24 = vpack.i.bf16 %v5865_v50, %v5864_v8  ;;  %v6025_v34 = vmax.f32 %v5927_v21, %v5991_v17  ;;  %v6751_v61 = vsel %vm4145_vm6, %v10496_v5, %v10501_v15  ;;  %v6750_v20 = vsel %vm4145_vm6, %v10495_v60, %v10500_v10 }
 0x457   : > { %v13578_v4 = vpop.permute.xlu1 %10503  ;;  %v5181_v45 = vpop.f32.mrb[120].mxu0  ;;  %v10567_v0 = vpack.i.bf16 %v5705_v6, %v5704_v62  ;;  %v6718_v27 = vsel %vm5292_vm7, %v5534_v53, %v10495_v60  ;;  %v6719_v13 = vsel %vm5292_vm7, %v5535_v54, %v10496_v5  ;;  %v7116_v17 = vsel %vm7114_vm9, %v10764_v63, 0  ;;  %v6031_v53 = vld [vmem:[#allocation2 + $0x20] ss:$2 sm:$0xff] }
 0x458   : > { %v14365_v12 = vunpack.i.h.bf16 %v13578_v4  ;;  %v14364_v22 = vunpack.i.l.bf16 %v13578_v4  ;;  %v5288_v11 = vmax.f32 %v13367_v44, %v5181_v45  ;;  %v5183_v58 = vpop.f32.mrb[121].mxu0  ;;  %10573 = vrot.lane.b32.xlu1 %v10572_v24, %s10824_s24  ;;  %v10577_v25 = vpack.i.bf16 %v6025_v34, %v6024_v57  ;;  %9211 = vmatpush3.bf16.msra.mxu1 %v7116_v17  ;;  %v6029_v24 = vld [vmem:[#allocation2 + $0x8] ss:$2 sm:$0xff]  ;;  %v6093_v45 = vld [vmem:[#allocation2 + $0x9] ss:$2 sm:$0xff] }
 0x459   : > { %10568 = vrot.lane.b32.xlu0 %v10567_v0, %s10825_s25  ;;  %v8985_v26 = vpop.f32.mrb[192].mxu1  ;;  %v5184_v1 = vpop.f32.mrb[122].mxu0  ;;  %v6857_v28 = vpack.c.bf16 %v6719_v13, %v6718_v27  ;;  %v5429_v0 = vld [vmem:[#allocation2 + $0x1e0] ss:$2 sm:$0xff]  ;;  %v5493_v57 = vld [vmem:[#allocation2 + $0x1e1] ss:$2 sm:$0xff]  ;;  %v14470_v23 = vunpack.i.h.bf16 %v13578_v4 }
 0x45a   : > { %5385 = vst.msk [vmem:[#allocation2 + $0x2e0] sm:$0xff] %vm5292_vm7, %v5288_v11  ;;  %v5289_v2 = vmax.f32 %v13369_v46, %v5184_v1  ;;  %v8986_v16 = vpop.f32.mrb[193].mxu1  ;;  %v5186_v44 = vpop.f32.mrb[123].mxu0  ;;  %v6783_v39 = vsel %vm6764_vm8, %v6750_v20, %v14364_v22  ;;  %v6784_v47 = vsel %vm6764_vm8, %v6751_v61, %v14365_v12  ;;  %v5431_v27 = vld [vmem:[#allocation2 + $0x1f8] ss:$2 sm:$0xff] }
 0x45b   : > { %v13598_v30 = vadd.f32 %v8986_v16, %v8985_v26  ;;  %v8988_v19 = vpop.f32.mrb[194].mxu1  ;;  %v6858_v3 = vpack.c.bf16 %v6784_v47, %v6783_v39  ;;  %v5495_v13 = vld [vmem:[#allocation2 + $0x1f9] ss:$2 sm:$0xff] }
 0x45c   : > { %5386 = vst.msk [vmem:[#allocation2 + $0x2e8] sm:$0xff] %vm5292_vm7, %v5289_v2  ;;  %v8989_v46 = vpop.f32.mrb[195].mxu1 }
 0x45d   : > { %v13601_v52 = vadd.f32 %v8989_v46, %v8988_v19  ;;  %7222 = vmatprep.mubr.bf16.mxu1 %v6858_v3  ;;  %10578 = vrot.lane.b32.xlu0 %v10577_v25, %s10826_s26  ;;  %v6156_v3 = vmax.f32 %v6029_v24, %v6093_v45 }
 0x45e   : > { %7223 = vmatmul.mubr.bf16.gmra.mrb[228].mxu1 %v6857_v28 }
 0x45f   : > { %v5189_v15 = vpop.f32.mrb[124].mxu0 }
 0x460   : > { %v5290_v5 = vmax.f32 %v13375_v48, %v5189_v15  ;;  %v5191_v8 = vpop.f32.mrb[125].mxu0  ;;  %v6095_v48 = vld [vmem:[#allocation2 + $0x21] ss:$2 sm:$0xff] }
 0x461   : > { %v5192_v50 = vpop.f32.mrb[126].mxu0  ;;  %v5769_v10 = vld [vmem:[#allocation2 + $0x2d4] ss:$2 sm:$0xff]  ;;  %v5833_v60 = vld [vmem:[#allocation2 + $0x2d5] ss:$2 sm:$0xff]  ;;  %v6157_v25 = vmax.f32 %v6031_v53, %v6095_v48 }
 0x462   : > { %5387 = vst.msk [vmem:[#allocation2 + $0x2f0] sm:$0xff] %vm5292_vm7, %v5290_v5  ;;  %v5291_v38 = vmax.f32 %v13377_v42, %v5192_v50  ;;  %v5194_v21 = vpop.f32.mrb[127].mxu0  ;;  %v5609_v62 = vld [vmem:[#allocation2 + $0x2d2] ss:$2 sm:$0xff]  ;;  %v5673_v6 = vld [vmem:[#allocation2 + $0x2d3] ss:$2 sm:$0xff]  ;;  %v5866_v26 = vmax.f32 %v5769_v10, %v5833_v60  ;;  %v5536_v50 = vmax.f32 %v5429_v0, %v5493_v57 }
 0x463   : > { %v5706_v1 = vmax.f32 %v5609_v62, %v5673_v6  ;;  %v5929_v5 = vld [vmem:[#allocation2 + $0x2d6] ss:$2 sm:$0xff]  ;;  %v5993_v8 = vld [vmem:[#allocation2 + $0x2d7] ss:$2 sm:$0xff] }
 0x464   : > { %5388 = vst.msk [vmem:[#allocation2 + $0x2f8] sm:$0xff] %vm5292_vm7, %v5291_v38  ;;  %v5537_v38 = vmax.f32 %v5431_v27, %v5495_v13  ;;  %v6039_v62 = vld [vmem:[#allocation2 + $0x80] ss:$2 sm:$0xff]  ;;  %v6103_v6 = vld [vmem:[#allocation2 + $0x81] ss:$2 sm:$0xff]  ;;  %v10597_v27 = vpack.i.bf16 %v6157_v25, %v6156_v3 }
 0x465   : > { %v6035_v0 = vld [vmem:[#allocation2 + $0x50] ss:$2 sm:$0xff]  ;;  %v6099_v57 = vld [vmem:[#allocation2 + $0x51] ss:$2 sm:$0xff] }
 0x466   : > { %v6033_v13 = vld [vmem:[#allocation2 + $0x38] ss:$2 sm:$0xff]  ;;  %v6045_v25 = vld [vmem:[#allocation2 + $0xc8] ss:$2 sm:$0xff] }
 0x46a   : > { %v10514_v34 = vpop.permute.xlu1 %10513 }
 0x46b   : > { %v10509_v54 = vpop.permute.xlu0 %10508  ;;  %v5771_v61 = vld [vmem:[#allocation2 + $0x2ec] ss:$2 sm:$0xff]  ;;  %v5835_v42 = vld [vmem:[#allocation2 + $0x2ed] ss:$2 sm:$0xff]  ;;  %v10516_v58 = vunpack.i.h.bf16 %v10514_v34  ;;  %v10515_v2 = vunpack.i.l.bf16 %v10514_v34 }
 0x46c   : > { %v5611_v11 = vld [vmem:[#allocation2 + $0x2ea] ss:$2 sm:$0xff]  ;;  %v10511_v20 = vunpack.i.h.bf16 %v10509_v54  ;;  %v5675_v63 = vld [vmem:[#allocation2 + $0x2eb] ss:$2 sm:$0xff]  ;;  %v10510_v16 = vunpack.i.l.bf16 %v10509_v54  ;;  %v5867_v44 = vmax.f32 %v5771_v61, %v5835_v42  ;;  %v6026_v42 = vmax.f32 %v5929_v5, %v5993_v8 }
 0x46d   : > { %v5707_v39 = vmax.f32 %v5611_v11, %v5675_v63  ;;  %v5931_v47 = vld [vmem:[#allocation2 + $0x2ee] ss:$2 sm:$0xff]  ;;  %v5995_v19 = vld [vmem:[#allocation2 + $0x2ef] ss:$2 sm:$0xff] }
 0x46e   : > { %v10587_v28 = vpack.i.bf16 %v5867_v44, %v5866_v26  ;;  %v6753_v21 = vsel %vm4145_vm6, %v10511_v20, %v10516_v58  ;;  %v6027_v60 = vmax.f32 %v5931_v47, %v5995_v19  ;;  %v6752_v24 = vsel %vm4145_vm6, %v10510_v16, %v10515_v2  ;;  %v6037_v11 = vld [vmem:[#allocation2 + $0x68] ss:$2 sm:$0xff]  ;;  %v6101_v58 = vld [vmem:[#allocation2 + $0x69] ss:$2 sm:$0xff]  ;;  %v6097_v2 = vld [vmem:[#allocation2 + $0x39] ss:$2 sm:$0xff] }
 0x46f   : > { %v13609_v46 = vpop.permute.xlu0 %10518  ;;  %v10582_v15 = vpack.i.bf16 %v5707_v39, %v5706_v1  ;;  %v6720_v45 = vsel %vm5292_vm7, %v5536_v50, %v10510_v16  ;;  %v6721_v48 = vsel %vm5292_vm7, %v5537_v38, %v10511_v20  ;;  %v6161_v20 = vmax.f32 %v6039_v62, %v6103_v6  ;;  %v6047_v19 = vld [vmem:[#allocation2 + $0xe0] ss:$2 sm:$0xff]  ;;  %v6043_v8 = vld [vmem:[#allocation2 + $0xb0] ss:$2 sm:$0xff]  ;;  %v6107_v50 = vld [vmem:[#allocation2 + $0xb1] ss:$2 sm:$0xff] }
 0x470   : > { %v14363_v17 = vunpack.i.h.bf16 %v13609_v46  ;;  %v14362_v10 = vunpack.i.l.bf16 %v13609_v46  ;;  %10588 = vrot.lane.b32.xlu0 %v10587_v28, %s10824_s24  ;;  %v10592_v44 = vpack.i.bf16 %v6027_v60, %v6026_v42  ;;  %v6860_v39 = vpack.c.bf16 %v6721_v48, %v6720_v45  ;;  %v6111_v28 = vld [vmem:[#allocation2 + $0xe1] ss:$2 sm:$0xff]  ;;  %s10827_s24 = smov 32   ;;  %v6041_v62 = vld [vmem:[#allocation2 + $0x98] ss:$2 sm:$0xff] }
 0x471   : > { %10583 = vrot.lane.b32.xlu1 %v10582_v15, %s10825_s25  ;;  %v8991_v53 = vpop.f32.mrb[196].mxu1  ;;  %v6159_v47 = vmax.f32 %v6035_v0, %v6099_v57  ;;  %v6160_v5 = vmax.f32 %v6037_v11, %v6101_v58  ;;  %v6158_v3 = vmax.f32 %v6033_v13, %v6097_v2  ;;  %v6109_v38 = vld [vmem:[#allocation2 + $0xc9] ss:$2 sm:$0xff]  ;;  %v6165_v60 = vmax.f32 %v6047_v19, %v6111_v28  ;;  %v6105_v6 = vld [vmem:[#allocation2 + $0x99] ss:$2 sm:$0xff] }
 0x472   : > { %v8992_v34 = vpop.f32.mrb[197].mxu1  ;;  %v6785_v54 = vsel %vm6764_vm8, %v6752_v24, %v14362_v10  ;;  %v6786_v61 = vsel %vm6764_vm8, %v6753_v21, %v14363_v17  ;;  %v6055_v45 = vld [vmem:[#allocation2 + $0x140] ss:$2 sm:$0xff]  ;;  %v6119_v48 = vld [vmem:[#allocation2 + $0x141] ss:$2 sm:$0xff]  ;;  %v6164_v0 = vmax.f32 %v6045_v25, %v6109_v38  ;;  %v14462_v17 = vunpack.i.l.bf16 %v13258_v40 }
 0x473   : > { %v13625_v26 = vadd.f32 %v8992_v34, %v8991_v53  ;;  %v8994_v63 = vpop.f32.mrb[198].mxu1  ;;  %v6861_v1 = vpack.c.bf16 %v6786_v61, %v6785_v54  ;;  %v10607_v21 = vpack.i.bf16 %v6161_v20, %v6160_v5  ;;  %v10602_v24 = vpack.i.bf16 %v6159_v47, %v6158_v3  ;;  %v6051_v57 = vld [vmem:[#allocation2 + $0x110] ss:$2 sm:$0xff]  ;;  %v6115_v34 = vld [vmem:[#allocation2 + $0x111] ss:$2 sm:$0xff] }
 0x474   : > { %v8995_v16 = vpop.f32.mrb[199].mxu1  ;;  %10598 = vrot.lane.b32.xlu0 %v10597_v27, %s10827_s24  ;;  %v6163_v53 = vmax.f32 %v6043_v8, %v6107_v50  ;;  %v6162_v54 = vmax.f32 %v6041_v62, %v6105_v6  ;;  %v6053_v61 = vld [vmem:[#allocation2 + $0x128] ss:$2 sm:$0xff]  ;;  %v6117_v42 = vld [vmem:[#allocation2 + $0x129] ss:$2 sm:$0xff]  ;;  %v10617_v11 = vpack.i.bf16 %v6165_v60, %v6164_v0  ;;  %v6169_v58 = vmax.f32 %v6055_v45, %v6119_v48 }
 0x475   : > { %v13627_v15 = vadd.f32 %v8995_v16, %v8994_v63  ;;  %7230 = vmatprep.mubr.bf16.mxu1 %v6861_v1  ;;  %10593 = vrot.lane.b32.xlu1 %v10592_v44, %s10826_s26  ;;  %v6049_v63 = vld [vmem:[#allocation2 + $0xf8] ss:$2 sm:$0xff]  ;;  %v6113_v1 = vld [vmem:[#allocation2 + $0xf9] ss:$2 sm:$0xff]  ;;  %v6167_v20 = vmax.f32 %v6051_v57, %v6115_v34  ;;  %v6168_v16 = vmax.f32 %v6053_v61, %v6117_v42  ;;  %v6061_v19 = vld [vmem:[#allocation2 + $0x188] ss:$2 sm:$0xff] }
 0x476   : > { %7231 = vmatmul.mubr.bf16.gmra.mrb[232].mxu1 %v6860_v39  ;;  %v10612_v27 = vpack.i.bf16 %v6163_v53, %v6162_v54  ;;  %v6063_v13 = vld [vmem:[#allocation2 + $0x1a0] ss:$2 sm:$0xff]  ;;  %v6127_v2 = vld [vmem:[#allocation2 + $0x1a1] ss:$2 sm:$0xff]  ;;  %v6059_v44 = vld [vmem:[#allocation2 + $0x170] ss:$2 sm:$0xff]  ;;  %v6166_v47 = vmax.f32 %v6049_v63, %v6113_v1 }
 0x477   : > { %v6123_v39 = vld [vmem:[#allocation2 + $0x171] ss:$2 sm:$0xff]  ;;  %v6057_v5 = vld [vmem:[#allocation2 + $0x158] ss:$2 sm:$0xff]  ;;  %v10627_v8 = vpack.i.bf16 %v6169_v58, %v6168_v16  ;;  %v6173_v50 = vmax.f32 %v6063_v13, %v6127_v2  ;;  %v6135_v6 = vld [vmem:[#allocation2 + $0x201] ss:$2 sm:$0xff] }
 0x478   : > { %10608 = vrot.lane.b32.xlu0 %v10607_v21, %s10827_s24  ;;  %v6125_v28 = vld [vmem:[#allocation2 + $0x189] ss:$2 sm:$0xff]  ;;  %v6121_v3 = vld [vmem:[#allocation2 + $0x159] ss:$2 sm:$0xff]  ;;  %v6067_v25 = vld [vmem:[#allocation2 + $0x1d0] ss:$2 sm:$0xff]  ;;  %v10622_v21 = vpack.i.bf16 %v6167_v20, %v6166_v47  ;;  %v6171_v60 = vmax.f32 %v6059_v44, %v6123_v39 }
 0x479   : > { %10603 = vrot.lane.b32.xlu1 %v10602_v24, %s10827_s24  ;;  %v6131_v38 = vld [vmem:[#allocation2 + $0x1d1] ss:$2 sm:$0xff]  ;;  %v6071_v62 = vld [vmem:[#allocation2 + $0x200] ss:$2 sm:$0xff]  ;;  %v6172_v53 = vmax.f32 %v6061_v19, %v6125_v28  ;;  %v6170_v34 = vmax.f32 %v6057_v5, %v6121_v3  ;;  %v5433_v61 = vld [vmem:[#allocation2 + $0x210] ss:$2 sm:$0xff] }
 0x47a   : > { %v6065_v24 = vld [vmem:[#allocation2 + $0x1b8] ss:$2 sm:$0xff]  ;;  %v6069_v45 = vld [vmem:[#allocation2 + $0x1e8] ss:$2 sm:$0xff]  ;;  %v6133_v48 = vld [vmem:[#allocation2 + $0x1e9] ss:$2 sm:$0xff]  ;;  %v6175_v54 = vmax.f32 %v6067_v25, %v6131_v38  ;;  %v6177_v58 = vmax.f32 %v6071_v62, %v6135_v6 }
 0x47b   : > { %v6129_v0 = vld [vmem:[#allocation2 + $0x1b9] ss:$2 sm:$0xff]  ;;  %v5435_v63 = vld [vmem:[#allocation2 + $0x228] ss:$2 sm:$0xff]  ;;  %v10632_v20 = vpack.i.bf16 %v6171_v60, %v6170_v34  ;;  %v6176_v13 = vmax.f32 %v6069_v45, %v6133_v48  ;;  %v6141_v3 = vld [vmem:[#allocation2 + $0x249] ss:$2 sm:$0xff] }
 0x47c   : > { %10618 = vrot.lane.b32.xlu0 %v10617_v11, %s10827_s24  ;;  %v10637_v11 = vpack.i.bf16 %v6173_v50, %v6172_v53  ;;  %v5497_v1 = vld [vmem:[#allocation2 + $0x211] ss:$2 sm:$0xff]  ;;  %v6174_v2 = vmax.f32 %v6065_v24, %v6129_v0  ;;  %v6079_v16 = vld [vmem:[#allocation2 + $0x260] ss:$2 sm:$0xff]  ;;  %v6143_v44 = vld [vmem:[#allocation2 + $0x261] ss:$2 sm:$0xff] }
 0x47d   : > { %10613 = vrot.lane.b32.xlu1 %v10612_v27, %s10827_s24  ;;  %v5499_v27 = vld [vmem:[#allocation2 + $0x229] ss:$2 sm:$0xff]  ;;  %v6075_v39 = vld [vmem:[#allocation2 + $0x230] ss:$2 sm:$0xff]  ;;  %v6181_v60 = vmax.f32 %v6079_v16, %v6143_v44  ;;  %v6137_v6 = vld [vmem:[#allocation2 + $0x219] ss:$2 sm:$0xff]  ;;  %v5538_v24 = vmax.f32 %v5433_v61, %v5497_v1 }
 0x47e   : > { %v6077_v5 = vld [vmem:[#allocation2 + $0x248] ss:$2 sm:$0xff]  ;;  %v6139_v25 = vld [vmem:[#allocation2 + $0x231] ss:$2 sm:$0xff]  ;;  %v10642_v50 = vpack.i.bf16 %v6175_v54, %v6174_v2  ;;  %v6073_v62 = vld [vmem:[#allocation2 + $0x218] ss:$2 sm:$0xff]  ;;  %v5539_v53 = vmax.f32 %v5435_v63, %v5499_v27 }
 0x47f   : > { %v6180_v0 = vmax.f32 %v6077_v5, %v6141_v3  ;;  %v6087_v34 = vld [vmem:[#allocation2 + $0x2c0] ss:$2 sm:$0xff]  ;;  %v6083_v63 = vld [vmem:[#allocation2 + $0x290] ss:$2 sm:$0xff]  ;;  %v6147_v1 = vld [vmem:[#allocation2 + $0x291] ss:$2 sm:$0xff]  ;;  %v6178_v16 = vmax.f32 %v6073_v62, %v6137_v6 }
 0x480   : > { %10628 = vrot.lane.b32.xlu0 %v10627_v8, %s10827_s24  ;;  %v6085_v44 = vld [vmem:[#allocation2 + $0x2a8] ss:$2 sm:$0xff]  ;;  %v6081_v3 = vld [vmem:[#allocation2 + $0x278] ss:$2 sm:$0xff]  ;;  %s10828_s26 = smov 64  }
 0x481   : > { %10623 = vrot.lane.b32.xlu1 %v10622_v21, %s10827_s24  ;;  %v10647_v21 = vpack.i.bf16 %v6177_v58, %v6176_v13  ;;  %v6091_v6 = vld [vmem:[#allocation2 + $0x2f0] ss:$2 sm:$0xff] }
 0x482   : > { %v10529_v57 = vpop.permute.xlu0 %10528 }
 0x483   : > { %v10524_v42 = vpop.permute.xlu1 %10523  ;;  %v10531_v47 = vunpack.i.h.bf16 %v10529_v57  ;;  %v10530_v19 = vunpack.i.l.bf16 %v10529_v57  ;;  %v6179_v57 = vmax.f32 %v6075_v39, %v6139_v25  ;;  %v6149_v39 = vld [vmem:[#allocation2 + $0x2a9] ss:$2 sm:$0xff]  ;;  %v6145_v25 = vld [vmem:[#allocation2 + $0x279] ss:$2 sm:$0xff] }
 0x484   : > { %v10526_v28 = vunpack.i.h.bf16 %v10524_v42  ;;  %v10525_v8 = vunpack.i.l.bf16 %v10524_v42  ;;  %10638 = vrot.lane.b32.xlu0 %v10637_v11, %s10827_s24  ;;  %v6151_v42 = vld [vmem:[#allocation2 + $0x2c1] ss:$2 sm:$0xff]  ;;  %v6184_v62 = vmax.f32 %v6085_v44, %v6149_v39 }
 0x485   : > { %10633 = vrot.lane.b32.xlu1 %v10632_v20, %s10827_s24  ;;  %v6185_v5 = vmax.f32 %v6087_v34, %v6151_v42  ;;  %v6153_v34 = vld [vmem:[#allocation2 + $0x2d9] ss:$2 sm:$0xff] }
 0x486   : > { %v6755_v11 = vsel %vm4145_vm6, %v10526_v28, %v10531_v47  ;;  %v6754_v54 = vsel %vm4145_vm6, %v10525_v8, %v10530_v19  ;;  %v6722_v20 = vsel %vm5292_vm7, %v5538_v24, %v10525_v8  ;;  %v6723_v61 = vsel %vm5292_vm7, %v5539_v53, %v10526_v28 }
 0x487   : > { %v13639_v38 = vpop.permute.xlu1 %10533  ;;  %v10657_v8 = vpack.i.bf16 %v6181_v60, %v6180_v0  ;;  %v6863_v24 = vpack.c.bf16 %v6723_v61, %v6722_v20  ;;  %v6183_v53 = vmax.f32 %v6083_v63, %v6147_v1  ;;  %v10667_v60 = vpack.i.bf16 %v6185_v5, %v6184_v62  ;;  %v6089_v0 = vld [vmem:[#allocation2 + $0x2d8] ss:$2 sm:$0xff] }
 0x488   : > { %v14361_v45 = vunpack.i.h.bf16 %v13639_v38  ;;  %v14360_v48 = vunpack.i.l.bf16 %v13639_v38  ;;  %10648 = vrot.lane.b32.xlu0 %v10647_v21, %s10827_s24  ;;  %v10652_v21 = vpack.i.bf16 %v6179_v57, %v6178_v16  ;;  %v6186_v57 = vmax.f32 %v6089_v0, %v6153_v34  ;;  %v5437_v1 = vld [vmem:[#allocation2 + $0x240] ss:$2 sm:$0xff]  ;;  %v5503_v16 = vld [vmem:[#allocation2 + $0x259] ss:$2 sm:$0xff] }
 0x489   : > { %v8997_v58 = vpop.f32.mrb[200].mxu1  ;;  %10643 = vrot.lane.b32.xlu1 %v10642_v50, %s10827_s24 }
 0x48a   : > { %v8998_v27 = vpop.f32.mrb[201].mxu1  ;;  %v6787_v13 = vsel %vm6764_vm8, %v6754_v54, %v14360_v48  ;;  %v6788_v2 = vsel %vm6764_vm8, %v6755_v11, %v14361_v45  ;;  %v6155_v11 = vld [vmem:[#allocation2 + $0x2f1] ss:$2 sm:$0xff]  ;;  %v5451_v48 = vld [vmem:[#allocation2 + $0x2e8] ss:$2 sm:$0xff] }
 0x48b   : > { %v13655_v47 = vadd.f32 %v8998_v27, %v8997_v58  ;;  %v9000_v19 = vpop.f32.mrb[202].mxu1  ;;  %v6864_v28 = vpack.c.bf16 %v6788_v2, %v6787_v13  ;;  %v6182_v58 = vmax.f32 %v6081_v3, %v6145_v25  ;;  %v6187_v27 = vmax.f32 %v6091_v6, %v6155_v11  ;;  %v5439_v13 = vld [vmem:[#allocation2 + $0x258] ss:$2 sm:$0xff]  ;;  %v5501_v2 = vld [vmem:[#allocation2 + $0x241] ss:$2 sm:$0xff] }
 0x48c   : > { %v9001_v50 = vpop.f32.mrb[203].mxu1  ;;  %10658 = vrot.lane.b32.xlu0 %v10657_v8, %s10827_s24  ;;  %v5540_v5 = vmax.f32 %v5437_v1, %v5501_v2  ;;  %v5541_v3 = vmax.f32 %v5439_v13, %v5503_v16  ;;  %v5441_v1 = vld [vmem:[#allocation2 + $0x270] ss:$2 sm:$0xff]  ;;  %v5505_v2 = vld [vmem:[#allocation2 + $0x271] ss:$2 sm:$0xff] }
 0x48d   : > { %v13657_v54 = vadd.f32 %v9001_v50, %v9000_v19  ;;  %7238 = vmatprep.mubr.bf16.mxu1 %v6864_v28  ;;  %10653 = vrot.lane.b32.xlu1 %v10652_v21, %s10827_s24  ;;  %v10662_v42 = vpack.i.bf16 %v6183_v53, %v6182_v58  ;;  %v10672_v20 = vpack.i.bf16 %v6187_v27, %v6186_v57  ;;  %v5443_v13 = vld [vmem:[#allocation2 + $0x288] ss:$2 sm:$0xff]  ;;  %v5507_v16 = vld [vmem:[#allocation2 + $0x289] ss:$2 sm:$0xff] }
 0x48e   : > { %7239 = vmatmul.mubr.bf16.gmra.mrb[236].mxu1 %v6863_v24  ;;  %v5513_v45 = vld [vmem:[#allocation2 + $0x2d1] ss:$2 sm:$0xff] }
 0x490   : > { %10668 = vrot.lane.b32.xlu0 %v10667_v60, %s10827_s24 }
 0x491   : > { %10663 = vrot.lane.b32.xlu1 %v10662_v42, %s10827_s24 }
 0x495   : > { %10673 = vrot.lane.b32.xlu1 %v10672_v20, %s10827_s24 }
 0x49a   : > { %v10544_v61 = vpop.permute.xlu1 %10543 }
 0x49b   : > { %v10539_v63 = vpop.permute.xlu0 %10538  ;;  %v10546_v44 = vunpack.i.h.bf16 %v10544_v61  ;;  %v10545_v39 = vunpack.i.l.bf16 %v10544_v61 }
 0x49c   : > { %v10541_v19 = vunpack.i.h.bf16 %v10539_v63  ;;  %v10540_v28 = vunpack.i.l.bf16 %v10539_v63 }
 0x49e   : > { %v6757_v21 = vsel %vm4145_vm6, %v10541_v19, %v10546_v44  ;;  %v6756_v24 = vsel %vm4145_vm6, %v10540_v28, %v10545_v39  ;;  %v6724_v62 = vsel %vm5292_vm7, %v5540_v5, %v10540_v28  ;;  %v6725_v6 = vsel %vm5292_vm7, %v5541_v3, %v10541_v19 }
 0x49f   : > { %v13664_v8 = vpop.permute.xlu0 %10548  ;;  %v6866_v57 = vpack.c.bf16 %v6725_v6, %v6724_v62  ;;  %v5542_v3 = vmax.f32 %v5441_v1, %v5505_v2 }
 0x4a0   : > { %v14359_v25 = vunpack.i.h.bf16 %v13664_v8  ;;  %v14358_v50 = vunpack.i.l.bf16 %v13664_v8 }
 0x4a1   : > { %v9003_v53 = vpop.f32.mrb[204].mxu1 }
 0x4a2   : > { %v9004_v11 = vpop.f32.mrb[205].mxu1  ;;  %v6789_v58 = vsel %vm6764_vm8, %v6756_v24, %v14358_v50  ;;  %v6790_v60 = vsel %vm6764_vm8, %v6757_v21, %v14359_v25  ;;  %v5543_v21 = vmax.f32 %v5443_v13, %v5507_v16 }
 0x4a3   : > { %v13678_v0 = vadd.f32 %v9004_v11, %v9003_v53  ;;  %v9006_v34 = vpop.f32.mrb[206].mxu1  ;;  %v6867_v42 = vpack.c.bf16 %v6790_v60, %v6789_v58 }
 0x4a4   : > { %v9007_v27 = vpop.f32.mrb[207].mxu1 }
 0x4a5   : > { %v13680_v20 = vadd.f32 %v9007_v27, %v9006_v34  ;;  %7246 = vmatprep.mubr.bf16.mxu1 %v6867_v42 }
 0x4a6   : > { %7247 = vmatmul.mubr.bf16.gmra.mrb[240].mxu1 %v6866_v57 }
 0x4b2   : > { %v10559_v61 = vpop.permute.xlu0 %10558 }
 0x4b3   : > { %v10554_v63 = vpop.permute.xlu1 %10553  ;;  %v10561_v44 = vunpack.i.h.bf16 %v10559_v61  ;;  %v10560_v39 = vunpack.i.l.bf16 %v10559_v61 }
 0x4b4   : > { %v10556_v19 = vunpack.i.h.bf16 %v10554_v63  ;;  %v10555_v28 = vunpack.i.l.bf16 %v10554_v63 }
 0x4b6   : > { %v6759_v62 = vsel %vm4145_vm6, %v10556_v19, %v10561_v44  ;;  %v6758_v6 = vsel %vm4145_vm6, %v10555_v28, %v10560_v39  ;;  %v6726_v58 = vsel %vm5292_vm7, %v5542_v3, %v10555_v28  ;;  %v6727_v60 = vsel %vm5292_vm7, %v5543_v21, %v10556_v19  ;;  %v5445_v39 = vld [vmem:[#allocation2 + $0x2a0] ss:$2 sm:$0xff]  ;;  %v5509_v28 = vld [vmem:[#allocation2 + $0x2a1] ss:$2 sm:$0xff] }
 0x4b7   : > { %v13682_v5 = vpop.permute.xlu1 %10563  ;;  %v6869_v13 = vpack.c.bf16 %v6727_v60, %v6726_v58  ;;  %v5447_v19 = vld [vmem:[#allocation2 + $0x2b8] ss:$2 sm:$0xff]  ;;  %v5511_v3 = vld [vmem:[#allocation2 + $0x2b9] ss:$2 sm:$0xff] }
 0x4b8   : > { %v14357_v24 = vunpack.i.h.bf16 %v13682_v5  ;;  %v14356_v53 = vunpack.i.l.bf16 %v13682_v5 }
 0x4b9   : > { %v9009_v11 = vpop.f32.mrb[208].mxu1 }
 0x4ba   : > { %v9010_v34 = vpop.f32.mrb[209].mxu1  ;;  %v6791_v42 = vsel %vm6764_vm8, %v6758_v6, %v14356_v53  ;;  %v6792_v27 = vsel %vm6764_vm8, %v6759_v62, %v14357_v24 }
 0x4bb   : > { %v13696_v57 = vadd.f32 %v9010_v34, %v9009_v11  ;;  %v9012_v61 = vpop.f32.mrb[210].mxu1  ;;  %v6870_v63 = vpack.c.bf16 %v6792_v27, %v6791_v42  ;;  %v5544_v34 = vmax.f32 %v5445_v39, %v5509_v28  ;;  %v5545_v42 = vmax.f32 %v5447_v19, %v5511_v3 }
 0x4bc   : > { %v9013_v1 = vpop.f32.mrb[211].mxu1 }
 0x4bd   : > { %v13698_v2 = vadd.f32 %v9013_v1, %v9012_v61  ;;  %7254 = vmatprep.mubr.bf16.mxu1 %v6870_v63 }
 0x4be   : > { %7255 = vmatmul.mubr.bf16.gmra.mrb[244].mxu1 %v6869_v13 }
 0x4ca   : > { %v10574_v16 = vpop.permute.xlu1 %10573 }
 0x4cb   : > { %v10569_v44 = vpop.permute.xlu0 %10568  ;;  %v10576_v21 = vunpack.i.h.bf16 %v10574_v16  ;;  %v10575_v6 = vunpack.i.l.bf16 %v10574_v16 }
 0x4cc   : > { %v10571_v53 = vunpack.i.h.bf16 %v10569_v44  ;;  %v10570_v62 = vunpack.i.l.bf16 %v10569_v44 }
 0x4ce   : > { %v6761_v27 = vsel %vm4145_vm6, %v10571_v53, %v10576_v21  ;;  %v6760_v61 = vsel %vm4145_vm6, %v10570_v62, %v10575_v6  ;;  %v6728_v1 = vsel %vm5292_vm7, %v5544_v34, %v10570_v62  ;;  %v6729_v13 = vsel %vm5292_vm7, %v5545_v42, %v10571_v53  ;;  %v5449_v34 = vld [vmem:[#allocation2 + $0x2d0] ss:$2 sm:$0xff] }
 0x4cf   : > { %v13700_v11 = vpop.permute.xlu0 %10578  ;;  %v6872_v6 = vpack.c.bf16 %v6729_v13, %v6728_v1  ;;  %v5546_v1 = vmax.f32 %v5449_v34, %v5513_v45 }
 0x4d0   : > { %v10581_v58 = vunpack.i.h.bf16 %v13700_v11  ;;  %v10580_v60 = vunpack.i.l.bf16 %v13700_v11 }
 0x4d1   : > { %v9015_v63 = vpop.f32.mrb[212].mxu1 }
 0x4d2   : > { %v9016_v16 = vpop.f32.mrb[213].mxu1  ;;  %v6793_v44 = vsel %vm6764_vm8, %v6760_v61, %v10580_v60  ;;  %v6794_v39 = vsel %vm6764_vm8, %v6761_v27, %v10581_v58  ;;  %v5515_v27 = vld [vmem:[#allocation2 + $0x2e9] ss:$2 sm:$0xff] }
 0x4d3   : > { %v13714_v19 = vadd.f32 %v9016_v16, %v9015_v63  ;;  %v9018_v28 = vpop.f32.mrb[214].mxu1  ;;  %v6873_v3 = vpack.c.bf16 %v6794_v39, %v6793_v44  ;;  %v5547_v13 = vmax.f32 %v5451_v48, %v5515_v27 }
 0x4d4   : > { %v9019_v21 = vpop.f32.mrb[215].mxu1 }
 0x4d5   : > { %v13716_v24 = vadd.f32 %v9019_v21, %v9018_v28  ;;  %7262 = vmatprep.mubr.bf16.mxu1 %v6873_v3 }
 0x4d6   : > { %7263 = vmatmul.mubr.bf16.gmra.mrb[248].mxu1 %v6872_v6 }
 0x4e2   : > { %v10589_v53 = vpop.permute.xlu0 %10588 }
 0x4e3   : > { %v10584_v62 = vpop.permute.xlu1 %10583  ;;  %v10591_v42 = vunpack.i.h.bf16 %v10589_v53  ;;  %v10590_v50 = vunpack.i.l.bf16 %v10589_v53 }
 0x4e4   : > { %v10586_v61 = vunpack.i.h.bf16 %v10584_v62  ;;  %v10585_v25 = vunpack.i.l.bf16 %v10584_v62  ;;  %v14461_v62 = vunpack.i.h.bf16 %v13258_v40 }
 0x4e6   : > { %v10599_v63 = vpop.permute.xlu0 %10598  ;;  %v6763_v28 = vsel %vm4145_vm6, %v10586_v61, %v10591_v42  ;;  %v6762_v3 = vsel %vm4145_vm6, %v10585_v25, %v10590_v50  ;;  %v6730_v45 = vsel %vm5292_vm7, %v5546_v1, %v10585_v25  ;;  %v6731_v48 = vsel %vm5292_vm7, %v5547_v13, %v10586_v61 }
 0x4e7   : > { %v10601_v16 = vunpack.i.h.bf16 %v10599_v63  ;;  %v10600_v44 = vunpack.i.l.bf16 %v10599_v63  ;;  %v13718_v39 = vpop.permute.xlu1 %10593  ;;  %v6875_v25 = vpack.c.bf16 %v6731_v48, %v6730_v45  ;;  %v14465_v45 = vld [vmem:[#allocation16_spill] sm:$0xff] }
 0x4e8   : > { %v14366_v21 = vunpack.i.h.bf16 %v13718_v39  ;;  %v14367_v6 = vunpack.i.l.bf16 %v13718_v39  ;;  %v14466_v48 = vunpack.i.h.bf16 %v14465_v45 }
 0x4e9   : > { %v9021_v53 = vpop.f32.mrb[216].mxu1  ;;  %v6799_v10 = vsel %vm6797_vm10, %v14461_v62, %v10601_v16  ;;  %v6798_v63 = vsel %vm6797_vm10, %v14462_v17, %v10600_v44 }
 0x4ea   : > { %v9022_v22 = vpop.f32.mrb[217].mxu1  ;;  %v10609_v50 = vpop.permute.xlu0 %10608  ;;  %v6795_v27 = vsel %vm6764_vm8, %v6762_v3, %v14367_v6  ;;  %v6796_v16 = vsel %vm6764_vm8, %v6763_v28, %v14366_v21  ;;  %v6832_v44 = vpack.c.bf16 %v6799_v10, %v6798_v63  ;;  %v14463_v28 = vunpack.i.h.bf16 %v13344_v37 }
 0x4eb   : > { %v13732_v34 = vadd.f32 %v9022_v22, %v9021_v53  ;;  %v9024_v42 = vpop.f32.mrb[218].mxu1  ;;  %v10604_v40 = vpop.permute.xlu1 %10603  ;;  %v6876_v17 = vpack.c.bf16 %v6796_v16, %v6795_v27  ;;  %v10611_v22 = vunpack.i.h.bf16 %v10609_v50  ;;  %v10610_v61 = vunpack.i.l.bf16 %v10609_v50 }
 0x4ec   : > { %v9025_v62 = vpop.f32.mrb[219].mxu1  ;;  %v10606_v1 = vunpack.i.h.bf16 %v10604_v40  ;;  %v10605_v13 = vunpack.i.l.bf16 %v10604_v40  ;;  %v14464_v10 = vunpack.i.l.bf16 %v13344_v37 }
 0x4ed   : > { %v13740_v12 = vadd.f32 %v9025_v62, %v9024_v42  ;;  %7270 = vmatprep.mubr.bf16.mxu1 %v6876_v17  ;;  %v6803_v21 = vsel %vm6797_vm10, %v14463_v28, %v10611_v22  ;;  %v14467_v42 = vunpack.i.l.bf16 %v14465_v45 }
 0x4ee   : > { %7271 = vmatmul.mubr.bf16.gmra.mrb[252].mxu1 %v6875_v25  ;;  %v10619_v53 = vpop.permute.xlu0 %10618  ;;  %v6802_v63 = vsel %vm6797_vm10, %v14464_v10, %v10610_v61  ;;  %v6801_v50 = vsel %vm6797_vm10, %v14466_v48, %v10606_v1 }
 0x4ef   : > { %v10614_v3 = vpop.permute.xlu1 %10613  ;;  %9212 = vmatprep.mubr.msk.bf16.mxu1 %vm7065_vm11, %v6832_v44  ;;  %v6800_v27 = vsel %vm6797_vm10, %v14467_v42, %v10605_v13  ;;  %v6838_v62 = vpack.c.bf16 %v6803_v21, %v6802_v63  ;;  %v10621_v44 = vunpack.i.h.bf16 %v10619_v53  ;;  %v10620_v25 = vunpack.i.l.bf16 %v10619_v53 }
 0x4f0   : > { %v6835_v17 = vpack.c.bf16 %v6801_v50, %v6800_v27  ;;  %v10616_v6 = vunpack.i.h.bf16 %v10614_v3  ;;  %v10615_v22 = vunpack.i.l.bf16 %v10614_v3 }
 0x4f1   : > { %v6807_v1 = vsel %vm6797_vm10, %v10431_v49, %v10621_v44  ;;  %v6806_v13 = vsel %vm6797_vm10, %v10430_v56, %v10620_v25 }
 0x4f2   : > { %v10629_v16 = vpop.permute.xlu0 %10628  ;;  %v6805_v21 = vsel %vm6797_vm10, %v10416_v7, %v10616_v6  ;;  %v6804_v53 = vsel %vm6797_vm10, %v10415_v29, %v10615_v22  ;;  %v6844_v10 = vpack.c.bf16 %v6807_v1, %v6806_v13 }
 0x4f3   : > { %v10624_v40 = vpop.permute.xlu1 %10623  ;;  %v6841_v63 = vpack.c.bf16 %v6805_v21, %v6804_v53  ;;  %v10631_v45 = vunpack.i.h.bf16 %v10629_v16  ;;  %v10630_v48 = vunpack.i.l.bf16 %v10629_v16 }
 0x4f4   : > { %v10626_v50 = vunpack.i.h.bf16 %v10624_v40  ;;  %v10625_v49 = vunpack.i.l.bf16 %v10624_v40 }
 0x4f5   : > { %v6811_v32 = vsel %vm6797_vm10, %v10461_v33, %v10631_v45  ;;  %v6810_v29 = vsel %vm6797_vm10, %v10460_v14, %v10630_v48  ;;  %v14468_v45 = vunpack.i.l.bf16 %v13718_v39 }
 0x4f6   : > { %9213 = vmatmul.mubr.msk.bf16.vlgmr.msra.gmra.mrb[0].mxu1 %vm7065_vm11, %v6835_v17  ;;  %v10639_v37 = vpop.permute.xlu0 %10638  ;;  %v6809_v6 = vsel %vm6797_vm10, %v10446_v41, %v10626_v50  ;;  %v6808_v42 = vsel %vm6797_vm10, %v10445_v59, %v10625_v49  ;;  %v6850_v25 = vpack.c.bf16 %v6811_v32, %v6810_v29  ;;  %v14469_v50 = vunpack.i.h.bf16 %v13718_v39 }
 0x4f7   : > { %v10634_v61 = vpop.permute.xlu1 %10633  ;;  %9216 = vmatprep.mubr.msk.bf16.mxu1 %vm7065_vm11, %v6838_v62  ;;  %v6847_v14 = vpack.c.bf16 %v6809_v6, %v6808_v42  ;;  %v10641_v13 = vunpack.i.h.bf16 %v10639_v37  ;;  %v10640_v21 = vunpack.i.l.bf16 %v10639_v37  ;;  %v14472_v42 = vunpack.i.h.bf16 %v13609_v46 }
 0x4f8   : > { %v10636_v1 = vunpack.i.h.bf16 %v10634_v61  ;;  %v10635_v41 = vunpack.i.l.bf16 %v10634_v61 }
 0x4f9   : > { %v6814_v37 = vsel %vm6797_vm10, %v10490_v35, %v10640_v21  ;;  %v14471_v35 = vunpack.i.l.bf16 %v13578_v4  ;;  %v10766_v4 = vld [vmem:[%s14321_s7 + $0x8] sm:$0xff]  }
 0x4fa   : > { %v10649_v3 = vpop.permute.xlu0 %10648  ;;  %v6812_v11 = vsel %vm6797_vm10, %v10475_v31, %v10635_v41  ;;  %v14474_v41 = vunpack.i.h.bf16 %v13639_v38 }
 0x4fb   : > { %v10644_v28 = vpop.permute.xlu1 %10643  ;;  %v10651_v29 = vunpack.i.h.bf16 %v10649_v3  ;;  %v10650_v6 = vunpack.i.l.bf16 %v10649_v3 }
 0x4fc   : > { %v10646_v31 = vunpack.i.h.bf16 %v10644_v28  ;;  %v10645_v32 = vunpack.i.l.bf16 %v10644_v28  ;;  %v14473_v28 = vunpack.i.l.bf16 %v13609_v46 }
 0x4fe   : > { %9217 = vmatmul.mubr.msk.bf16.gmra.mrb[4].mxu1 %vm7065_vm11, %v6841_v63  ;;  %v13770_v18 = vpop.permute.xlu0 %10658  ;;  %v6816_v39 = vsel %vm6797_vm10, %v14471_v35, %v10645_v32  ;;  %v6818_v3 = vsel %vm6797_vm10, %v14473_v28, %v10650_v6 }
 0x4ff   : > { %v13772_v56 = vpop.permute.xlu1 %10653  ;;  %9220 = vmatprep.mubr.msk.bf16.mxu1 %vm7065_vm11, %v6844_v10  ;;  %v10661_v46 = vunpack.i.h.bf16 %v13770_v18 }
 0x501   : > { %v9027_v7 = vpop.f32.mrb[220].mxu1 }
 0x502   : > { %v9028_v27 = vpop.f32.mrb[221].mxu1  ;;  %v10669_v40 = vpop.permute.xlu0 %10668 }
 0x503   : > { %v13787_v16 = vadd.f32 %v9028_v27, %v9027_v7  ;;  %v9030_v62 = vpop.f32.mrb[222].mxu1  ;;  %v10671_v17 = vunpack.i.h.bf16 %v10669_v40  ;;  %v10670_v44 = vunpack.i.l.bf16 %v10669_v40  ;;  %v13789_v33 = vpop.permute.xlu1 %10663  ;;  %v6819_v27 = vsel %vm6797_vm10, %v14472_v42, %v10651_v29  ;;  %v10765_v40 = vld [vmem:[%s14321_s7] sm:$0xff]  }
 0x504   : > { %v9031_v51 = vpop.f32.mrb[223].mxu1  ;;  %9244 = vmatprep.subr.bf16.mxu1 %v10765_v40 }
 0x505   : > { %v13791_v22 = vadd.f32 %v9031_v51, %v9030_v62  ;;  %v13796_v36 = vsel %vm6797_vm10, %v10581_v58, %v10671_v17  ;;  %v13801_v59 = vsel %vm6797_vm10, %v10580_v60, %v10670_v44  ;;  %v6813_v58 = vsel %vm6797_vm10, %v10476_v43, %v10636_v1  ;;  %9245 = vmatpush3.bf16.msra.mxu1 %v10765_v40  ;;  %v10772_v40 = vld [vmem:[%s14321_s7 + $0x38] sm:$0xff]  }
 0x506   : > { %v6874_v53 = vpack.c.bf16 %v13796_v36, %v13801_v59  ;;  %9221 = vmatmul.mubr.msk.bf16.gmra.mrb[8].mxu1 %vm7065_vm11, %v6847_v14  ;;  %v6815_v60 = vsel %vm6797_vm10, %v10491_v55, %v10641_v13  ;;  %v6853_v9 = vpack.c.bf16 %v6813_v58, %v6812_v11  ;;  %v6817_v55 = vsel %vm6797_vm10, %v14470_v23, %v10646_v31  ;;  %v10767_v14 = vld [vmem:[%s14321_s7 + $0x10] sm:$0xff]   ;;  %v10769_v31 = vld [vmem:[%s14321_s7 + $0x20] sm:$0xff]  }
 0x507   : > { %v10674_v10 = vpop.permute.xlu1 %10673  ;;  %9224 = vmatprep.mubr.msk.bf16.mxu1 %vm7065_vm11, %v6850_v25  ;;  %v6856_v7 = vpack.c.bf16 %v6815_v60, %v6814_v37  ;;  %v6859_v62 = vpack.c.bf16 %v6817_v55, %v6816_v39  ;;  %v6862_v17 = vpack.c.bf16 %v6819_v27, %v6818_v3  ;;  %v10656_v44 = vunpack.i.h.bf16 %v13772_v56  ;;  %9246 = vmatprep.subr.bf16.mxu1 %v10766_v4 }
 0x508   : > { %v10676_v61 = vunpack.i.h.bf16 %v10674_v10  ;;  %v10675_v63 = vunpack.i.l.bf16 %v10674_v10  ;;  %v10655_v51 = vunpack.i.l.bf16 %v13772_v56  ;;  %v10660_v25 = vunpack.i.l.bf16 %v13770_v18 }
 0x509   : > { %v6821_v36 = vsel %vm6797_vm10, %v14474_v41, %v10656_v44  ;;  %v14475_v56 = vunpack.i.l.bf16 %v13639_v38  ;;  %9247 = vmatpush3.bf16.msra.mxu1 %v10766_v4  ;;  %v14476_v18 = vunpack.i.h.bf16 %v13664_v8  ;;  %v14477_v10 = vunpack.i.l.bf16 %v13664_v8 }
 0x50a   : > { %v6828_v48 = vsel %vm6797_vm10, %v14468_v45, %v10675_v63  ;;  %v6829_v43 = vsel %vm6797_vm10, %v14469_v50, %v10676_v61  ;;  %9248 = vmatprep.subr.bf16.mxu1 %v10767_v14  ;;  %v10666_v45 = vunpack.i.h.bf16 %v13789_v33  ;;  %v14478_v8 = vunpack.i.h.bf16 %v13682_v5 }
 0x50b   : > { %v6877_v49 = vpack.c.bf16 %v6829_v43, %v6828_v48  ;;  %v6820_v59 = vsel %vm6797_vm10, %v14475_v56, %v10655_v51  ;;  %v6823_v21 = vsel %vm6797_vm10, %v14476_v18, %v10661_v46  ;;  %v6822_v61 = vsel %vm6797_vm10, %v14477_v10, %v10660_v25 }
 0x50c   : > { %v6865_v60 = vpack.c.bf16 %v6821_v36, %v6820_v59  ;;  %v6868_v38 = vpack.c.bf16 %v6823_v21, %v6822_v61  ;;  %v10665_v48 = vunpack.i.l.bf16 %v13789_v33  ;;  %v6825_v50 = vsel %vm6797_vm10, %v14478_v8, %v10666_v45  ;;  %v10768_v33 = vld [vmem:[%s14321_s7 + $0x18] sm:$0xff]  }
 0x50d   : > { %9249 = vmatpush3.bf16.msra.mxu1 %v10767_v14  ;;  %v14479_v43 = vunpack.i.l.bf16 %v13682_v5  ;;  %v10770_v5 = vld [vmem:[%s14321_s7 + $0x28] sm:$0xff]  }
 0x50e   : > { %9225 = vmatmul.mubr.msk.bf16.gmra.mrb[12].mxu1 %vm7065_vm11, %v6853_v9  ;;  %9250 = vmatprep.subr.bf16.mxu1 %v10768_v33 }
 0x50f   : > { %9228 = vmatprep.mubr.msk.bf16.mxu1 %vm7065_vm11, %v6856_v7  ;;  %v6824_v9 = vsel %vm6797_vm10, %v14479_v43, %v10665_v48 }
 0x510   : > { %v6871_v7 = vpack.c.bf16 %v6825_v50, %v6824_v9 }
 0x511   : > { %9251 = vmatpush3.bf16.msra.mxu1 %v10768_v33 }
 0x512   : > { %9252 = vmatprep.subr.bf16.mxu1 %v10769_v31 }
 0x515   : > { %9253 = vmatpush3.bf16.msra.mxu1 %v10769_v31 }
 0x516   : > { %9229 = vmatmul.mubr.msk.bf16.gmra.mrb[16].mxu1 %vm7065_vm11, %v6859_v62  ;;  %9254 = vmatprep.subr.bf16.mxu1 %v10770_v5  ;;  %v13909_v62 = vld [vmem:[%s14322_s8] sm:$0xff]  }
 0x517   : > { %9232 = vmatprep.mubr.msk.bf16.mxu1 %vm7065_vm11, %v6862_v17 }
 0x519   : > { %v9033_v1 = vpop.f32.mrb[224].mxu1  ;;  %9255 = vmatpush3.bf16.msra.mxu1 %v10770_v5  ;;  %v13935_v5 = vld [vmem:[%s14320_s6] ss:$0 sm:$0xff] }
 0x51a   : > { %v9034_v13 = vpop.f32.mrb[225].mxu1 }
 0x51b   : > { %v13866_v63 = vadd.f32 %v9034_v13, %v9033_v1  ;;  %v9036_v58 = vpop.f32.mrb[226].mxu1 }
 0x51c   : > { %v9037_v11 = vpop.f32.mrb[227].mxu1 }
 0x51d   : > { %v13868_v37 = vadd.f32 %v9037_v11, %v9036_v58 }
 0x51e   : > { %9233 = vmatmul.mubr.msk.bf16.gmra.mrb[20].mxu1 %vm7065_vm11, %v6865_v60 }
 0x51f   : > { %9236 = vmatprep.mubr.msk.bf16.mxu1 %vm7065_vm11, %v6868_v38 }
 0x526   : > { %9237 = vmatmul.mubr.msk.bf16.gmra.mrb[24].mxu1 %vm7065_vm11, %v6871_v7 }
 0x527   : > { %9240 = vmatprep.mubr.msk.bf16.mxu1 %vm7065_vm11, %v6874_v53 }
 0x52e   : > { %9241 = vmatmul.mubr.msk.bf16.gmra.mrb[28].mxu1 %vm7065_vm11, %v6877_v49  ;;  %v10771_v49 = vld [vmem:[%s14321_s7 + $0x30] sm:$0xff]  }
 0x52f   : > { %9256 = vmatprep.subr.bf16.mxu1 %v10771_v49 }
 0x530   : > { %9257 = vmatpush3.bf16.msra.mxu1 %v10771_v49 }
 0x531   : > { %v9039_v32 = vpop.f32.mrb[228].mxu1  ;;  %9258 = vmatprep.subr.bf16.mxu1 %v10772_v40 }
 0x532   : > { %v9040_v29 = vpop.f32.mrb[229].mxu1 }
 0x533   : > { %v13892_v53 = vadd.f32 %v9040_v29, %v9039_v32  ;;  %v9042_v6 = vpop.f32.mrb[230].mxu1  ;;  %v7161_v32 = vadd.f32 %v13625_v26, %v13935_v5 }
 0x534   : > { %v9043_v23 = vpop.f32.mrb[231].mxu1  ;;  %9259 = vmatpush3.bf16.msra.mxu1 %v10772_v40 }
 0x535   : > { %v13894_v55 = vadd.f32 %v9043_v23, %v9042_v6  ;;  %9292 = vmatprep.subr.bf16.mxu1 %v13909_v62  ;;  %v7153_v6 = vadd.f32 %v13598_v30, %v13935_v5  ;;  %v7177_v30 = vadd.f32 %v13678_v0, %v13935_v5  ;;  %v7172_v0 = vadd.f32 %v13657_v54, %v13935_v5 }
 0x536   : > { %v7193_v54 = vadd.f32 %v13714_v19, %v13935_v5  ;;  %v7188_v19 = vadd.f32 %v13698_v2, %v13935_v5  ;;  %v7209_v2 = vadd.f32 %v13787_v16, %v13935_v5  ;;  %v7204_v16 = vadd.f32 %v13740_v12, %v13935_v5 }
 0x537   : > { %v7225_v12 = vadd.f32 %v13892_v53, %v13935_v5  ;;  %v7220_v53 = vadd.f32 %v13868_v37, %v13935_v5 }
 0x549   : > { %v9045_v35 = vpop.f32.mrb[232].mxu1 }
 0x54a   : > { %v9046_v39 = vpop.f32.mrb[233].mxu1 }
 0x54b   : > { %v13899_v42 = vadd.f32 %v9046_v39, %v9045_v35  ;;  %v9048_v27 = vpop.f32.mrb[234].mxu1  ;;  %v7164_v35 = vadd.f32 %v13627_v15, %v13935_v5 }
 0x54c   : > { %v9049_v28 = vpop.f32.mrb[235].mxu1 }
 0x54d   : > { %v13901_v3 = vadd.f32 %v9049_v28, %v9048_v27  ;;  %v7156_v28 = vadd.f32 %v13601_v52, %v13935_v5  ;;  %v7233_v37 = vadd.f32 %v13899_v42, %v13935_v5 }
 0x561   : > { %v9051_v4 = vpop.f32.mrb[236].mxu1 }
 0x562   : > { %v9052_v17 = vpop.f32.mrb[237].mxu1 }
 0x563   : > { %v13912_v44 = vadd.f32 %v9052_v17, %v9051_v4  ;;  %v9054_v51 = vpop.f32.mrb[238].mxu1 }
 0x564   : > { %v9055_v46 = vpop.f32.mrb[239].mxu1 }
 0x565   : > { %v13914_v25 = vadd.f32 %v9055_v46, %v9054_v51 }
 0x579   : > { %v9057_v14 = vpop.f32.mrb[240].mxu1 }
 0x57a   : > { %v9058_v1 = vpop.f32.mrb[241].mxu1 }
 0x57b   : > { %v13916_v41 = vadd.f32 %v9058_v1, %v9057_v14  ;;  %v9060_v36 = vpop.f32.mrb[242].mxu1 }
 0x57c   : > { %v9061_v56 = vpop.f32.mrb[243].mxu1 }
 0x57d   : > { %v13918_v59 = vadd.f32 %v9061_v56, %v9060_v36  ;;  %v7169_v56 = vadd.f32 %v13655_v47, %v13935_v5 }
 0x591   : > { %v9063_v13 = vpop.f32.mrb[244].mxu1 }
 0x592   : > { %v9064_v18 = vpop.f32.mrb[245].mxu1 }
 0x593   : > { %v13920_v21 = vadd.f32 %v9064_v18, %v9063_v13  ;;  %v9066_v10 = vpop.f32.mrb[246].mxu1  ;;  %v7180_v18 = vadd.f32 %v13680_v20, %v13935_v5 }
 0x594   : > { %v9067_v61 = vpop.f32.mrb[247].mxu1 }
 0x595   : > { %v13922_v58 = vadd.f32 %v9067_v61, %v9066_v10  ;;  %v10774_v10 = vld [vmem:[%s14322_s8 + $0x8] sm:$0xff]  }
 0x5a9   : > { %v9069_v11 = vpop.f32.mrb[248].mxu1 }
 0x5aa   : > { %v9070_v60 = vpop.f32.mrb[249].mxu1 }
 0x5ab   : > { %v13924_v38 = vadd.f32 %v9070_v60, %v9069_v11  ;;  %v9072_v45 = vpop.f32.mrb[250].mxu1 }
 0x5ac   : > { %v9073_v48 = vpop.f32.mrb[251].mxu1 }
 0x5ad   : > { %v13926_v8 = vadd.f32 %v9073_v48, %v9072_v45 }
 0x5c1   : > { %v9075_v50 = vpop.f32.mrb[252].mxu1 }
 0x5c2   : > { %v9076_v43 = vpop.f32.mrb[253].mxu1 }
 0x5c3   : > { %v13928_v9 = vadd.f32 %v9076_v43, %v9075_v50  ;;  %v9078_v7 = vpop.f32.mrb[254].mxu1  ;;  %v10775_v50 = vld [vmem:[%s14322_s8 + $0x10] sm:$0xff]  }
 0x5c4   : > { %v9079_v33 = vpop.f32.mrb[255].mxu1 }
 0x5c5   : > { %v13930_v31 = vadd.f32 %v9079_v33, %v9078_v7 }
 0x5c9   : > { %v9214_v29 = vpop.f32.mrb[0].mxu1 }
 0x5ca   : > { %v7322_v23 = vadd.f32 %v9214_v29, %v7161_v32  ;;  %v7313_v49 = vpop.f32.mrb[1].mxu1 }
 0x5cb   : > { %v7314_v39 = vadd.f32 %v7313_v49, %v7153_v6  ;;  %v9215_v27 = vpop.f32.mrb[2].mxu1  ;;  %v7196_v49 = vadd.f32 %v13716_v24, %v13935_v5 }
 0x5cc   : > { %v7325_v40 = vadd.f32 %v9215_v27, %v7164_v35  ;;  %v7316_v4 = vpop.f32.mrb[3].mxu1  ;;  %v7442_v51 = vmax.f32 %v7322_v23, 0.0  ;;  %v10776_v35 = vld [vmem:[%s14322_s8 + $0x18] sm:$0xff]  }
 0x5cd   : > { %v7317_v17 = vadd.f32 %v7316_v4, %v7156_v28  ;;  %v7440_v26 = vmax.f32 %v7314_v39, 0.0 }
 0x5ce   : > { %v7443_v46 = vmax.f32 %v7325_v40, 0.0 }
 0x5cf   : > { %v7441_v14 = vmax.f32 %v7317_v17, 0.0  ;;  %v10777_v17 = vld [vmem:[%s14322_s8 + $0x20] sm:$0xff]  }
 0x5d0   : > { %v13945_v1 = vpack.c.bf16 %v7443_v46, %v7442_v51 }
 0x5d1   : > { %v13949_v36 = vpack.c.bf16 %v7441_v14, %v7440_v26  ;;  %v9218_v15 = vpop.f32.mrb[4].mxu1 }
 0x5d2   : > { %v7338_v13 = vadd.f32 %v9218_v15, %v7177_v30  ;;  %v7329_v52 = vpop.f32.mrb[5].mxu1  ;;  %v7201_v15 = vadd.f32 %v13732_v34, %v13935_v5 }
 0x5d3   : > { %v7330_v61 = vadd.f32 %v7329_v52, %v7169_v56  ;;  %v9219_v11 = vpop.f32.mrb[6].mxu1  ;;  %9260 = vmatprep.mubr.bf16.mxu1 %v13949_v36  ;;  %v7212_v52 = vadd.f32 %v13791_v22, %v13935_v5 }
 0x5d4   : > { %v7341_v60 = vadd.f32 %v9219_v11, %v7180_v18  ;;  %v7332_v45 = vpop.f32.mrb[7].mxu1  ;;  %9261 = vmatmul.mubr.bf16.vlgmr.msra.gmra.mrb[32].mxu1 %v13945_v1  ;;  %v7446_v48 = vmax.f32 %v7338_v13, 0.0  ;;  %v10778_v18 = vld [vmem:[%s14322_s8 + $0x28] sm:$0xff]  }
 0x5d5   : > { %v7333_v47 = vadd.f32 %v7332_v45, %v7172_v0  ;;  %9293 = vmatpush3.bf16.msra.mxu1 %v13909_v62  ;;  %v7444_v43 = vmax.f32 %v7330_v61, 0.0  ;;  %v7185_v62 = vadd.f32 %v13696_v57, %v13935_v5  ;;  %v10779_v45 = vld [vmem:[%s14322_s8 + $0x30] sm:$0xff]  }
 0x5d6   : > { %v7447_v20 = vmax.f32 %v7341_v60, 0.0  ;;  %9294 = vmatprep.subr.bf16.mxu1 %v10774_v10 }
 0x5d7   : > { %v7445_v7 = vmax.f32 %v7333_v47, 0.0 }
 0x5d8   : > { %v13966_v33 = vpack.c.bf16 %v7447_v20, %v7446_v48 }
 0x5d9   : > { %v13970_v32 = vpack.c.bf16 %v7445_v7, %v7444_v43  ;;  %v9222_v29 = vpop.f32.mrb[8].mxu1  ;;  %9295 = vmatpush3.bf16.msra.mxu1 %v10774_v10  ;;  %v7217_v7 = vadd.f32 %v13866_v63, %v13935_v5 }
 0x5da   : > { %v7354_v6 = vadd.f32 %v9222_v29, %v7193_v54  ;;  %v7345_v23 = vpop.f32.mrb[9].mxu1  ;;  %9296 = vmatprep.subr.bf16.mxu1 %v10775_v50 }
 0x5db   : > { %v7346_v39 = vadd.f32 %v7345_v23, %v7185_v62  ;;  %v9223_v27 = vpop.f32.mrb[10].mxu1  ;;  %9264 = vmatprep.mubr.bf16.mxu1 %v13970_v32  ;;  %v7228_v62 = vadd.f32 %v13894_v55, %v13935_v5 }
 0x5dc   : > { %v7357_v28 = vadd.f32 %v9223_v27, %v7196_v49  ;;  %v7348_v57 = vpop.f32.mrb[11].mxu1  ;;  %9265 = vmatmul.mubr.bf16.gmra.mrb[36].mxu1 %v13966_v33  ;;  %v7450_v4 = vmax.f32 %v7354_v6, 0.0  ;;  %v10780_v6 = vld [vmem:[%s14322_s8 + $0x38] sm:$0xff]  }
 0x5dd   : > { %v7349_v40 = vadd.f32 %v7348_v57, %v7188_v19  ;;  %9297 = vmatpush3.bf16.msra.mxu1 %v10775_v50  ;;  %v7448_v51 = vmax.f32 %v7346_v39, 0.0 }
 0x5de   : > { %v7451_v24 = vmax.f32 %v7357_v28, 0.0  ;;  %9298 = vmatprep.subr.bf16.mxu1 %v10776_v35 }
 0x5df   : > { %v7449_v46 = vmax.f32 %v7349_v40, 0.0  ;;  %v7241_v40 = vadd.f32 %v13912_v44, %v13935_v5 }
 0x5e0   : > { %v13986_v26 = vpack.c.bf16 %v7451_v24, %v7450_v4 }
 0x5e1   : > { %v13990_v14 = vpack.c.bf16 %v7449_v46, %v7448_v51  ;;  %v9226_v30 = vpop.f32.mrb[12].mxu1  ;;  %9299 = vmatpush3.bf16.msra.mxu1 %v10776_v35  ;;  %v7244_v46 = vadd.f32 %v13914_v25, %v13935_v5  ;;  %v7257_v25 = vadd.f32 %v13920_v21, %v13935_v5 }
 0x5e2   : > { %v7370_v56 = vadd.f32 %v9226_v30, %v7209_v2  ;;  %v7361_v13 = vpop.f32.mrb[13].mxu1  ;;  %9300 = vmatprep.subr.bf16.mxu1 %v10777_v17 }
 0x5e3   : > { %v7362_v10 = vadd.f32 %v7361_v13, %v7201_v15  ;;  %v9227_v61 = vpop.f32.mrb[14].mxu1  ;;  %9268 = vmatprep.mubr.bf16.mxu1 %v13990_v14  ;;  %v7236_v15 = vadd.f32 %v13901_v3, %v13935_v5 }
 0x5e4   : > { %v7373_v11 = vadd.f32 %v9227_v61, %v7212_v52  ;;  %v7364_v34 = vpop.f32.mrb[15].mxu1  ;;  %9269 = vmatmul.mubr.bf16.gmra.mrb[40].mxu1 %v13986_v26  ;;  %v7454_v60 = vmax.f32 %v7370_v56, 0.0 }
 0x5e5   : > { %v7365_v0 = vadd.f32 %v7364_v34, %v7204_v16  ;;  %9301 = vmatpush3.bf16.msra.mxu1 %v10777_v17  ;;  %v7452_v47 = vmax.f32 %v7362_v10, 0.0  ;;  %v7249_v34 = vadd.f32 %v13916_v41, %v13935_v5 }
 0x5e6   : > { %v7455_v22 = vmax.f32 %v7373_v11, 0.0  ;;  %9302 = vmatprep.subr.bf16.mxu1 %v10778_v18 }
 0x5e7   : > { %v7453_v48 = vmax.f32 %v7365_v0, 0.0 }
 0x5e8   : > { %v14006_v20 = vpack.c.bf16 %v7455_v22, %v7454_v60  ;;  %v7260_v60 = vadd.f32 %v13922_v58, %v13935_v5 }
 0x5e9   : > { %v14010_v50 = vpack.c.bf16 %v7453_v48, %v7452_v47  ;;  %v9230_v43 = vpop.f32.mrb[16].mxu1  ;;  %9303 = vmatpush3.bf16.msra.mxu1 %v10778_v18  ;;  %v7252_v47 = vadd.f32 %v13918_v59, %v13935_v5  ;;  %v7276_v59 = vadd.f32 %v13930_v31, %v13935_v5 }
 0x5ea   : > { %v7386_v54 = vadd.f32 %v9230_v43, %v7225_v12  ;;  %v7377_v29 = vpop.f32.mrb[17].mxu1  ;;  %9304 = vmatprep.subr.bf16.mxu1 %v10779_v45 }
 0x5eb   : > { %v7378_v23 = vadd.f32 %v7377_v29, %v7217_v7  ;;  %v9231_v49 = vpop.f32.mrb[18].mxu1  ;;  %9272 = vmatprep.mubr.bf16.mxu1 %v14010_v50 }
 0x5ec   : > { %v7389_v35 = vadd.f32 %v9231_v49, %v7228_v62  ;;  %v7380_v63 = vpop.f32.mrb[19].mxu1  ;;  %9273 = vmatmul.mubr.bf16.gmra.mrb[44].mxu1 %v14006_v20  ;;  %v7458_v27 = vmax.f32 %v7386_v54, 0.0  ;;  %v7273_v62 = vadd.f32 %v13928_v9, %v13935_v5 }
 0x5ed   : > { %v7381_v39 = vadd.f32 %v7380_v63, %v7220_v53  ;;  %9305 = vmatpush3.bf16.msra.mxu1 %v10779_v45  ;;  %v7456_v19 = vmax.f32 %v7378_v23, 0.0  ;;  %v7265_v23 = vadd.f32 %v13924_v38, %v13935_v5 }
 0x5ee   : > { %v7459_v55 = vmax.f32 %v7389_v35, 0.0  ;;  %9306 = vmatprep.subr.bf16.mxu1 %v10780_v6 }
 0x5ef   : > { %v7457_v28 = vmax.f32 %v7381_v39, 0.0  ;;  %v7268_v39 = vadd.f32 %v13926_v8, %v13935_v5 }
 0x5f0   : > { %v14023_v57 = vpack.c.bf16 %v7459_v55, %v7458_v27 }
 0x5f1   : > { %v14027_v4 = vpack.c.bf16 %v7457_v28, %v7456_v19  ;;  %v9234_v24 = vpop.f32.mrb[20].mxu1  ;;  %9307 = vmatpush3.bf16.msra.mxu1 %v10780_v6 }
 0x5f2   : > { %v7402_v17 = vadd.f32 %v9234_v24, %v7241_v40  ;;  %v7393_v51 = vpop.f32.mrb[21].mxu1 }
 0x5f3   : > { %v7394_v2 = vadd.f32 %v7393_v51, %v7233_v37  ;;  %v9235_v30 = vpop.f32.mrb[22].mxu1  ;;  %9276 = vmatprep.mubr.bf16.mxu1 %v14027_v4  ;;  %v10785_v51 = vld [vmem:[%s14323_s9 + $0x50] sm:$0xff]  }
 0x5f4   : > { %v7405_v44 = vadd.f32 %v9235_v30, %v7244_v46  ;;  %v7396_v56 = vpop.f32.mrb[23].mxu1  ;;  %9277 = vmatmul.mubr.bf16.gmra.mrb[48].mxu1 %v14023_v57  ;;  %v7462_v52 = vmax.f32 %v7402_v17, 0.0  ;;  %v10786_v30 = vld [vmem:[%s14323_s9 + $0x10] sm:$0xff]  }
 0x5f5   : > { %v7397_v13 = vadd.f32 %v7396_v56, %v7236_v15  ;;  %v7460_v18 = vmax.f32 %v7394_v2, 0.0  ;;  %v10787_v15 = vld [vmem:[%s14323_s9 + $0x58] sm:$0xff]  }
 0x5f6   : > { %v7463_v42 = vmax.f32 %v7405_v44, 0.0  ;;  %v10788_v56 = vld [vmem:[%s14323_s9 + $0x18] sm:$0xff]  }
 0x5f7   : > { %v7461_v10 = vmax.f32 %v7397_v13, 0.0 }
 0x5f8   : > { %v7483_v61 = vpack.c.bf16 %v7463_v42, %v7462_v52  ;;  %v10789_v52 = vld [vmem:[%s14323_s9 + $0x60] sm:$0xff]  }
 0x5f9   : > { %v7482_v16 = vpack.c.bf16 %v7461_v10, %v7460_v18  ;;  %v9238_v11 = vpop.f32.mrb[24].mxu1  ;;  %v10790_v10 = vld [vmem:[%s14323_s9 + $0x20] sm:$0xff]  }
 0x5fa   : > { %v7418_v0 = vadd.f32 %v9238_v11, %v7257_v25  ;;  %v7409_v3 = vpop.f32.mrb[25].mxu1 }
 0x5fb   : > { %v7410_v22 = vadd.f32 %v7409_v3, %v7249_v34  ;;  %v9239_v45 = vpop.f32.mrb[26].mxu1  ;;  %9280 = vmatprep.mubr.bf16.mxu1 %v7482_v16  ;;  %v10793_v34 = vld [vmem:[%s14323_s9 + $0x70] sm:$0xff]  }
 0x5fc   : > { %v7421_v48 = vadd.f32 %v9239_v45, %v7260_v60  ;;  %v7412_v12 = vpop.f32.mrb[27].mxu1  ;;  %9281 = vmatmul.mubr.bf16.gmra.mrb[52].mxu1 %v7483_v61  ;;  %v7466_v43 = vmax.f32 %v7418_v0, 0.0  ;;  %v10794_v60 = vld [vmem:[%s14323_s9 + $0x30] sm:$0xff]  }
 0x5fd   : > { %v7413_v21 = vadd.f32 %v7412_v12, %v7252_v47  ;;  %v7464_v54 = vmax.f32 %v7410_v22, 0.0 }
 0x5fe   : > { %v7467_v7 = vmax.f32 %v7421_v48, 0.0 }
 0x5ff   : > { %v7465_v29 = vmax.f32 %v7413_v21, 0.0 }
 0x600   : > { %v7485_v41 = vpack.c.bf16 %v7467_v7, %v7466_v43 }
 0x601   : > { %v7484_v6 = vpack.c.bf16 %v7465_v29, %v7464_v54  ;;  %v9242_v58 = vpop.f32.mrb[28].mxu1 }
 0x602   : > { %v7434_v49 = vadd.f32 %v9242_v58, %v7273_v62  ;;  %v7425_v53 = vpop.f32.mrb[29].mxu1 }
 0x603   : > { %v7426_v35 = vadd.f32 %v7425_v53, %v7265_v23  ;;  %v9243_v63 = vpop.f32.mrb[30].mxu1  ;;  %9284 = vmatprep.mubr.bf16.mxu1 %v7484_v6 }
 0x604   : > { %v7437_v27 = vadd.f32 %v9243_v63, %v7276_v59  ;;  %v7428_v55 = vpop.f32.mrb[31].mxu1  ;;  %9285 = vmatmul.mubr.bf16.gmra.mrb[56].mxu1 %v7485_v41  ;;  %v7470_v19 = vmax.f32 %v7434_v49, 0.0 }
 0x605   : > { %v7429_v9 = vadd.f32 %v7428_v55, %v7268_v39  ;;  %v7468_v40 = vmax.f32 %v7426_v35, 0.0 }
 0x606   : > { %v7471_v28 = vmax.f32 %v7437_v27, 0.0 }
 0x607   : > { %v7469_v24 = vmax.f32 %v7429_v9, 0.0 }
 0x608   : > { %v7487_v38 = vpack.c.bf16 %v7471_v28, %v7470_v19 }
 0x609   : > { %v7486_v37 = vpack.c.bf16 %v7469_v24, %v7468_v40 }
 0x60b   : > { %9288 = vmatprep.mubr.bf16.mxu1 %v7486_v37 }
 0x60c   : > { %9289 = vmatmul.mubr.bf16.gmra.mrb[60].mxu1 %v7487_v38 }
 0x60d   : > { %9308 = vmatprep.mubr.bf16.mxu1 %v13949_v36 }
 0x614   : > { %9309 = vmatmul.mubr.bf16.vlgmr.msra.gmra.mrb[64].mxu1 %v13945_v1 }
 0x615   : > { %9312 = vmatprep.mubr.bf16.mxu1 %v13970_v32 }
 0x61c   : > { %9313 = vmatmul.mubr.bf16.gmra.mrb[68].mxu1 %v13966_v33 }
 0x61d   : > { %9316 = vmatprep.mubr.bf16.mxu1 %v13990_v14  ;;  %v10781_v14 = vld [vmem:[%s14323_s9 + $0x40] sm:$0xff]  }
 0x61e   : > { %9152 = vmatprep.subr.bf16.mxu1 %v10781_v14 }
 0x624   : > { %9317 = vmatmul.mubr.bf16.gmra.mrb[72].mxu1 %v13986_v26 }
 0x625   : > { %9320 = vmatprep.mubr.bf16.mxu1 %v14010_v50  ;;  %v10783_v50 = vld [vmem:[%s14323_s9 + $0x48] sm:$0xff]  }
 0x62c   : > { %9321 = vmatmul.mubr.bf16.gmra.mrb[76].mxu1 %v14006_v20  ;;  %v10782_v20 = vld [vmem:[%s14323_s9] sm:$0xff]  }
 0x62d   : > { %9324 = vmatprep.mubr.bf16.mxu1 %v14027_v4  ;;  %9153 = vmatpush3.bf16.msra.mxu1 %v10782_v20  ;;  %v10784_v4 = vld [vmem:[%s14323_s9 + $0x8] sm:$0xff]  }
 0x62e   : > { %9154 = vmatprep.subr.bf16.mxu1 %v10783_v50 }
 0x631   : > { %9155 = vmatpush3.bf16.msra.mxu1 %v10784_v4 }
 0x632   : > { %9156 = vmatprep.subr.bf16.mxu1 %v10785_v51 }
 0x634   : > { %9325 = vmatmul.mubr.bf16.gmra.mrb[80].mxu1 %v14023_v57 }
 0x635   : > { %9328 = vmatprep.mubr.bf16.mxu1 %v7482_v16  ;;  %9157 = vmatpush3.bf16.msra.mxu1 %v10786_v30  ;;  %v10792_v16 = vld [vmem:[%s14323_s9 + $0x28] sm:$0xff]  }
 0x636   : > { %9158 = vmatprep.subr.bf16.mxu1 %v10787_v15 }
 0x639   : > { %9159 = vmatpush3.bf16.msra.mxu1 %v10788_v56 }
 0x63a   : > { %9160 = vmatprep.subr.bf16.mxu1 %v10789_v52  ;;  %v10795_v52 = vld [vmem:[%s14323_s9 + $0x78] sm:$0xff]  }
 0x63c   : > { %9329 = vmatmul.mubr.bf16.gmra.mrb[84].mxu1 %v7483_v61  ;;  %v10791_v61 = vld [vmem:[%s14323_s9 + $0x68] sm:$0xff]  }
 0x63d   : > { %9332 = vmatprep.mubr.bf16.mxu1 %v7484_v6  ;;  %9161 = vmatpush3.bf16.msra.mxu1 %v10790_v10 }
 0x63e   : > { %9162 = vmatprep.subr.bf16.mxu1 %v10791_v61 }
 0x641   : > { %9163 = vmatpush3.bf16.msra.mxu1 %v10792_v16 }
 0x642   : > { %9164 = vmatprep.subr.bf16.mxu1 %v10793_v34  ;;  %v10796_v34 = vld [vmem:[%s14323_s9 + $0x38] sm:$0xff]  }
 0x644   : > { %9333 = vmatmul.mubr.bf16.gmra.mrb[88].mxu1 %v7485_v41 }
 0x645   : > { %9336 = vmatprep.mubr.bf16.mxu1 %v7486_v37  ;;  %9165 = vmatpush3.bf16.msra.mxu1 %v10794_v60 }
 0x646   : > { %9166 = vmatprep.subr.bf16.mxu1 %v10795_v52 }
 0x649   : > { %9167 = vmatpush3.bf16.msra.mxu1 %v10796_v34 }
 0x64c   : > { %9337 = vmatmul.mubr.bf16.gmra.mrb[92].mxu1 %v7487_v38 }
 0x6a7   : > { %v14063_v8 = vpop.f32.mrb[32].mxu1 }
 0x6a8   : > { %v14065_v31 = vpop.f32.mrb[33].mxu1 }
 0x6a9   : > { %v14067_v5 = vpop.f32.mrb[34].mxu1 }
 0x6aa   : > { %v14069_v1 = vpop.f32.mrb[35].mxu1 }
 0x6af   : > { %v14071_v36 = vpop.f32.mrb[36].mxu1 }
 0x6b0   : > { %v14073_v33 = vpop.f32.mrb[37].mxu1 }
 0x6b1   : > { %v14075_v32 = vpop.f32.mrb[38].mxu1 }
 0x6b2   : > { %v14077_v26 = vpop.f32.mrb[39].mxu1 }
 0x6b7   : > { %v14088_v57 = vpop.f32.mrb[40].mxu1 }
 0x6b8   : > { %v14093_v17 = vpop.f32.mrb[41].mxu1 }
 0x6b9   : > { %v14098_v46 = vpop.f32.mrb[42].mxu1 }
 0x6ba   : > { %v14100_v2 = vpop.f32.mrb[43].mxu1 }
 0x6bf   : > { %v14108_v44 = vpop.f32.mrb[44].mxu1 }
 0x6c0   : > { %v14113_v13 = vpop.f32.mrb[45].mxu1 }
 0x6c1   : > { %v14118_v42 = vpop.f32.mrb[46].mxu1 }
 0x6c2   : > { %v14120_v18 = vpop.f32.mrb[47].mxu1 }
 0x6c7   : > { %v14128_v25 = vpop.f32.mrb[48].mxu1 }
 0x6c8   : > { %v14133_v11 = vpop.f32.mrb[49].mxu1 }
 0x6c9   : > { %v14138_v0 = vpop.f32.mrb[50].mxu1 }
 0x6ca   : > { %v14140_v3 = vpop.f32.mrb[51].mxu1 }
 0x6cf   : > { %v14145_v22 = vpop.f32.mrb[52].mxu1 }
 0x6d0   : > { %v14147_v45 = vpop.f32.mrb[53].mxu1 }
 0x6d1   : > { %v14149_v47 = vpop.f32.mrb[54].mxu1 }
 0x6d2   : > { %v14151_v48 = vpop.f32.mrb[55].mxu1 }
 0x6d7   : > { %v14153_v12 = vpop.f32.mrb[56].mxu1 }
 0x6d8   : > { %v14155_v21 = vpop.f32.mrb[57].mxu1 }
 0x6d9   : > { %v14157_v43 = vpop.f32.mrb[58].mxu1 }
 0x6da   : > { %v14159_v7 = vpop.f32.mrb[59].mxu1 }
 0x6df   : > { %v14161_v54 = vpop.f32.mrb[60].mxu1 }
 0x6e0   : > { %v14163_v29 = vpop.f32.mrb[61].mxu1 }
 0x6e1   : > { %v14165_v41 = vpop.f32.mrb[62].mxu1 }
 0x6e2   : > { %v14167_v62 = vpop.f32.mrb[63].mxu1 }
 0x6e7   : > { %v9310_v6 = vpop.f32.mrb[64].mxu1 }
 0x6e8   : > { %v7940_v58 = vmax.f32 %v14063_v8, %v9310_v6  ;;  %v7811_v23 = vpop.f32.mrb[65].mxu1 }
 0x6e9   : > { %v7938_v49 = vmax.f32 %v14065_v31, %v7811_v23  ;;  %v9311_v53 = vpop.f32.mrb[66].mxu1 }
 0x6ea   : > { %7973 = vst.msk [vmem:[#allocation3 + $0x10] sm:$0xff] %vm7970_vm12, %v7940_v58  ;;  %v7941_v59 = vmax.f32 %v14067_v5, %v9311_v53  ;;  %v7814_v35 = vpop.f32.mrb[67].mxu1 }
 0x6eb   : > { %7971 = vst.msk [vmem:[#allocation3] sm:$0xff] %vm7970_vm12, %v7938_v49  ;;  %v7939_v63 = vmax.f32 %v14069_v1, %v7814_v35 }
 0x6ec   : > { %7974 = vst.msk [vmem:[#allocation3 + $0x18] sm:$0xff] %vm7970_vm12, %v7941_v59 }
 0x6ed   : > { %7972 = vst.msk [vmem:[#allocation3 + $0x8] sm:$0xff] %vm7970_vm12, %v7939_v63 }
 0x6ef   : > { %v9314_v39 = vpop.f32.mrb[68].mxu1 }
 0x6f0   : > { %v7944_v27 = vmax.f32 %v14071_v36, %v9314_v39  ;;  %v7827_v55 = vpop.f32.mrb[69].mxu1 }
 0x6f1   : > { %v7942_v9 = vmax.f32 %v14073_v33, %v7827_v55  ;;  %v9315_v19 = vpop.f32.mrb[70].mxu1 }
 0x6f2   : > { %7977 = vst.msk [vmem:[#allocation3 + $0x30] sm:$0xff] %vm7970_vm12, %v7944_v27  ;;  %v7945_v28 = vmax.f32 %v14075_v32, %v9315_v19  ;;  %v7830_v40 = vpop.f32.mrb[71].mxu1 }
 0x6f3   : > { %7975 = vst.msk [vmem:[#allocation3 + $0x20] sm:$0xff] %vm7970_vm12, %v7942_v9  ;;  %v7943_v24 = vmax.f32 %v14077_v26, %v7830_v40 }
 0x6f4   : > { %7978 = vst.msk [vmem:[#allocation3 + $0x38] sm:$0xff] %vm7970_vm12, %v7945_v28  ;;  %v8127_v56 = vld [vmem:[#allocation3 + $0x7] ss:$8 sm:$0xf] }
 0x6f5   : > { %7976 = vst.msk [vmem:[#allocation3 + $0x28] sm:$0xff] %vm7970_vm12, %v7943_v24  ;;  %v8039_v10 = vld [vmem:[#allocation3 + $0x2] ss:$8 sm:$0xf] }
 0x6f6   : > { %v8055_v61 = vld [vmem:[#allocation3 + $0x3] ss:$8 sm:$0xf] }
 0x6f7   : > { %v9318_v38 = vpop.f32.mrb[72].mxu1 }
 0x6f8   : > { %v7948_v37 = vmax.f32 %v14088_v57, %v9318_v38  ;;  %v7843_v8 = vpop.f32.mrb[73].mxu1 }
 0x6f9   : > { %v7946_v31 = vmax.f32 %v14093_v17, %v7843_v8  ;;  %v9319_v5 = vpop.f32.mrb[74].mxu1 }
 0x6fa   : > { %7981 = vst.msk [vmem:[#allocation3 + $0x50] sm:$0xff] %vm7970_vm12, %v7948_v37  ;;  %v7949_v1 = vmax.f32 %v14098_v46, %v9319_v5  ;;  %v7846_v36 = vpop.f32.mrb[75].mxu1 }
 0x6fb   : > { %7979 = vst.msk [vmem:[#allocation3 + $0x40] sm:$0xff] %vm7970_vm12, %v7946_v31  ;;  %v7947_v33 = vmax.f32 %v14100_v2, %v7846_v36 }
 0x6fc   : > { %7982 = vst.msk [vmem:[#allocation3 + $0x58] sm:$0xff] %vm7970_vm12, %v7949_v1  ;;  %v8112_v51 = vld [vmem:[#allocation3 + $0x6] ss:$8 sm:$0xf0] }
 0x6fd   : > { %7980 = vst.msk [vmem:[#allocation3 + $0x48] sm:$0xff] %vm7970_vm12, %v7947_v33  ;;  %v8128_v2 = vld [vmem:[#allocation3 + $0x7] ss:$8 sm:$0xf0] }
 0x6fe   : > { %v8056_v16 = vld [vmem:[#allocation3 + $0x3] ss:$8 sm:$0xf0]  ;;  %v8129_v49 = vor.u32 %v8128_v2, %v8127_v56 }
 0x6ff   : > { %v9322_v32 = vpop.f32.mrb[76].mxu1  ;;  %v8057_v27 = vor.u32 %v8056_v16, %v8055_v61 }
 0x700   : > { %v7952_v26 = vmax.f32 %v14108_v44, %v9322_v32  ;;  %v7859_v14 = vpop.f32.mrb[77].mxu1  ;;  %v8111_v44 = vld [vmem:[#allocation3 + $0x6] ss:$8 sm:$0xf] }
 0x701   : > { %v7950_v20 = vmax.f32 %v14113_v13, %v7859_v14  ;;  %v9323_v50 = vpop.f32.mrb[78].mxu1  ;;  %v8040_v13 = vld [vmem:[#allocation3 + $0x2] ss:$8 sm:$0xf0]  ;;  %v8113_v23 = vor.u32 %v8112_v51, %v8111_v44 }
 0x702   : > { %7985 = vst.msk [vmem:[#allocation3 + $0x70] sm:$0xff] %vm7970_vm12, %v7952_v26  ;;  %v7953_v57 = vmax.f32 %v14118_v42, %v9323_v50  ;;  %v7862_v4 = vpop.f32.mrb[79].mxu1  ;;  %v8041_v39 = vor.u32 %v8040_v13, %v8039_v10 }
 0x703   : > { %7983 = vst.msk [vmem:[#allocation3 + $0x60] sm:$0xff] %vm7970_vm12, %v7950_v20  ;;  %v7951_v17 = vmax.f32 %v14120_v18, %v7862_v4  ;;  %v8142_v24 = vmax.f32 %v8113_v23, %v8129_v49 }
 0x704   : > { %7986 = vst.msk [vmem:[#allocation3 + $0x78] sm:$0xff] %vm7970_vm12, %v7953_v57  ;;  %v8115_v6 = vld [vmem:[#allocation3 + $0x46] ss:$8 sm:$0xf]  ;;  %v8070_v31 = vmax.f32 %v8041_v39, %v8057_v27 }
 0x705   : > { %7984 = vst.msk [vmem:[#allocation3 + $0x68] sm:$0xff] %vm7970_vm12, %v7951_v17  ;;  %v8131_v58 = vld [vmem:[#allocation3 + $0x47] ss:$8 sm:$0xf] }
 0x706   : > { %v8043_v53 = vld [vmem:[#allocation3 + $0x42] ss:$8 sm:$0xf]  ;;  %v8059_v59 = vld [vmem:[#allocation3 + $0x43] ss:$8 sm:$0xf] }
 0x707   : > { %v9326_v46 = vpop.f32.mrb[80].mxu1 }
 0x708   : > { %v7956_v30 = vmax.f32 %v14128_v25, %v9326_v46  ;;  %v7875_v15 = vpop.f32.mrb[81].mxu1 }
 0x709   : > { %v7954_v42 = vmax.f32 %v14133_v11, %v7875_v15  ;;  %v9327_v18 = vpop.f32.mrb[82].mxu1 }
 0x70a   : > { %7989 = vst.msk [vmem:[#allocation3 + $0x90] sm:$0xff] %vm7970_vm12, %v7956_v30  ;;  %v7957_v25 = vmax.f32 %v14138_v0, %v9327_v18  ;;  %v7878_v60 = vpop.f32.mrb[83].mxu1 }
 0x70b   : > { %7987 = vst.msk [vmem:[#allocation3 + $0x80] sm:$0xff] %vm7970_vm12, %v7954_v42  ;;  %v7955_v11 = vmax.f32 %v14140_v3, %v7878_v60 }
 0x70c   : > { %7990 = vst.msk [vmem:[#allocation3 + $0x98] sm:$0xff] %vm7970_vm12, %v7957_v25  ;;  %v8116_v35 = vld [vmem:[#allocation3 + $0x46] ss:$8 sm:$0xf0] }
 0x70d   : > { %v8132_v63 = vld [vmem:[#allocation3 + $0x47] ss:$8 sm:$0xf0]  ;;  %7988 = vst.msk [vmem:[#allocation3 + $0x88] sm:$0xff] %vm7970_vm12, %v7955_v11  ;;  %v8117_v0 = vor.u32 %v8116_v35, %v8115_v6 }
 0x70e   : > { %v8133_v55 = vor.u32 %v8132_v63, %v8131_v58  ;;  %v8044_v9 = vld [vmem:[#allocation3 + $0x42] ss:$8 sm:$0xf0]  ;;  %v8060_v19 = vld [vmem:[#allocation3 + $0x43] ss:$8 sm:$0xf0] }
 0x70f   : > { %v8045_v28 = vor.u32 %v8044_v9, %v8043_v53  ;;  %v8061_v40 = vor.u32 %v8060_v19, %v8059_v59  ;;  %v9330_v3 = vpop.f32.mrb[84].mxu1  ;;  %v8004_v9 = vld [vmem:[#allocation3] ss:$8 sm:$0xf0] }
 0x710   : > { %v8143_v38 = vmax.f32 %v8117_v0, %v8133_v55  ;;  %v7960_v37 = vmax.f32 %v14145_v22, %v9330_v3  ;;  %v7891_v8 = vpop.f32.mrb[85].mxu1  ;;  %v8020_v19 = vld [vmem:[#allocation3 + $0x1] ss:$8 sm:$0xf0] }
 0x711   : > { %v8071_v5 = vmax.f32 %v8045_v28, %v8061_v40  ;;  %v7958_v1 = vmax.f32 %v14147_v45, %v7891_v8  ;;  %v9331_v36 = vpop.f32.mrb[86].mxu1  ;;  %v8076_v28 = vld [vmem:[#allocation3 + $0x4] ss:$8 sm:$0xf0] }
 0x712   : > { %v10677_v33 = vpack.i.bf16 %v8143_v38, %v8142_v24  ;;  %7993 = vst.msk [vmem:[#allocation3 + $0xb0] sm:$0xff] %vm7970_vm12, %v7960_v37  ;;  %v7961_v32 = vmax.f32 %v14149_v47, %v9331_v36  ;;  %v7894_v26 = vpop.f32.mrb[87].mxu1  ;;  %v8092_v40 = vld [vmem:[#allocation3 + $0x5] ss:$8 sm:$0xf0] }
 0x713   : > { %v10682_v14 = vpack.i.bf16 %v8071_v5, %v8070_v31  ;;  %7991 = vst.msk [vmem:[#allocation3 + $0xa0] sm:$0xff] %vm7970_vm12, %v7958_v1  ;;  %v7959_v20 = vmax.f32 %v14151_v48, %v7894_v26  ;;  %v8075_v3 = vld [vmem:[#allocation3 + $0x4] ss:$8 sm:$0xf] }
 0x714   : > { %10678 = vrot.lane.b32.xlu0 %v10677_v33, %s10828_s26  ;;  %7994 = vst.msk [vmem:[#allocation3 + $0xb8] sm:$0xff] %vm7970_vm12, %v7961_v32  ;;  %v8119_v15 = vld [vmem:[#allocation3 + $0x86] ss:$8 sm:$0xf] }
 0x715   : > { %10683 = vrot.lane.b32.xlu1 %v10682_v14, %s10828_s26  ;;  %7992 = vst.msk [vmem:[#allocation3 + $0xa8] sm:$0xff] %vm7970_vm12, %v7959_v20  ;;  %v8047_v13 = vld [vmem:[#allocation3 + $0x82] ss:$8 sm:$0xf]  ;;  %v8077_v14 = vor.u32 %v8076_v28, %v8075_v3 }
 0x716   : > { %v8063_v52 = vld [vmem:[#allocation3 + $0x83] ss:$8 sm:$0xf]  ;;  %v8080_v24 = vld [vmem:[#allocation3 + $0x44] ss:$8 sm:$0xf0] }
 0x717   : > { %v9334_v22 = vpop.f32.mrb[88].mxu1  ;;  %v8091_v38 = vld [vmem:[#allocation3 + $0x5] ss:$8 sm:$0xf] }
 0x718   : > { %v7964_v45 = vmax.f32 %v14153_v12, %v9334_v22  ;;  %v7907_v50 = vpop.f32.mrb[89].mxu1  ;;  %v8096_v37 = vld [vmem:[#allocation3 + $0x45] ss:$8 sm:$0xf0]  ;;  %v8093_v22 = vor.u32 %v8092_v40, %v8091_v38 }
 0x719   : > { %v7962_v47 = vmax.f32 %v14155_v21, %v7907_v50  ;;  %v9335_v57 = vpop.f32.mrb[90].mxu1  ;;  %v8003_v8 = vld [vmem:[#allocation3] ss:$8 sm:$0xf] }
 0x71a   : > { %7997 = vst.msk [vmem:[#allocation3 + $0xd0] sm:$0xff] %vm7970_vm12, %v7964_v45  ;;  %v7965_v48 = vmax.f32 %v14157_v43, %v9335_v57  ;;  %v7910_v4 = vpop.f32.mrb[91].mxu1  ;;  %v8019_v31 = vld [vmem:[#allocation3 + $0x1] ss:$8 sm:$0xf]  ;;  %v8005_v50 = vor.u32 %v8004_v9, %v8003_v8 }
 0x71b   : > { %7995 = vst.msk [vmem:[#allocation3 + $0xc0] sm:$0xff] %vm7970_vm12, %v7962_v47  ;;  %v7963_v17 = vmax.f32 %v14159_v7, %v7910_v4  ;;  %v8008_v5 = vld [vmem:[#allocation3 + $0x40] ss:$8 sm:$0xf0]  ;;  %v8021_v47 = vor.u32 %v8020_v19, %v8019_v31 }
 0x71c   : > { %7998 = vst.msk [vmem:[#allocation3 + $0xd8] sm:$0xff] %vm7970_vm12, %v7965_v48  ;;  %v8120_v44 = vld [vmem:[#allocation3 + $0x86] ss:$8 sm:$0xf0] }
 0x71d   : > { %7996 = vst.msk [vmem:[#allocation3 + $0xc8] sm:$0xff] %vm7970_vm12, %v7963_v17  ;;  %v8136_v56 = vld [vmem:[#allocation3 + $0x87] ss:$8 sm:$0xf0] }
 0x71e   : > { %v8064_v42 = vld [vmem:[#allocation3 + $0x83] ss:$8 sm:$0xf0]  ;;  %v8024_v1 = vld [vmem:[#allocation3 + $0x41] ss:$8 sm:$0xf0] }
 0x71f   : > { %v9338_v51 = vpop.f32.mrb[92].mxu1  ;;  %v8065_v6 = vor.u32 %v8064_v42, %v8063_v52  ;;  %v8079_v36 = vld [vmem:[#allocation3 + $0x44] ss:$8 sm:$0xf] }
 0x720   : > { %v7968_v12 = vmax.f32 %v14161_v54, %v9338_v51  ;;  %v7923_v46 = vpop.f32.mrb[93].mxu1  ;;  %v8135_v54 = vld [vmem:[#allocation3 + $0x87] ss:$8 sm:$0xf]  ;;  %v8081_v20 = vor.u32 %v8080_v24, %v8079_v36 }
 0x721   : > { %v7966_v21 = vmax.f32 %v14163_v29, %v7923_v46  ;;  %v9339_v2 = vpop.f32.mrb[94].mxu1  ;;  %v8048_v29 = vld [vmem:[#allocation3 + $0x82] ss:$8 sm:$0xf0]  ;;  %v8137_v61 = vor.u32 %v8136_v56, %v8135_v54  ;;  %v8106_v46 = vmax.f32 %v8077_v14, %v8093_v22 }
 0x722   : > { %8001 = vst.msk [vmem:[#allocation3 + $0xf0] sm:$0xff] %vm7970_vm12, %v7968_v12  ;;  %v7969_v43 = vmax.f32 %v14165_v41, %v9339_v2  ;;  %v7926_v30 = vpop.f32.mrb[95].mxu1  ;;  %v8121_v41 = vor.u32 %v8120_v44, %v8119_v15  ;;  %v8049_v60 = vor.u32 %v8048_v29, %v8047_v13  ;;  %v8095_v33 = vld [vmem:[#allocation3 + $0x45] ss:$8 sm:$0xf]  ;;  %v8034_v2 = vmax.f32 %v8005_v50, %v8021_v47 }
 0x723   : > { %7999 = vst.msk [vmem:[#allocation3 + $0xe0] sm:$0xff] %vm7970_vm12, %v7966_v21  ;;  %v7967_v7 = vmax.f32 %v14167_v62, %v7926_v30  ;;  %v8007_v32 = vld [vmem:[#allocation3 + $0x40] ss:$8 sm:$0xf]  ;;  %v8097_v45 = vor.u32 %v8096_v37, %v8095_v33 }
 0x724   : > { %8002 = vst.msk [vmem:[#allocation3 + $0xf8] sm:$0xff] %vm7970_vm12, %v7969_v43  ;;  %v8123_v18 = vld [vmem:[#allocation3 + $0xc6] ss:$8 sm:$0xf]  ;;  %v8144_v35 = vmax.f32 %v8121_v41, %v8137_v61  ;;  %v8072_v39 = vmax.f32 %v8049_v60, %v8065_v6  ;;  %v8009_v57 = vor.u32 %v8008_v5, %v8007_v32 }
 0x725   : > { %8000 = vst.msk [vmem:[#allocation3 + $0xe8] sm:$0xff] %vm7970_vm12, %v7967_v7  ;;  %v8139_v10 = vld [vmem:[#allocation3 + $0xc7] ss:$8 sm:$0xf]  ;;  %v8107_v21 = vmax.f32 %v8081_v20, %v8097_v45 }
 0x726   : > { %v8051_v16 = vld [vmem:[#allocation3 + $0xc2] ss:$8 sm:$0xf]  ;;  %v8067_v34 = vld [vmem:[#allocation3 + $0xc3] ss:$8 sm:$0xf] }
 0x727   : > { %v8023_v26 = vld [vmem:[#allocation3 + $0x41] ss:$8 sm:$0xf]  ;;  %v8012_v52 = vld [vmem:[#allocation3 + $0x80] ss:$8 sm:$0xf0] }
 0x728   : > { %v8025_v48 = vor.u32 %v8024_v1, %v8023_v26  ;;  %v8028_v42 = vld [vmem:[#allocation3 + $0x81] ss:$8 sm:$0xf0]  ;;  %v8083_v41 = vld [vmem:[#allocation3 + $0x84] ss:$8 sm:$0xf] }
 0x729   : > { %v10797_v14 = vld [vmem:[%s14325_s11] sm:$0xff]   ;;  %v10798_v20 = vld [vmem:[%s14325_s11 + $0x8] sm:$0xff]   ;;  %v10799_v22 = vld [vmem:[%s14325_s11 + $0x10] sm:$0xff]  }
 0x72a   : > { %v8035_v7 = vmax.f32 %v8009_v57, %v8025_v48  ;;  %9340 = vmatprep.subr.bf16.mxu1 %v10797_v14  ;;  %v10800_v45 = vld [vmem:[%s14325_s11 + $0x18] sm:$0xff]   ;;  %v10801_v50 = vld [vmem:[%s14325_s11 + $0x20] sm:$0xff]   ;;  %v10802_v47 = vld [vmem:[%s14325_s11 + $0x28] sm:$0xff]  }
 0x72b   : > { %v10803_v57 = vld [vmem:[%s14325_s11 + $0x30] sm:$0xff]   ;;  %v10804_v48 = vld [vmem:[%s14325_s11 + $0x38] ss:$0 sps:$4 sm:$0xff]  }
 0x72c   : > { %v8124_v25 = vld [vmem:[#allocation3 + $0xc6] ss:$8 sm:$0xf0]  ;;  %v8140_v62 = vld [vmem:[#allocation3 + $0xc7] ss:$8 sm:$0xf0] }
 0x72d   : > { %v8125_v58 = vor.u32 %v8124_v25, %v8123_v18  ;;  %v8141_v11 = vor.u32 %v8140_v62, %v8139_v10  ;;  %v8052_v23 = vld [vmem:[#allocation3 + $0xc2] ss:$8 sm:$0xf0]  ;;  %v8068_v49 = vld [vmem:[#allocation3 + $0xc3] ss:$8 sm:$0xf0] }
 0x72e   : > { %v8053_v53 = vor.u32 %v8052_v23, %v8051_v16  ;;  %v8069_v59 = vor.u32 %v8068_v49, %v8067_v34  ;;  %v8084_v18 = vld [vmem:[#allocation3 + $0x84] ss:$8 sm:$0xf0]  ;;  %v8100_v10 = vld [vmem:[#allocation3 + $0x85] ss:$8 sm:$0xf0] }
 0x72f   : > { %v8145_v63 = vmax.f32 %v8125_v58, %v8141_v11  ;;  %v8088_v61 = vld [vmem:[#allocation3 + $0xc4] ss:$8 sm:$0xf0]  ;;  %v8099_v16 = vld [vmem:[#allocation3 + $0x85] ss:$8 sm:$0xf] }
 0x730   : > { %v8073_v27 = vmax.f32 %v8053_v53, %v8069_v59  ;;  %v8104_v34 = vld [vmem:[#allocation3 + $0xc5] ss:$8 sm:$0xf0]  ;;  %v8011_v25 = vld [vmem:[#allocation3 + $0x80] ss:$8 sm:$0xf]  ;;  %v8085_v53 = vor.u32 %v8084_v18, %v8083_v41 }
 0x731   : > { %v10687_v0 = vpack.i.bf16 %v8145_v63, %v8144_v35  ;;  %v8027_v62 = vld [vmem:[#allocation3 + $0x81] ss:$8 sm:$0xf]  ;;  %v8016_v60 = vld [vmem:[#allocation3 + $0xc0] ss:$8 sm:$0xf0]  ;;  %v8101_v35 = vor.u32 %v8100_v10, %v8099_v16 }
 0x732   : > { %v10692_v55 = vpack.i.bf16 %v8073_v27, %v8072_v39  ;;  %v8032_v6 = vld [vmem:[#allocation3 + $0xc1] ss:$8 sm:$0xf0]  ;;  %v8087_v58 = vld [vmem:[#allocation3 + $0xc4] ss:$8 sm:$0xf]  ;;  %v8013_v39 = vor.u32 %v8012_v52, %v8011_v25  ;;  %v8029_v27 = vor.u32 %v8028_v42, %v8027_v62 }
 0x733   : > { %10688 = vrot.lane.b32.xlu0 %v10687_v0, %s10828_s26  ;;  %v8103_v11 = vld [vmem:[#allocation3 + $0xc5] ss:$8 sm:$0xf]  ;;  %v8015_v23 = vld [vmem:[#allocation3 + $0xc0] ss:$8 sm:$0xf]  ;;  %v8089_v59 = vor.u32 %v8088_v61, %v8087_v58  ;;  %v8108_v3 = vmax.f32 %v8085_v53, %v8101_v35 }
 0x734   : > { %10693 = vrot.lane.b32.xlu1 %v10692_v55, %s10828_s26  ;;  %v8031_v49 = vld [vmem:[#allocation3 + $0xc1] ss:$8 sm:$0xf]  ;;  %v8105_v63 = vor.u32 %v8104_v34, %v8103_v11  ;;  %v8017_v0 = vor.u32 %v8016_v60, %v8015_v23  ;;  %v8036_v38 = vmax.f32 %v8013_v39, %v8029_v27  ;;  %v10810_v11 = vld [vmem:[%s14327_s13 + $0x28] ss:$0 sps:$4 sm:$0x33]   ;;  %s499_s26 = scalar_lea.vmem %s14329_s15, %s8691_s29 }
 0x735   : > { %v8033_v55 = vor.u32 %v8032_v6, %v8031_v49  ;;  %v10806_v62 = vld [vmem:[%s14327_s13 + $0x8] sm:$0xff]   ;;  %v10807_v60 = vld [vmem:[%s14327_s13 + $0x10] sm:$0xff]   ;;  %v10808_v6 = vld [vmem:[%s14327_s13 + $0x18] sm:$0xff]   ;;  %v8571_v23 = vsel %vm8569_vm14, %v10810_v11, 0 }
 0x736   : > { %v8109_v24 = vmax.f32 %v8089_v59, %v8105_v63  ;;  %v10809_v58 = vld [vmem:[%s14327_s13 + $0x20] sm:$0xff]  }
 0x737   : > { %v8037_v31 = vmax.f32 %v8017_v0, %v8033_v55  ;;  %v8946_v49 = vld [vmem:[%s14326_s12] ss:$0 sm:$0xff] }
 0x786   : > { %v10679_v4 = vpop.permute.xlu0 %10678 }
 0x787   : > { %v10681_v17 = vunpack.i.h.bf16 %v10679_v4  ;;  %v10680_v51 = vunpack.i.l.bf16 %v10679_v4  ;;  %v10684_v12 = vpop.permute.xlu1 %10683  ;;  %v8455_v4 = vsel %vm7114_vm9, %v10804_v48, 0 }
 0x788   : > { %v10686_v43 = vunpack.i.h.bf16 %v10684_v12  ;;  %v10685_v30 = vunpack.i.l.bf16 %v10684_v12  ;;  %v8929_v12 = vld [vmem:[%s14324_s10] ss:$0 sm:$0xff] }
 0x789   : > { %v8182_v15 = vsel %vm7970_vm12, %v8106_v46, %v10680_v51  ;;  %v8183_v44 = vsel %vm7970_vm12, %v8107_v21, %v10681_v17  ;;  %v10805_v17 = vld [vmem:[%s14327_s13] sm:$0xff]  }
 0x78a   : > { %v8178_v54 = vsel %vm7970_vm12, %v8034_v2, %v10685_v30  ;;  %v8179_v56 = vsel %vm7970_vm12, %v8035_v7, %v10686_v43  ;;  %v8187_v13 = vpack.c.bf16 %v8183_v44, %v8182_v15 }
 0x78b   : > { %v8186_v29 = vpack.c.bf16 %v8179_v56, %v8178_v54 }
 0x78c   : > { %8357 = vmatprep.mubr.bf16.mxu1 %v8187_v13 }
 0x78d   : > { %8358 = vmatmul.mubr.bf16.vlgmr.msra.gmra.mrb[96].mxu1 %v8186_v29 }
 0x78e   : > { %9341 = vmatpush3.bf16.msra.mxu1 %v10797_v14 }
 0x78f   : > { %9342 = vmatprep.subr.bf16.mxu1 %v10798_v20 }
 0x792   : > { %9343 = vmatpush3.bf16.msra.mxu1 %v10798_v20 }
 0x793   : > { %9344 = vmatprep.subr.bf16.mxu1 %v10799_v22 }
 0x796   : > { %9345 = vmatpush3.bf16.msra.mxu1 %v10799_v22 }
 0x797   : > { %9346 = vmatprep.subr.bf16.mxu1 %v10800_v45 }
 0x79a   : > { %9347 = vmatpush3.bf16.msra.mxu1 %v10800_v45 }
 0x79b   : > { %9348 = vmatprep.subr.bf16.mxu1 %v10801_v50 }
 0x79e   : > { %9349 = vmatpush3.bf16.msra.mxu1 %v10801_v50 }
 0x79f   : > { %9350 = vmatprep.subr.bf16.mxu1 %v10802_v47 }
 0x7a2   : > { %9351 = vmatpush3.bf16.msra.mxu1 %v10802_v47 }
 0x7a3   : > { %9352 = vmatprep.subr.bf16.mxu1 %v10803_v57 }
 0x7a5   : > { %v10689_v9 = vpop.permute.xlu0 %10688 }
 0x7a6   : > { %v10691_v19 = vunpack.i.h.bf16 %v10689_v9  ;;  %v10690_v28 = vunpack.i.l.bf16 %v10689_v9  ;;  %v10694_v40 = vpop.permute.xlu1 %10693  ;;  %9353 = vmatpush3.bf16.msra.mxu1 %v10803_v57 }
 0x7a7   : > { %v10696_v37 = vunpack.i.h.bf16 %v10694_v40  ;;  %v10695_v8 = vunpack.i.l.bf16 %v10694_v40  ;;  %9377 = vmatprep.subr.msk.bf16.mxu1 %vm7114_vm9, %v10804_v48 }
 0x7a8   : > { %v8184_v5 = vsel %vm7970_vm12, %v8108_v3, %v10690_v28  ;;  %v8185_v1 = vsel %vm7970_vm12, %v8109_v24, %v10691_v19 }
 0x7a9   : > { %v8180_v36 = vsel %vm7970_vm12, %v8036_v38, %v10695_v8  ;;  %v8181_v33 = vsel %vm7970_vm12, %v8037_v31, %v10696_v37  ;;  %v8189_v32 = vpack.c.bf16 %v8185_v1, %v8184_v5  ;;  %v8957_v38 = vld [vmem:[%s14328_s14] ss:$0 sm:$0xff] }
 0x7aa   : > { %v8188_v26 = vpack.c.bf16 %v8181_v33, %v8180_v36  ;;  %9355 = vmatpush3.bf16.msra.mxu1 %v8455_v4 }
 0x7ab   : > { %8365 = vmatprep.mubr.bf16.mxu1 %v8189_v32  ;;  %9360 = vmatprep.subr.bf16.mxu1 %v10805_v17 }
 0x7ac   : > { %8366 = vmatmul.mubr.bf16.gmra.mrb[100].mxu1 %v8188_v26 }
 0x860   : > { %v9168_v51 = vpop.f32.mrb[96].mxu1 }
 0x861   : > { %v9169_v46 = vpop.f32.mrb[97].mxu1 }
 0x862   : > { %v9170_v21 = vadd.f32 %v9169_v46, %v9168_v51  ;;  %v9171_v2 = vpop.f32.mrb[98].mxu1 }
 0x863   : > { %v9172_v43 = vpop.f32.mrb[99].mxu1 }
 0x864   : > { %v8360_v30 = vadd.f32 %v9170_v21, %v8929_v12  ;;  %v9173_v7 = vadd.f32 %v9172_v43, %v9171_v2 }
 0x866   : > { %v8363_v15 = vadd.f32 %v9173_v7, %v8929_v12  ;;  %v8374_v44 = vmax.f32 %v8360_v30, 0.0 }
 0x868   : > { %v8375_v54 = vmax.f32 %v8363_v15, 0.0 }
 0x86a   : > { %v8378_v56 = vpack.c.bf16 %v8375_v54, %v8374_v44 }
 0x86c   : > { %9356 = vmatprep.mubr.msk.bf16.mxu1 %vm8447_vm13, %v8378_v56 }
 0x87f   : > { %v9174_v13 = vpop.f32.mrb[100].mxu1 }
 0x880   : > { %v9175_v29 = vpop.f32.mrb[101].mxu1 }
 0x881   : > { %v9176_v52 = vadd.f32 %v9175_v29, %v9174_v13  ;;  %v9177_v42 = vpop.f32.mrb[102].mxu1 }
 0x882   : > { %v9178_v18 = vpop.f32.mrb[103].mxu1 }
 0x883   : > { %v8368_v10 = vadd.f32 %v9176_v52, %v8929_v12  ;;  %v9179_v41 = vadd.f32 %v9178_v18, %v9177_v42 }
 0x885   : > { %v8371_v61 = vadd.f32 %v9179_v41, %v8929_v12  ;;  %v8376_v16 = vmax.f32 %v8368_v10, 0.0 }
 0x887   : > { %v8377_v34 = vmax.f32 %v8371_v61, 0.0 }
 0x889   : > { %v8379_v25 = vpack.c.bf16 %v8377_v34, %v8376_v16 }
 0x88b   : > { %9357 = vmatmul.mubr.msk.bf16.vlgmr.msra.gmra.mrb[104].mxu1 %vm8447_vm13, %v8379_v25 }
 0x88c   : > { %9361 = vmatpush3.bf16.msra.mxu1 %v10805_v17 }
 0x88d   : > { %9362 = vmatprep.subr.bf16.mxu1 %v10806_v62 }
 0x890   : > { %9363 = vmatpush3.bf16.msra.mxu1 %v10806_v62 }
 0x891   : > { %9364 = vmatprep.subr.bf16.mxu1 %v10807_v60 }
 0x894   : > { %9365 = vmatpush3.bf16.msra.mxu1 %v10807_v60 }
 0x895   : > { %9366 = vmatprep.subr.bf16.mxu1 %v10808_v6 }
 0x898   : > { %9367 = vmatpush3.bf16.msra.mxu1 %v10808_v6 }
 0x899   : > { %9368 = vmatprep.subr.bf16.mxu1 %v10809_v58 }
 0x89c   : > { %9369 = vmatpush3.bf16.msra.mxu1 %v10809_v58 }
 0x89d   : > { %9378 = vmatprep.subr.msk.bf16.mxu1 %vm8569_vm14, %v10810_v11 }
 0x8a0   : > { %9371 = vmatpush3.bf16.msra.mxu1 %v8571_v23 }
 0x95e   : > { %v9358_v53 = vpop.f32.mrb[104].mxu1 }
 0x95f   : > { %v8500_v59 = vadd.f32 %v9358_v53, %v8946_v49  ;;  %v8491_v35 = vpop.f32.mrb[105].mxu1 }
 0x960   : > { %v8492_v63 = vadd.f32 %v8946_v49, %v8491_v35  ;;  %v9359_v39 = vpop.f32.mrb[106].mxu1 }
 0x961   : > { %v8503_v27 = vadd.f32 %v9359_v39, %v8946_v49  ;;  %v8494_v0 = vpop.f32.mrb[107].mxu1  ;;  %v8508_v9 = vmax.f32 %v8500_v59, 0.0 }
 0x962   : > { %v8495_v55 = vadd.f32 %v8946_v49, %v8494_v0  ;;  %v8506_v28 = vmax.f32 %v8492_v63, 0.0 }
 0x963   : > { %v8509_v19 = vmax.f32 %v8503_v27, 0.0 }
 0x964   : > { %v8507_v40 = vmax.f32 %v8495_v55, 0.0 }
 0x965   : > { %v8511_v3 = vpack.c.bf16 %v8509_v19, %v8508_v9 }
 0x966   : > { %v8510_v24 = vpack.c.bf16 %v8507_v40, %v8506_v28 }
 0x968   : > { %9372 = vmatprep.mubr.msk.bf16.mxu1 %vm2712_vm3, %v8510_v24 }
 0x969   : > { %9373 = vmatmul.mubr.msk.bf16.vlgmr.msra.gmra.mrb[108].mxu1 %vm2712_vm3, %v8511_v3 }
 0xa3c   : > { %v9374_v37 = vpop.f32.mrb[108].mxu1 }
 0xa3d   : > { %v8616_v8 = vadd.f32 %v9374_v37, %v8957_v38  ;;  %v8607_v31 = vpop.f32.mrb[109].mxu1 }
 0xa3e   : > { %v8608_v5 = vadd.f32 %v8957_v38, %v8607_v31  ;;  %v9375_v1 = vpop.f32.mrb[110].mxu1 }
 0xa3f   : > { %8624 = vst [vmem:[%s499_s26 + $0x10] sm:$0xff] %v8616_v8  ;;  %v8619_v36 = vadd.f32 %v9375_v1, %v8957_v38  ;;  %v8610_v33 = vpop.f32.mrb[111].mxu1 }
 0xa40   : > { %8622 = vst [vmem:[%s499_s26] sm:$0xff] %v8608_v5  ;;  %v8611_v32 = vadd.f32 %v8957_v38, %v8610_v33 }
 0xa41   : > { %8625 = vst [vmem:[%s499_s26 + $0x18] sm:$0xff] %v8619_v36 }
 0xa42   : > { %8623 = vst [vmem:[%s499_s26 + $0x8] sm:$0xff] %v8611_v32 }
 0xa43 PF: > { %s25_s18 = sadd.s32 1, %s10817_s18  }
 0xa44   : > { %p22_p5 = scmp.ge.s32.totalorder %s25_s18, 5  }
 0xa46   :  { %24 = sbr.rel (!%p22_p5) target bundleno = 1 (0x1), region = 460 }

</bundles_post_ra>
